<compile_context>
chip_gen: v7x
topology: tpu7x:2x2x1
jax: 0.10.0
libtpu: 0.0.40
codegen_flags: <defaults>
</compile_context>

<pallas_src>
import functools

import jax
import jax.numpy as jnp
from jax import lax
from jax.experimental import pallas as pl
from jax.experimental.pallas import tpu as pltpu


# ---------------------------------------------------------------------------
# Kernel 1: fused conv stack (conv/BN/ReLU x3 + two 2x2 maxpools), one image
# per grid step, all activations resident in VMEM scratch.
# ---------------------------------------------------------------------------
def _cnn_feature_kernel(H0, W0,
                        x_ref,
                        w1_ref, s1_ref, b1_ref,
                        w2_ref, s2_ref, b2_ref,
                        w3_ref, s3_ref, b3_ref,
                        o_ref,
                        a1, y1, a2, y2, a3, y3, ost):
    # Spatial sizes per stage (all static Python ints).
    H1, W1 = H0 // 2, W0 // 2
    H2, W2 = H1 // 2, W1 // 2
    W0p, W1p, W2p = W0 + 2, W1 + 2, W2 + 2

    def conv_bn_relu(a_ref, w_ref, s_ref, b_ref, Hs, Wsp):
        # 3x3 conv over the zero-padded flat input: each tap is one contiguous
        # row slab, so the conv is 9 whole-image matmuls accumulated in f32.
        # (Garbage appears only in the two horizontal-pad output columns,
        # which downstream code never reads.)
        M = Hs * Wsp
        Cin = w_ref.shape[1]
        acc = None
        for t in range(9):                                    # static, unrolled
            dh, dw = t // 3, t % 3
            slab = a_ref[pl.ds(dh * Wsp + dw, M), :]          # (M, Cin)
            w_t = w_ref[t]                                    # (Cin, Cout)
            if Cin == 1:
                # rank-1 tap over the whole image: broadcast FMA on the VPU
                # (avoids a degenerate K=1 MXU matmul); M is the full image.
                part = slab * w_t
            else:
                part = jnp.dot(slab, w_t, preferred_element_type=jnp.float32)
            acc = part if acc is None else acc + part
        # folded BatchNorm (running stats + conv bias) + ReLU
        return jnp.maximum(acc * s_ref[...] + b_ref[...], 0.0)

    def pool_into(y_ref, a_next, Hs, Wsp, Wnp):
        # 2x2 / stride-2 max pool, written directly into the interior of the
        # next layer's zero-padded flat scratch.  The stride-2 column pick is
        # an exact 0/1 selection matmul (keeps all VMEM loads contiguous).
        Hn = Hs // 2
        Ws = Wsp - 2
        Wn = Ws // 2
        rows = lax.broadcasted_iota(jnp.int32, (Wn, Ws), 0)
        cols = lax.broadcasted_iota(jnp.int32, (Wn, Ws), 1)
        e_even = (cols == 2 * rows).astype(jnp.float32)       # hoisted out of loop
        e_odd = (cols == 2 * rows + 1).astype(jnp.float32)
        for i in range(Hn):                                   # static, unrolled
            r0 = y_ref[pl.ds((2 * i) * Wsp, Ws), :]           # input row 2i
            r1 = y_ref[pl.ds((2 * i + 1) * Wsp, Ws), :]       # input row 2i+1
            m = jnp.maximum(r0, r1)                           # (Ws, C)
            pooled = jnp.maximum(
                jnp.dot(e_even, m, preferred_element_type=jnp.float32),
                jnp.dot(e_odd, m, preferred_element_type=jnp.float32))
            a_next[pl.ds((i + 1) * Wnp + 1, Wn), :] = pooled  # interior write

    # Zero the padded scratches (the pad ring must be zero; interiors are
    # rewritten every step, so this is unconditional and megacore-safe).
    a1[...] = jnp.zeros_like(a1)
    a2[...] = jnp.zeros_like(a2)
    a3[...] = jnp.zeros_like(a3)

    # Stage the input image into the padded flat layout (halo handled here,
    # no wrapper-side jnp.pad / HBM copy).
    for h in range(H0):
        a1[pl.ds((h + 1) * W0p + 1, W0), :] = x_ref[0, pl.ds(h * W0, W0), :]

    y1[...] = conv_bn_relu(a1, w1_ref, s1_ref, b1_ref, H0, W0p)
    pool_into(y1, a2, H0, W0p, W1p)
    y2[...] = conv_bn_relu(a2, w2_ref, s2_ref, b2_ref, H1, W1p)
    pool_into(y2, a3, H1, W1p, W2p)
    y3[...] = conv_bn_relu(a3, w3_ref, s3_ref, b3_ref, H2, W2p)

    # Gather the valid columns into a compact (H2*W2, C3) staging scratch,
    # then emit with one full, aligned bf16 block store (NHWC order; the NCHW
    # flatten is absorbed into the fc1 weight permutation at prep time).
    for h in range(H2):
        ost[pl.ds(h * W2, W2), :] = y3[pl.ds(h * W2p, W2), :]
    o_ref[0, :, :] = ost[...].astype(o_ref.dtype)


def cnn_features(x_flat, H, W, w1, s1, b1, w2, s2, b2, w3, s3, b3):
    N = x_flat.shape[0]
    C1, C2, C3 = w1.shape[-1], w2.shape[-1], w3.shape[-1]
    H1, W1 = H // 2, W // 2
    H2, W2 = H1 // 2, W1 // 2
    W0p, W1p, W2p = W + 2, W1 + 2, W2 + 2

    kernel = functools.partial(_cnn_feature_kernel, H, W)

    def full(a):
        nd = a.ndim
        return pl.BlockSpec(a.shape, lambda n, _nd=nd: (0,) * _nd)

    return pl.pallas_call(
        kernel,
        out_shape=jax.ShapeDtypeStruct((N, H2 * W2, C3), jnp.bfloat16),
        grid=(N,),
        in_specs=[
            pl.BlockSpec((1, H * W, 1), lambda n: (n, 0, 0)),
            full(w1), full(s1), full(b1),
            full(w2), full(s2), full(b2),
            full(w3), full(s3), full(b3),
        ],
        out_specs=pl.BlockSpec((1, H2 * W2, C3), lambda n: (n, 0, 0)),
        scratch_shapes=[
            # padded flat inputs (+1 extra zero row so every tap slab stays
            # in bounds) and per-layer conv outputs, all VMEM-resident
            pltpu.VMEM(((H + 3) * W0p, 1), jnp.float32),       # a1
            pltpu.VMEM((H * W0p, C1), jnp.float32),            # y1
            pltpu.VMEM(((H1 + 3) * W1p, C1), jnp.float32),     # a2
            pltpu.VMEM((H1 * W1p, C2), jnp.float32),           # y2
            pltpu.VMEM(((H2 + 3) * W2p, C2), jnp.float32),     # a3
            pltpu.VMEM((H2 * W2p, C3), jnp.float32),           # y3
            pltpu.VMEM((H2 * W2, C3), jnp.float32),            # output staging
        ],
        compiler_params=pltpu.CompilerParams(
            dimension_semantics=("parallel",)),   # >=2 steps -> both v7x TCs busy
    )(x_flat, w1, s1, b1, w2, s2, b2, w3, s3, b3)


# ---------------------------------------------------------------------------
# Kernel 2: fused MLP head (fc1 -> ReLU -> fc2 -> ReLU -> fc3), grid over the
# fc1-output dimension so the big weight tiles are pipelined against compute.
# ---------------------------------------------------------------------------
def _mlp_kernel(x_ref, w1_ref, b1_ref, w2_ref, b2_ref, w3_ref, b3_ref,
                o_ref, acc_ref):
    k = pl.program_id(0)

    @pl.when(k == 0)
    def _():
        acc_ref[...] = jnp.zeros_like(acc_ref)

    # fc1 tile (bf16 x bf16 on the MXU, f32 accumulation) + bias + ReLU
    h1 = jnp.dot(x_ref[...], w1_ref[...],
                 preferred_element_type=jnp.float32) + b1_ref[...]
    h1 = jnp.maximum(h1, 0.0)
    # TODO(synk): nn.Dropout(0.5) is the eval-mode identity (no train RNG mask).
    # partial fc2 contribution of this fc1-output tile
    acc_ref[...] += jnp.dot(h1.astype(jnp.bfloat16), w2_ref[...],
                            preferred_element_type=jnp.float32)

    @pl.when(k == pl.num_programs(0) - 1)
    def _():
        h2 = jnp.maximum(acc_ref[...] + b2_ref[...], 0.0)
        out = jnp.dot(h2, w3_ref[...],
                      preferred_element_type=jnp.float32) + b3_ref[...]
        o_ref[...] = out.astype(o_ref.dtype)


def mlp_head(x, w1, b1, w2, b2, w3, b3, tile_k=512):
    N, D0 = x.shape
    D1 = w1.shape[1]
    D2 = w2.shape[1]
    C = w3.shape[1]
    tk = min(tile_k, D1)
    assert D1 % tk == 0, "fc1 output dim must be divisible by the tile size"
    return pl.pallas_call(
        _mlp_kernel,
        out_shape=jax.ShapeDtypeStruct((N, C), jnp.float32),
        grid=(D1 // tk,),
        in_specs=[
            pl.BlockSpec((N, D0), lambda k: (0, 0)),    # bf16 features, resident
            pl.BlockSpec((D0, tk), lambda k: (0, k)),   # fc1 weight tiles (pipelined, bf16)
            pl.BlockSpec((1, tk), lambda k: (0, k)),
            pl.BlockSpec((tk, D2), lambda k: (k, 0)),   # fc2 weight tiles (pipelined, bf16)
            pl.BlockSpec((1, D2), lambda k: (0, 0)),
            pl.BlockSpec((D2, C), lambda k: (0, 0)),
            pl.BlockSpec((1, C), lambda k: (0, 0)),
        ],
        out_specs=pl.BlockSpec((N, C), lambda k: (0, 0)),
        scratch_shapes=[pltpu.VMEM((N, D2), jnp.float32)],
        compiler_params=pltpu.CompilerParams(
            dimension_semantics=("arbitrary",)),        # reduction into the fc2 accumulator
    )(x, w1, b1, w2, b2, w3, b3)


# ---------------------------------------------------------------------------
# One-time weight preparation (deployment-style, outside the jitted forward):
# fold BN running stats + conv bias, reshape conv weights to per-tap matrices,
# permute fc1 rows from NCHW-flatten to NHWC-flatten order (absorbs the
# PyTorch Flatten layout), store the large FC weights in bf16.
# ---------------------------------------------------------------------------
def _fold_bn(conv_b, gamma, beta, mean, var, eps=1e-5):
    scale = gamma / jnp.sqrt(var + eps)
    bias = beta + scale * (conv_b - mean)
    return (scale.reshape(1, -1).astype(jnp.float32),
            bias.reshape(1, -1).astype(jnp.float32))


def prepare_kernel_params(p):
    kp = {}
    for i in (1, 2, 3):
        w = p[f"conv{i}_w"]                               # (3, 3, Cin, Cout) HWIO
        kp[f"w{i}"] = w.reshape(9, w.shape[2], w.shape[3])
        kp[f"s{i}"], kp[f"cb{i}"] = _fold_bn(
            p[f"conv{i}_b"], p[f"bn{i}_g"], p[f"bn{i}_b"],
            p[f"bn{i}_m"], p[f"bn{i}_v"])
    # fc1 row permutation: PyTorch flatten index (c, h, w) -> kernel-1 NHWC
    # order (h, w, c), so no transpose is needed between the two kernels.
    C3 = p["conv3_w"].shape[3]
    D0, D1 = p["fc1_w"].shape
    HW = D0 // C3
    fc1 = p["fc1_w"].reshape(C3, HW, D1).transpose(1, 0, 2).reshape(D0, D1)
    kp["fc1_w"] = fc1.astype(jnp.bfloat16)
    kp["fc1_b"] = p["fc1_b"].reshape(1, -1)
    kp["fc2_w"] = p["fc2_w"].astype(jnp.bfloat16)
    kp["fc2_b"] = p["fc2_b"].reshape(1, -1)
    kp["fc3_w"] = p["fc3_w"]
    kp["fc3_b"] = p["fc3_b"].reshape(1, -1)
    return kp


@jax.jit
def birdcall_cnn_forward(x_nchw, kp):
    N, _, H, W = x_nchw.shape
    # TODO(synk): PyTorch MaxPool2d floors odd spatial dims; this path assumes
    # H, W divisible by 4 (true for the module's 128 x time_steps usage here).
    assert H % 4 == 0 and W % 4 == 0
    x_flat = x_nchw.reshape(N, H * W, 1)       # Cin=1: NCHW == NHWC, free reshape
    feats = cnn_features(x_flat, H, W,
                         kp["w1"], kp["s1"], kp["cb1"],
                         kp["w2"], kp["s2"], kp["cb2"],
                         kp["w3"], kp["s3"], kp["cb3"])    # (N, H/4*W/4, 64) bf16
    feats = feats.reshape(N, -1)               # contiguous merge -> free reshape
    return mlp_head(feats, kp["fc1_w"], kp["fc1_b"], kp["fc2_w"], kp["fc2_b"],
                    kp["fc3_w"], kp["fc3_b"])


# ---------------------------------------------------------------------------
# Pure-JAX reference (correctness check only; f32, HIGHEST precision).
# ---------------------------------------------------------------------------
def _bn_eval(y, g, b, m, v, eps=1e-5):
    return g * (y - m) / jnp.sqrt(v + eps) + b


def reference_forward(x_nchw, p):
    x = jnp.transpose(x_nchw, (0, 2, 3, 1))

    def block(h, wk, cb, g, b, m, v):
        y = lax.conv_general_dilated(
            h, wk, window_strides=(1, 1), padding=((1, 1), (1, 1)),
            dimension_numbers=("NHWC", "HWIO", "NHWC"),
            precision=lax.Precision.HIGHEST) + cb
        return jnp.maximum(_bn_eval(y, g, b, m, v), 0.0)

    def pool(h):
        return lax.reduce_window(h, -jnp.inf, lax.max,
                                 (1, 2, 2, 1), (1, 2, 2, 1), "VALID")

    h = pool(block(x, p["conv1_w"], p["conv1_b"],
                   p["bn1_g"], p["bn1_b"], p["bn1_m"], p["bn1_v"]))
    h = pool(block(h, p["conv2_w"], p["conv2_b"],
                   p["bn2_g"], p["bn2_b"], p["bn2_m"], p["bn2_v"]))
    h = block(h, p["conv3_w"], p["conv3_b"],
              p["bn3_g"], p["bn3_b"], p["bn3_m"], p["bn3_v"])
    h = jnp.transpose(h, (0, 3, 1, 2)).reshape(h.shape[0], -1)
    dot = lambda a, b: jnp.dot(a, b, precision=lax.Precision.HIGHEST)
    h = jnp.maximum(dot(h, p["fc1_w"]) + p["fc1_b"], 0.0)
    h = jnp.maximum(dot(h, p["fc2_w"]) + p["fc2_b"], 0.0)
    return dot(h, p["fc3_w"]) + p["fc3_b"]


if __name__ == "__main__":
    # Small shapes consistent with the module: input (N, 1, H, W).
    # fc1's input dim follows the forward pass: 64 * (H/4) * (W/4);
    # fc1's output dim stays 64*32 = 2048 as hard-coded in the module.
    N, H, W = 2, 16, 16
    NUM_CLASSES = 2
    FC1_IN = 64 * (H // 4) * (W // 4)          # 1024
    FC1_OUT = 64 * 32                          # 2048

    keys = jax.random.split(jax.random.PRNGKey(0), 25)
    nrm = lambda k, s, sc: sc * jax.random.normal(k, s, dtype=jnp.float32)

    params = {
        "conv1_w": nrm(keys[0], (3, 3, 1, 16), 0.2),
        "conv1_b": nrm(keys[1], (16,), 0.1),
        "bn1_g": 1.0 + nrm(keys[2], (16,), 0.1),
        "bn1_b": nrm(keys[3], (16,), 0.1),
        "bn1_m": nrm(keys[4], (16,), 0.1),
        "bn1_v": 1.0 + jnp.abs(nrm(keys[5], (16,), 0.1)),
        "conv2_w": nrm(keys[6], (3, 3, 16, 32), 0.1),
        "conv2_b": nrm(keys[7], (32,), 0.1),
        "bn2_g": 1.0 + nrm(keys[8], (32,), 0.1),
        "bn2_b": nrm(keys[9], (32,), 0.1),
        "bn2_m": nrm(keys[10], (32,), 0.1),
        "bn2_v": 1.0 + jnp.abs(nrm(keys[11], (32,), 0.1)),
        "conv3_w": nrm(keys[12], (3, 3, 32, 64), 0.05),
        "conv3_b": nrm(keys[13], (64,), 0.1),
        "bn3_g": 1.0 + nrm(keys[14], (64,), 0.1),
        "bn3_b": nrm(keys[15], (64,), 0.1),
        "bn3_m": nrm(keys[16], (64,), 0.1),
        "bn3_v": 1.0 + jnp.abs(nrm(keys[17], (64,), 0.1)),
        "fc1_w": nrm(keys[18], (FC1_IN, FC1_OUT), 0.02),
        "fc1_b": nrm(keys[19], (FC1_OUT,), 0.02),
        "fc2_w": nrm(keys[20], (FC1_OUT, 128), 0.02),
        "fc2_b": nrm(keys[21], (128,), 0.02),
        "fc3_w": nrm(keys[22], (128, NUM_CLASSES), 0.1),
        "fc3_b": nrm(keys[23], (NUM_CLASSES,), 0.1),
    }

    x = jax.random.normal(keys[24], (N, 1, H, W), dtype=jnp.float32)  # NCHW like PyTorch

    kp = prepare_kernel_params(params)          # one-time weight prep (outside jit)
    out = birdcall_cnn_forward(x, kp)
    out = jax.block_until_ready(out)

    assert out.shape == (N, NUM_CLASSES), out.shape
    ref = reference_forward(x, params)
    if not bool(jnp.allclose(out, ref, rtol=1e-2, atol=1e-2)):
        raise SystemExit(f"mismatch vs reference: pallas={out}, ref={ref}")

    print("KERNEL_OK")
</pallas_src>

<mosaic_0001>
module attributes {stable_mosaic.version = 11 : i64} {
  func.func @_cnn_feature_kernel(%arg0: i32, %arg1: memref<1x256x1xf32, #tpu.memory_space<vmem>>, %arg2: memref<9x1x16xf32, #tpu.memory_space<vmem>>, %arg3: memref<1x16xf32, #tpu.memory_space<vmem>>, %arg4: memref<1x16xf32, #tpu.memory_space<vmem>>, %arg5: memref<9x16x32xf32, #tpu.memory_space<vmem>>, %arg6: memref<1x32xf32, #tpu.memory_space<vmem>>, %arg7: memref<1x32xf32, #tpu.memory_space<vmem>>, %arg8: memref<9x32x64xf32, #tpu.memory_space<vmem>>, %arg9: memref<1x64xf32, #tpu.memory_space<vmem>>, %arg10: memref<1x64xf32, #tpu.memory_space<vmem>>, %arg11: memref<1x16x64xbf16, #tpu.memory_space<vmem>>, %arg12: memref<342x1xf32, #tpu.memory_space<vmem>>, %arg13: memref<288x16xf32, #tpu.memory_space<vmem>>, %arg14: memref<110x16xf32, #tpu.memory_space<vmem>>, %arg15: memref<80x32xf32, #tpu.memory_space<vmem>>, %arg16: memref<42x32xf32, #tpu.memory_space<vmem>>, %arg17: memref<24x64xf32, #tpu.memory_space<vmem>>, %arg18: memref<16x64xf32, #tpu.memory_space<vmem>>) attributes {dimension_semantics = [#tpu.dimension_semantics<parallel>], iteration_bounds = array<i64: 2>, scalar_prefetch = 0 : i64, scratch_operands = 7 : i64, tpu.core_type = #tpu.core_type<tc>, window_params = [{transform_indices = @transform_0, window_bounds = array<i64: 1, 256, 1>}, {pipeline_mode = #tpu.pipeline_mode<synchronous>, transform_indices = @transform_1, window_bounds = array<i64: 9, 1, 16>}, {pipeline_mode = #tpu.pipeline_mode<synchronous>, transform_indices = @transform_2, window_bounds = array<i64: 1, 16>}, {pipeline_mode = #tpu.pipeline_mode<synchronous>, transform_indices = @transform_3, window_bounds = array<i64: 1, 16>}, {pipeline_mode = #tpu.pipeline_mode<synchronous>, transform_indices = @transform_4, window_bounds = array<i64: 9, 16, 32>}, {pipeline_mode = #tpu.pipeline_mode<synchronous>, transform_indices = @transform_5, window_bounds = array<i64: 1, 32>}, {pipeline_mode = #tpu.pipeline_mode<synchronous>, transform_indices = @transform_6, window_bounds = array<i64: 1, 32>}, {pipeline_mode = #tpu.pipeline_mode<synchronous>, transform_indices = @transform_7, window_bounds = array<i64: 9, 32, 64>}, {pipeline_mode = #tpu.pipeline_mode<synchronous>, transform_indices = @transform_8, window_bounds = array<i64: 1, 64>}, {pipeline_mode = #tpu.pipeline_mode<synchronous>, transform_indices = @transform_9, window_bounds = array<i64: 1, 64>}, {transform_indices = @transform_10, window_bounds = array<i64: 1, 16, 64>}]} {
    %cst = arith.constant 0.000000e+00 : f32
    %0 = vector.broadcast %cst : f32 to vector<342x1xf32>
    %c0 = arith.constant 0 : index
    %c0_0 = arith.constant 0 : index
    %1 = vector.load %arg12[%c0, %c0_0] : memref<342x1xf32, #tpu.memory_space<vmem>>, vector<342x1xf32>
    tpu.vector_store %arg12[%c0, %c0_0], %0 {strides = array<i32>} : memref<342x1xf32, #tpu.memory_space<vmem>>, vector<342x1xf32>,
    %cst_1 = arith.constant 0.000000e+00 : f32
    %2 = vector.broadcast %cst_1 : f32 to vector<110x16xf32>
    %c0_2 = arith.constant 0 : index
    %c0_3 = arith.constant 0 : index
    %3 = vector.load %arg14[%c0_2, %c0_3] : memref<110x16xf32, #tpu.memory_space<vmem>>, vector<110x16xf32>
    tpu.vector_store %arg14[%c0_2, %c0_3], %2 {strides = array<i32>} : memref<110x16xf32, #tpu.memory_space<vmem>>, vector<110x16xf32>,
    %cst_4 = arith.constant 0.000000e+00 : f32
    %4 = vector.broadcast %cst_4 : f32 to vector<42x32xf32>
    %c0_5 = arith.constant 0 : index
    %c0_6 = arith.constant 0 : index
    %5 = vector.load %arg16[%c0_5, %c0_6] : memref<42x32xf32, #tpu.memory_space<vmem>>, vector<42x32xf32>
    tpu.vector_store %arg16[%c0_5, %c0_6], %4 {strides = array<i32>} : memref<42x32xf32, #tpu.memory_space<vmem>>, vector<42x32xf32>,
    %c0_7 = arith.constant 0 : index
    %c0_8 = arith.constant 0 : index
    %c0_9 = arith.constant 0 : index
    %6 = vector.load %arg1[%c0_7, %c0_8, %c0_9] : memref<1x256x1xf32, #tpu.memory_space<vmem>>, vector<1x16x1xf32>
    %7 = vector.shape_cast %6 : vector<1x16x1xf32> to vector<16x1xf32>
    %c19 = arith.constant 19 : index
    %c0_10 = arith.constant 0 : index
    %8 = vector.load %arg12[%c19, %c0_10] : memref<342x1xf32, #tpu.memory_space<vmem>>, vector<16x1xf32>
    tpu.vector_store %arg12[%c19, %c0_10], %7 {strides = array<i32>} : memref<342x1xf32, #tpu.memory_space<vmem>>, vector<16x1xf32>,
    %c0_11 = arith.constant 0 : index
    %c16 = arith.constant 16 : index
    %c0_12 = arith.constant 0 : index
    %9 = vector.load %arg1[%c0_11, %c16, %c0_12] : memref<1x256x1xf32, #tpu.memory_space<vmem>>, vector<1x16x1xf32>
    %10 = vector.shape_cast %9 : vector<1x16x1xf32> to vector<16x1xf32>
    %c37 = arith.constant 37 : index
    %c0_13 = arith.constant 0 : index
    %11 = vector.load %arg12[%c37, %c0_13] : memref<342x1xf32, #tpu.memory_space<vmem>>, vector<16x1xf32>
    tpu.vector_store %arg12[%c37, %c0_13], %10 {strides = array<i32>} : memref<342x1xf32, #tpu.memory_space<vmem>>, vector<16x1xf32>,
    %c0_14 = arith.constant 0 : index
    %c32 = arith.constant 32 : index
    %c0_15 = arith.constant 0 : index
    %12 = vector.load %arg1[%c0_14, %c32, %c0_15] : memref<1x256x1xf32, #tpu.memory_space<vmem>>, vector<1x16x1xf32>
    %13 = vector.shape_cast %12 : vector<1x16x1xf32> to vector<16x1xf32>
    %c55 = arith.constant 55 : index
    %c0_16 = arith.constant 0 : index
    %14 = vector.load %arg12[%c55, %c0_16] : memref<342x1xf32, #tpu.memory_space<vmem>>, vector<16x1xf32>
    tpu.vector_store %arg12[%c55, %c0_16], %13 {strides = array<i32>} : memref<342x1xf32, #tpu.memory_space<vmem>>, vector<16x1xf32>,
    %c0_17 = arith.constant 0 : index
    %c48 = arith.constant 48 : index
    %c0_18 = arith.constant 0 : index
    %15 = vector.load %arg1[%c0_17, %c48, %c0_18] : memref<1x256x1xf32, #tpu.memory_space<vmem>>, vector<1x16x1xf32>
    %16 = vector.shape_cast %15 : vector<1x16x1xf32> to vector<16x1xf32>
    %c73 = arith.constant 73 : index
    %c0_19 = arith.constant 0 : index
    %17 = vector.load %arg12[%c73, %c0_19] : memref<342x1xf32, #tpu.memory_space<vmem>>, vector<16x1xf32>
    tpu.vector_store %arg12[%c73, %c0_19], %16 {strides = array<i32>} : memref<342x1xf32, #tpu.memory_space<vmem>>, vector<16x1xf32>,
    %c0_20 = arith.constant 0 : index
    %c64 = arith.constant 64 : index
    %c0_21 = arith.constant 0 : index
    %18 = vector.load %arg1[%c0_20, %c64, %c0_21] : memref<1x256x1xf32, #tpu.memory_space<vmem>>, vector<1x16x1xf32>
    %19 = vector.shape_cast %18 : vector<1x16x1xf32> to vector<16x1xf32>
    %c91 = arith.constant 91 : index
    %c0_22 = arith.constant 0 : index
    %20 = vector.load %arg12[%c91, %c0_22] : memref<342x1xf32, #tpu.memory_space<vmem>>, vector<16x1xf32>
    tpu.vector_store %arg12[%c91, %c0_22], %19 {strides = array<i32>} : memref<342x1xf32, #tpu.memory_space<vmem>>, vector<16x1xf32>,
    %c0_23 = arith.constant 0 : index
    %c80 = arith.constant 80 : index
    %c0_24 = arith.constant 0 : index
    %21 = vector.load %arg1[%c0_23, %c80, %c0_24] : memref<1x256x1xf32, #tpu.memory_space<vmem>>, vector<1x16x1xf32>
    %22 = vector.shape_cast %21 : vector<1x16x1xf32> to vector<16x1xf32>
    %c109 = arith.constant 109 : index
    %c0_25 = arith.constant 0 : index
    %23 = vector.load %arg12[%c109, %c0_25] : memref<342x1xf32, #tpu.memory_space<vmem>>, vector<16x1xf32>
    tpu.vector_store %arg12[%c109, %c0_25], %22 {strides = array<i32>} : memref<342x1xf32, #tpu.memory_space<vmem>>, vector<16x1xf32>,
    %c0_26 = arith.constant 0 : index
    %c96 = arith.constant 96 : index
    %c0_27 = arith.constant 0 : index
    %24 = vector.load %arg1[%c0_26, %c96, %c0_27] : memref<1x256x1xf32, #tpu.memory_space<vmem>>, vector<1x16x1xf32>
    %25 = vector.shape_cast %24 : vector<1x16x1xf32> to vector<16x1xf32>
    %c127 = arith.constant 127 : index
    %c0_28 = arith.constant 0 : index
    %26 = vector.load %arg12[%c127, %c0_28] : memref<342x1xf32, #tpu.memory_space<vmem>>, vector<16x1xf32>
    tpu.vector_store %arg12[%c127, %c0_28], %25 {strides = array<i32>} : memref<342x1xf32, #tpu.memory_space<vmem>>, vector<16x1xf32>,
    %c0_29 = arith.constant 0 : index
    %c112 = arith.constant 112 : index
    %c0_30 = arith.constant 0 : index
    %27 = vector.load %arg1[%c0_29, %c112, %c0_30] : memref<1x256x1xf32, #tpu.memory_space<vmem>>, vector<1x16x1xf32>
    %28 = vector.shape_cast %27 : vector<1x16x1xf32> to vector<16x1xf32>
    %c145 = arith.constant 145 : index
    %c0_31 = arith.constant 0 : index
    %29 = vector.load %arg12[%c145, %c0_31] : memref<342x1xf32, #tpu.memory_space<vmem>>, vector<16x1xf32>
    tpu.vector_store %arg12[%c145, %c0_31], %28 {strides = array<i32>} : memref<342x1xf32, #tpu.memory_space<vmem>>, vector<16x1xf32>,
    %c0_32 = arith.constant 0 : index
    %c128 = arith.constant 128 : index
    %c0_33 = arith.constant 0 : index
    %30 = vector.load %arg1[%c0_32, %c128, %c0_33] : memref<1x256x1xf32, #tpu.memory_space<vmem>>, vector<1x16x1xf32>
    %31 = vector.shape_cast %30 : vector<1x16x1xf32> to vector<16x1xf32>
    %c163 = arith.constant 163 : index
    %c0_34 = arith.constant 0 : index
    %32 = vector.load %arg12[%c163, %c0_34] : memref<342x1xf32, #tpu.memory_space<vmem>>, vector<16x1xf32>
    tpu.vector_store %arg12[%c163, %c0_34], %31 {strides = array<i32>} : memref<342x1xf32, #tpu.memory_space<vmem>>, vector<16x1xf32>,
    %c0_35 = arith.constant 0 : index
    %c144 = arith.constant 144 : index
    %c0_36 = arith.constant 0 : index
    %33 = vector.load %arg1[%c0_35, %c144, %c0_36] : memref<1x256x1xf32, #tpu.memory_space<vmem>>, vector<1x16x1xf32>
    %34 = vector.shape_cast %33 : vector<1x16x1xf32> to vector<16x1xf32>
    %c181 = arith.constant 181 : index
    %c0_37 = arith.constant 0 : index
    %35 = vector.load %arg12[%c181, %c0_37] : memref<342x1xf32, #tpu.memory_space<vmem>>, vector<16x1xf32>
    tpu.vector_store %arg12[%c181, %c0_37], %34 {strides = array<i32>} : memref<342x1xf32, #tpu.memory_space<vmem>>, vector<16x1xf32>,
    %c0_38 = arith.constant 0 : index
    %c160 = arith.constant 160 : index
    %c0_39 = arith.constant 0 : index
    %36 = vector.load %arg1[%c0_38, %c160, %c0_39] : memref<1x256x1xf32, #tpu.memory_space<vmem>>, vector<1x16x1xf32>
    %37 = vector.shape_cast %36 : vector<1x16x1xf32> to vector<16x1xf32>
    %c199 = arith.constant 199 : index
    %c0_40 = arith.constant 0 : index
    %38 = vector.load %arg12[%c199, %c0_40] : memref<342x1xf32, #tpu.memory_space<vmem>>, vector<16x1xf32>
    tpu.vector_store %arg12[%c199, %c0_40], %37 {strides = array<i32>} : memref<342x1xf32, #tpu.memory_space<vmem>>, vector<16x1xf32>,
    %c0_41 = arith.constant 0 : index
    %c176 = arith.constant 176 : index
    %c0_42 = arith.constant 0 : index
    %39 = vector.load %arg1[%c0_41, %c176, %c0_42] : memref<1x256x1xf32, #tpu.memory_space<vmem>>, vector<1x16x1xf32>
    %40 = vector.shape_cast %39 : vector<1x16x1xf32> to vector<16x1xf32>
    %c217 = arith.constant 217 : index
    %c0_43 = arith.constant 0 : index
    %41 = vector.load %arg12[%c217, %c0_43] : memref<342x1xf32, #tpu.memory_space<vmem>>, vector<16x1xf32>
    tpu.vector_store %arg12[%c217, %c0_43], %40 {strides = array<i32>} : memref<342x1xf32, #tpu.memory_space<vmem>>, vector<16x1xf32>,
    %c0_44 = arith.constant 0 : index
    %c192 = arith.constant 192 : index
    %c0_45 = arith.constant 0 : index
    %42 = vector.load %arg1[%c0_44, %c192, %c0_45] : memref<1x256x1xf32, #tpu.memory_space<vmem>>, vector<1x16x1xf32>
    %43 = vector.shape_cast %42 : vector<1x16x1xf32> to vector<16x1xf32>
    %c235 = arith.constant 235 : index
    %c0_46 = arith.constant 0 : index
    %44 = vector.load %arg12[%c235, %c0_46] : memref<342x1xf32, #tpu.memory_space<vmem>>, vector<16x1xf32>
    tpu.vector_store %arg12[%c235, %c0_46], %43 {strides = array<i32>} : memref<342x1xf32, #tpu.memory_space<vmem>>, vector<16x1xf32>,
    %c0_47 = arith.constant 0 : index
    %c208 = arith.constant 208 : index
    %c0_48 = arith.constant 0 : index
    %45 = vector.load %arg1[%c0_47, %c208, %c0_48] : memref<1x256x1xf32, #tpu.memory_space<vmem>>, vector<1x16x1xf32>
    %46 = vector.shape_cast %45 : vector<1x16x1xf32> to vector<16x1xf32>
    %c253 = arith.constant 253 : index
    %c0_49 = arith.constant 0 : index
    %47 = vector.load %arg12[%c253, %c0_49] : memref<342x1xf32, #tpu.memory_space<vmem>>, vector<16x1xf32>
    tpu.vector_store %arg12[%c253, %c0_49], %46 {strides = array<i32>} : memref<342x1xf32, #tpu.memory_space<vmem>>, vector<16x1xf32>,
    %c0_50 = arith.constant 0 : index
    %c224 = arith.constant 224 : index
    %c0_51 = arith.constant 0 : index
    %48 = vector.load %arg1[%c0_50, %c224, %c0_51] : memref<1x256x1xf32, #tpu.memory_space<vmem>>, vector<1x16x1xf32>
    %49 = vector.shape_cast %48 : vector<1x16x1xf32> to vector<16x1xf32>
    %c271 = arith.constant 271 : index
    %c0_52 = arith.constant 0 : index
    %50 = vector.load %arg12[%c271, %c0_52] : memref<342x1xf32, #tpu.memory_space<vmem>>, vector<16x1xf32>
    tpu.vector_store %arg12[%c271, %c0_52], %49 {strides = array<i32>} : memref<342x1xf32, #tpu.memory_space<vmem>>, vector<16x1xf32>,
    %c0_53 = arith.constant 0 : index
    %c240 = arith.constant 240 : index
    %c0_54 = arith.constant 0 : index
    %51 = vector.load %arg1[%c0_53, %c240, %c0_54] : memref<1x256x1xf32, #tpu.memory_space<vmem>>, vector<1x16x1xf32>
    %52 = vector.shape_cast %51 : vector<1x16x1xf32> to vector<16x1xf32>
    %c289 = arith.constant 289 : index
    %c0_55 = arith.constant 0 : index
    %53 = vector.load %arg12[%c289, %c0_55] : memref<342x1xf32, #tpu.memory_space<vmem>>, vector<16x1xf32>
    tpu.vector_store %arg12[%c289, %c0_55], %52 {strides = array<i32>} : memref<342x1xf32, #tpu.memory_space<vmem>>, vector<16x1xf32>,
    %c0_56 = arith.constant 0 : index
    %c0_57 = arith.constant 0 : index
    %54 = vector.load %arg12[%c0_56, %c0_57] : memref<342x1xf32, #tpu.memory_space<vmem>>, vector<288x1xf32>
    %c0_58 = arith.constant 0 : index
    %c0_59 = arith.constant 0 : index
    %c0_60 = arith.constant 0 : index
    %55 = vector.load %arg2[%c0_58, %c0_59, %c0_60] : memref<9x1x16xf32, #tpu.memory_space<vmem>>, vector<1x1x16xf32>
    %56 = vector.shape_cast %55 : vector<1x1x16xf32> to vector<1x16xf32>
    %57 = vector.broadcast %54 : vector<288x1xf32> to vector<288x16xf32>
    %58 = vector.broadcast %56 : vector<1x16xf32> to vector<288x16xf32>
    %59 = arith.mulf %57, %58 : vector<288x16xf32>
    %c1 = arith.constant 1 : index
    %c0_61 = arith.constant 0 : index
    %60 = vector.load %arg12[%c1, %c0_61] : memref<342x1xf32, #tpu.memory_space<vmem>>, vector<288x1xf32>
    %c1_62 = arith.constant 1 : index
    %c0_63 = arith.constant 0 : index
    %c0_64 = arith.constant 0 : index
    %61 = vector.load %arg2[%c1_62, %c0_63, %c0_64] : memref<9x1x16xf32, #tpu.memory_space<vmem>>, vector<1x1x16xf32>
    %62 = vector.shape_cast %61 : vector<1x1x16xf32> to vector<1x16xf32>
    %63 = vector.broadcast %60 : vector<288x1xf32> to vector<288x16xf32>
    %64 = vector.broadcast %62 : vector<1x16xf32> to vector<288x16xf32>
    %65 = arith.mulf %63, %64 : vector<288x16xf32>
    %66 = arith.addf %59, %65 : vector<288x16xf32>
    %c2 = arith.constant 2 : index
    %c0_65 = arith.constant 0 : index
    %67 = vector.load %arg12[%c2, %c0_65] : memref<342x1xf32, #tpu.memory_space<vmem>>, vector<288x1xf32>
    %c2_66 = arith.constant 2 : index
    %c0_67 = arith.constant 0 : index
    %c0_68 = arith.constant 0 : index
    %68 = vector.load %arg2[%c2_66, %c0_67, %c0_68] : memref<9x1x16xf32, #tpu.memory_space<vmem>>, vector<1x1x16xf32>
    %69 = vector.shape_cast %68 : vector<1x1x16xf32> to vector<1x16xf32>
    %70 = vector.broadcast %67 : vector<288x1xf32> to vector<288x16xf32>
    %71 = vector.broadcast %69 : vector<1x16xf32> to vector<288x16xf32>
    %72 = arith.mulf %70, %71 : vector<288x16xf32>
    %73 = arith.addf %66, %72 : vector<288x16xf32>
    %c18 = arith.constant 18 : index
    %c0_69 = arith.constant 0 : index
    %74 = vector.load %arg12[%c18, %c0_69] : memref<342x1xf32, #tpu.memory_space<vmem>>, vector<288x1xf32>
    %c3 = arith.constant 3 : index
    %c0_70 = arith.constant 0 : index
    %c0_71 = arith.constant 0 : index
    %75 = vector.load %arg2[%c3, %c0_70, %c0_71] : memref<9x1x16xf32, #tpu.memory_space<vmem>>, vector<1x1x16xf32>
    %76 = vector.shape_cast %75 : vector<1x1x16xf32> to vector<1x16xf32>
    %77 = vector.broadcast %74 : vector<288x1xf32> to vector<288x16xf32>
    %78 = vector.broadcast %76 : vector<1x16xf32> to vector<288x16xf32>
    %79 = arith.mulf %77, %78 : vector<288x16xf32>
    %80 = arith.addf %73, %79 : vector<288x16xf32>
    %c19_72 = arith.constant 19 : index
    %c0_73 = arith.constant 0 : index
    %81 = vector.load %arg12[%c19_72, %c0_73] : memref<342x1xf32, #tpu.memory_space<vmem>>, vector<288x1xf32>
    %c4 = arith.constant 4 : index
    %c0_74 = arith.constant 0 : index
    %c0_75 = arith.constant 0 : index
    %82 = vector.load %arg2[%c4, %c0_74, %c0_75] : memref<9x1x16xf32, #tpu.memory_space<vmem>>, vector<1x1x16xf32>
    %83 = vector.shape_cast %82 : vector<1x1x16xf32> to vector<1x16xf32>
    %84 = vector.broadcast %81 : vector<288x1xf32> to vector<288x16xf32>
    %85 = vector.broadcast %83 : vector<1x16xf32> to vector<288x16xf32>
    %86 = arith.mulf %84, %85 : vector<288x16xf32>
    %87 = arith.addf %80, %86 : vector<288x16xf32>
    %c20 = arith.constant 20 : index
    %c0_76 = arith.constant 0 : index
    %88 = vector.load %arg12[%c20, %c0_76] : memref<342x1xf32, #tpu.memory_space<vmem>>, vector<288x1xf32>
    %c5 = arith.constant 5 : index
    %c0_77 = arith.constant 0 : index
    %c0_78 = arith.constant 0 : index
    %89 = vector.load %arg2[%c5, %c0_77, %c0_78] : memref<9x1x16xf32, #tpu.memory_space<vmem>>, vector<1x1x16xf32>
    %90 = vector.shape_cast %89 : vector<1x1x16xf32> to vector<1x16xf32>
    %91 = vector.broadcast %88 : vector<288x1xf32> to vector<288x16xf32>
    %92 = vector.broadcast %90 : vector<1x16xf32> to vector<288x16xf32>
    %93 = arith.mulf %91, %92 : vector<288x16xf32>
    %94 = arith.addf %87, %93 : vector<288x16xf32>
    %c36 = arith.constant 36 : index
    %c0_79 = arith.constant 0 : index
    %95 = vector.load %arg12[%c36, %c0_79] : memref<342x1xf32, #tpu.memory_space<vmem>>, vector<288x1xf32>
    %c6 = arith.constant 6 : index
    %c0_80 = arith.constant 0 : index
    %c0_81 = arith.constant 0 : index
    %96 = vector.load %arg2[%c6, %c0_80, %c0_81] : memref<9x1x16xf32, #tpu.memory_space<vmem>>, vector<1x1x16xf32>
    %97 = vector.shape_cast %96 : vector<1x1x16xf32> to vector<1x16xf32>
    %98 = vector.broadcast %95 : vector<288x1xf32> to vector<288x16xf32>
    %99 = vector.broadcast %97 : vector<1x16xf32> to vector<288x16xf32>
    %100 = arith.mulf %98, %99 : vector<288x16xf32>
    %101 = arith.addf %94, %100 : vector<288x16xf32>
    %c37_82 = arith.constant 37 : index
    %c0_83 = arith.constant 0 : index
    %102 = vector.load %arg12[%c37_82, %c0_83] : memref<342x1xf32, #tpu.memory_space<vmem>>, vector<288x1xf32>
    %c7 = arith.constant 7 : index
    %c0_84 = arith.constant 0 : index
    %c0_85 = arith.constant 0 : index
    %103 = vector.load %arg2[%c7, %c0_84, %c0_85] : memref<9x1x16xf32, #tpu.memory_space<vmem>>, vector<1x1x16xf32>
    %104 = vector.shape_cast %103 : vector<1x1x16xf32> to vector<1x16xf32>
    %105 = vector.broadcast %102 : vector<288x1xf32> to vector<288x16xf32>
    %106 = vector.broadcast %104 : vector<1x16xf32> to vector<288x16xf32>
    %107 = arith.mulf %105, %106 : vector<288x16xf32>
    %108 = arith.addf %101, %107 : vector<288x16xf32>
    %c38 = arith.constant 38 : index
    %c0_86 = arith.constant 0 : index
    %109 = vector.load %arg12[%c38, %c0_86] : memref<342x1xf32, #tpu.memory_space<vmem>>, vector<288x1xf32>
    %c8 = arith.constant 8 : index
    %c0_87 = arith.constant 0 : index
    %c0_88 = arith.constant 0 : index
    %110 = vector.load %arg2[%c8, %c0_87, %c0_88] : memref<9x1x16xf32, #tpu.memory_space<vmem>>, vector<1x1x16xf32>
    %111 = vector.shape_cast %110 : vector<1x1x16xf32> to vector<1x16xf32>
    %112 = vector.broadcast %109 : vector<288x1xf32> to vector<288x16xf32>
    %113 = vector.broadcast %111 : vector<1x16xf32> to vector<288x16xf32>
    %114 = arith.mulf %112, %113 : vector<288x16xf32>
    %115 = arith.addf %108, %114 : vector<288x16xf32>
    %c0_89 = arith.constant 0 : index
    %c0_90 = arith.constant 0 : index
    %116 = vector.load %arg3[%c0_89, %c0_90] : memref<1x16xf32, #tpu.memory_space<vmem>>, vector<1x16xf32>
    %117 = vector.broadcast %116 : vector<1x16xf32> to vector<288x16xf32>
    %118 = arith.mulf %115, %117 : vector<288x16xf32>
    %c0_91 = arith.constant 0 : index
    %c0_92 = arith.constant 0 : index
    %119 = vector.load %arg4[%c0_91, %c0_92] : memref<1x16xf32, #tpu.memory_space<vmem>>, vector<1x16xf32>
    %120 = vector.broadcast %119 : vector<1x16xf32> to vector<288x16xf32>
    %121 = arith.addf %118, %120 : vector<288x16xf32>
    %cst_93 = arith.constant 0.000000e+00 : f32
    %122 = vector.broadcast %cst_93 : f32 to vector<288x16xf32>
    %123 = arith.maximumf %121, %122 : vector<288x16xf32>
    %c0_94 = arith.constant 0 : index
    %c0_95 = arith.constant 0 : index
    %124 = vector.load %arg13[%c0_94, %c0_95] : memref<288x16xf32, #tpu.memory_space<vmem>>, vector<288x16xf32>
    tpu.vector_store %arg13[%c0_94, %c0_95], %123 {strides = array<i32>} : memref<288x16xf32, #tpu.memory_space<vmem>>, vector<288x16xf32>,
    %125 = tpu.iota {dimensions = array<i32: 0>} : vector<8x16xi32>
    %126 = tpu.iota {dimensions = array<i32: 1>} : vector<8x16xi32>
    %c2_i32 = arith.constant 2 : i32
    %127 = vector.broadcast %c2_i32 : i32 to vector<8x16xi32>
    %128 = arith.muli %127, %125 : vector<8x16xi32>
    %129 = arith.cmpi eq, %126, %128 : vector<8x16xi32>
    %130 = arith.extui %129 : vector<8x16xi1> to vector<8x16xi32>
    %131 = arith.sitofp %130 : vector<8x16xi32> to vector<8x16xf32>
    %c2_i32_96 = arith.constant 2 : i32
    %132 = vector.broadcast %c2_i32_96 : i32 to vector<8x16xi32>
    %133 = arith.muli %132, %125 : vector<8x16xi32>
    %c1_i32 = arith.constant 1 : i32
    %134 = vector.broadcast %c1_i32 : i32 to vector<8x16xi32>
    %135 = arith.addi %133, %134 : vector<8x16xi32>
    %136 = arith.cmpi eq, %126, %135 : vector<8x16xi32>
    %137 = arith.extui %136 : vector<8x16xi1> to vector<8x16xi32>
    %138 = arith.sitofp %137 : vector<8x16xi32> to vector<8x16xf32>
    %c0_97 = arith.constant 0 : index
    %c0_98 = arith.constant 0 : index
    %139 = vector.load %arg13[%c0_97, %c0_98] : memref<288x16xf32, #tpu.memory_space<vmem>>, vector<16x16xf32>
    %c18_99 = arith.constant 18 : index
    %c0_100 = arith.constant 0 : index
    %140 = vector.load %arg13[%c18_99, %c0_100] : memref<288x16xf32, #tpu.memory_space<vmem>>, vector<16x16xf32>
    %141 = arith.maximumf %139, %140 : vector<16x16xf32>
    %cst_101 = arith.constant dense<0.000000e+00> : vector<8x16xf32>
    %142 = tpu.matmul %131, %141, %cst_101 {dimension_numbers = #tpu.dot_dimension_numbers<[1], [0], [0], [1], [0, 0, 1, 1], [], []>} : vector<8x16xf32>, vector<16x16xf32>, vector<8x16xf32> -> vector<8x16xf32>
    %cst_102 = arith.constant dense<0.000000e+00> : vector<8x16xf32>
    %143 = tpu.matmul %138, %141, %cst_102 {dimension_numbers = #tpu.dot_dimension_numbers<[1], [0], [0], [1], [0, 0, 1, 1], [], []>} : vector<8x16xf32>, vector<16x16xf32>, vector<8x16xf32> -> vector<8x16xf32>
    %144 = arith.maximumf %142, %143 : vector<8x16xf32>
    %c11 = arith.constant 11 : index
    %c0_103 = arith.constant 0 : index
    %145 = vector.load %arg14[%c11, %c0_103] : memref<110x16xf32, #tpu.memory_space<vmem>>, vector<8x16xf32>
    tpu.vector_store %arg14[%c11, %c0_103], %144 {strides = array<i32>} : memref<110x16xf32, #tpu.memory_space<vmem>>, vector<8x16xf32>,
    %c36_104 = arith.constant 36 : index
    %c0_105 = arith.constant 0 : index
    %146 = vector.load %arg13[%c36_104, %c0_105] : memref<288x16xf32, #tpu.memory_space<vmem>>, vector<16x16xf32>
    %c54 = arith.constant 54 : index
    %c0_106 = arith.constant 0 : index
    %147 = vector.load %arg13[%c54, %c0_106] : memref<288x16xf32, #tpu.memory_space<vmem>>, vector<16x16xf32>
    %148 = arith.maximumf %146, %147 : vector<16x16xf32>
    %cst_107 = arith.constant dense<0.000000e+00> : vector<8x16xf32>
    %149 = tpu.matmul %131, %148, %cst_107 {dimension_numbers = #tpu.dot_dimension_numbers<[1], [0], [0], [1], [0, 0, 1, 1], [], []>} : vector<8x16xf32>, vector<16x16xf32>, vector<8x16xf32> -> vector<8x16xf32>
    %cst_108 = arith.constant dense<0.000000e+00> : vector<8x16xf32>
    %150 = tpu.matmul %138, %148, %cst_108 {dimension_numbers = #tpu.dot_dimension_numbers<[1], [0], [0], [1], [0, 0, 1, 1], [], []>} : vector<8x16xf32>, vector<16x16xf32>, vector<8x16xf32> -> vector<8x16xf32>
    %151 = arith.maximumf %149, %150 : vector<8x16xf32>
    %c21 = arith.constant 21 : index
    %c0_109 = arith.constant 0 : index
    %152 = vector.load %arg14[%c21, %c0_109] : memref<110x16xf32, #tpu.memory_space<vmem>>, vector<8x16xf32>
    tpu.vector_store %arg14[%c21, %c0_109], %151 {strides = array<i32>} : memref<110x16xf32, #tpu.memory_space<vmem>>, vector<8x16xf32>,
    %c72 = arith.constant 72 : index
    %c0_110 = arith.constant 0 : index
    %153 = vector.load %arg13[%c72, %c0_110] : memref<288x16xf32, #tpu.memory_space<vmem>>, vector<16x16xf32>
    %c90 = arith.constant 90 : index
    %c0_111 = arith.constant 0 : index
    %154 = vector.load %arg13[%c90, %c0_111] : memref<288x16xf32, #tpu.memory_space<vmem>>, vector<16x16xf32>
    %155 = arith.maximumf %153, %154 : vector<16x16xf32>
    %cst_112 = arith.constant dense<0.000000e+00> : vector<8x16xf32>
    %156 = tpu.matmul %131, %155, %cst_112 {dimension_numbers = #tpu.dot_dimension_numbers<[1], [0], [0], [1], [0, 0, 1, 1], [], []>} : vector<8x16xf32>, vector<16x16xf32>, vector<8x16xf32> -> vector<8x16xf32>
    %cst_113 = arith.constant dense<0.000000e+00> : vector<8x16xf32>
    %157 = tpu.matmul %138, %155, %cst_113 {dimension_numbers = #tpu.dot_dimension_numbers<[1], [0], [0], [1], [0, 0, 1, 1], [], []>} : vector<8x16xf32>, vector<16x16xf32>, vector<8x16xf32> -> vector<8x16xf32>
    %158 = arith.maximumf %156, %157 : vector<8x16xf32>
    %c31 = arith.constant 31 : index
    %c0_114 = arith.constant 0 : index
    %159 = vector.load %arg14[%c31, %c0_114] : memref<110x16xf32, #tpu.memory_space<vmem>>, vector<8x16xf32>
    tpu.vector_store %arg14[%c31, %c0_114], %158 {strides = array<i32>} : memref<110x16xf32, #tpu.memory_space<vmem>>, vector<8x16xf32>,
    %c108 = arith.constant 108 : index
    %c0_115 = arith.constant 0 : index
    %160 = vector.load %arg13[%c108, %c0_115] : memref<288x16xf32, #tpu.memory_space<vmem>>, vector<16x16xf32>
    %c126 = arith.constant 126 : index
    %c0_116 = arith.constant 0 : index
    %161 = vector.load %arg13[%c126, %c0_116] : memref<288x16xf32, #tpu.memory_space<vmem>>, vector<16x16xf32>
    %162 = arith.maximumf %160, %161 : vector<16x16xf32>
    %cst_117 = arith.constant dense<0.000000e+00> : vector<8x16xf32>
    %163 = tpu.matmul %131, %162, %cst_117 {dimension_numbers = #tpu.dot_dimension_numbers<[1], [0], [0], [1], [0, 0, 1, 1], [], []>} : vector<8x16xf32>, vector<16x16xf32>, vector<8x16xf32> -> vector<8x16xf32>
    %cst_118 = arith.constant dense<0.000000e+00> : vector<8x16xf32>
    %164 = tpu.matmul %138, %162, %cst_118 {dimension_numbers = #tpu.dot_dimension_numbers<[1], [0], [0], [1], [0, 0, 1, 1], [], []>} : vector<8x16xf32>, vector<16x16xf32>, vector<8x16xf32> -> vector<8x16xf32>
    %165 = arith.maximumf %163, %164 : vector<8x16xf32>
    %c41 = arith.constant 41 : index
    %c0_119 = arith.constant 0 : index
    %166 = vector.load %arg14[%c41, %c0_119] : memref<110x16xf32, #tpu.memory_space<vmem>>, vector<8x16xf32>
    tpu.vector_store %arg14[%c41, %c0_119], %165 {strides = array<i32>} : memref<110x16xf32, #tpu.memory_space<vmem>>, vector<8x16xf32>,
    %c144_120 = arith.constant 144 : index
    %c0_121 = arith.constant 0 : index
    %167 = vector.load %arg13[%c144_120, %c0_121] : memref<288x16xf32, #tpu.memory_space<vmem>>, vector<16x16xf32>
    %c162 = arith.constant 162 : index
    %c0_122 = arith.constant 0 : index
    %168 = vector.load %arg13[%c162, %c0_122] : memref<288x16xf32, #tpu.memory_space<vmem>>, vector<16x16xf32>
    %169 = arith.maximumf %167, %168 : vector<16x16xf32>
    %cst_123 = arith.constant dense<0.000000e+00> : vector<8x16xf32>
    %170 = tpu.matmul %131, %169, %cst_123 {dimension_numbers = #tpu.dot_dimension_numbers<[1], [0], [0], [1], [0, 0, 1, 1], [], []>} : vector<8x16xf32>, vector<16x16xf32>, vector<8x16xf32> -> vector<8x16xf32>
    %cst_124 = arith.constant dense<0.000000e+00> : vector<8x16xf32>
    %171 = tpu.matmul %138, %169, %cst_124 {dimension_numbers = #tpu.dot_dimension_numbers<[1], [0], [0], [1], [0, 0, 1, 1], [], []>} : vector<8x16xf32>, vector<16x16xf32>, vector<8x16xf32> -> vector<8x16xf32>
    %172 = arith.maximumf %170, %171 : vector<8x16xf32>
    %c51 = arith.constant 51 : index
    %c0_125 = arith.constant 0 : index
    %173 = vector.load %arg14[%c51, %c0_125] : memref<110x16xf32, #tpu.memory_space<vmem>>, vector<8x16xf32>
    tpu.vector_store %arg14[%c51, %c0_125], %172 {strides = array<i32>} : memref<110x16xf32, #tpu.memory_space<vmem>>, vector<8x16xf32>,
    %c180 = arith.constant 180 : index
    %c0_126 = arith.constant 0 : index
    %174 = vector.load %arg13[%c180, %c0_126] : memref<288x16xf32, #tpu.memory_space<vmem>>, vector<16x16xf32>
    %c198 = arith.constant 198 : index
    %c0_127 = arith.constant 0 : index
    %175 = vector.load %arg13[%c198, %c0_127] : memref<288x16xf32, #tpu.memory_space<vmem>>, vector<16x16xf32>
    %176 = arith.maximumf %174, %175 : vector<16x16xf32>
    %cst_128 = arith.constant dense<0.000000e+00> : vector<8x16xf32>
    %177 = tpu.matmul %131, %176, %cst_128 {dimension_numbers = #tpu.dot_dimension_numbers<[1], [0], [0], [1], [0, 0, 1, 1], [], []>} : vector<8x16xf32>, vector<16x16xf32>, vector<8x16xf32> -> vector<8x16xf32>
    %cst_129 = arith.constant dense<0.000000e+00> : vector<8x16xf32>
    %178 = tpu.matmul %138, %176, %cst_129 {dimension_numbers = #tpu.dot_dimension_numbers<[1], [0], [0], [1], [0, 0, 1, 1], [], []>} : vector<8x16xf32>, vector<16x16xf32>, vector<8x16xf32> -> vector<8x16xf32>
    %179 = arith.maximumf %177, %178 : vector<8x16xf32>
    %c61 = arith.constant 61 : index
    %c0_130 = arith.constant 0 : index
    %180 = vector.load %arg14[%c61, %c0_130] : memref<110x16xf32, #tpu.memory_space<vmem>>, vector<8x16xf32>
    tpu.vector_store %arg14[%c61, %c0_130], %179 {strides = array<i32>} : memref<110x16xf32, #tpu.memory_space<vmem>>, vector<8x16xf32>,
    %c216 = arith.constant 216 : index
    %c0_131 = arith.constant 0 : index
    %181 = vector.load %arg13[%c216, %c0_131] : memref<288x16xf32, #tpu.memory_space<vmem>>, vector<16x16xf32>
    %c234 = arith.constant 234 : index
    %c0_132 = arith.constant 0 : index
    %182 = vector.load %arg13[%c234, %c0_132] : memref<288x16xf32, #tpu.memory_space<vmem>>, vector<16x16xf32>
    %183 = arith.maximumf %181, %182 : vector<16x16xf32>
    %cst_133 = arith.constant dense<0.000000e+00> : vector<8x16xf32>
    %184 = tpu.matmul %131, %183, %cst_133 {dimension_numbers = #tpu.dot_dimension_numbers<[1], [0], [0], [1], [0, 0, 1, 1], [], []>} : vector<8x16xf32>, vector<16x16xf32>, vector<8x16xf32> -> vector<8x16xf32>
    %cst_134 = arith.constant dense<0.000000e+00> : vector<8x16xf32>
    %185 = tpu.matmul %138, %183, %cst_134 {dimension_numbers = #tpu.dot_dimension_numbers<[1], [0], [0], [1], [0, 0, 1, 1], [], []>} : vector<8x16xf32>, vector<16x16xf32>, vector<8x16xf32> -> vector<8x16xf32>
    %186 = arith.maximumf %184, %185 : vector<8x16xf32>
    %c71 = arith.constant 71 : index
    %c0_135 = arith.constant 0 : index
    %187 = vector.load %arg14[%c71, %c0_135] : memref<110x16xf32, #tpu.memory_space<vmem>>, vector<8x16xf32>
    tpu.vector_store %arg14[%c71, %c0_135], %186 {strides = array<i32>} : memref<110x16xf32, #tpu.memory_space<vmem>>, vector<8x16xf32>,
    %c252 = arith.constant 252 : index
    %c0_136 = arith.constant 0 : index
    %188 = vector.load %arg13[%c252, %c0_136] : memref<288x16xf32, #tpu.memory_space<vmem>>, vector<16x16xf32>
    %c270 = arith.constant 270 : index
    %c0_137 = arith.constant 0 : index
    %189 = vector.load %arg13[%c270, %c0_137] : memref<288x16xf32, #tpu.memory_space<vmem>>, vector<16x16xf32>
    %190 = arith.maximumf %188, %189 : vector<16x16xf32>
    %cst_138 = arith.constant dense<0.000000e+00> : vector<8x16xf32>
    %191 = tpu.matmul %131, %190, %cst_138 {dimension_numbers = #tpu.dot_dimension_numbers<[1], [0], [0], [1], [0, 0, 1, 1], [], []>} : vector<8x16xf32>, vector<16x16xf32>, vector<8x16xf32> -> vector<8x16xf32>
    %cst_139 = arith.constant dense<0.000000e+00> : vector<8x16xf32>
    %192 = tpu.matmul %138, %190, %cst_139 {dimension_numbers = #tpu.dot_dimension_numbers<[1], [0], [0], [1], [0, 0, 1, 1], [], []>} : vector<8x16xf32>, vector<16x16xf32>, vector<8x16xf32> -> vector<8x16xf32>
    %193 = arith.maximumf %191, %192 : vector<8x16xf32>
    %c81 = arith.constant 81 : index
    %c0_140 = arith.constant 0 : index
    %194 = vector.load %arg14[%c81, %c0_140] : memref<110x16xf32, #tpu.memory_space<vmem>>, vector<8x16xf32>
    tpu.vector_store %arg14[%c81, %c0_140], %193 {strides = array<i32>} : memref<110x16xf32, #tpu.memory_space<vmem>>, vector<8x16xf32>,
    %c0_141 = arith.constant 0 : index
    %c0_142 = arith.constant 0 : index
    %195 = vector.load %arg14[%c0_141, %c0_142] : memref<110x16xf32, #tpu.memory_space<vmem>>, vector<80x16xf32>
    %c0_143 = arith.constant 0 : index
    %c0_144 = arith.constant 0 : index
    %c0_145 = arith.constant 0 : index
    %196 = vector.load %arg5[%c0_143, %c0_144, %c0_145] : memref<9x16x32xf32, #tpu.memory_space<vmem>>, vector<1x16x32xf32>
    %197 = vector.shape_cast %196 : vector<1x16x32xf32> to vector<16x32xf32>
    %cst_146 = arith.constant dense<0.000000e+00> : vector<80x32xf32>
    %198 = tpu.matmul %195, %197, %cst_146 {dimension_numbers = #tpu.dot_dimension_numbers<[1], [0], [0], [1], [0, 0, 1, 1], [], []>} : vector<80x16xf32>, vector<16x32xf32>, vector<80x32xf32> -> vector<80x32xf32>
    %c1_147 = arith.constant 1 : index
    %c0_148 = arith.constant 0 : index
    %199 = vector.load %arg14[%c1_147, %c0_148] : memref<110x16xf32, #tpu.memory_space<vmem>>, vector<80x16xf32>
    %c1_149 = arith.constant 1 : index
    %c0_150 = arith.constant 0 : index
    %c0_151 = arith.constant 0 : index
    %200 = vector.load %arg5[%c1_149, %c0_150, %c0_151] : memref<9x16x32xf32, #tpu.memory_space<vmem>>, vector<1x16x32xf32>
    %201 = vector.shape_cast %200 : vector<1x16x32xf32> to vector<16x32xf32>
    %cst_152 = arith.constant dense<0.000000e+00> : vector<80x32xf32>
    %202 = tpu.matmul %199, %201, %cst_152 {dimension_numbers = #tpu.dot_dimension_numbers<[1], [0], [0], [1], [0, 0, 1, 1], [], []>} : vector<80x16xf32>, vector<16x32xf32>, vector<80x32xf32> -> vector<80x32xf32>
    %203 = arith.addf %198, %202 : vector<80x32xf32>
    %c2_153 = arith.constant 2 : index
    %c0_154 = arith.constant 0 : index
    %204 = vector.load %arg14[%c2_153, %c0_154] : memref<110x16xf32, #tpu.memory_space<vmem>>, vector<80x16xf32>
    %c2_155 = arith.constant 2 : index
    %c0_156 = arith.constant 0 : index
    %c0_157 = arith.constant 0 : index
    %205 = vector.load %arg5[%c2_155, %c0_156, %c0_157] : memref<9x16x32xf32, #tpu.memory_space<vmem>>, vector<1x16x32xf32>
    %206 = vector.shape_cast %205 : vector<1x16x32xf32> to vector<16x32xf32>
    %cst_158 = arith.constant dense<0.000000e+00> : vector<80x32xf32>
    %207 = tpu.matmul %204, %206, %cst_158 {dimension_numbers = #tpu.dot_dimension_numbers<[1], [0], [0], [1], [0, 0, 1, 1], [], []>} : vector<80x16xf32>, vector<16x32xf32>, vector<80x32xf32> -> vector<80x32xf32>
    %208 = arith.addf %203, %207 : vector<80x32xf32>
    %c10 = arith.constant 10 : index
    %c0_159 = arith.constant 0 : index
    %209 = vector.load %arg14[%c10, %c0_159] : memref<110x16xf32, #tpu.memory_space<vmem>>, vector<80x16xf32>
    %c3_160 = arith.constant 3 : index
    %c0_161 = arith.constant 0 : index
    %c0_162 = arith.constant 0 : index
    %210 = vector.load %arg5[%c3_160, %c0_161, %c0_162] : memref<9x16x32xf32, #tpu.memory_space<vmem>>, vector<1x16x32xf32>
    %211 = vector.shape_cast %210 : vector<1x16x32xf32> to vector<16x32xf32>
    %cst_163 = arith.constant dense<0.000000e+00> : vector<80x32xf32>
    %212 = tpu.matmul %209, %211, %cst_163 {dimension_numbers = #tpu.dot_dimension_numbers<[1], [0], [0], [1], [0, 0, 1, 1], [], []>} : vector<80x16xf32>, vector<16x32xf32>, vector<80x32xf32> -> vector<80x32xf32>
    %213 = arith.addf %208, %212 : vector<80x32xf32>
    %c11_164 = arith.constant 11 : index
    %c0_165 = arith.constant 0 : index
    %214 = vector.load %arg14[%c11_164, %c0_165] : memref<110x16xf32, #tpu.memory_space<vmem>>, vector<80x16xf32>
    %c4_166 = arith.constant 4 : index
    %c0_167 = arith.constant 0 : index
    %c0_168 = arith.constant 0 : index
    %215 = vector.load %arg5[%c4_166, %c0_167, %c0_168] : memref<9x16x32xf32, #tpu.memory_space<vmem>>, vector<1x16x32xf32>
    %216 = vector.shape_cast %215 : vector<1x16x32xf32> to vector<16x32xf32>
    %cst_169 = arith.constant dense<0.000000e+00> : vector<80x32xf32>
    %217 = tpu.matmul %214, %216, %cst_169 {dimension_numbers = #tpu.dot_dimension_numbers<[1], [0], [0], [1], [0, 0, 1, 1], [], []>} : vector<80x16xf32>, vector<16x32xf32>, vector<80x32xf32> -> vector<80x32xf32>
    %218 = arith.addf %213, %217 : vector<80x32xf32>
    %c12 = arith.constant 12 : index
    %c0_170 = arith.constant 0 : index
    %219 = vector.load %arg14[%c12, %c0_170] : memref<110x16xf32, #tpu.memory_space<vmem>>, vector<80x16xf32>
    %c5_171 = arith.constant 5 : index
    %c0_172 = arith.constant 0 : index
    %c0_173 = arith.constant 0 : index
    %220 = vector.load %arg5[%c5_171, %c0_172, %c0_173] : memref<9x16x32xf32, #tpu.memory_space<vmem>>, vector<1x16x32xf32>
    %221 = vector.shape_cast %220 : vector<1x16x32xf32> to vector<16x32xf32>
    %cst_174 = arith.constant dense<0.000000e+00> : vector<80x32xf32>
    %222 = tpu.matmul %219, %221, %cst_174 {dimension_numbers = #tpu.dot_dimension_numbers<[1], [0], [0], [1], [0, 0, 1, 1], [], []>} : vector<80x16xf32>, vector<16x32xf32>, vector<80x32xf32> -> vector<80x32xf32>
    %223 = arith.addf %218, %222 : vector<80x32xf32>
    %c20_175 = arith.constant 20 : index
    %c0_176 = arith.constant 0 : index
    %224 = vector.load %arg14[%c20_175, %c0_176] : memref<110x16xf32, #tpu.memory_space<vmem>>, vector<80x16xf32>
    %c6_177 = arith.constant 6 : index
    %c0_178 = arith.constant 0 : index
    %c0_179 = arith.constant 0 : index
    %225 = vector.load %arg5[%c6_177, %c0_178, %c0_179] : memref<9x16x32xf32, #tpu.memory_space<vmem>>, vector<1x16x32xf32>
    %226 = vector.shape_cast %225 : vector<1x16x32xf32> to vector<16x32xf32>
    %cst_180 = arith.constant dense<0.000000e+00> : vector<80x32xf32>
    %227 = tpu.matmul %224, %226, %cst_180 {dimension_numbers = #tpu.dot_dimension_numbers<[1], [0], [0], [1], [0, 0, 1, 1], [], []>} : vector<80x16xf32>, vector<16x32xf32>, vector<80x32xf32> -> vector<80x32xf32>
    %228 = arith.addf %223, %227 : vector<80x32xf32>
    %c21_181 = arith.constant 21 : index
    %c0_182 = arith.constant 0 : index
    %229 = vector.load %arg14[%c21_181, %c0_182] : memref<110x16xf32, #tpu.memory_space<vmem>>, vector<80x16xf32>
    %c7_183 = arith.constant 7 : index
    %c0_184 = arith.constant 0 : index
    %c0_185 = arith.constant 0 : index
    %230 = vector.load %arg5[%c7_183, %c0_184, %c0_185] : memref<9x16x32xf32, #tpu.memory_space<vmem>>, vector<1x16x32xf32>
    %231 = vector.shape_cast %230 : vector<1x16x32xf32> to vector<16x32xf32>
    %cst_186 = arith.constant dense<0.000000e+00> : vector<80x32xf32>
    %232 = tpu.matmul %229, %231, %cst_186 {dimension_numbers = #tpu.dot_dimension_numbers<[1], [0], [0], [1], [0, 0, 1, 1], [], []>} : vector<80x16xf32>, vector<16x32xf32>, vector<80x32xf32> -> vector<80x32xf32>
    %233 = arith.addf %228, %232 : vector<80x32xf32>
    %c22 = arith.constant 22 : index
    %c0_187 = arith.constant 0 : index
    %234 = vector.load %arg14[%c22, %c0_187] : memref<110x16xf32, #tpu.memory_space<vmem>>, vector<80x16xf32>
    %c8_188 = arith.constant 8 : index
    %c0_189 = arith.constant 0 : index
    %c0_190 = arith.constant 0 : index
    %235 = vector.load %arg5[%c8_188, %c0_189, %c0_190] : memref<9x16x32xf32, #tpu.memory_space<vmem>>, vector<1x16x32xf32>
    %236 = vector.shape_cast %235 : vector<1x16x32xf32> to vector<16x32xf32>
    %cst_191 = arith.constant dense<0.000000e+00> : vector<80x32xf32>
    %237 = tpu.matmul %234, %236, %cst_191 {dimension_numbers = #tpu.dot_dimension_numbers<[1], [0], [0], [1], [0, 0, 1, 1], [], []>} : vector<80x16xf32>, vector<16x32xf32>, vector<80x32xf32> -> vector<80x32xf32>
    %238 = arith.addf %233, %237 : vector<80x32xf32>
    %c0_192 = arith.constant 0 : index
    %c0_193 = arith.constant 0 : index
    %239 = vector.load %arg6[%c0_192, %c0_193] : memref<1x32xf32, #tpu.memory_space<vmem>>, vector<1x32xf32>
    %240 = vector.broadcast %239 : vector<1x32xf32> to vector<80x32xf32>
    %241 = arith.mulf %238, %240 : vector<80x32xf32>
    %c0_194 = arith.constant 0 : index
    %c0_195 = arith.constant 0 : index
    %242 = vector.load %arg7[%c0_194, %c0_195] : memref<1x32xf32, #tpu.memory_space<vmem>>, vector<1x32xf32>
    %243 = vector.broadcast %242 : vector<1x32xf32> to vector<80x32xf32>
    %244 = arith.addf %241, %243 : vector<80x32xf32>
    %cst_196 = arith.constant 0.000000e+00 : f32
    %245 = vector.broadcast %cst_196 : f32 to vector<80x32xf32>
    %246 = arith.maximumf %244, %245 : vector<80x32xf32>
    %c0_197 = arith.constant 0 : index
    %c0_198 = arith.constant 0 : index
    %247 = vector.load %arg15[%c0_197, %c0_198] : memref<80x32xf32, #tpu.memory_space<vmem>>, vector<80x32xf32>
    tpu.vector_store %arg15[%c0_197, %c0_198], %246 {strides = array<i32>} : memref<80x32xf32, #tpu.memory_space<vmem>>, vector<80x32xf32>,
    %248 = tpu.iota {dimensions = array<i32: 0>} : vector<4x8xi32>
    %249 = tpu.iota {dimensions = array<i32: 1>} : vector<4x8xi32>
    %c2_i32_199 = arith.constant 2 : i32
    %250 = vector.broadcast %c2_i32_199 : i32 to vector<4x8xi32>
    %251 = arith.muli %250, %248 : vector<4x8xi32>
    %252 = arith.cmpi eq, %249, %251 : vector<4x8xi32>
    %253 = arith.extui %252 : vector<4x8xi1> to vector<4x8xi32>
    %254 = arith.sitofp %253 : vector<4x8xi32> to vector<4x8xf32>
    %c2_i32_200 = arith.constant 2 : i32
    %255 = vector.broadcast %c2_i32_200 : i32 to vector<4x8xi32>
    %256 = arith.muli %255, %248 : vector<4x8xi32>
    %c1_i32_201 = arith.constant 1 : i32
    %257 = vector.broadcast %c1_i32_201 : i32 to vector<4x8xi32>
    %258 = arith.addi %256, %257 : vector<4x8xi32>
    %259 = arith.cmpi eq, %249, %258 : vector<4x8xi32>
    %260 = arith.extui %259 : vector<4x8xi1> to vector<4x8xi32>
    %261 = arith.sitofp %260 : vector<4x8xi32> to vector<4x8xf32>
    %c0_202 = arith.constant 0 : index
    %c0_203 = arith.constant 0 : index
    %262 = vector.load %arg15[%c0_202, %c0_203] : memref<80x32xf32, #tpu.memory_space<vmem>>, vector<8x32xf32>
    %c10_204 = arith.constant 10 : index
    %c0_205 = arith.constant 0 : index
    %263 = vector.load %arg15[%c10_204, %c0_205] : memref<80x32xf32, #tpu.memory_space<vmem>>, vector<8x32xf32>
    %264 = arith.maximumf %262, %263 : vector<8x32xf32>
    %cst_206 = arith.constant dense<0.000000e+00> : vector<4x32xf32>
    %265 = tpu.matmul %254, %264, %cst_206 {dimension_numbers = #tpu.dot_dimension_numbers<[1], [0], [0], [1], [0, 0, 1, 1], [], []>} : vector<4x8xf32>, vector<8x32xf32>, vector<4x32xf32> -> vector<4x32xf32>
    %cst_207 = arith.constant dense<0.000000e+00> : vector<4x32xf32>
    %266 = tpu.matmul %261, %264, %cst_207 {dimension_numbers = #tpu.dot_dimension_numbers<[1], [0], [0], [1], [0, 0, 1, 1], [], []>} : vector<4x8xf32>, vector<8x32xf32>, vector<4x32xf32> -> vector<4x32xf32>
    %267 = arith.maximumf %265, %266 : vector<4x32xf32>
    %c7_208 = arith.constant 7 : index
    %c0_209 = arith.constant 0 : index
    %268 = vector.load %arg16[%c7_208, %c0_209] : memref<42x32xf32, #tpu.memory_space<vmem>>, vector<4x32xf32>
    tpu.vector_store %arg16[%c7_208, %c0_209], %267 {strides = array<i32>} : memref<42x32xf32, #tpu.memory_space<vmem>>, vector<4x32xf32>,
    %c20_210 = arith.constant 20 : index
    %c0_211 = arith.constant 0 : index
    %269 = vector.load %arg15[%c20_210, %c0_211] : memref<80x32xf32, #tpu.memory_space<vmem>>, vector<8x32xf32>
    %c30 = arith.constant 30 : index
    %c0_212 = arith.constant 0 : index
    %270 = vector.load %arg15[%c30, %c0_212] : memref<80x32xf32, #tpu.memory_space<vmem>>, vector<8x32xf32>
    %271 = arith.maximumf %269, %270 : vector<8x32xf32>
    %cst_213 = arith.constant dense<0.000000e+00> : vector<4x32xf32>
    %272 = tpu.matmul %254, %271, %cst_213 {dimension_numbers = #tpu.dot_dimension_numbers<[1], [0], [0], [1], [0, 0, 1, 1], [], []>} : vector<4x8xf32>, vector<8x32xf32>, vector<4x32xf32> -> vector<4x32xf32>
    %cst_214 = arith.constant dense<0.000000e+00> : vector<4x32xf32>
    %273 = tpu.matmul %261, %271, %cst_214 {dimension_numbers = #tpu.dot_dimension_numbers<[1], [0], [0], [1], [0, 0, 1, 1], [], []>} : vector<4x8xf32>, vector<8x32xf32>, vector<4x32xf32> -> vector<4x32xf32>
    %274 = arith.maximumf %272, %273 : vector<4x32xf32>
    %c13 = arith.constant 13 : index
    %c0_215 = arith.constant 0 : index
    %275 = vector.load %arg16[%c13, %c0_215] : memref<42x32xf32, #tpu.memory_space<vmem>>, vector<4x32xf32>
    tpu.vector_store %arg16[%c13, %c0_215], %274 {strides = array<i32>} : memref<42x32xf32, #tpu.memory_space<vmem>>, vector<4x32xf32>,
    %c40 = arith.constant 40 : index
    %c0_216 = arith.constant 0 : index
    %276 = vector.load %arg15[%c40, %c0_216] : memref<80x32xf32, #tpu.memory_space<vmem>>, vector<8x32xf32>
    %c50 = arith.constant 50 : index
    %c0_217 = arith.constant 0 : index
    %277 = vector.load %arg15[%c50, %c0_217] : memref<80x32xf32, #tpu.memory_space<vmem>>, vector<8x32xf32>
    %278 = arith.maximumf %276, %277 : vector<8x32xf32>
    %cst_218 = arith.constant dense<0.000000e+00> : vector<4x32xf32>
    %279 = tpu.matmul %254, %278, %cst_218 {dimension_numbers = #tpu.dot_dimension_numbers<[1], [0], [0], [1], [0, 0, 1, 1], [], []>} : vector<4x8xf32>, vector<8x32xf32>, vector<4x32xf32> -> vector<4x32xf32>
    %cst_219 = arith.constant dense<0.000000e+00> : vector<4x32xf32>
    %280 = tpu.matmul %261, %278, %cst_219 {dimension_numbers = #tpu.dot_dimension_numbers<[1], [0], [0], [1], [0, 0, 1, 1], [], []>} : vector<4x8xf32>, vector<8x32xf32>, vector<4x32xf32> -> vector<4x32xf32>
    %281 = arith.maximumf %279, %280 : vector<4x32xf32>
    %c19_220 = arith.constant 19 : index
    %c0_221 = arith.constant 0 : index
    %282 = vector.load %arg16[%c19_220, %c0_221] : memref<42x32xf32, #tpu.memory_space<vmem>>, vector<4x32xf32>
    tpu.vector_store %arg16[%c19_220, %c0_221], %281 {strides = array<i32>} : memref<42x32xf32, #tpu.memory_space<vmem>>, vector<4x32xf32>,
    %c60 = arith.constant 60 : index
    %c0_222 = arith.constant 0 : index
    %283 = vector.load %arg15[%c60, %c0_222] : memref<80x32xf32, #tpu.memory_space<vmem>>, vector<8x32xf32>
    %c70 = arith.constant 70 : index
    %c0_223 = arith.constant 0 : index
    %284 = vector.load %arg15[%c70, %c0_223] : memref<80x32xf32, #tpu.memory_space<vmem>>, vector<8x32xf32>
    %285 = arith.maximumf %283, %284 : vector<8x32xf32>
    %cst_224 = arith.constant dense<0.000000e+00> : vector<4x32xf32>
    %286 = tpu.matmul %254, %285, %cst_224 {dimension_numbers = #tpu.dot_dimension_numbers<[1], [0], [0], [1], [0, 0, 1, 1], [], []>} : vector<4x8xf32>, vector<8x32xf32>, vector<4x32xf32> -> vector<4x32xf32>
    %cst_225 = arith.constant dense<0.000000e+00> : vector<4x32xf32>
    %287 = tpu.matmul %261, %285, %cst_225 {dimension_numbers = #tpu.dot_dimension_numbers<[1], [0], [0], [1], [0, 0, 1, 1], [], []>} : vector<4x8xf32>, vector<8x32xf32>, vector<4x32xf32> -> vector<4x32xf32>
    %288 = arith.maximumf %286, %287 : vector<4x32xf32>
    %c25 = arith.constant 25 : index
    %c0_226 = arith.constant 0 : index
    %289 = vector.load %arg16[%c25, %c0_226] : memref<42x32xf32, #tpu.memory_space<vmem>>, vector<4x32xf32>
    tpu.vector_store %arg16[%c25, %c0_226], %288 {strides = array<i32>} : memref<42x32xf32, #tpu.memory_space<vmem>>, vector<4x32xf32>,
    %c0_227 = arith.constant 0 : index
    %c0_228 = arith.constant 0 : index
    %290 = vector.load %arg16[%c0_227, %c0_228] : memref<42x32xf32, #tpu.memory_space<vmem>>, vector<24x32xf32>
    %c0_229 = arith.constant 0 : index
    %c0_230 = arith.constant 0 : index
    %c0_231 = arith.constant 0 : index
    %291 = vector.load %arg8[%c0_229, %c0_230, %c0_231] : memref<9x32x64xf32, #tpu.memory_space<vmem>>, vector<1x32x64xf32>
    %292 = vector.shape_cast %291 : vector<1x32x64xf32> to vector<32x64xf32>
    %cst_232 = arith.constant dense<0.000000e+00> : vector<24x64xf32>
    %293 = tpu.matmul %290, %292, %cst_232 {dimension_numbers = #tpu.dot_dimension_numbers<[1], [0], [0], [1], [0, 0, 1, 1], [], []>} : vector<24x32xf32>, vector<32x64xf32>, vector<24x64xf32> -> vector<24x64xf32>
    %c1_233 = arith.constant 1 : index
    %c0_234 = arith.constant 0 : index
    %294 = vector.load %arg16[%c1_233, %c0_234] : memref<42x32xf32, #tpu.memory_space<vmem>>, vector<24x32xf32>
    %c1_235 = arith.constant 1 : index
    %c0_236 = arith.constant 0 : index
    %c0_237 = arith.constant 0 : index
    %295 = vector.load %arg8[%c1_235, %c0_236, %c0_237] : memref<9x32x64xf32, #tpu.memory_space<vmem>>, vector<1x32x64xf32>
    %296 = vector.shape_cast %295 : vector<1x32x64xf32> to vector<32x64xf32>
    %cst_238 = arith.constant dense<0.000000e+00> : vector<24x64xf32>
    %297 = tpu.matmul %294, %296, %cst_238 {dimension_numbers = #tpu.dot_dimension_numbers<[1], [0], [0], [1], [0, 0, 1, 1], [], []>} : vector<24x32xf32>, vector<32x64xf32>, vector<24x64xf32> -> vector<24x64xf32>
    %298 = arith.addf %293, %297 : vector<24x64xf32>
    %c2_239 = arith.constant 2 : index
    %c0_240 = arith.constant 0 : index
    %299 = vector.load %arg16[%c2_239, %c0_240] : memref<42x32xf32, #tpu.memory_space<vmem>>, vector<24x32xf32>
    %c2_241 = arith.constant 2 : index
    %c0_242 = arith.constant 0 : index
    %c0_243 = arith.constant 0 : index
    %300 = vector.load %arg8[%c2_241, %c0_242, %c0_243] : memref<9x32x64xf32, #tpu.memory_space<vmem>>, vector<1x32x64xf32>
    %301 = vector.shape_cast %300 : vector<1x32x64xf32> to vector<32x64xf32>
    %cst_244 = arith.constant dense<0.000000e+00> : vector<24x64xf32>
    %302 = tpu.matmul %299, %301, %cst_244 {dimension_numbers = #tpu.dot_dimension_numbers<[1], [0], [0], [1], [0, 0, 1, 1], [], []>} : vector<24x32xf32>, vector<32x64xf32>, vector<24x64xf32> -> vector<24x64xf32>
    %303 = arith.addf %298, %302 : vector<24x64xf32>
    %c6_245 = arith.constant 6 : index
    %c0_246 = arith.constant 0 : index
    %304 = vector.load %arg16[%c6_245, %c0_246] : memref<42x32xf32, #tpu.memory_space<vmem>>, vector<24x32xf32>
    %c3_247 = arith.constant 3 : index
    %c0_248 = arith.constant 0 : index
    %c0_249 = arith.constant 0 : index
    %305 = vector.load %arg8[%c3_247, %c0_248, %c0_249] : memref<9x32x64xf32, #tpu.memory_space<vmem>>, vector<1x32x64xf32>
    %306 = vector.shape_cast %305 : vector<1x32x64xf32> to vector<32x64xf32>
    %cst_250 = arith.constant dense<0.000000e+00> : vector<24x64xf32>
    %307 = tpu.matmul %304, %306, %cst_250 {dimension_numbers = #tpu.dot_dimension_numbers<[1], [0], [0], [1], [0, 0, 1, 1], [], []>} : vector<24x32xf32>, vector<32x64xf32>, vector<24x64xf32> -> vector<24x64xf32>
    %308 = arith.addf %303, %307 : vector<24x64xf32>
    %c7_251 = arith.constant 7 : index
    %c0_252 = arith.constant 0 : index
    %309 = vector.load %arg16[%c7_251, %c0_252] : memref<42x32xf32, #tpu.memory_space<vmem>>, vector<24x32xf32>
    %c4_253 = arith.constant 4 : index
    %c0_254 = arith.constant 0 : index
    %c0_255 = arith.constant 0 : index
    %310 = vector.load %arg8[%c4_253, %c0_254, %c0_255] : memref<9x32x64xf32, #tpu.memory_space<vmem>>, vector<1x32x64xf32>
    %311 = vector.shape_cast %310 : vector<1x32x64xf32> to vector<32x64xf32>
    %cst_256 = arith.constant dense<0.000000e+00> : vector<24x64xf32>
    %312 = tpu.matmul %309, %311, %cst_256 {dimension_numbers = #tpu.dot_dimension_numbers<[1], [0], [0], [1], [0, 0, 1, 1], [], []>} : vector<24x32xf32>, vector<32x64xf32>, vector<24x64xf32> -> vector<24x64xf32>
    %313 = arith.addf %308, %312 : vector<24x64xf32>
    %c8_257 = arith.constant 8 : index
    %c0_258 = arith.constant 0 : index
    %314 = vector.load %arg16[%c8_257, %c0_258] : memref<42x32xf32, #tpu.memory_space<vmem>>, vector<24x32xf32>
    %c5_259 = arith.constant 5 : index
    %c0_260 = arith.constant 0 : index
    %c0_261 = arith.constant 0 : index
    %315 = vector.load %arg8[%c5_259, %c0_260, %c0_261] : memref<9x32x64xf32, #tpu.memory_space<vmem>>, vector<1x32x64xf32>
    %316 = vector.shape_cast %315 : vector<1x32x64xf32> to vector<32x64xf32>
    %cst_262 = arith.constant dense<0.000000e+00> : vector<24x64xf32>
    %317 = tpu.matmul %314, %316, %cst_262 {dimension_numbers = #tpu.dot_dimension_numbers<[1], [0], [0], [1], [0, 0, 1, 1], [], []>} : vector<24x32xf32>, vector<32x64xf32>, vector<24x64xf32> -> vector<24x64xf32>
    %318 = arith.addf %313, %317 : vector<24x64xf32>
    %c12_263 = arith.constant 12 : index
    %c0_264 = arith.constant 0 : index
    %319 = vector.load %arg16[%c12_263, %c0_264] : memref<42x32xf32, #tpu.memory_space<vmem>>, vector<24x32xf32>
    %c6_265 = arith.constant 6 : index
    %c0_266 = arith.constant 0 : index
    %c0_267 = arith.constant 0 : index
    %320 = vector.load %arg8[%c6_265, %c0_266, %c0_267] : memref<9x32x64xf32, #tpu.memory_space<vmem>>, vector<1x32x64xf32>
    %321 = vector.shape_cast %320 : vector<1x32x64xf32> to vector<32x64xf32>
    %cst_268 = arith.constant dense<0.000000e+00> : vector<24x64xf32>
    %322 = tpu.matmul %319, %321, %cst_268 {dimension_numbers = #tpu.dot_dimension_numbers<[1], [0], [0], [1], [0, 0, 1, 1], [], []>} : vector<24x32xf32>, vector<32x64xf32>, vector<24x64xf32> -> vector<24x64xf32>
    %323 = arith.addf %318, %322 : vector<24x64xf32>
    %c13_269 = arith.constant 13 : index
    %c0_270 = arith.constant 0 : index
    %324 = vector.load %arg16[%c13_269, %c0_270] : memref<42x32xf32, #tpu.memory_space<vmem>>, vector<24x32xf32>
    %c7_271 = arith.constant 7 : index
    %c0_272 = arith.constant 0 : index
    %c0_273 = arith.constant 0 : index
    %325 = vector.load %arg8[%c7_271, %c0_272, %c0_273] : memref<9x32x64xf32, #tpu.memory_space<vmem>>, vector<1x32x64xf32>
    %326 = vector.shape_cast %325 : vector<1x32x64xf32> to vector<32x64xf32>
    %cst_274 = arith.constant dense<0.000000e+00> : vector<24x64xf32>
    %327 = tpu.matmul %324, %326, %cst_274 {dimension_numbers = #tpu.dot_dimension_numbers<[1], [0], [0], [1], [0, 0, 1, 1], [], []>} : vector<24x32xf32>, vector<32x64xf32>, vector<24x64xf32> -> vector<24x64xf32>
    %328 = arith.addf %323, %327 : vector<24x64xf32>
    %c14 = arith.constant 14 : index
    %c0_275 = arith.constant 0 : index
    %329 = vector.load %arg16[%c14, %c0_275] : memref<42x32xf32, #tpu.memory_space<vmem>>, vector<24x32xf32>
    %c8_276 = arith.constant 8 : index
    %c0_277 = arith.constant 0 : index
    %c0_278 = arith.constant 0 : index
    %330 = vector.load %arg8[%c8_276, %c0_277, %c0_278] : memref<9x32x64xf32, #tpu.memory_space<vmem>>, vector<1x32x64xf32>
    %331 = vector.shape_cast %330 : vector<1x32x64xf32> to vector<32x64xf32>
    %cst_279 = arith.constant dense<0.000000e+00> : vector<24x64xf32>
    %332 = tpu.matmul %329, %331, %cst_279 {dimension_numbers = #tpu.dot_dimension_numbers<[1], [0], [0], [1], [0, 0, 1, 1], [], []>} : vector<24x32xf32>, vector<32x64xf32>, vector<24x64xf32> -> vector<24x64xf32>
    %333 = arith.addf %328, %332 : vector<24x64xf32>
    %c0_280 = arith.constant 0 : index
    %c0_281 = arith.constant 0 : index
    %334 = vector.load %arg9[%c0_280, %c0_281] : memref<1x64xf32, #tpu.memory_space<vmem>>, vector<1x64xf32>
    %335 = vector.broadcast %334 : vector<1x64xf32> to vector<24x64xf32>
    %336 = arith.mulf %333, %335 : vector<24x64xf32>
    %c0_282 = arith.constant 0 : index
    %c0_283 = arith.constant 0 : index
    %337 = vector.load %arg10[%c0_282, %c0_283] : memref<1x64xf32, #tpu.memory_space<vmem>>, vector<1x64xf32>
    %338 = vector.broadcast %337 : vector<1x64xf32> to vector<24x64xf32>
    %339 = arith.addf %336, %338 : vector<24x64xf32>
    %cst_284 = arith.constant 0.000000e+00 : f32
    %340 = vector.broadcast %cst_284 : f32 to vector<24x64xf32>
    %341 = arith.maximumf %339, %340 : vector<24x64xf32>
    %c0_285 = arith.constant 0 : index
    %c0_286 = arith.constant 0 : index
    %342 = vector.load %arg17[%c0_285, %c0_286] : memref<24x64xf32, #tpu.memory_space<vmem>>, vector<24x64xf32>
    tpu.vector_store %arg17[%c0_285, %c0_286], %341 {strides = array<i32>} : memref<24x64xf32, #tpu.memory_space<vmem>>, vector<24x64xf32>,
    %c0_287 = arith.constant 0 : index
    %c0_288 = arith.constant 0 : index
    %343 = vector.load %arg17[%c0_287, %c0_288] : memref<24x64xf32, #tpu.memory_space<vmem>>, vector<4x64xf32>
    %c0_289 = arith.constant 0 : index
    %c0_290 = arith.constant 0 : index
    %344 = vector.load %arg18[%c0_289, %c0_290] : memref<16x64xf32, #tpu.memory_space<vmem>>, vector<4x64xf32>
    tpu.vector_store %arg18[%c0_289, %c0_290], %343 {strides = array<i32>} : memref<16x64xf32, #tpu.memory_space<vmem>>, vector<4x64xf32>,
    %c6_291 = arith.constant 6 : index
    %c0_292 = arith.constant 0 : index
    %345 = vector.load %arg17[%c6_291, %c0_292] : memref<24x64xf32, #tpu.memory_space<vmem>>, vector<4x64xf32>
    %c4_293 = arith.constant 4 : index
    %c0_294 = arith.constant 0 : index
    %346 = vector.load %arg18[%c4_293, %c0_294] : memref<16x64xf32, #tpu.memory_space<vmem>>, vector<4x64xf32>
    tpu.vector_store %arg18[%c4_293, %c0_294], %345 {strides = array<i32>} : memref<16x64xf32, #tpu.memory_space<vmem>>, vector<4x64xf32>,
    %c12_295 = arith.constant 12 : index
    %c0_296 = arith.constant 0 : index
    %347 = vector.load %arg17[%c12_295, %c0_296] : memref<24x64xf32, #tpu.memory_space<vmem>>, vector<4x64xf32>
    %c8_297 = arith.constant 8 : index
    %c0_298 = arith.constant 0 : index
    %348 = vector.load %arg18[%c8_297, %c0_298] : memref<16x64xf32, #tpu.memory_space<vmem>>, vector<4x64xf32>
    tpu.vector_store %arg18[%c8_297, %c0_298], %347 {strides = array<i32>} : memref<16x64xf32, #tpu.memory_space<vmem>>, vector<4x64xf32>,
    %c18_299 = arith.constant 18 : index
    %c0_300 = arith.constant 0 : index
    %349 = vector.load %arg17[%c18_299, %c0_300] : memref<24x64xf32, #tpu.memory_space<vmem>>, vector<4x64xf32>
    %c12_301 = arith.constant 12 : index
    %c0_302 = arith.constant 0 : index
    %350 = vector.load %arg18[%c12_301, %c0_302] : memref<16x64xf32, #tpu.memory_space<vmem>>, vector<4x64xf32>
    tpu.vector_store %arg18[%c12_301, %c0_302], %349 {strides = array<i32>} : memref<16x64xf32, #tpu.memory_space<vmem>>, vector<4x64xf32>,
    %c0_303 = arith.constant 0 : index
    %c0_304 = arith.constant 0 : index
    %351 = vector.load %arg18[%c0_303, %c0_304] : memref<16x64xf32, #tpu.memory_space<vmem>>, vector<16x64xf32>
    %352 = arith.truncf %351 : vector<16x64xf32> to vector<16x64xbf16>
    %c0_305 = arith.constant 0 : index
    %c0_306 = arith.constant 0 : index
    %c0_307 = arith.constant 0 : index
    %353 = vector.load %arg11[%c0_305, %c0_306, %c0_307] : memref<1x16x64xbf16, #tpu.memory_space<vmem>>, vector<1x16x64xbf16>
    %354 = vector.shape_cast %353 : vector<1x16x64xbf16> to vector<16x64xbf16>
    %355 = vector.shape_cast %352 : vector<16x64xbf16> to vector<1x16x64xbf16>
    tpu.vector_store %arg11[%c0_305, %c0_306, %c0_307], %355 {strides = array<i32>} : memref<1x16x64xbf16, #tpu.memory_space<vmem>>, vector<1x16x64xbf16>,
    return
  }
  func.func @transform_0(%arg0: i32) -> (i32, i32, i32) {
    %c0_i32 = arith.constant 0 : i32
    %c0_i32_0 = arith.constant 0 : i32
    %c0_i32_1 = arith.constant 0 : i32
    return %arg0, %c0_i32, %c0_i32_0 : i32, i32, i32
  }
  func.func @transform_1(%arg0: i32) -> (i32, i32, i32) {
    %c0_i32 = arith.constant 0 : i32
    %c0_i32_0 = arith.constant 0 : i32
    %c0_i32_1 = arith.constant 0 : i32
    %c0_i32_2 = arith.constant 0 : i32
    return %c0_i32, %c0_i32_0, %c0_i32_1 : i32, i32, i32
  }
  func.func @transform_2(%arg0: i32) -> (i32, i32) {
    %c0_i32 = arith.constant 0 : i32
    %c0_i32_0 = arith.constant 0 : i32
    %c0_i32_1 = arith.constant 0 : i32
    return %c0_i32, %c0_i32_0 : i32, i32
  }
  func.func @transform_3(%arg0: i32) -> (i32, i32) {
    %c0_i32 = arith.constant 0 : i32
    %c0_i32_0 = arith.constant 0 : i32
    %c0_i32_1 = arith.constant 0 : i32
    return %c0_i32, %c0_i32_0 : i32, i32
  }
  func.func @transform_4(%arg0: i32) -> (i32, i32, i32) {
    %c0_i32 = arith.constant 0 : i32
    %c0_i32_0 = arith.constant 0 : i32
    %c0_i32_1 = arith.constant 0 : i32
    %c0_i32_2 = arith.constant 0 : i32
    return %c0_i32, %c0_i32_0, %c0_i32_1 : i32, i32, i32
  }
  func.func @transform_5(%arg0: i32) -> (i32, i32) {
    %c0_i32 = arith.constant 0 : i32
    %c0_i32_0 = arith.constant 0 : i32
    %c0_i32_1 = arith.constant 0 : i32
    return %c0_i32, %c0_i32_0 : i32, i32
  }
  func.func @transform_6(%arg0: i32) -> (i32, i32) {
    %c0_i32 = arith.constant 0 : i32
    %c0_i32_0 = arith.constant 0 : i32
    %c0_i32_1 = arith.constant 0 : i32
    return %c0_i32, %c0_i32_0 : i32, i32
  }
  func.func @transform_7(%arg0: i32) -> (i32, i32, i32) {
    %c0_i32 = arith.constant 0 : i32
    %c0_i32_0 = arith.constant 0 : i32
    %c0_i32_1 = arith.constant 0 : i32
    %c0_i32_2 = arith.constant 0 : i32
    return %c0_i32, %c0_i32_0, %c0_i32_1 : i32, i32, i32
  }
  func.func @transform_8(%arg0: i32) -> (i32, i32) {
    %c0_i32 = arith.constant 0 : i32
    %c0_i32_0 = arith.constant 0 : i32
    %c0_i32_1 = arith.constant 0 : i32
    return %c0_i32, %c0_i32_0 : i32, i32
  }
  func.func @transform_9(%arg0: i32) -> (i32, i32) {
    %c0_i32 = arith.constant 0 : i32
    %c0_i32_0 = arith.constant 0 : i32
    %c0_i32_1 = arith.constant 0 : i32
    return %c0_i32, %c0_i32_0 : i32, i32
  }
  func.func @transform_10(%arg0: i32) -> (i32, i32, i32) {
    %c0_i32 = arith.constant 0 : i32
    %c0_i32_0 = arith.constant 0 : i32
    %c0_i32_1 = arith.constant 0 : i32
    return %arg0, %c0_i32, %c0_i32_0 : i32, i32, i32
  }
}

module attributes {stable_mosaic.version = 11 : i64} {
  func.func @_mlp_kernel(%arg0: i32, %arg1: memref<2x1024xbf16, #tpu.memory_space<vmem>>, %arg2: memref<1024x512xbf16, #tpu.memory_space<vmem>>, %arg3: memref<1x512xf32, #tpu.memory_space<vmem>>, %arg4: memref<512x128xbf16, #tpu.memory_space<vmem>>, %arg5: memref<1x128xf32, #tpu.memory_space<vmem>>, %arg6: memref<128x2xf32, #tpu.memory_space<vmem>>, %arg7: memref<1x2xf32, #tpu.memory_space<vmem>>, %arg8: memref<2x2xf32, #tpu.memory_space<vmem>>, %arg9: memref<2x128xf32, #tpu.memory_space<vmem>>) attributes {dimension_semantics = [#tpu.dimension_semantics<arbitrary>], iteration_bounds = array<i64: 4>, scalar_prefetch = 0 : i64, scratch_operands = 1 : i64, tpu.core_type = #tpu.core_type<tc>, window_params = [{pipeline_mode = #tpu.pipeline_mode<synchronous>, transform_indices = @transform_0, window_bounds = array<i64: 2, 1024>}, {transform_indices = @transform_1, window_bounds = array<i64: 1024, 512>}, {transform_indices = @transform_2, window_bounds = array<i64: 1, 512>}, {transform_indices = @transform_3, window_bounds = array<i64: 512, 128>}, {pipeline_mode = #tpu.pipeline_mode<synchronous>, transform_indices = @transform_4, window_bounds = array<i64: 1, 128>}, {pipeline_mode = #tpu.pipeline_mode<synchronous>, transform_indices = @transform_5, window_bounds = array<i64: 128, 2>}, {pipeline_mode = #tpu.pipeline_mode<synchronous>, transform_indices = @transform_6, window_bounds = array<i64: 1, 2>}, {pipeline_mode = #tpu.pipeline_mode<synchronous>, transform_indices = @transform_7, window_bounds = array<i64: 2, 2>}]} {
    %c0_i32 = arith.constant 0 : i32
    %0 = arith.cmpi eq, %arg0, %c0_i32 : i32
    %1 = arith.extui %0 : i1 to i32
    %c0_i32_0 = arith.constant 0 : i32
    %2 = arith.cmpi ne, %1, %c0_i32_0 : i32
    scf.if %2 {
      %cst_15 = arith.constant 0.000000e+00 : f32
      %20 = vector.broadcast %cst_15 : f32 to vector<2x128xf32>
      %c0_16 = arith.constant 0 : index
      %c0_17 = arith.constant 0 : index
      %21 = vector.load %arg9[%c0_16, %c0_17] : memref<2x128xf32, #tpu.memory_space<vmem>>, vector<2x128xf32>
      tpu.vector_store %arg9[%c0_16, %c0_17], %20 {strides = array<i32>} : memref<2x128xf32, #tpu.memory_space<vmem>>, vector<2x128xf32>,
    } else {
    }
    %c0 = arith.constant 0 : index
    %c0_1 = arith.constant 0 : index
    %3 = vector.load %arg1[%c0, %c0_1] : memref<2x1024xbf16, #tpu.memory_space<vmem>>, vector<2x1024xbf16>
    %c0_2 = arith.constant 0 : index
    %c0_3 = arith.constant 0 : index
    %4 = vector.load %arg2[%c0_2, %c0_3] : memref<1024x512xbf16, #tpu.memory_space<vmem>>, vector<1024x512xbf16>
    %cst = arith.constant dense<0.000000e+00> : vector<2x512xf32>
    %5 = tpu.matmul %3, %4, %cst {dimension_numbers = #tpu.dot_dimension_numbers<[1], [0], [0], [1], [0, 0, 1, 1], [], []>} : vector<2x1024xbf16>, vector<1024x512xbf16>, vector<2x512xf32> -> vector<2x512xf32>
    %c0_4 = arith.constant 0 : index
    %c0_5 = arith.constant 0 : index
    %6 = vector.load %arg3[%c0_4, %c0_5] : memref<1x512xf32, #tpu.memory_space<vmem>>, vector<1x512xf32>
    %7 = vector.broadcast %6 : vector<1x512xf32> to vector<2x512xf32>
    %8 = arith.addf %5, %7 : vector<2x512xf32>
    %cst_6 = arith.constant 0.000000e+00 : f32
    %9 = vector.broadcast %cst_6 : f32 to vector<2x512xf32>
    %10 = arith.maximumf %8, %9 : vector<2x512xf32>
    %c0_7 = arith.constant 0 : index
    %c0_8 = arith.constant 0 : index
    %11 = vector.load %arg9[%c0_7, %c0_8] : memref<2x128xf32, #tpu.memory_space<vmem>>, vector<2x128xf32>
    %12 = arith.truncf %10 : vector<2x512xf32> to vector<2x512xbf16>
    %c0_9 = arith.constant 0 : index
    %c0_10 = arith.constant 0 : index
    %13 = vector.load %arg4[%c0_9, %c0_10] : memref<512x128xbf16, #tpu.memory_space<vmem>>, vector<512x128xbf16>
    %cst_11 = arith.constant dense<0.000000e+00> : vector<2x128xf32>
    %14 = tpu.matmul %12, %13, %cst_11 {dimension_numbers = #tpu.dot_dimension_numbers<[1], [0], [0], [1], [0, 0, 1, 1], [], []>} : vector<2x512xbf16>, vector<512x128xbf16>, vector<2x128xf32> -> vector<2x128xf32>
    %15 = arith.addf %11, %14 : vector<2x128xf32>
    %c0_12 = arith.constant 0 : index
    %c0_13 = arith.constant 0 : index
    %16 = vector.load %arg9[%c0_12, %c0_13] : memref<2x128xf32, #tpu.memory_space<vmem>>, vector<2x128xf32>
    tpu.vector_store %arg9[%c0_12, %c0_13], %15 {strides = array<i32>} : memref<2x128xf32, #tpu.memory_space<vmem>>, vector<2x128xf32>,
    %c3_i32 = arith.constant 3 : i32
    %17 = arith.cmpi eq, %arg0, %c3_i32 : i32
    %18 = arith.extui %17 : i1 to i32
    %c0_i32_14 = arith.constant 0 : i32
    %19 = arith.cmpi ne, %18, %c0_i32_14 : i32
    scf.if %19 {
      %c0_15 = arith.constant 0 : index
      %c0_16 = arith.constant 0 : index
      %20 = vector.load %arg9[%c0_15, %c0_16] : memref<2x128xf32, #tpu.memory_space<vmem>>, vector<2x128xf32>
      %c0_17 = arith.constant 0 : index
      %c0_18 = arith.constant 0 : index
      %21 = vector.load %arg5[%c0_17, %c0_18] : memref<1x128xf32, #tpu.memory_space<vmem>>, vector<1x128xf32>
      %22 = vector.broadcast %21 : vector<1x128xf32> to vector<2x128xf32>
      %23 = arith.addf %20, %22 : vector<2x128xf32>
      %cst_19 = arith.constant 0.000000e+00 : f32
      %24 = vector.broadcast %cst_19 : f32 to vector<2x128xf32>
      %25 = arith.maximumf %23, %24 : vector<2x128xf32>
      %c0_20 = arith.constant 0 : index
      %c0_21 = arith.constant 0 : index
      %26 = vector.load %arg6[%c0_20, %c0_21] : memref<128x2xf32, #tpu.memory_space<vmem>>, vector<128x2xf32>
      %cst_22 = arith.constant dense<0.000000e+00> : vector<2x2xf32>
      %27 = tpu.matmul %25, %26, %cst_22 {dimension_numbers = #tpu.dot_dimension_numbers<[1], [0], [0], [1], [0, 0, 1, 1], [], []>} : vector<2x128xf32>, vector<128x2xf32>, vector<2x2xf32> -> vector<2x2xf32>
      %c0_23 = arith.constant 0 : index
      %c0_24 = arith.constant 0 : index
      %28 = vector.load %arg7[%c0_23, %c0_24] : memref<1x2xf32, #tpu.memory_space<vmem>>, vector<1x2xf32>
      %29 = vector.broadcast %28 : vector<1x2xf32> to vector<2x2xf32>
      %30 = arith.addf %27, %29 : vector<2x2xf32>
      %c0_25 = arith.constant 0 : index
      %c0_26 = arith.constant 0 : index
      %31 = vector.load %arg8[%c0_25, %c0_26] : memref<2x2xf32, #tpu.memory_space<vmem>>, vector<2x2xf32>
      tpu.vector_store %arg8[%c0_25, %c0_26], %30 {strides = array<i32>} : memref<2x2xf32, #tpu.memory_space<vmem>>, vector<2x2xf32>,
    } else {
    }
    return
  }
  func.func @transform_0(%arg0: i32) -> (i32, i32) {
    %c0_i32 = arith.constant 0 : i32
    %c0_i32_0 = arith.constant 0 : i32
    %c0_i32_1 = arith.constant 0 : i32
    return %c0_i32, %c0_i32_0 : i32, i32
  }
  func.func @transform_1(%arg0: i32) -> (i32, i32) {
    %c0_i32 = arith.constant 0 : i32
    %c0_i32_0 = arith.constant 0 : i32
    return %c0_i32, %arg0 : i32, i32
  }
  func.func @transform_2(%arg0: i32) -> (i32, i32) {
    %c0_i32 = arith.constant 0 : i32
    %c0_i32_0 = arith.constant 0 : i32
    return %c0_i32, %arg0 : i32, i32
  }
  func.func @transform_3(%arg0: i32) -> (i32, i32) {
    %c0_i32 = arith.constant 0 : i32
    %c0_i32_0 = arith.constant 0 : i32
    return %arg0, %c0_i32 : i32, i32
  }
  func.func @transform_4(%arg0: i32) -> (i32, i32) {
    %c0_i32 = arith.constant 0 : i32
    %c0_i32_0 = arith.constant 0 : i32
    %c0_i32_1 = arith.constant 0 : i32
    return %c0_i32, %c0_i32_0 : i32, i32
  }
  func.func @transform_5(%arg0: i32) -> (i32, i32) {
    %c0_i32 = arith.constant 0 : i32
    %c0_i32_0 = arith.constant 0 : i32
    %c0_i32_1 = arith.constant 0 : i32
    return %c0_i32, %c0_i32_0 : i32, i32
  }
  func.func @transform_6(%arg0: i32) -> (i32, i32) {
    %c0_i32 = arith.constant 0 : i32
    %c0_i32_0 = arith.constant 0 : i32
    %c0_i32_1 = arith.constant 0 : i32
    return %c0_i32, %c0_i32_0 : i32, i32
  }
  func.func @transform_7(%arg0: i32) -> (i32, i32) {
    %c0_i32 = arith.constant 0 : i32
    %c0_i32_0 = arith.constant 0 : i32
    %c0_i32_1 = arith.constant 0 : i32
    return %c0_i32, %c0_i32_0 : i32, i32
  }
}

</mosaic_0001>

<bundles_post_ra>
// kernel: birdcall_cnn_forward.3
= control target key start
LH: loop header
LB: loop body
LE: loop exit
PB: predicated region body
PF: predicated region fallthrough
CT: control target
= control target key end

     0   :  { %s4818_s0 = inlined_call_operand.vmem [shape: bf16[2,1024], index: 0, kind: input, shape index: {}]   ;;  %s4819_s1 = inlined_call_operand.hbm [shape: bf16[1024,2048], index: 1, kind: input, shape index: {}]   ;;  %s4820_s2 = inlined_call_operand.hbm [shape: f32[1,2048], index: 2, kind: input, shape index: {}]   ;;  %s4821_s3 = inlined_call_operand.hbm [shape: bf16[2048,128], index: 3, kind: input, shape index: {}]   ;;  %s4822_s4 = inlined_call_operand.hbm [shape: f32[1,128], index: 4, kind: input, shape index: {}]   ;;  %s4823_s5 = inlined_call_operand.vmem [shape: f32[128,2], index: 5, kind: input, shape index: {}]   ;;  %s4824_s6 = inlined_call_operand.hbm [shape: f32[1,2], index: 6, kind: input, shape index: {}]   ;;  %s4825_s7 = inlined_call_operand.hbm [shape: f32[2,2], index: 7, kind: output, shape index: {}]  }
   0x1   :  { %4836 = sst [smem:[#allocation17_spill]] %s4819_s1 }
   0x2   :  { %4837 = sst [smem:[#allocation18_spill]] %s4820_s2 }
   0x3   :  { %4838 = sst [smem:[#allocation19_spill]] %s4822_s4 }
   0x4   :  { %12 = vsyncpa [#allocation4], 0 }
   0x5   :  { %14 = vsyncpa [#allocation4 + $0x1], 0 }
   0x6   :  { %15 = vsyncpa [#allocation7], 0 }
   0x7   :  { %17 = vsyncpa [#allocation7 + $0x1], 0 }
   0x8   :  { %18 = vsyncpa [#allocation10], 0 }
   0x9   :  { %19 = vsyncpa [#allocation5], 0  ;;  %s4161_s24 = smov 0   ;;  %s4163_s25 = smov 0  }
   0xa   :  { %s4165_s26 = smov 0   ;;  %s4167_s27 = smov 0  }
   0xb LB: > { %s4180_s28 = sadd.s32 4294967295, %s4103_s27   ;;  %p66_p0 = scmp.ne.s32.totalorder %s4095_s25, %s4091_s24  ;;  %s4103_s27 = sphi %s4167_s27, %s4865_s27   ;;  %s4099_s26 = sphi %s4165_s26, %s4864_s26   ;;  %s4095_s25 = sphi %s4163_s25, %s4863_s25   ;;  %s4091_s24 = sphi %s4161_s24, %s4862_s24  }
   0xc   : > { %p4826_p1 = scmp.eq.s32.totalorder %s4180_s28, 0  ;;  %p2915_p2 = scmp.ge.s32.totalorder %s4103_s27, 1 }
   0xd   : > { %p213_p3 = scmp.lt.s32.totalorder %s4103_s27, 5  ;;  %s4105_s8 = smov [#allocation9]  }
   0xe   : > { %p4189_p5 = por %p4826_p1, %p66_p0  ;;  %s229_s9 = sshll.u32 %s4105_s8, 4  ;;  %s230_s9 = int_to_ptr.vmem [resolvable:$true] %s229_s9 }
   0xf   : > { %p4193_p6 = pnand %p2915_p2, %p213_p3  ;;  %s4200_s10 = sadd.s32 1, %s4103_s27  }
  0x10   : > { %s4839_s29 = scalar_select %p4189_p5, 1, 0 }
  0x11   : > { %s4840_s30 = scalar_select %p4193_p6, 1, 0 }
  0x12   : > { %p3399_p7 = pneg %p4193_p6  ;;  %s50_s12 = ssub.s32 %s4103_s27, %s4200_s10 }
  0x13   : > { %p4210_p9 = scmp.eq.s32.totalorder %s50_s12, 0  ;;  %s53_s14 = sadd.s32 1, %s4099_s26 }
  0x14   : > { %p4204_p8 = pnand %p3399_p7, %p4826_p1  ;;  %s4843_s4 = sld [smem:[#allocation19_spill]] }
  0x15   : > { %s4842_s13 = scalar_select %p4210_p9, 1, 0 }
  0x16   : > { %s4841_s11 = scalar_select %p4204_p8, 1, 0 }
  0x17   : > { %p4829_p12 = pneg %p4204_p8 }
  0x1a   : > { %s3885_s17 = scalar_lea.hbm %s4843_s4, 16 }
  0x1b   : > { %p3886_p11 = scmp.ne.s32.totalorder %s4843_s4, %s3885_s17  ;;  %p3892_p2 = scmp.lt.u32.totalorder %s3885_s17, %s4843_s4 }
  0x1d   : > { %p3888_p13 = pnand %p4829_p12, %p3886_p11 }
  0x1f   : > { %p3889_p0 = pneg %p3888_p13 }
  0x21   : > { %p3894_p3 = pnand %p3892_p2, %p3889_p0 }
  0x23   : > { %3897 = shalt.err (!%p3894_p3)
}
  0x24   : > { %s3898_s22 = scalar_lea.vmem %s230_s9, 16  ;;  %s3905_s23 = scalar_lea.vmem %s230_s9, 32 }
  0x25   : > { %p3899_p7 = scmp.ne.s32.totalorder %s230_s9, %s3898_s22  ;;  %p3906_p10 = scmp.lt.s32.totalorder %s230_s9, %s230_s9 }
  0x26   : > { %p3907_p5 = scmp.lt.s32.totalorder %s3905_s23, %s3898_s22 }
  0x27   : > { %p3901_p4 = pnand %p3899_p7, %p4829_p12 }
  0x28   : > { %p3908_p6 = por %p3907_p5, %p3906_p10 }
  0x29   : > { %p3902_p1 = pneg %p3901_p4 }
  0x2b   : > { %p3909_p9 = pnand %p3908_p6, %p3902_p1 }
  0x2d   : > { %3912 = shalt.err (!%p3909_p9)
}
  0x2e   : > { %3402 = dma.hbm_to_vmem [thread:$0]  (!%p4204_p8), %s4843_s4, 16, %s230_s9, [#allocation10]  }
  0x2f   : > { %p4844_p4 = scmp.ne.s32.totalorder %s4842_s13, 0  ;;  %p61_p1 = scmp.eq.s32.totalorder %s4103_s27, 0 }
  0x30   : > { %p3418_p5 = scmp.lt.s32.totalorder %s4103_s27, 4  ;;  %s4247_s15 = sand.u32 1, %s4099_s26  }
  0x31   : > { %s4242_s12 = scalar_select %p4844_p4, %s4099_s26, %s53_s14  }
  0x32   : > { %s275_s16 = sand.u32 1, %s4103_s27   ;;  %p4845_p6 = scmp.ne.s32.totalorder %s4099_s26, %s4095_s25 }
  0x33   : > { %s2922_s18 = sshll.u32 %s4247_s15, 2  ;;  %s3231_s9 = sshll.u32 %s4103_s27, 6 }
  0x34   : > { %p62_p9 = por %p61_p1, %p4845_p6  ;;  %s279_s13 = scalar_lea.vmem [#allocation6], %s2922_s18 }
  0x35   : > { %s287_s14 = sshll.u32 %s279_s13, 4  ;;  %s4847_s2 = sld [smem:[#allocation18_spill]]  ;;  %s4265_s14 = int_to_ptr.vmem [resolvable:$true] %s287_s14 }
  0x36   : > { %p4255_p10 = pnand %p3418_p5, %p62_p9  ;;  %s4268_s24 = scalar_lea.sflag [#allocation7], %s275_s16 }
  0x38   : > { %s4846_s19 = scalar_select %p4255_p10, 1, 0 }
  0x39   : > { %p4274_p13 = pneg %p4255_p10 }
  0x3b   : > { %s4263_s22 = scalar_lea.hbm %s4847_s2, %s3231_s9  ;;  %s3918_s20 = scalar_lea.hbm %s4847_s2, 256 }
  0x3c   : > { %s3913_s8 = scalar_lea.hbm %s4263_s22, 64  ;;  %p3919_p3 = scmp.lt.u32.totalorder %s4263_s22, %s4847_s2 }
  0x3d   : > { %p3914_p11 = scmp.ne.s32.totalorder %s4263_s22, %s3913_s8  ;;  %p3920_p7 = scmp.lt.u32.totalorder %s3918_s20, %s3913_s8 }
  0x3e   : > { %s4848_s18 = scalar_select %p4274_p13, 1, 0 }
  0x3f   : > { %p3916_p0 = pnand %p4274_p13, %p3914_p11  ;;  %p3921_p4 = por %p3920_p7, %p3919_p3 }
  0x40   : > { %p3922_p1 = scmp.lt.u32.totalorder %s3913_s8, %s4263_s22 }
  0x41   : > { %p3917_p2 = pneg %p3916_p0 }
  0x42   : > { %p3923_p5 = por %p3922_p1, %p3921_p4 }
  0x44   : > { %p3924_p6 = pnand %p3923_p5, %p3917_p2 }
  0x46   : > { %3927 = shalt.err (!%p3924_p6)
}
  0x47   : > { %s3928_s16 = scalar_lea.vmem %s4265_s14, 64  ;;  %s4106_s9 = smov [#allocation6]  }
  0x48   : > { %p3929_p9 = scmp.ne.s32.totalorder %s4265_s14, %s3928_s16  ;;  %s3933_s13 = sshll.u32 %s4106_s9, 4  ;;  %s3934_s13 = int_to_ptr.vmem [resolvable:$false] %s3933_s13 }
  0x49   : > { %s3935_s17 = scalar_lea.vmem %s3934_s13, 128  ;;  %p3936_p12 = scmp.lt.s32.totalorder %s4265_s14, %s3934_s13 }
  0x4a   : > { %p3931_p11 = pnand %p3929_p9, %p4274_p13  ;;  %p3937_p8 = scmp.lt.s32.totalorder %s3935_s17, %s3928_s16 }
  0x4c   : > { %p3932_p0 = pneg %p3931_p11  ;;  %p3938_p3 = por %p3937_p8, %p3936_p12 }
  0x4e   : > { %p3939_p7 = pnand %p3938_p3, %p3932_p0 }
  0x50   : > { %3942 = shalt.err (!%p3939_p7)
}
  0x51   : > { %3412 = dma.hbm_to_vmem [thread:$0]  (!%p4255_p10), %s4263_s22, 64, %s4265_s14, %s4268_s24  }
  0x52   : > { %s4107_s8 = smov [#allocation11]   ;;  %s3230_s21 = sshll.u32 %s4103_s27, 8 }
  0x53   : > { %s243_s20 = sshll.u32 %s4107_s8, 4  ;;  %s3943_s13 = scalar_lea.hbm %s4824_s6, 16  ;;  %s244_s20 = int_to_ptr.vmem [resolvable:$true] %s243_s20 }
  0x54   : > { %p3944_p8 = scmp.ne.s32.totalorder %s4824_s6, %s3943_s13  ;;  %p4849_p12 = scmp.ne.s32.totalorder %s4841_s11, 0 }
  0x55   : > { %p3950_p5 = scmp.lt.u32.totalorder %s3943_s13, %s4824_s6 }
  0x56   : > { %p4850_p2 = pneg %p4849_p12 }
  0x58   : > { %p3946_p4 = pnand %p3944_p8, %p4850_p2 }
  0x5a   : > { %p3947_p1 = pneg %p3946_p4 }
  0x5c   : > { %p3952_p6 = pnand %p3950_p5, %p3947_p1 }
  0x5e   : > { %3955 = shalt.err (!%p3952_p6)
}
  0x5f   : > { %s3956_s14 = scalar_lea.vmem %s244_s20, 16  ;;  %p4851_p11 = pmov %p4850_p2 }
  0x60   : > { %p3957_p9 = scmp.ne.s32.totalorder %s244_s20, %s3956_s14  ;;  %s3963_s22 = scalar_lea.vmem %s244_s20, 32 }
  0x61   : > { %p3964_p7 = scmp.lt.s32.totalorder %s244_s20, %s244_s20  ;;  %p3965_p10 = scmp.lt.s32.totalorder %s3963_s22, %s3956_s14 }
  0x62   : > { %p3959_p0 = pnand %p3957_p9, %p4851_p11 }
  0x63   : > { %p3966_p13 = por %p3965_p10, %p3964_p7 }
  0x64   : > { %p3960_p3 = pneg %p3959_p0 }
  0x66   : > { %p3967_p2 = pnand %p3966_p13, %p3960_p3 }
  0x68   : > { %3970 = shalt.err (!%p3967_p2)
}
  0x69   : > { %3405 = dma.hbm_to_vmem [thread:$0]  (!%p4849_p12), %s4824_s6, 16, %s244_s20, [#allocation10]  }
  0x6a   : > { %s4852_s1 = sld [smem:[#allocation17_spill]]  ;;  %s4853_s13 = sshll.u32 %s4247_s15, 11 }
  0x6b   : > { %s258_s16 = scalar_lea.vmem [#allocation3], %s4853_s13  ;;  %s255_s11 = scalar_lea.sflag [#allocation4], %s4247_s15 }
  0x6c   : > { %s265_s17 = sshll.u32 %s258_s16, 4  ;;  %p4854_p13 = scmp.ne.s32.totalorder %s4848_s18, 0  ;;  %s4326_s17 = int_to_ptr.vmem [resolvable:$true] %s265_s17 }
  0x70   : > { %s4322_s9 = scalar_lea.hbm %s4852_s1, %s3230_s21  ;;  %s3976_s21 = scalar_lea.hbm %s4852_s1, 131072 }
  0x71   : > { %s3971_s14 = scalar_lea.hbm %s4322_s9, 32768  ;;  %p3977_p4 = scmp.lt.u32.totalorder %s4322_s9, %s4852_s1 }
  0x72   : > { %p3972_p10 = scmp.ne.s32.totalorder %s4322_s9, %s3971_s14  ;;  %p3978_p1 = scmp.lt.u32.totalorder %s3976_s21, %s3971_s14 }
  0x73   : > { %p3980_p6 = scmp.lt.u32.totalorder %s3971_s14, %s4322_s9 }
  0x74   : > { %p3974_p8 = pnand %p3972_p10, %p4854_p13  ;;  %p3979_p5 = por %p3978_p1, %p3977_p4 }
  0x76   : > { %p3975_p12 = pneg %p3974_p8  ;;  %p3981_p9 = por %p3980_p6, %p3979_p5 }
  0x78   : > { %p3982_p11 = pnand %p3981_p9, %p3975_p12 }
  0x7a   : > { %3985 = shalt.err (!%p3982_p11)
}
  0x7b   : > { %s3986_s4 = scalar_lea.vmem %s4326_s17, 32768  ;;  %s4108_s8 = smov [#allocation3]  }
  0x7c   : > { %p3987_p0 = scmp.ne.s32.totalorder %s4326_s17, %s3986_s4  ;;  %s3991_s13 = sshll.u32 %s4108_s8, 4  ;;  %s3992_s13 = int_to_ptr.vmem [resolvable:$false] %s3991_s13 }
  0x7d   : > { %s3993_s16 = scalar_lea.vmem %s3992_s13, 65536  ;;  %p3994_p2 = scmp.lt.s32.totalorder %s4326_s17, %s3992_s13 }
  0x7e   : > { %p3989_p3 = pnand %p3987_p0, %p4854_p13  ;;  %p3995_p10 = scmp.lt.s32.totalorder %s3993_s16, %s3986_s4 }
  0x80   : > { %p3990_p7 = pneg %p3989_p3  ;;  %p3996_p8 = por %p3995_p10, %p3994_p2 }
  0x82   : > { %p3997_p4 = pnand %p3996_p8, %p3990_p7 }
  0x84   : > { %4000 = shalt.err (!%p3997_p4)
}
  0x85   : > { %s4109_s14 = smov 1024   ;;  %s4110_s20 = smov 256  }
  0x86   : > { %s4111_s22 = smov 16   ;;  %p4855_p12 = scmp.ne.s32.totalorder %s4846_s19, 0 }
  0x87   : > { %s3232_s21 = sshll.u32 %s4103_s27, 12  ;;  %s4856_s8 = sshll.u32 %s4247_s15, 8 }
  0x88   : > { %3409 = dma.hbm_to_vmem [thread:$0]  (!%p4855_p12), %s4322_s9, 32768, %s4326_s17, %s255_s11, %s4109_s14, %s4110_s20, %s4111_s22  }
  0x89   : > { %s4356_s4 = scalar_lea.hbm %s4821_s3, %s3232_s21  ;;  %s298_s13 = scalar_lea.vmem [#allocation8], %s4856_s8 }
  0x8a   : > { %s305_s16 = sshll.u32 %s298_s13, 4  ;;  %s4001_s1 = scalar_lea.hbm %s4356_s4, 4096  ;;  %s4360_s16 = int_to_ptr.vmem [resolvable:$true] %s305_s16 }
  0x8b   : > { %p4002_p1 = scmp.ne.s32.totalorder %s4356_s4, %s4001_s1  ;;  %s4006_s17 = scalar_lea.hbm %s4821_s3, 16384 }
  0x8c   : > { %p4007_p9 = scmp.lt.u32.totalorder %s4356_s4, %s4821_s3  ;;  %p4008_p11 = scmp.lt.u32.totalorder %s4006_s17, %s4001_s1 }
  0x8d   : > { %p4004_p5 = pnand %p4002_p1, %p4854_p13  ;;  %p4010_p3 = scmp.lt.u32.totalorder %s4001_s1, %s4356_s4 }
  0x8e   : > { %p4009_p0 = por %p4008_p11, %p4007_p9 }
  0x8f   : > { %p4005_p6 = pneg %p4004_p5 }
  0x90   : > { %p4011_p7 = por %p4010_p3, %p4009_p0 }
  0x92   : > { %p4012_p2 = pnand %p4011_p7, %p4005_p6 }
  0x94   : > { %4015 = shalt.err (!%p4012_p2)
}
  0x95   : > { %s4016_s15 = scalar_lea.vmem %s4360_s16, 4096  ;;  %s4112_s20 = smov [#allocation8]  }
  0x96   : > { %p4017_p10 = scmp.ne.s32.totalorder %s4360_s16, %s4016_s15  ;;  %s4021_s22 = sshll.u32 %s4112_s20, 4  ;;  %s4022_s22 = int_to_ptr.vmem [resolvable:$false] %s4021_s22 }
  0x97   : > { %s4023_s21 = scalar_lea.vmem %s4022_s22, 8192  ;;  %p4024_p1 = scmp.lt.s32.totalorder %s4360_s16, %s4022_s22 }
  0x98   : > { %p4019_p8 = pnand %p4017_p10, %p4854_p13  ;;  %p4025_p5 = scmp.lt.s32.totalorder %s4023_s21, %s4016_s15 }
  0x9a   : > { %p4020_p4 = pneg %p4019_p8  ;;  %p4026_p9 = por %p4025_p5, %p4024_p1 }
  0x9c   : > { %p4027_p11 = pnand %p4026_p9, %p4020_p4 }
  0x9e   : > { %4030 = shalt.err (!%p4027_p11)
}
  0x9f   : > { %s4113_s1 = smov 64   ;;  %s4114_s23 = smov 4  }
  0xa0   : > { %3415 = dma.hbm_to_vmem [thread:$0]  (!%p4855_p12), %s4356_s4, 4096, %s4360_s16, %s4268_s24, %s4113_s1, %s4113_s1, %s4114_s23  }
  0xa1   : > { %p4857_p13 = scmp.ne.s32.totalorder %s4840_s30, 0 }
  0xa2   : > { %s319_s18 = sand.u32 (!%p4857_p13), 1, %s4095_s25   ;;  %p4858_p6 = scmp.ne.s32.totalorder (!%p4857_p13), %s4839_s29, 0 }
  0xa3   : > { %317 = sbr.rel (%p4857_p13) target bundleno = 1134 (0x46e), region = 48  ;;  %s2929_s2 = sshll.u32 (!%p4857_p13), %s319_s18, 11 }
  0xa4   : > { %s320_s8 = scalar_lea.sflag (!%p4857_p13), [#allocation4], %s319_s18  ;;  %s4387_s13 = scalar_lea.vmem (!%p4857_p13), [#allocation3], %s2929_s2 }
  0xaa   : > { %4074 = dma.done.wait (%p4858_p6), %s320_s8, 32768  }
  0xab   : > { %4076 = vsyncadd (%p4858_p6), %s320_s8, 4294934528  ;;  %s328_s27 = sand.u32 1, %s4180_s28   ;;  %s2930_s19 = sshll.u32 %s319_s18, 2 }
  0xac   : > { %s329_s24 = scalar_lea.sflag [#allocation7], %s328_s27  ;;  %s4394_s4 = scalar_lea.vmem [#allocation6], %s2930_s19 }
  0xad   : > { %4078 = dma.done.wait (%p4858_p6), %s329_s24, 4160  }
  0xae   : > { %4080 = vsyncadd (%p4858_p6), %s329_s24, 4294963136  ;;  %s2931_s30 = sshll.u32 %s319_s18, 8  ;;  %p4859_p12 = scmp.eq.s32.totalorder %s4180_s28, 0 }
  0xaf   : > { %s4400_s16 = scalar_lea.vmem [#allocation8], %s2931_s30 }
  0xb0   : > { %4082 = dma.done.wait (%p4859_p12), [#allocation10], 32   ;;  %p4860_p0 = pmov %p4859_p12 }
  0xb1   : > { %p4861_p3 = scmp.ne.s32.totalorder %s4180_s28, 0 }
  0xb2   : > { %4084 = vsyncadd (%p4860_p0), [#allocation10], 4294967264  ;;  %v4115_v0 = vmov (!%p4861_p3), 0.0  }
  0xb3   : > { %392 = sbr.rel (%p4861_p3) target bundleno = 186 (0xba), region = 72  ;;  %393 = vst [vmem:[#allocation2] sm:$0x3] (!%p4861_p3), %v4115_v0 }
  0xba PF: > { %v3468_v1 = vld [vmem:[%s4387_s13 + $0x4] ss:$16 sps:$4 sm:$0xff]   ;;  %v3470_v2 = vld [vmem:[%s4387_s13 + $0xc] ss:$16 sps:$4 sm:$0xff]   ;;  %v3472_v3 = vld [vmem:[%s4387_s13] ss:$16 sps:$4 sm:$0xff]   ;;  %v653_v37 = vlaneseq }
  0xbb   : > { %2011 = vmatprep.subr.bf16.mxu0 %v3468_v1  ;;  %v3473_v4 = vld [vmem:[%s4387_s13 + $0x8] ss:$16 sps:$4 sm:$0xff]   ;;  %2175 = vmatprep.subr.bf16.mxu1 %v3470_v2  ;;  %v3474_v5 = vld [vmem:[%s4387_s13 + $0x24] ss:$16 sps:$4 sm:$0xff]   ;;  %v3476_v6 = vld [vmem:[%s4387_s13 + $0x2c] ss:$16 sps:$4 sm:$0xff]  }
  0xbc   : > { %2012 = vmatpush1.bf16.msra.mxu0 %v3472_v3  ;;  %2176 = vmatpush1.bf16.msra.mxu1 %v3473_v4  ;;  %v3478_v7 = vld [vmem:[%s4387_s13 + $0x20] ss:$16 sps:$4 sm:$0xff]   ;;  %v3479_v8 = vld [vmem:[%s4387_s13 + $0x28] ss:$16 sps:$4 sm:$0xff]   ;;  %v3480_v9 = vld [vmem:[%s4387_s13 + $0x44] ss:$16 sps:$4 sm:$0xff]  }
  0xbd   : > { %2013 = vmatprep.subr.bf16.mxu0 %v3474_v5  ;;  %2177 = vmatprep.subr.bf16.mxu1 %v3476_v6  ;;  %v3482_v10 = vld [vmem:[%s4387_s13 + $0x4c] ss:$16 sps:$4 sm:$0xff]   ;;  %v3484_v11 = vld [vmem:[%s4387_s13 + $0x40] ss:$16 sps:$4 sm:$0xff]   ;;  %v3485_v12 = vld [vmem:[%s4387_s13 + $0x48] ss:$16 sps:$4 sm:$0xff]  }
  0xbe   : > { %v3486_v13 = vld [vmem:[%s4387_s13 + $0x64] ss:$16 sps:$4 sm:$0xff]   ;;  %v3488_v14 = vld [vmem:[%s4387_s13 + $0x6c] ss:$16 sps:$4 sm:$0xff]   ;;  %v3490_v15 = vld [vmem:[%s4387_s13 + $0x60] ss:$16 sps:$4 sm:$0xff]  }
  0xbf   : > { %v3491_v16 = vld [vmem:[%s4387_s13 + $0x68] ss:$16 sps:$4 sm:$0xff]   ;;  %v3492_v17 = vld [vmem:[%s4387_s13 + $0x84] ss:$16 sps:$4 sm:$0xff]   ;;  %v3494_v18 = vld [vmem:[%s4387_s13 + $0x8c] ss:$16 sps:$4 sm:$0xff]  }
  0xc0   : > { %2014 = vmatpush1.bf16.msra.mxu0 %v3478_v7  ;;  %2178 = vmatpush1.bf16.msra.mxu1 %v3479_v8  ;;  %v3496_v19 = vld [vmem:[%s4387_s13 + $0x80] ss:$16 sps:$4 sm:$0xff]   ;;  %v3497_v20 = vld [vmem:[%s4387_s13 + $0x88] ss:$16 sps:$4 sm:$0xff]   ;;  %v3498_v21 = vld [vmem:[%s4387_s13 + $0xa4] ss:$16 sps:$4 sm:$0xff]  }
  0xc1   : > { %2015 = vmatprep.subr.bf16.mxu0 %v3480_v9  ;;  %2179 = vmatprep.subr.bf16.mxu1 %v3482_v10  ;;  %v3500_v22 = vld [vmem:[%s4387_s13 + $0xac] ss:$16 sps:$4 sm:$0xff]   ;;  %v3502_v23 = vld [vmem:[%s4387_s13 + $0xa0] ss:$16 sps:$4 sm:$0xff]   ;;  %v3503_v24 = vld [vmem:[%s4387_s13 + $0xa8] ss:$16 sps:$4 sm:$0xff]  }
  0xc2   : > { %v3504_v25 = vld [vmem:[%s4387_s13 + $0xc4] ss:$16 sps:$4 sm:$0xff]   ;;  %v3506_v26 = vld [vmem:[%s4387_s13 + $0xcc] ss:$16 sps:$4 sm:$0xff]   ;;  %v3508_v27 = vld [vmem:[%s4387_s13 + $0xc0] ss:$16 sps:$4 sm:$0xff]  }
  0xc3   : > { %v3509_v28 = vld [vmem:[%s4387_s13 + $0xc8] ss:$16 sps:$4 sm:$0xff]   ;;  %v3510_v29 = vld [vmem:[%s4387_s13 + $0xe4] ss:$16 sps:$4 sm:$0xff]   ;;  %v3512_v30 = vld [vmem:[%s4387_s13 + $0xec] ss:$16 sps:$4 sm:$0xff]  }
  0xc4   : > { %2016 = vmatpush1.bf16.msra.mxu0 %v3484_v11  ;;  %2180 = vmatpush1.bf16.msra.mxu1 %v3485_v12  ;;  %v3514_v31 = vld [vmem:[%s4387_s13 + $0xe0] ss:$16 sps:$4 sm:$0xff]   ;;  %v3515_v32 = vld [vmem:[%s4387_s13 + $0xe8] ss:$16 sps:$4 sm:$0xff]   ;;  %v3516_v33 = vld [vmem:[%s4387_s13 + $0x104] ss:$16 sps:$4 sm:$0xff]  }
  0xc5   : > { %2017 = vmatprep.subr.bf16.mxu0 %v3486_v13  ;;  %2181 = vmatprep.subr.bf16.mxu1 %v3488_v14  ;;  %v3518_v34 = vld [vmem:[%s4387_s13 + $0x10c] ss:$16 sps:$4 sm:$0xff]   ;;  %v3520_v35 = vld [vmem:[%s4387_s13 + $0x100] ss:$16 sps:$4 sm:$0xff]   ;;  %v3521_v36 = vld [vmem:[%s4387_s13 + $0x108] ss:$16 sps:$4 sm:$0xff]  }
  0xc6   : > { %v4116_v38 = vmov 1966171168   ;;  %v3522_v40 = vld [vmem:[%s4387_s13 + $0x124] ss:$16 sps:$4 sm:$0xff]   ;;  %v3524_v41 = vld [vmem:[%s4387_s13 + $0x12c] ss:$16 sps:$4 sm:$0xff]  }
  0xc7   : > { %v676_v39 = vunpack.c.l.s4 %v4116_v38  ;;  %v3526_v42 = vld [vmem:[%s4387_s13 + $0x120] ss:$16 sps:$4 sm:$0xff]   ;;  %v4447_v43 = vshrl.u32 %v653_v37, 7  ;;  %v3527_v45 = vld [vmem:[%s4387_s13 + $0x128] ss:$16 sps:$4 sm:$0xff]   ;;  %p3223_p7 = scmp.ne.s32.totalorder %s4180_s28, 3 }
  0xc8   : > { %2018 = vmatpush1.bf16.msra.mxu0 %v3490_v15  ;;  %2182 = vmatpush1.bf16.msra.mxu1 %v3491_v16  ;;  %v3528_v46 = vld [vmem:[%s4387_s13 + $0x144] ss:$16 sps:$4 sm:$0xff]   ;;  %v3530_v47 = vld [vmem:[%s4387_s13 + $0x14c] ss:$16 sps:$4 sm:$0xff]   ;;  %v3532_v48 = vld [vmem:[%s4387_s13 + $0x140] ss:$16 sps:$4 sm:$0xff]  }
  0xc9   : > { %2019 = vmatprep.subr.bf16.mxu0 %v3492_v17  ;;  %2183 = vmatprep.subr.bf16.mxu1 %v3494_v18  ;;  %v677_v44 = vunpack.c.0.s8 %v676_v39  ;;  %v3533_v49 = vld [vmem:[%s4387_s13 + $0x148] ss:$16 sps:$4 sm:$0xff]   ;;  %v3534_v51 = vld [vmem:[%s4387_s13 + $0x164] ss:$16 sps:$4 sm:$0xff]   ;;  %v3536_v52 = vld [vmem:[%s4387_s13 + $0x16c] ss:$16 sps:$4 sm:$0xff]  }
  0xca   : > { %v394_v53 = vld [vmem:[%s4818_s0] sm:$0xff]  ;;  %v3539_v56 = vld [vmem:[%s4387_s13 + $0x168] ss:$16 sps:$4 sm:$0xff]   ;;  %vm4118_vm0 = vmmov (!%p3223_p7), 0   ;;  %vm2793_vm1 = vcmask (!%p3223_p7), 9216  }
  0xcb   : > { %v4455_v50 = vsub.s32 %v677_v44, %v4447_v43  ;;  %v3538_v54 = vld [vmem:[%s4387_s13 + $0x160] ss:$16 sps:$4 sm:$0xff]   ;;  %v3540_v57 = vld [vmem:[%s4387_s13 + $0x184] ss:$16 sps:$4 sm:$0xff]   ;;  %v3542_v58 = vld [vmem:[%s4387_s13 + $0x18c] ss:$16 sps:$4 sm:$0xff]   ;;  %v674_v10 = vcombine.high %v394_v53, %v394_v53 }
  0xcc   : > { %2020 = vmatpush1.bf16.msra.mxu0 %v3496_v19  ;;  %2184 = vmatpush1.bf16.msra.mxu1 %v3497_v20  ;;  %v3544_v60 = vld [vmem:[%s4387_s13 + $0x180] ss:$16 sps:$4 sm:$0xff]   ;;  %v3545_v62 = vld [vmem:[%s4387_s13 + $0x188] ss:$16 sps:$4 sm:$0xff]   ;;  %v3546_v63 = vld [vmem:[%s4387_s13 + $0x1a4] ss:$16 sps:$4 sm:$0xff]  }
  0xcd   : > { %2021 = vmatprep.subr.bf16.mxu0 %v3498_v21  ;;  %2185 = vmatprep.subr.bf16.mxu1 %v3500_v22  ;;  %v681_v55 = vrot.slane %v394_v53, %v4455_v50  ;;  %v3548_v0 = vld [vmem:[%s4387_s13 + $0x1ac] ss:$16 sps:$4 sm:$0xff]   ;;  %v3550_v1 = vld [vmem:[%s4387_s13 + $0x1a0] ss:$16 sps:$4 sm:$0xff]   ;;  %v3551_v2 = vld [vmem:[%s4387_s13 + $0x1a8] ss:$16 sps:$4 sm:$0xff]   ;;  %v688_v14 = vrot.slane %v674_v10, %v4455_v50 }
  0xce   : > { %v3552_v3 = vld [vmem:[%s4387_s13 + $0x1c4] ss:$16 sps:$4 sm:$0xff]   ;;  %v3554_v4 = vld [vmem:[%s4387_s13 + $0x1cc] ss:$16 sps:$4 sm:$0xff]   ;;  %v3556_v5 = vld [vmem:[%s4387_s13 + $0x1c0] ss:$16 sps:$4 sm:$0xff]  }
  0xcf   : > { %v689_v59 = vcombine.high %v681_v55, %v681_v55  ;;  %v3557_v6 = vld [vmem:[%s4387_s13 + $0x1c8] ss:$16 sps:$4 sm:$0xff]   ;;  %v3558_v7 = vld [vmem:[%s4387_s13 + $0x1e4] ss:$16 sps:$4 sm:$0xff]   ;;  %v3560_v8 = vld [vmem:[%s4387_s13 + $0x1ec] ss:$16 sps:$4 sm:$0xff]   ;;  %v4487_v16 = vrot.slane %v681_v55, %v4455_v50  ;;  %v690_v17 = vcombine.high %v688_v14, %v688_v14  ;;  %v4496_v22 = vrot.slane %v688_v14, %v4455_v50 }
  0xd0   : > { %2022 = vmatpush1.bf16.msra.mxu0 %v3502_v23  ;;  %2186 = vmatpush1.bf16.msra.mxu1 %v3503_v24  ;;  %v3562_v9 = vld [vmem:[%s4387_s13 + $0x1e0] ss:$16 sps:$4 sm:$0xff]   ;;  %v3563_v11 = vld [vmem:[%s4387_s13 + $0x1e8] ss:$16 sps:$4 sm:$0xff]   ;;  %v3566_v12 = vld [vmem:[%s4387_s13 + $0x204] ss:$16 sps:$4 sm:$0xff]  }
  0xd1   : > { %2023 = vmatprep.subr.bf16.mxu0 %v3504_v25  ;;  %2187 = vmatprep.subr.bf16.mxu1 %v3506_v26  ;;  %v711_v61 = vrot.slane %v689_v59, %v4455_v50  ;;  %v3569_v13 = vld [vmem:[%s4387_s13 + $0x20c] ss:$16 sps:$4 sm:$0xff]   ;;  %v3564_v15 = vld [vmem:[%s4387_s13 + $0x200] ss:$16 sps:$4 sm:$0xff]   ;;  %v3567_v18 = vld [vmem:[%s4387_s13 + $0x208] ss:$16 sps:$4 sm:$0xff]   ;;  %v4493_v21 = vrot.slane %v690_v17, %v4455_v50 }
  0xd2   : > { %v3572_v19 = vld [vmem:[%s4387_s13 + $0x224] ss:$16 sps:$4 sm:$0xff]   ;;  %v3575_v20 = vld [vmem:[%s4387_s13 + $0x22c] ss:$16 sps:$4 sm:$0xff]   ;;  %v3570_v24 = vld [vmem:[%s4387_s13 + $0x220] ss:$16 sps:$4 sm:$0xff]  }
  0xd3   : > { %2043 = vmatprep.mubr.bf16.mxu0 %v711_v61  ;;  %2207 = vmatprep.mubr.bf16.mxu1 %v711_v61  ;;  %v721_v23 = vcombine.high %v711_v61, %v711_v61  ;;  %v3573_v25 = vld [vmem:[%s4387_s13 + $0x228] ss:$16 sps:$4 sm:$0xff]   ;;  %v3578_v26 = vld [vmem:[%s4387_s13 + $0x244] ss:$16 sps:$4 sm:$0xff]   ;;  %v3599_v39 = vld [vmem:[%s4387_s13 + $0x2ac] ss:$16 sps:$4 sm:$0xff]  }
  0xd4   : > { %2024 = vmatpush1.bf16.msra.mxu0 %v3508_v27  ;;  %2188 = vmatpush1.bf16.msra.mxu1 %v3509_v28  ;;  %v3581_v27 = vld [vmem:[%s4387_s13 + $0x24c] ss:$16 sps:$4 sm:$0xff]   ;;  %v3576_v28 = vld [vmem:[%s4387_s13 + $0x240] ss:$16 sps:$4 sm:$0xff]   ;;  %v3591_v37 = vld [vmem:[%s4387_s13 + $0x288] ss:$16 sps:$4 sm:$0xff]  }
  0xd5   : > { %2025 = vmatprep.subr.bf16.mxu0 %v3510_v29  ;;  %2189 = vmatprep.subr.bf16.mxu1 %v3512_v30  ;;  %v3579_v29 = vld [vmem:[%s4387_s13 + $0x248] ss:$16 sps:$4 sm:$0xff]   ;;  %v3584_v30 = vld [vmem:[%s4387_s13 + $0x264] ss:$16 sps:$4 sm:$0xff]   ;;  %v3605_v44 = vld [vmem:[%s4387_s13 + $0x2cc] ss:$16 sps:$4 sm:$0xff]  }
  0xd6   : > { %v3596_v38 = vld [vmem:[%s4387_s13 + $0x2a4] ss:$16 sps:$4 sm:$0xff]   ;;  %v3609_v50 = vld [vmem:[%s4387_s13 + $0x2e8] ss:$16 sps:$4 sm:$0xff]   ;;  %v3612_v53 = vld [vmem:[%s4387_s13 + $0x300] ss:$16 sps:$4 sm:$0xff]  }
  0xd7   : > { %v3620_v55 = vld [vmem:[%s4387_s13 + $0x324] ss:$16 sps:$4 sm:$0xff]   ;;  %v3624_v61 = vld [vmem:[%s4387_s13 + $0x340] ss:$16 sps:$4 sm:$0xff]   ;;  %v3645_v10 = vld [vmem:[%s4387_s13 + $0x3a8] ss:$16 sps:$4 sm:$0xff]  }
  0xd8   : > { %2026 = vmatpush1.bf16.msra.mxu0 %v3514_v31  ;;  %2190 = vmatpush1.bf16.msra.mxu1 %v3515_v32  ;;  %v3587_v31 = vld [vmem:[%s4387_s13 + $0x26c] ss:$16 sps:$4 sm:$0xff]   ;;  %v3582_v32 = vld [vmem:[%s4387_s13 + $0x260] ss:$16 sps:$4 sm:$0xff]   ;;  %v3626_v59 = vld [vmem:[%s4387_s13 + $0x344] ss:$16 sps:$4 sm:$0xff]  }
  0xd9   : > { %2027 = vmatprep.subr.bf16.mxu0 %v3516_v33  ;;  %2191 = vmatprep.subr.bf16.mxu1 %v3518_v34  ;;  %v3585_v33 = vld [vmem:[%s4387_s13 + $0x268] ss:$16 sps:$4 sm:$0xff]   ;;  %v3590_v34 = vld [vmem:[%s4387_s13 + $0x284] ss:$16 sps:$4 sm:$0xff]   ;;  %v3659_v17 = vld [vmem:[%s4387_s13 + $0x3ec] ss:$16 sps:$4 sm:$0xff]  }
  0xda   : > { %v3651_v14 = vld [vmem:[%s4387_s13 + $0x3c8] ss:$16 sps:$4 sm:$0xff]  }
  0xdc   : > { %2028 = vmatpush1.bf16.msra.mxu0 %v3520_v35  ;;  %2192 = vmatpush1.bf16.msra.mxu1 %v3521_v36  ;;  %v3593_v35 = vld [vmem:[%s4387_s13 + $0x28c] ss:$16 sps:$4 sm:$0xff]   ;;  %v3588_v36 = vld [vmem:[%s4387_s13 + $0x280] ss:$16 sps:$4 sm:$0xff]  }
  0xdd   : > { %2029 = vmatprep.subr.bf16.mxu0 %v3522_v40  ;;  %2193 = vmatprep.subr.bf16.mxu1 %v3524_v41  ;;  %v3594_v40 = vld [vmem:[%s4387_s13 + $0x2a0] ss:$16 sps:$4 sm:$0xff]   ;;  %v3597_v41 = vld [vmem:[%s4387_s13 + $0x2a8] ss:$16 sps:$4 sm:$0xff]  }
  0xe0   : > { %2030 = vmatpush1.bf16.msra.mxu0 %v3526_v42  ;;  %2194 = vmatpush1.bf16.msra.mxu1 %v3527_v45  ;;  %v3602_v42 = vld [vmem:[%s4387_s13 + $0x2c4] ss:$16 sps:$4 sm:$0xff]   ;;  %v3600_v45 = vld [vmem:[%s4387_s13 + $0x2c0] ss:$16 sps:$4 sm:$0xff]  }
  0xe1   : > { %2031 = vmatprep.subr.bf16.mxu0 %v3528_v46  ;;  %2195 = vmatprep.subr.bf16.mxu1 %v3530_v47  ;;  %v3603_v46 = vld [vmem:[%s4387_s13 + $0x2c8] ss:$16 sps:$4 sm:$0xff]   ;;  %v3608_v47 = vld [vmem:[%s4387_s13 + $0x2e4] ss:$16 sps:$4 sm:$0xff]  }
  0xe4   : > { %2032 = vmatpush1.bf16.msra.mxu0 %v3532_v48  ;;  %2196 = vmatpush1.bf16.msra.mxu1 %v3533_v49  ;;  %v3611_v48 = vld [vmem:[%s4387_s13 + $0x2ec] ss:$16 sps:$4 sm:$0xff]   ;;  %v3606_v49 = vld [vmem:[%s4387_s13 + $0x2e0] ss:$16 sps:$4 sm:$0xff]  }
  0xe5   : > { %2033 = vmatprep.subr.bf16.mxu0 %v3534_v51  ;;  %2197 = vmatprep.subr.bf16.mxu1 %v3536_v52  ;;  %v3614_v51 = vld [vmem:[%s4387_s13 + $0x304] ss:$16 sps:$4 sm:$0xff]   ;;  %v3617_v52 = vld [vmem:[%s4387_s13 + $0x30c] ss:$16 sps:$4 sm:$0xff]  }
  0xe8   : > { %2034 = vmatpush1.bf16.msra.mxu0 %v3538_v54  ;;  %2198 = vmatpush1.bf16.msra.mxu1 %v3539_v56  ;;  %v3615_v54 = vld [vmem:[%s4387_s13 + $0x308] ss:$16 sps:$4 sm:$0xff]   ;;  %v3623_v56 = vld [vmem:[%s4387_s13 + $0x32c] ss:$16 sps:$4 sm:$0xff]  }
  0xe9   : > { %2035 = vmatprep.subr.bf16.mxu0 %v3540_v57  ;;  %2199 = vmatprep.subr.bf16.mxu1 %v3542_v58  ;;  %v3618_v57 = vld [vmem:[%s4387_s13 + $0x320] ss:$16 sps:$4 sm:$0xff]   ;;  %v3621_v58 = vld [vmem:[%s4387_s13 + $0x328] ss:$16 sps:$4 sm:$0xff]  }
  0xec   : > { %2036 = vmatpush1.bf16.msra.mxu0 %v3544_v60  ;;  %2200 = vmatpush1.bf16.msra.mxu1 %v3545_v62  ;;  %v3629_v60 = vld [vmem:[%s4387_s13 + $0x34c] ss:$16 sps:$4 sm:$0xff]   ;;  %v3627_v62 = vld [vmem:[%s4387_s13 + $0x348] ss:$16 sps:$4 sm:$0xff]  }
  0xed   : > { %2037 = vmatprep.subr.bf16.mxu0 %v3546_v63  ;;  %2201 = vmatprep.subr.bf16.mxu1 %v3548_v0  ;;  %v3632_v63 = vld [vmem:[%s4387_s13 + $0x364] ss:$16 sps:$4 sm:$0xff]   ;;  %v3635_v0 = vld [vmem:[%s4387_s13 + $0x36c] ss:$16 sps:$4 sm:$0xff]  }
  0xf0   : > { %2038 = vmatpush1.bf16.msra.mxu0 %v3550_v1  ;;  %2202 = vmatpush1.bf16.msra.mxu1 %v3551_v2  ;;  %v3630_v1 = vld [vmem:[%s4387_s13 + $0x360] ss:$16 sps:$4 sm:$0xff]   ;;  %v3633_v2 = vld [vmem:[%s4387_s13 + $0x368] ss:$16 sps:$4 sm:$0xff]  }
  0xf1   : > { %2039 = vmatprep.subr.bf16.mxu0 %v3552_v3  ;;  %2203 = vmatprep.subr.bf16.mxu1 %v3554_v4  ;;  %v3638_v3 = vld [vmem:[%s4387_s13 + $0x384] ss:$16 sps:$4 sm:$0xff]   ;;  %v3641_v4 = vld [vmem:[%s4387_s13 + $0x38c] ss:$16 sps:$4 sm:$0xff]  }
  0xf4   : > { %2040 = vmatpush1.bf16.msra.mxu0 %v3556_v5  ;;  %2204 = vmatpush1.bf16.msra.mxu1 %v3557_v6  ;;  %v3636_v5 = vld [vmem:[%s4387_s13 + $0x380] ss:$16 sps:$4 sm:$0xff]   ;;  %v3639_v6 = vld [vmem:[%s4387_s13 + $0x388] ss:$16 sps:$4 sm:$0xff]  }
  0xf5   : > { %2041 = vmatprep.subr.bf16.mxu0 %v3558_v7  ;;  %2205 = vmatprep.subr.bf16.mxu1 %v3560_v8  ;;  %v3644_v7 = vld [vmem:[%s4387_s13 + $0x3a4] ss:$16 sps:$4 sm:$0xff]   ;;  %v3647_v8 = vld [vmem:[%s4387_s13 + $0x3ac] ss:$16 sps:$4 sm:$0xff]  }
  0xf8   : > { %2042 = vmatpush1.bf16.msra.mxu0 %v3562_v9  ;;  %2206 = vmatpush1.bf16.msra.mxu1 %v3563_v11  ;;  %v3642_v9 = vld [vmem:[%s4387_s13 + $0x3a0] ss:$16 sps:$4 sm:$0xff]   ;;  %v3650_v11 = vld [vmem:[%s4387_s13 + $0x3c4] ss:$16 sps:$4 sm:$0xff]  }
  0xf9   : > { %2052 = vmatprep.subr.bf16.mxu0 %v3566_v12  ;;  %2216 = vmatprep.subr.bf16.mxu1 %v3569_v13  ;;  %v3653_v12 = vld [vmem:[%s4387_s13 + $0x3cc] ss:$16 sps:$4 sm:$0xff]   ;;  %v3648_v13 = vld [vmem:[%s4387_s13 + $0x3c0] ss:$16 sps:$4 sm:$0xff]  }
  0xfb   : > { %2044 = vmatmul.mubr.bf16.vlgmr.msra.gmra.mrb[0].mxu0 %v4487_v16  ;;  %2208 = vmatmul.mubr.bf16.vlgmr.msra.gmra.mrb[0].mxu1 %v4487_v16 }
  0xfc   : > { %2053 = vmatpush1.bf16.msra.mxu0 %v3564_v15  ;;  %2217 = vmatpush1.bf16.msra.mxu1 %v3567_v18  ;;  %v3656_v15 = vld [vmem:[%s4387_s13 + $0x3e4] ss:$16 sps:$4 sm:$0xff]   ;;  %v3654_v18 = vld [vmem:[%s4387_s13 + $0x3e0] ss:$16 sps:$4 sm:$0xff]  }
  0xfd   : > { %2054 = vmatprep.subr.bf16.mxu0 %v3572_v19  ;;  %2218 = vmatprep.subr.bf16.mxu1 %v3575_v20  ;;  %v3657_v19 = vld [vmem:[%s4387_s13 + $0x3e8] ss:$16 sps:$4 sm:$0xff]   ;;  %v3662_v20 = vld [vmem:[%s4387_s13 + $0x404] ss:$16 sps:$4 sm:$0xff]  }
  0xfe   : > { %2084 = vmatprep.mubr.bf16.mxu0 %v721_v23  ;;  %2248 = vmatprep.mubr.bf16.mxu1 %v721_v23  ;;  %v3665_v23 = vld [vmem:[%s4387_s13 + $0x40c] ss:$16 sps:$4 sm:$0xff]  }
 0x100   : > { %2055 = vmatpush1.bf16.msra.mxu0 %v3570_v24  ;;  %2219 = vmatpush1.bf16.msra.mxu1 %v3573_v25  ;;  %v3660_v24 = vld [vmem:[%s4387_s13 + $0x400] ss:$16 sps:$4 sm:$0xff]   ;;  %v719_v25 = vcombine.high %v4487_v16, %v4487_v16  ;;  %v3669_v16 = vld [vmem:[%s4387_s13 + $0x428] ss:$16 sps:$4 sm:$0xff]  }
 0x101   : > { %2056 = vmatprep.subr.bf16.mxu0 %v3578_v26  ;;  %2220 = vmatprep.subr.bf16.mxu1 %v3581_v27  ;;  %v3663_v26 = vld [vmem:[%s4387_s13 + $0x408] ss:$16 sps:$4 sm:$0xff]   ;;  %v3668_v27 = vld [vmem:[%s4387_s13 + $0x424] ss:$16 sps:$4 sm:$0xff]  }
 0x104   : > { %2057 = vmatpush1.bf16.msra.mxu0 %v3576_v28  ;;  %2221 = vmatpush1.bf16.msra.mxu1 %v3579_v29  ;;  %v3671_v28 = vld [vmem:[%s4387_s13 + $0x42c] ss:$16 sps:$4 sm:$0xff]   ;;  %v3666_v29 = vld [vmem:[%s4387_s13 + $0x420] ss:$16 sps:$4 sm:$0xff]  }
 0x105   : > { %2058 = vmatprep.subr.bf16.mxu0 %v3584_v30  ;;  %2222 = vmatprep.subr.bf16.mxu1 %v3587_v31  ;;  %v3674_v30 = vld [vmem:[%s4387_s13 + $0x444] ss:$16 sps:$4 sm:$0xff]   ;;  %v3677_v31 = vld [vmem:[%s4387_s13 + $0x44c] ss:$16 sps:$4 sm:$0xff]  }
 0x108   : > { %2059 = vmatpush1.bf16.msra.mxu0 %v3582_v32  ;;  %2223 = vmatpush1.bf16.msra.mxu1 %v3585_v33  ;;  %v3672_v32 = vld [vmem:[%s4387_s13 + $0x440] ss:$16 sps:$4 sm:$0xff]   ;;  %v3675_v33 = vld [vmem:[%s4387_s13 + $0x448] ss:$16 sps:$4 sm:$0xff]  }
 0x109   : > { %2060 = vmatprep.subr.bf16.mxu0 %v3590_v34  ;;  %2224 = vmatprep.subr.bf16.mxu1 %v3593_v35  ;;  %v3680_v34 = vld [vmem:[%s4387_s13 + $0x464] ss:$16 sps:$4 sm:$0xff]   ;;  %v3683_v35 = vld [vmem:[%s4387_s13 + $0x46c] ss:$16 sps:$4 sm:$0xff]  }
 0x10c   : > { %2061 = vmatpush1.bf16.msra.mxu0 %v3588_v36  ;;  %2225 = vmatpush1.bf16.msra.mxu1 %v3591_v37  ;;  %v3678_v36 = vld [vmem:[%s4387_s13 + $0x460] ss:$16 sps:$4 sm:$0xff]   ;;  %v3681_v37 = vld [vmem:[%s4387_s13 + $0x468] ss:$16 sps:$4 sm:$0xff]  }
 0x10d   : > { %2062 = vmatprep.subr.bf16.mxu0 %v3596_v38  ;;  %2226 = vmatprep.subr.bf16.mxu1 %v3599_v39  ;;  %v3686_v38 = vld [vmem:[%s4387_s13 + $0x484] ss:$16 sps:$4 sm:$0xff]   ;;  %v3689_v39 = vld [vmem:[%s4387_s13 + $0x48c] ss:$16 sps:$4 sm:$0xff]  }
 0x110   : > { %2063 = vmatpush1.bf16.msra.mxu0 %v3594_v40  ;;  %2227 = vmatpush1.bf16.msra.mxu1 %v3597_v41  ;;  %v3684_v40 = vld [vmem:[%s4387_s13 + $0x480] ss:$16 sps:$4 sm:$0xff]   ;;  %v3687_v41 = vld [vmem:[%s4387_s13 + $0x488] ss:$16 sps:$4 sm:$0xff]  }
 0x111   : > { %2064 = vmatprep.subr.bf16.mxu0 %v3602_v42  ;;  %2228 = vmatprep.subr.bf16.mxu1 %v3605_v44  ;;  %v3692_v42 = vld [vmem:[%s4387_s13 + $0x4a4] ss:$16 sps:$4 sm:$0xff]   ;;  %v3695_v44 = vld [vmem:[%s4387_s13 + $0x4ac] ss:$16 sps:$4 sm:$0xff]  }
 0x114   : > { %2065 = vmatpush1.bf16.msra.mxu0 %v3600_v45  ;;  %2229 = vmatpush1.bf16.msra.mxu1 %v3603_v46  ;;  %v3690_v45 = vld [vmem:[%s4387_s13 + $0x4a0] ss:$16 sps:$4 sm:$0xff]   ;;  %v3693_v46 = vld [vmem:[%s4387_s13 + $0x4a8] ss:$16 sps:$4 sm:$0xff]  }
 0x115   : > { %2066 = vmatprep.subr.bf16.mxu0 %v3608_v47  ;;  %2230 = vmatprep.subr.bf16.mxu1 %v3611_v48  ;;  %v3698_v47 = vld [vmem:[%s4387_s13 + $0x4c4] ss:$16 sps:$4 sm:$0xff]   ;;  %v3701_v48 = vld [vmem:[%s4387_s13 + $0x4cc] ss:$16 sps:$4 sm:$0xff]  }
 0x118   : > { %2067 = vmatpush1.bf16.msra.mxu0 %v3606_v49  ;;  %2231 = vmatpush1.bf16.msra.mxu1 %v3609_v50  ;;  %v3696_v49 = vld [vmem:[%s4387_s13 + $0x4c0] ss:$16 sps:$4 sm:$0xff]   ;;  %v3699_v50 = vld [vmem:[%s4387_s13 + $0x4c8] ss:$16 sps:$4 sm:$0xff]  }
 0x119   : > { %2068 = vmatprep.subr.bf16.mxu0 %v3614_v51  ;;  %2232 = vmatprep.subr.bf16.mxu1 %v3617_v52  ;;  %v3704_v51 = vld [vmem:[%s4387_s13 + $0x4e4] ss:$16 sps:$4 sm:$0xff]   ;;  %v3707_v52 = vld [vmem:[%s4387_s13 + $0x4ec] ss:$16 sps:$4 sm:$0xff]  }
 0x11c   : > { %2069 = vmatpush1.bf16.msra.mxu0 %v3612_v53  ;;  %2233 = vmatpush1.bf16.msra.mxu1 %v3615_v54  ;;  %v3702_v53 = vld [vmem:[%s4387_s13 + $0x4e0] ss:$16 sps:$4 sm:$0xff]   ;;  %v3705_v54 = vld [vmem:[%s4387_s13 + $0x4e8] ss:$16 sps:$4 sm:$0xff]  }
 0x11d   : > { %2070 = vmatprep.subr.bf16.mxu0 %v3620_v55  ;;  %2234 = vmatprep.subr.bf16.mxu1 %v3623_v56  ;;  %v3710_v55 = vld [vmem:[%s4387_s13 + $0x504] ss:$16 sps:$4 sm:$0xff]   ;;  %v3713_v56 = vld [vmem:[%s4387_s13 + $0x50c] ss:$16 sps:$4 sm:$0xff]  }
 0x120   : > { %2071 = vmatpush1.bf16.msra.mxu0 %v3618_v57  ;;  %2235 = vmatpush1.bf16.msra.mxu1 %v3621_v58  ;;  %v3708_v57 = vld [vmem:[%s4387_s13 + $0x500] ss:$16 sps:$4 sm:$0xff]   ;;  %v3711_v58 = vld [vmem:[%s4387_s13 + $0x508] ss:$16 sps:$4 sm:$0xff]  }
 0x121   : > { %2072 = vmatprep.subr.bf16.mxu0 %v3626_v59  ;;  %2236 = vmatprep.subr.bf16.mxu1 %v3629_v60  ;;  %v3716_v59 = vld [vmem:[%s4387_s13 + $0x524] ss:$16 sps:$4 sm:$0xff]   ;;  %v3719_v60 = vld [vmem:[%s4387_s13 + $0x52c] ss:$16 sps:$4 sm:$0xff]  }
 0x124   : > { %2073 = vmatpush1.bf16.msra.mxu0 %v3624_v61  ;;  %2237 = vmatpush1.bf16.msra.mxu1 %v3627_v62  ;;  %v3714_v61 = vld [vmem:[%s4387_s13 + $0x520] ss:$16 sps:$4 sm:$0xff]   ;;  %v3717_v62 = vld [vmem:[%s4387_s13 + $0x528] ss:$16 sps:$4 sm:$0xff]  }
 0x125   : > { %2074 = vmatprep.subr.bf16.mxu0 %v3632_v63  ;;  %2238 = vmatprep.subr.bf16.mxu1 %v3635_v0  ;;  %v3722_v63 = vld [vmem:[%s4387_s13 + $0x544] ss:$16 sps:$4 sm:$0xff]   ;;  %v3725_v0 = vld [vmem:[%s4387_s13 + $0x54c] ss:$16 sps:$4 sm:$0xff]  }
 0x128   : > { %2075 = vmatpush1.bf16.msra.mxu0 %v3630_v1  ;;  %2239 = vmatpush1.bf16.msra.mxu1 %v3633_v2  ;;  %v3720_v1 = vld [vmem:[%s4387_s13 + $0x540] ss:$16 sps:$4 sm:$0xff]   ;;  %v3723_v2 = vld [vmem:[%s4387_s13 + $0x548] ss:$16 sps:$4 sm:$0xff]  }
 0x129   : > { %2076 = vmatprep.subr.bf16.mxu0 %v3638_v3  ;;  %2240 = vmatprep.subr.bf16.mxu1 %v3641_v4  ;;  %v3728_v3 = vld [vmem:[%s4387_s13 + $0x564] ss:$16 sps:$4 sm:$0xff]   ;;  %v3731_v4 = vld [vmem:[%s4387_s13 + $0x56c] ss:$16 sps:$4 sm:$0xff]  }
 0x12c   : > { %2077 = vmatpush1.bf16.msra.mxu0 %v3636_v5  ;;  %2241 = vmatpush1.bf16.msra.mxu1 %v3639_v6  ;;  %v3726_v5 = vld [vmem:[%s4387_s13 + $0x560] ss:$16 sps:$4 sm:$0xff]   ;;  %v3729_v6 = vld [vmem:[%s4387_s13 + $0x568] ss:$16 sps:$4 sm:$0xff]  }
 0x12d   : > { %2078 = vmatprep.subr.bf16.mxu0 %v3644_v7  ;;  %2242 = vmatprep.subr.bf16.mxu1 %v3647_v8  ;;  %v3734_v7 = vld [vmem:[%s4387_s13 + $0x584] ss:$16 sps:$4 sm:$0xff]   ;;  %v3737_v8 = vld [vmem:[%s4387_s13 + $0x58c] ss:$16 sps:$4 sm:$0xff]  }
 0x130   : > { %2079 = vmatpush1.bf16.msra.mxu0 %v3642_v9  ;;  %2243 = vmatpush1.bf16.msra.mxu1 %v3645_v10  ;;  %v3732_v9 = vld [vmem:[%s4387_s13 + $0x580] ss:$16 sps:$4 sm:$0xff]   ;;  %v3735_v10 = vld [vmem:[%s4387_s13 + $0x588] ss:$16 sps:$4 sm:$0xff]  }
 0x131   : > { %2080 = vmatprep.subr.bf16.mxu0 %v3650_v11  ;;  %2244 = vmatprep.subr.bf16.mxu1 %v3653_v12  ;;  %v3740_v11 = vld [vmem:[%s4387_s13 + $0x5a4] ss:$16 sps:$4 sm:$0xff]   ;;  %v3743_v12 = vld [vmem:[%s4387_s13 + $0x5ac] ss:$16 sps:$4 sm:$0xff]  }
 0x134   : > { %2081 = vmatpush1.bf16.msra.mxu0 %v3648_v13  ;;  %2245 = vmatpush1.bf16.msra.mxu1 %v3651_v14  ;;  %v3738_v13 = vld [vmem:[%s4387_s13 + $0x5a0] ss:$16 sps:$4 sm:$0xff]   ;;  %v3741_v14 = vld [vmem:[%s4387_s13 + $0x5a8] ss:$16 sps:$4 sm:$0xff]  }
 0x135   : > { %2082 = vmatprep.subr.bf16.mxu0 %v3656_v15  ;;  %2246 = vmatprep.subr.bf16.mxu1 %v3659_v17  ;;  %v3746_v15 = vld [vmem:[%s4387_s13 + $0x5c4] ss:$16 sps:$4 sm:$0xff]   ;;  %v3749_v17 = vld [vmem:[%s4387_s13 + $0x5cc] ss:$16 sps:$4 sm:$0xff]  }
 0x138   : > { %2083 = vmatpush1.bf16.msra.mxu0 %v3654_v18  ;;  %2247 = vmatpush1.bf16.msra.mxu1 %v3657_v19  ;;  %v3744_v18 = vld [vmem:[%s4387_s13 + $0x5c0] ss:$16 sps:$4 sm:$0xff]   ;;  %v3747_v19 = vld [vmem:[%s4387_s13 + $0x5c8] ss:$16 sps:$4 sm:$0xff]  }
 0x139   : > { %2093 = vmatprep.subr.bf16.mxu0 %v3662_v20  ;;  %2257 = vmatprep.subr.bf16.mxu1 %v3665_v23  ;;  %v3752_v20 = vld [vmem:[%s4387_s13 + $0x5e4] ss:$16 sps:$4 sm:$0xff]   ;;  %v3755_v23 = vld [vmem:[%s4387_s13 + $0x5ec] ss:$16 sps:$4 sm:$0xff]  }
 0x13b   : > { %2085 = vmatmul.mubr.bf16.vlgmr.msra.gmra.mrb[0].mxu0 %v719_v25  ;;  %2249 = vmatmul.mubr.bf16.vlgmr.msra.gmra.mrb[0].mxu1 %v719_v25  ;;  %v3753_v25 = vld [vmem:[%s4387_s13 + $0x5e8] ss:$16 sps:$4 sm:$0xff]  }
 0x13c   : > { %2094 = vmatpush1.bf16.msra.mxu0 %v3660_v24  ;;  %2258 = vmatpush1.bf16.msra.mxu1 %v3663_v26  ;;  %v3750_v24 = vld [vmem:[%s4387_s13 + $0x5e0] ss:$16 sps:$4 sm:$0xff]   ;;  %v3759_v26 = vld [vmem:[%s4387_s13 + $0x604] ss:$16 sps:$4 sm:$0xff]  }
 0x13d   : > { %2095 = vmatprep.subr.bf16.mxu0 %v3668_v27  ;;  %2259 = vmatprep.subr.bf16.mxu1 %v3671_v28  ;;  %v3762_v27 = vld [vmem:[%s4387_s13 + $0x60c] ss:$16 sps:$4 sm:$0xff]   ;;  %v3757_v28 = vld [vmem:[%s4387_s13 + $0x600] ss:$16 sps:$4 sm:$0xff]  }
 0x13e   : > { %2125 = vmatprep.mubr.bf16.mxu0 %v4493_v21  ;;  %2289 = vmatprep.mubr.bf16.mxu1 %v4493_v21 }
 0x140   : > { %2096 = vmatpush1.bf16.msra.mxu0 %v3666_v29  ;;  %2260 = vmatpush1.bf16.msra.mxu1 %v3669_v16  ;;  %v3760_v29 = vld [vmem:[%s4387_s13 + $0x608] ss:$16 sps:$4 sm:$0xff]   ;;  %v3765_v16 = vld [vmem:[%s4387_s13 + $0x624] ss:$16 sps:$4 sm:$0xff]  }
 0x141   : > { %2097 = vmatprep.subr.bf16.mxu0 %v3674_v30  ;;  %2261 = vmatprep.subr.bf16.mxu1 %v3677_v31  ;;  %v3768_v30 = vld [vmem:[%s4387_s13 + $0x62c] ss:$16 sps:$4 sm:$0xff]   ;;  %v3763_v31 = vld [vmem:[%s4387_s13 + $0x620] ss:$16 sps:$4 sm:$0xff]  }
 0x144   : > { %2098 = vmatpush1.bf16.msra.mxu0 %v3672_v32  ;;  %2262 = vmatpush1.bf16.msra.mxu1 %v3675_v33  ;;  %v3766_v32 = vld [vmem:[%s4387_s13 + $0x628] ss:$16 sps:$4 sm:$0xff]   ;;  %v722_v33 = vcombine.high %v4493_v21, %v4493_v21 }
 0x145   : > { %2099 = vmatprep.subr.bf16.mxu0 %v3680_v34  ;;  %2263 = vmatprep.subr.bf16.mxu1 %v3683_v35  ;;  %v3771_v34 = vld [vmem:[%s4387_s13 + $0x644] ss:$16 sps:$4 sm:$0xff]   ;;  %v3774_v35 = vld [vmem:[%s4387_s13 + $0x64c] ss:$16 sps:$4 sm:$0xff]   ;;  %v3772_v21 = vld [vmem:[%s4387_s13 + $0x648] ss:$16 sps:$4 sm:$0xff]  }
 0x148   : > { %2100 = vmatpush1.bf16.msra.mxu0 %v3678_v36  ;;  %2264 = vmatpush1.bf16.msra.mxu1 %v3681_v37  ;;  %v3769_v36 = vld [vmem:[%s4387_s13 + $0x640] ss:$16 sps:$4 sm:$0xff]   ;;  %v3777_v37 = vld [vmem:[%s4387_s13 + $0x664] ss:$16 sps:$4 sm:$0xff]  }
 0x149   : > { %2101 = vmatprep.subr.bf16.mxu0 %v3686_v38  ;;  %2265 = vmatprep.subr.bf16.mxu1 %v3689_v39  ;;  %v3780_v38 = vld [vmem:[%s4387_s13 + $0x66c] ss:$16 sps:$4 sm:$0xff]   ;;  %v3775_v39 = vld [vmem:[%s4387_s13 + $0x660] ss:$16 sps:$4 sm:$0xff]  }
 0x14c   : > { %2102 = vmatpush1.bf16.msra.mxu0 %v3684_v40  ;;  %2266 = vmatpush1.bf16.msra.mxu1 %v3687_v41  ;;  %v3778_v40 = vld [vmem:[%s4387_s13 + $0x668] ss:$16 sps:$4 sm:$0xff]   ;;  %v3783_v41 = vld [vmem:[%s4387_s13 + $0x684] ss:$16 sps:$4 sm:$0xff]  }
 0x14d   : > { %2103 = vmatprep.subr.bf16.mxu0 %v3692_v42  ;;  %2267 = vmatprep.subr.bf16.mxu1 %v3695_v44  ;;  %v3786_v42 = vld [vmem:[%s4387_s13 + $0x68c] ss:$16 sps:$4 sm:$0xff]   ;;  %v3781_v44 = vld [vmem:[%s4387_s13 + $0x680] ss:$16 sps:$4 sm:$0xff]  }
 0x150   : > { %2104 = vmatpush1.bf16.msra.mxu0 %v3690_v45  ;;  %2268 = vmatpush1.bf16.msra.mxu1 %v3693_v46  ;;  %v3784_v45 = vld [vmem:[%s4387_s13 + $0x688] ss:$16 sps:$4 sm:$0xff]   ;;  %v3789_v46 = vld [vmem:[%s4387_s13 + $0x6a4] ss:$16 sps:$4 sm:$0xff]  }
 0x151   : > { %2105 = vmatprep.subr.bf16.mxu0 %v3698_v47  ;;  %2269 = vmatprep.subr.bf16.mxu1 %v3701_v48  ;;  %v3792_v47 = vld [vmem:[%s4387_s13 + $0x6ac] ss:$16 sps:$4 sm:$0xff]   ;;  %v3787_v48 = vld [vmem:[%s4387_s13 + $0x6a0] ss:$16 sps:$4 sm:$0xff]  }
 0x154   : > { %2106 = vmatpush1.bf16.msra.mxu0 %v3696_v49  ;;  %2270 = vmatpush1.bf16.msra.mxu1 %v3699_v50  ;;  %v3790_v49 = vld [vmem:[%s4387_s13 + $0x6a8] ss:$16 sps:$4 sm:$0xff]   ;;  %v3795_v50 = vld [vmem:[%s4387_s13 + $0x6c4] ss:$16 sps:$4 sm:$0xff]  }
 0x155   : > { %2107 = vmatprep.subr.bf16.mxu0 %v3704_v51  ;;  %2271 = vmatprep.subr.bf16.mxu1 %v3707_v52  ;;  %v3798_v51 = vld [vmem:[%s4387_s13 + $0x6cc] ss:$16 sps:$4 sm:$0xff]   ;;  %v3793_v52 = vld [vmem:[%s4387_s13 + $0x6c0] ss:$16 sps:$4 sm:$0xff]  }
 0x158   : > { %2108 = vmatpush1.bf16.msra.mxu0 %v3702_v53  ;;  %2272 = vmatpush1.bf16.msra.mxu1 %v3705_v54  ;;  %v3796_v53 = vld [vmem:[%s4387_s13 + $0x6c8] ss:$16 sps:$4 sm:$0xff]   ;;  %v3801_v54 = vld [vmem:[%s4387_s13 + $0x6e4] ss:$16 sps:$4 sm:$0xff]  }
 0x159   : > { %2109 = vmatprep.subr.bf16.mxu0 %v3710_v55  ;;  %2273 = vmatprep.subr.bf16.mxu1 %v3713_v56  ;;  %v3804_v55 = vld [vmem:[%s4387_s13 + $0x6ec] ss:$16 sps:$4 sm:$0xff]   ;;  %v3799_v56 = vld [vmem:[%s4387_s13 + $0x6e0] ss:$16 sps:$4 sm:$0xff]  }
 0x15c   : > { %2110 = vmatpush1.bf16.msra.mxu0 %v3708_v57  ;;  %2274 = vmatpush1.bf16.msra.mxu1 %v3711_v58  ;;  %v3802_v57 = vld [vmem:[%s4387_s13 + $0x6e8] ss:$16 sps:$4 sm:$0xff]   ;;  %v3807_v58 = vld [vmem:[%s4387_s13 + $0x704] ss:$16 sps:$4 sm:$0xff]  }
 0x15d   : > { %2111 = vmatprep.subr.bf16.mxu0 %v3716_v59  ;;  %2275 = vmatprep.subr.bf16.mxu1 %v3719_v60  ;;  %v3810_v59 = vld [vmem:[%s4387_s13 + $0x70c] ss:$16 sps:$4 sm:$0xff]   ;;  %v3805_v60 = vld [vmem:[%s4387_s13 + $0x700] ss:$16 sps:$4 sm:$0xff]  }
 0x160   : > { %2112 = vmatpush1.bf16.msra.mxu0 %v3714_v61  ;;  %2276 = vmatpush1.bf16.msra.mxu1 %v3717_v62  ;;  %v3808_v61 = vld [vmem:[%s4387_s13 + $0x708] ss:$16 sps:$4 sm:$0xff]   ;;  %v3813_v62 = vld [vmem:[%s4387_s13 + $0x724] ss:$16 sps:$4 sm:$0xff]  }
 0x161   : > { %2113 = vmatprep.subr.bf16.mxu0 %v3722_v63  ;;  %2277 = vmatprep.subr.bf16.mxu1 %v3725_v0  ;;  %v3816_v63 = vld [vmem:[%s4387_s13 + $0x72c] ss:$16 sps:$4 sm:$0xff]   ;;  %v3811_v0 = vld [vmem:[%s4387_s13 + $0x720] ss:$16 sps:$4 sm:$0xff]  }
 0x164   : > { %2114 = vmatpush1.bf16.msra.mxu0 %v3720_v1  ;;  %2278 = vmatpush1.bf16.msra.mxu1 %v3723_v2  ;;  %v3814_v1 = vld [vmem:[%s4387_s13 + $0x728] ss:$16 sps:$4 sm:$0xff]   ;;  %v3819_v2 = vld [vmem:[%s4387_s13 + $0x744] ss:$16 sps:$4 sm:$0xff]  }
 0x165   : > { %2115 = vmatprep.subr.bf16.mxu0 %v3728_v3  ;;  %2279 = vmatprep.subr.bf16.mxu1 %v3731_v4  ;;  %v3822_v3 = vld [vmem:[%s4387_s13 + $0x74c] ss:$16 sps:$4 sm:$0xff]   ;;  %v3817_v4 = vld [vmem:[%s4387_s13 + $0x740] ss:$16 sps:$4 sm:$0xff]  }
 0x168   : > { %2116 = vmatpush1.bf16.msra.mxu0 %v3726_v5  ;;  %2280 = vmatpush1.bf16.msra.mxu1 %v3729_v6  ;;  %v3820_v5 = vld [vmem:[%s4387_s13 + $0x748] ss:$16 sps:$4 sm:$0xff]   ;;  %v3825_v6 = vld [vmem:[%s4387_s13 + $0x764] ss:$16 sps:$4 sm:$0xff]  }
 0x169   : > { %2117 = vmatprep.subr.bf16.mxu0 %v3734_v7  ;;  %2281 = vmatprep.subr.bf16.mxu1 %v3737_v8  ;;  %v3828_v7 = vld [vmem:[%s4387_s13 + $0x76c] ss:$16 sps:$4 sm:$0xff]   ;;  %v3823_v8 = vld [vmem:[%s4387_s13 + $0x760] ss:$16 sps:$4 sm:$0xff]  }
 0x16c   : > { %2118 = vmatpush1.bf16.msra.mxu0 %v3732_v9  ;;  %2282 = vmatpush1.bf16.msra.mxu1 %v3735_v10  ;;  %v3826_v9 = vld [vmem:[%s4387_s13 + $0x768] ss:$16 sps:$4 sm:$0xff]   ;;  %v3831_v10 = vld [vmem:[%s4387_s13 + $0x784] ss:$16 sps:$4 sm:$0xff]  }
 0x16d   : > { %2119 = vmatprep.subr.bf16.mxu0 %v3740_v11  ;;  %2283 = vmatprep.subr.bf16.mxu1 %v3743_v12  ;;  %v3834_v11 = vld [vmem:[%s4387_s13 + $0x78c] ss:$16 sps:$4 sm:$0xff]   ;;  %v3829_v12 = vld [vmem:[%s4387_s13 + $0x780] ss:$16 sps:$4 sm:$0xff]  }
 0x170   : > { %2120 = vmatpush1.bf16.msra.mxu0 %v3738_v13  ;;  %2284 = vmatpush1.bf16.msra.mxu1 %v3741_v14  ;;  %v3832_v13 = vld [vmem:[%s4387_s13 + $0x788] ss:$16 sps:$4 sm:$0xff]   ;;  %v3837_v14 = vld [vmem:[%s4387_s13 + $0x7a4] ss:$16 sps:$4 sm:$0xff]  }
 0x171   : > { %2121 = vmatprep.subr.bf16.mxu0 %v3746_v15  ;;  %2285 = vmatprep.subr.bf16.mxu1 %v3749_v17  ;;  %v3840_v15 = vld [vmem:[%s4387_s13 + $0x7ac] ss:$16 sps:$4 sm:$0xff]   ;;  %v3835_v17 = vld [vmem:[%s4387_s13 + $0x7a0] ss:$16 sps:$4 sm:$0xff]  }
 0x174   : > { %2122 = vmatpush1.bf16.msra.mxu0 %v3744_v18  ;;  %2286 = vmatpush1.bf16.msra.mxu1 %v3747_v19  ;;  %v3838_v18 = vld [vmem:[%s4387_s13 + $0x7a8] ss:$16 sps:$4 sm:$0xff]   ;;  %v3843_v19 = vld [vmem:[%s4387_s13 + $0x7c4] ss:$16 sps:$4 sm:$0xff]  }
 0x175   : > { %2123 = vmatprep.subr.bf16.mxu0 %v3752_v20  ;;  %2287 = vmatprep.subr.bf16.mxu1 %v3755_v23  ;;  %v3846_v20 = vld [vmem:[%s4387_s13 + $0x7cc] ss:$16 sps:$4 sm:$0xff]   ;;  %v3841_v23 = vld [vmem:[%s4387_s13 + $0x7c0] ss:$16 sps:$4 sm:$0xff]  }
 0x178   : > { %2124 = vmatpush1.bf16.msra.mxu0 %v3750_v24  ;;  %2288 = vmatpush1.bf16.msra.mxu1 %v3753_v25  ;;  %v3844_v24 = vld [vmem:[%s4387_s13 + $0x7c8] ss:$16 sps:$4 sm:$0xff]   ;;  %v3849_v25 = vld [vmem:[%s4387_s13 + $0x7e4] ss:$16 sps:$4 sm:$0xff]  }
 0x179   : > { %2134 = vmatprep.subr.bf16.mxu0 %v3759_v26  ;;  %2298 = vmatprep.subr.bf16.mxu1 %v3762_v27  ;;  %v3852_v26 = vld [vmem:[%s4387_s13 + $0x7ec] ss:$16 sps:$4 sm:$0xff]   ;;  %v3847_v27 = vld [vmem:[%s4387_s13 + $0x7e0] ss:$16 sps:$4 sm:$0xff]  }
 0x17b   : > { %2126 = vmatmul.mubr.bf16.vlgmr.msra.gmra.mrb[0].mxu0 %v4496_v22  ;;  %2290 = vmatmul.mubr.bf16.vlgmr.msra.gmra.mrb[0].mxu1 %v4496_v22 }
 0x17c   : > { %2135 = vmatpush1.bf16.msra.mxu0 %v3757_v28  ;;  %2299 = vmatpush1.bf16.msra.mxu1 %v3760_v29  ;;  %v3850_v28 = vld [vmem:[%s4387_s13 + $0x7e8] ss:$16 sps:$4 sm:$0xff]  }
 0x17d   : > { %2136 = vmatprep.subr.bf16.mxu0 %v3765_v16  ;;  %2300 = vmatprep.subr.bf16.mxu1 %v3768_v30  ;;  %v3853_v29 = vld [vmem:[%s4400_s16 + $0x40] sm:$0xff]   ;;  %v720_v30 = vcombine.high %v4496_v22, %v4496_v22  ;;  %v3860_v22 = vld [vmem:[%s4400_s16 + $0x88] sm:$0xff]  }
 0x17e   : > { %2166 = vmatprep.mubr.bf16.mxu0 %v722_v33  ;;  %2330 = vmatprep.mubr.bf16.mxu1 %v722_v33  ;;  %v3854_v16 = vld [vmem:[%s4400_s16 + $0xc0] sm:$0xff]   ;;  %v3857_v33 = vld [vmem:[%s4400_s16 + $0x48] sm:$0xff]  }
 0x180   : > { %2137 = vmatpush1.bf16.msra.mxu0 %v3763_v31  ;;  %2301 = vmatpush1.bf16.msra.mxu1 %v3766_v32  ;;  %v3855_v31 = vld [vmem:[%s4400_s16] sm:$0xff]  }
 0x181   : > { %2138 = vmatprep.subr.bf16.mxu0 %v3771_v34  ;;  %2302 = vmatprep.subr.bf16.mxu1 %v3774_v35  ;;  %v3856_v32 = vld [vmem:[%s4400_s16 + $0x80] sm:$0xff]   ;;  %v3858_v34 = vld [vmem:[%s4400_s16 + $0xc8] sm:$0xff]  }
 0x182   : > { %v3859_v35 = vld [vmem:[%s4400_s16 + $0x8] sm:$0xff]  }
 0x184   : > { %2139 = vmatpush1.bf16.msra.mxu0 %v3769_v36  ;;  %2303 = vmatpush1.bf16.msra.mxu1 %v3772_v21  ;;  %v3861_v36 = vld [vmem:[%s4400_s16 + $0x50] sm:$0xff]  }
 0x185   : > { %2140 = vmatprep.subr.bf16.mxu0 %v3777_v37  ;;  %2304 = vmatprep.subr.bf16.mxu1 %v3780_v38  ;;  %v3862_v21 = vld [vmem:[%s4400_s16 + $0xd0] sm:$0xff]  }
 0x186   : > { %v3863_v37 = vld [vmem:[%s4400_s16 + $0x10] sm:$0xff]  }
 0x187   : > { %v3864_v38 = vld [vmem:[%s4400_s16 + $0x90] sm:$0xff]  }
 0x188   : > { %2141 = vmatpush1.bf16.msra.mxu0 %v3775_v39  ;;  %2305 = vmatpush1.bf16.msra.mxu1 %v3778_v40  ;;  %v3865_v39 = vld [vmem:[%s4400_s16 + $0x58] sm:$0xff]  }
 0x189   : > { %2142 = vmatprep.subr.bf16.mxu0 %v3783_v41  ;;  %2306 = vmatprep.subr.bf16.mxu1 %v3786_v42  ;;  %v3866_v40 = vld [vmem:[%s4400_s16 + $0xd8] sm:$0xff]  }
 0x18a   : > { %v3867_v41 = vld [vmem:[%s4400_s16 + $0x18] sm:$0xff]  }
 0x18b   : > { %v3868_v42 = vld [vmem:[%s4400_s16 + $0x98] sm:$0xff]  }
 0x18c   : > { %2143 = vmatpush1.bf16.msra.mxu0 %v3781_v44  ;;  %2307 = vmatpush1.bf16.msra.mxu1 %v3784_v45  ;;  %v3869_v44 = vld [vmem:[%s4400_s16 + $0x60] sm:$0xff]  }
 0x18d   : > { %2144 = vmatprep.subr.bf16.mxu0 %v3789_v46  ;;  %2308 = vmatprep.subr.bf16.mxu1 %v3792_v47  ;;  %v3870_v45 = vld [vmem:[%s4400_s16 + $0xe0] sm:$0xff]  }
 0x18e   : > { %v3871_v46 = vld [vmem:[%s4400_s16 + $0x20] sm:$0xff]  }
 0x18f   : > { %v3872_v47 = vld [vmem:[%s4400_s16 + $0xa0] sm:$0xff]  }
 0x190   : > { %2145 = vmatpush1.bf16.msra.mxu0 %v3787_v48  ;;  %2309 = vmatpush1.bf16.msra.mxu1 %v3790_v49  ;;  %v3873_v48 = vld [vmem:[%s4400_s16 + $0x68] sm:$0xff]  }
 0x191   : > { %2146 = vmatprep.subr.bf16.mxu0 %v3795_v50  ;;  %2310 = vmatprep.subr.bf16.mxu1 %v3798_v51  ;;  %v3874_v49 = vld [vmem:[%s4400_s16 + $0xe8] sm:$0xff]  }
 0x192   : > { %v3875_v50 = vld [vmem:[%s4400_s16 + $0x28] sm:$0xff]  }
 0x193   : > { %v3876_v51 = vld [vmem:[%s4400_s16 + $0xa8] sm:$0xff]  }
 0x194   : > { %2147 = vmatpush1.bf16.msra.mxu0 %v3793_v52  ;;  %2311 = vmatpush1.bf16.msra.mxu1 %v3796_v53  ;;  %v3877_v52 = vld [vmem:[%s4400_s16 + $0x70] sm:$0xff]  }
 0x195   : > { %2148 = vmatprep.subr.bf16.mxu0 %v3801_v54  ;;  %2312 = vmatprep.subr.bf16.mxu1 %v3804_v55  ;;  %v3878_v53 = vld [vmem:[%s4400_s16 + $0xf0] sm:$0xff]  }
 0x196   : > { %v3879_v54 = vld [vmem:[%s4400_s16 + $0x30] sm:$0xff]  }
 0x197   : > { %v3880_v55 = vld [vmem:[%s4400_s16 + $0xb0] sm:$0xff]  }
 0x198   : > { %2149 = vmatpush1.bf16.msra.mxu0 %v3799_v56  ;;  %2313 = vmatpush1.bf16.msra.mxu1 %v3802_v57  ;;  %v3881_v56 = vld [vmem:[%s4400_s16 + $0x78] sm:$0xff]  }
 0x199   : > { %2150 = vmatprep.subr.bf16.mxu0 %v3807_v58  ;;  %2314 = vmatprep.subr.bf16.mxu1 %v3810_v59  ;;  %v3882_v57 = vld [vmem:[%s4400_s16 + $0xf8] sm:$0xff]  }
 0x19a   : > { %v3883_v58 = vld [vmem:[%s4400_s16 + $0x38] sm:$0xff]  }
 0x19b   : > { %v3884_v59 = vld [vmem:[%s4400_s16 + $0xb8] sm:$0xff]  }
 0x19c   : > { %2151 = vmatpush1.bf16.msra.mxu0 %v3805_v60  ;;  %2315 = vmatpush1.bf16.msra.mxu1 %v3808_v61  ;;  %v655_v60 = vsub.s32 0, %v4447_v43  ;;  %v663_v61 = vsub.s32 2, %v4447_v43 }
 0x19d   : > { %2152 = vmatprep.subr.bf16.mxu0 %v3813_v62  ;;  %2316 = vmatprep.subr.bf16.mxu1 %v3816_v63  ;;  %v651_v62 = vld [vmem:[%s4394_s4] sm:$0xf]  ;;  %v659_v63 = vsub.s32 1, %v4447_v43 }
 0x1a0   : > { %2153 = vmatpush1.bf16.msra.mxu0 %v3811_v0  ;;  %2317 = vmatpush1.bf16.msra.mxu1 %v3814_v1  ;;  %v667_v0 = vsub.s32 3, %v4447_v43  ;;  %v656_v1 = vrot.slane %v651_v62, %v655_v60 }
 0x1a1   : > { %2154 = vmatprep.subr.bf16.mxu0 %v3819_v2  ;;  %2318 = vmatprep.subr.bf16.mxu1 %v3822_v3  ;;  %v664_v2 = vrot.slane %v651_v62, %v663_v61  ;;  %v660_v3 = vrot.slane %v651_v62, %v659_v63  ;;  %v2714_v63 = vld [vmem:[%s4823_s5 + $0x70] sm:$0xff] (!%p3223_p7) }
 0x1a4   : > { %2155 = vmatpush1.bf16.msra.mxu0 %v3817_v4  ;;  %2319 = vmatpush1.bf16.msra.mxu1 %v3820_v5  ;;  %v668_v4 = vrot.slane %v651_v62, %v667_v0  ;;  %v3224_v62 = vld [vmem:[#allocation9] ss:$0 sm:$0xff] (!%p3223_p7)  ;;  %v2715_v0 = vld [vmem:[%s4823_s5 + $0x78] sm:$0xff] (!%p3223_p7) }
 0x1a5   : > { %2156 = vmatprep.subr.bf16.mxu0 %v3825_v6  ;;  %2320 = vmatprep.subr.bf16.mxu1 %v3828_v7 }
 0x1a8   : > { %2157 = vmatpush1.bf16.msra.mxu0 %v3823_v8  ;;  %2321 = vmatpush1.bf16.msra.mxu1 %v3826_v9 }
 0x1a9   : > { %2158 = vmatprep.subr.bf16.mxu0 %v3831_v10  ;;  %2322 = vmatprep.subr.bf16.mxu1 %v3834_v11 }
 0x1ac   : > { %2159 = vmatpush1.bf16.msra.mxu0 %v3829_v12  ;;  %2323 = vmatpush1.bf16.msra.mxu1 %v3832_v13 }
 0x1ad   : > { %2160 = vmatprep.subr.bf16.mxu0 %v3837_v14  ;;  %2324 = vmatprep.subr.bf16.mxu1 %v3840_v15 }
 0x1b0   : > { %2161 = vmatpush1.bf16.msra.mxu0 %v3835_v17  ;;  %2325 = vmatpush1.bf16.msra.mxu1 %v3838_v18 }
 0x1b1   : > { %2162 = vmatprep.subr.bf16.mxu0 %v3843_v19  ;;  %2326 = vmatprep.subr.bf16.mxu1 %v3846_v20 }
 0x1b4   : > { %2163 = vmatpush1.bf16.msra.mxu0 %v3841_v23  ;;  %2327 = vmatpush1.bf16.msra.mxu1 %v3844_v24 }
 0x1b5   : > { %2164 = vmatprep.subr.bf16.mxu0 %v3849_v25  ;;  %2328 = vmatprep.subr.bf16.mxu1 %v3852_v26 }
 0x1b8   : > { %2165 = vmatpush1.bf16.msra.mxu0 %v3847_v27  ;;  %2329 = vmatpush1.bf16.msra.mxu1 %v3850_v28 }
 0x1b9   : > { %3233 = vmatprep.subr.bf16.mxu0 %v3853_v29  ;;  %3255 = vmatprep.subr.bf16.mxu1 %v3854_v16 }
 0x1bb   : > { %2167 = vmatmul.mubr.bf16.vlgmr.msra.gmra.mrb[0].mxu0 %v720_v30  ;;  %2331 = vmatmul.mubr.bf16.vlgmr.msra.gmra.mrb[0].mxu1 %v720_v30 }
 0x1bc   : > { %3234 = vmatpush3.bf16.msra.mxu0 %v3855_v31  ;;  %3256 = vmatpush3.bf16.msra.mxu1 %v3856_v32 }
 0x1bd   : > { %3235 = vmatprep.subr.bf16.mxu0 %v3857_v33  ;;  %3257 = vmatprep.subr.bf16.mxu1 %v3858_v34  ;;  %v2343_v34 = vld [vmem:[#allocation2] sm:$0x3] }
 0x1c0   : > { %3236 = vmatpush3.bf16.msra.mxu0 %v3859_v35  ;;  %3258 = vmatpush3.bf16.msra.mxu1 %v3860_v22 }
 0x1c1   : > { %3237 = vmatprep.subr.bf16.mxu0 %v3861_v36  ;;  %3259 = vmatprep.subr.bf16.mxu1 %v3862_v21 }
 0x1c4   : > { %3238 = vmatpush3.bf16.msra.mxu0 %v3863_v37  ;;  %3260 = vmatpush3.bf16.msra.mxu1 %v3864_v38  ;;  %v2700_v37 = vld [vmem:[%s4823_s5] sm:$0xff] (!%p3223_p7)  ;;  %v2701_v38 = vld [vmem:[%s4823_s5 + $0x8] sm:$0xff] (!%p3223_p7) }
 0x1c5   : > { %3239 = vmatprep.subr.bf16.mxu0 %v3865_v39  ;;  %3261 = vmatprep.subr.bf16.mxu1 %v3866_v40  ;;  %v2702_v39 = vld [vmem:[%s4823_s5 + $0x10] sm:$0xff] (!%p3223_p7)  ;;  %v4117_v40 = vmov (!%p3223_p7), 0.0|0.0  }
 0x1c8   : > { %3240 = vmatpush3.bf16.msra.mxu0 %v3867_v41  ;;  %3262 = vmatpush3.bf16.msra.mxu1 %v3868_v42  ;;  %v3330_v41 = vpack.c.bf16 (!%p3223_p7), %v2701_v38, %v2700_v37  ;;  %v2703_v42 = vld [vmem:[%s4823_s5 + $0x18] sm:$0xff] (!%p3223_p7) }
 0x1c9   : > { %3241 = vmatprep.subr.bf16.mxu0 %v3869_v44  ;;  %3263 = vmatprep.subr.bf16.mxu1 %v3870_v45  ;;  %v4119_v44 = vmov (!%p3223_p7), 0.0   ;;  %v3333_v45 = vpack.c.bf16 (!%p3223_p7), %v2703_v42, %v2702_v39 }
 0x1cc   : > { %3242 = vmatpush3.bf16.msra.mxu0 %v3871_v46  ;;  %3264 = vmatpush3.bf16.msra.mxu1 %v3872_v47  ;;  %v2704_v46 = vld [vmem:[%s4823_s5 + $0x20] sm:$0xff] (!%p3223_p7)  ;;  %v2705_v47 = vld [vmem:[%s4823_s5 + $0x28] sm:$0xff] (!%p3223_p7) }
 0x1cd   : > { %3243 = vmatprep.subr.bf16.mxu0 %v3873_v48  ;;  %3265 = vmatprep.subr.bf16.mxu1 %v3874_v49  ;;  %v3336_v48 = vpack.c.bf16 (!%p3223_p7), %v2705_v47, %v2704_v46  ;;  %v2706_v49 = vld [vmem:[%s4823_s5 + $0x30] sm:$0xff] (!%p3223_p7) }
 0x1d0   : > { %3244 = vmatpush3.bf16.msra.mxu0 %v3875_v50  ;;  %3266 = vmatpush3.bf16.msra.mxu1 %v3876_v51  ;;  %v2707_v50 = vld [vmem:[%s4823_s5 + $0x38] sm:$0xff] (!%p3223_p7) }
 0x1d1   : > { %3245 = vmatprep.subr.bf16.mxu0 %v3877_v52  ;;  %3267 = vmatprep.subr.bf16.mxu1 %v3878_v53  ;;  %v3339_v51 = vpack.c.bf16 (!%p3223_p7), %v2707_v50, %v2706_v49  ;;  %v2708_v52 = vld [vmem:[%s4823_s5 + $0x40] sm:$0xff] (!%p3223_p7)  ;;  %v2709_v53 = vld [vmem:[%s4823_s5 + $0x48] sm:$0xff] (!%p3223_p7) }
 0x1d4   : > { %3246 = vmatpush3.bf16.msra.mxu0 %v3879_v54  ;;  %3268 = vmatpush3.bf16.msra.mxu1 %v3880_v55  ;;  %v3342_v54 = vpack.c.bf16 (!%p3223_p7), %v2709_v53, %v2708_v52  ;;  %v2710_v55 = vld [vmem:[%s4823_s5 + $0x50] sm:$0xff] (!%p3223_p7) }
 0x1d5   : > { %3247 = vmatprep.subr.bf16.mxu0 %v3881_v56  ;;  %3269 = vmatprep.subr.bf16.mxu1 %v3882_v57  ;;  %v2711_v56 = vld [vmem:[%s4823_s5 + $0x58] sm:$0xff] (!%p3223_p7) }
 0x1d6   : > { %v3345_v57 = vpack.c.bf16 (!%p3223_p7), %v2711_v56, %v2710_v55 }
 0x1d8   : > { %3248 = vmatpush3.bf16.msra.mxu0 %v3883_v58  ;;  %3270 = vmatpush3.bf16.msra.mxu1 %v3884_v59  ;;  %v2712_v58 = vld [vmem:[%s4823_s5 + $0x60] sm:$0xff] (!%p3223_p7)  ;;  %v2713_v59 = vld [vmem:[%s4823_s5 + $0x68] sm:$0xff] (!%p3223_p7) }
 0x1d9   : > { %3329 = vmatprep.subr.bf16.mxu0 (!%p3223_p7), %v4117_v40  ;;  %v3348_v60 = vpack.c.bf16 (!%p3223_p7), %v2713_v59, %v2712_v58 }
 0x28e   : > { %v2168_v5 = vpop.f32.mrb[0].mxu0  ;;  %v2332_v6 = vpop.f32.mrb[0].mxu1 }
 0x28f   : > { %v3353_v7 = vadd.f32 %v2168_v5, %v656_v1  ;;  %v3355_v8 = vadd.f32 %v2332_v6, %v664_v2  ;;  %v2170_v9 = vpop.f32.mrb[1].mxu0  ;;  %v2334_v10 = vpop.f32.mrb[1].mxu1  ;;  %v3351_v2 = vpack.c.bf16 (!%p3223_p7), %v2715_v0, %v2714_v63 }
 0x290   : > { %v3354_v11 = vadd.f32 %v2170_v9, %v660_v3  ;;  %v3356_v12 = vadd.f32 %v2334_v10, %v668_v4  ;;  %v2172_v13 = vpop.f32.mrb[2].mxu0  ;;  %v2336_v14 = vpop.f32.mrb[2].mxu1  ;;  %v3225_v4 = vld [vmem:[#allocation11] ss:$0 sm:$0xff] (!%p3223_p7) }
 0x291   : > { %v2339_v15 = vmax.f32 %v3353_v7, 0.0  ;;  %v2341_v17 = vmax.f32 %v3355_v8, 0.0  ;;  %v2173_v18 = vpop.f32.mrb[3].mxu0  ;;  %v2337_v19 = vpop.f32.mrb[3].mxu1 }
 0x292   : > { %v2340_v20 = vmax.f32 %v3354_v11, 0.0  ;;  %v2342_v43 = vmax.f32 %v3356_v12, 0.0 }
 0x293   : > { %v2344_v25 = vpack.c.bf16 %v2339_v15, %v2339_v15  ;;  %v2346_v26 = vpack.c.bf16 %v2341_v17, %v2341_v17 }
 0x294   : > { %v2345_v23 = vpack.c.bf16 %v2340_v20, %v2340_v20  ;;  %v2347_v24 = vpack.c.bf16 %v2342_v43, %v2342_v43 }
 0x296   : > { %2636 = vmatprep.mubr.bf16.mxu0 %v2345_v23  ;;  %2676 = vmatprep.mubr.bf16.mxu1 %v2347_v24 }
 0x297   : > { %2637 = vmatmul.mubr.bf16.vlgmr.msra.gmra.mrb[4].mxu0 %v2344_v25  ;;  %2677 = vmatmul.mubr.bf16.vlgmr.msra.gmra.mrb[4].mxu1 %v2346_v26 }
 0x298   : > { %3326 = vmatprep.mubr.msk.f32.mxu0 (!%p3223_p7), %vm4118_vm0, %v4119_v44  ;;  %3331 = vmatpush3.bf16.msra.mxu0 (!%p3223_p7), %v3330_v41 }
 0x299   : > { %3332 = vmatprep.subr.bf16.mxu0 (!%p3223_p7), %v4117_v40 }
 0x29c   : > { %3334 = vmatpush3.bf16.msra.mxu0 (!%p3223_p7), %v3333_v45 }
 0x29d   : > { %3335 = vmatprep.subr.bf16.mxu0 (!%p3223_p7), %v4117_v40 }
 0x2a0   : > { %3337 = vmatpush3.bf16.msra.mxu0 (!%p3223_p7), %v3336_v48 }
 0x2a1   : > { %3338 = vmatprep.subr.bf16.mxu0 (!%p3223_p7), %v4117_v40 }
 0x2a4   : > { %3340 = vmatpush3.bf16.msra.mxu0 (!%p3223_p7), %v3339_v51 }
 0x2a5   : > { %3341 = vmatprep.subr.bf16.mxu0 (!%p3223_p7), %v4117_v40 }
 0x2a8   : > { %3343 = vmatpush3.bf16.msra.mxu0 (!%p3223_p7), %v3342_v54 }
 0x2a9   : > { %3344 = vmatprep.subr.bf16.mxu0 (!%p3223_p7), %v4117_v40 }
 0x2ac   : > { %3346 = vmatpush3.bf16.msra.mxu0 (!%p3223_p7), %v3345_v57 }
 0x2ad   : > { %3347 = vmatprep.subr.bf16.mxu0 (!%p3223_p7), %v4117_v40 }
 0x2b0   : > { %3349 = vmatpush3.bf16.msra.mxu0 (!%p3223_p7), %v3348_v60 }
 0x2b1   : > { %3350 = vmatprep.subr.bf16.mxu0 (!%p3223_p7), %v4117_v40 }
 0x2b4   : > { %3352 = vmatpush3.bf16.msra.mxu0 (!%p3223_p7), %v3351_v2 }
 0x36a   : > { %v3249_v27 = vpop.f32.mrb[4].mxu0  ;;  %v3271_v28 = vpop.f32.mrb[4].mxu1 }
 0x36b   : > { %v3250_v29 = vpop.f32.mrb[5].mxu0  ;;  %v3272_v16 = vpop.f32.mrb[5].mxu1 }
 0x36c   : > { %v3251_v30 = vadd.f32 %v3250_v29, %v3249_v27  ;;  %v3273_v31 = vadd.f32 %v3272_v16, %v3271_v28  ;;  %v3252_v32 = vpop.f32.mrb[6].mxu0  ;;  %v3274_v33 = vpop.f32.mrb[6].mxu1  ;;  %2689 = sbr.rel (%p3223_p7) target bundleno = 1109 (0x455), region = 76 }
 0x36d   : > { %v3253_v35 = vpop.f32.mrb[7].mxu0  ;;  %v3275_v22 = vpop.f32.mrb[7].mxu1 }
 0x36e   : > { %v2679_v36 = vadd.f32 %v3273_v31, %v3251_v30 }
 0x370   : > { %v2684_v21 = vadd.f32 %v2679_v36, %v2343_v34 }
 0x372   : > { %2685 = vst [vmem:[#allocation2] sm:$0x3] %v2684_v21 }
 0x379   : > { %v2690_v61 = vld [vmem:[#allocation2] sm:$0x3] }
 0x37a   : > { %v2698_v1 = vadd.f32 %v3224_v62, %v2690_v61 }
 0x37c   : > { %v2699_v3 = vmax.f32 %v2698_v1, 0.0 }
 0x37e   : > { %3327 = vmatmul.mubr.f32.vlgmr.msra.gmra.mrb[0].mxu0 %v2699_v3 }
 0x451   : > { %v2789_v5 = vpop.f32.mrb[0].mxu0 }
 0x452   : > { %v2790_v6 = vadd.f32 %v3225_v4, %v2789_v5  ;;  %v3328_v7 = vpop.f32.mrb[1].mxu0 }
 0x454   : > { %2794 = vst.msk [vmem:[#allocation12] sm:$0x3] %vm2793_vm1, %v2790_v6 }
 0x455 PF: > { %p3421_p2 = scmp.eq.s32.totalorder %s4180_s28, 3  ;;  %s4120_s8 = smov [#allocation12]  }
 0x456   : > { %s2802_s13 = sshll.u32 %s4120_s8, 4  ;;  %s2803_s13 = int_to_ptr.vmem [resolvable:$true] %s2802_s13 }
 0x457   : > { %s4031_s27 = scalar_lea.vmem %s2803_s13, 32  ;;  %p4038_p1 = scmp.lt.s32.totalorder %s2803_s13, %s2803_s13 }
 0x458   : > { %p4032_p10 = scmp.ne.s32.totalorder %s2803_s13, %s4031_s27  ;;  %p4039_p5 = scmp.lt.s32.totalorder %s4031_s27, %s4031_s27 }
 0x45a   : > { %p4033_p8 = pnand %p4032_p10, %p3421_p2  ;;  %p4040_p9 = por %p4039_p5, %p4038_p1 }
 0x45c   : > { %p4034_p4 = pneg %p4033_p8 }
 0x45e   : > { %p4041_p11 = pnand %p4040_p9, %p4034_p4 }
 0x460   : > { %4044 = shalt.err (!%p4041_p11)
}
 0x461   : > { %s4045_s4 = scalar_lea.hbm %s4825_s7, 32 }
 0x462   : > { %p4046_p13 = scmp.ne.s32.totalorder %s4825_s7, %s4045_s4  ;;  %p4051_p0 = scmp.lt.u32.totalorder %s4045_s4, %s4825_s7 }
 0x464   : > { %p4047_p6 = pnand %p4046_p13, %p3421_p2 }
 0x466   : > { %p4048_p12 = pneg %p4047_p6 }
 0x468   : > { %p4053_p3 = pnand %p4051_p0, %p4048_p12 }
 0x46a   : > { %4056 = shalt.err (!%p4053_p3)
}
 0x46b   : > { %3396 = dma.vmem_to_hbm [thread:$0]  (%p3421_p2), %s2803_s13, 32, %s4825_s7, [#allocation5]  }
 0x46c   : > { %4086 = dma.done.wait (%p3421_p2), [#allocation5], 32  }
 0x46d   : > { %4088 = vsyncadd (%p3421_p2), [#allocation5], 4294967264 }
 0x46e PF: > { %p22_p7 = scmp.ge.s32.totalorder %s4200_s10, 6   ;;  %s4862_s24 = smov %s4095_s25 }
 0x46f   : > { %s4863_s25 = smov %s4099_s26  ;;  %s4864_s26 = smov %s4242_s12 }
 0x470   : > { %s4865_s27 = smov %s4200_s10  ;;  %24 = sbr.rel (!%p22_p7) target bundleno = 11 (0xb), region = 125 }
 0x477   :  { %2815 = vsyncpa [#allocation4], 1 }
 0x478   :  { %2817 = vsyncpa [#allocation4 + $0x1], 1 }
 0x479   :  { %2818 = vsyncpa [#allocation7], 1 }
 0x47a   :  { %2820 = vsyncpa [#allocation7 + $0x1], 1 }
 0x47b   :  { %2821 = vsyncpa [#allocation10], 1 }
 0x47c   :  { %2822 = vsyncpa [#allocation5], 1 }
 0x47d   :  { %2824 = vsyncpa [#allocation5 + $0x1], 1 }

// kernel: birdcall_cnn_forward.2
= control target key start
LH: loop header
LB: loop body
LE: loop exit
PB: predicated region body
PF: predicated region fallthrough
CT: control target
= control target key end

     0   :  { %15 = vsyncpa [#allocation10], 0  ;;  %s11661_s0 = inlined_call_operand.vmem [shape: f32[2,256,1], index: 0, kind: input, shape index: {}]   ;;  %s11662_s1 = inlined_call_operand.hbm [shape: f32[9,1,16], index: 1, kind: input, shape index: {}]   ;;  %s11663_s2 = inlined_call_operand.hbm [shape: f32[1,16], index: 2, kind: input, shape index: {}]   ;;  %s11664_s3 = inlined_call_operand.hbm [shape: f32[1,16], index: 3, kind: input, shape index: {}]   ;;  %s11665_s4 = inlined_call_operand.hbm [shape: f32[9,16,32], index: 4, kind: input, shape index: {}]   ;;  %s11666_s5 = inlined_call_operand.hbm [shape: f32[1,32], index: 5, kind: input, shape index: {}]   ;;  %s11667_s6 = inlined_call_operand.hbm [shape: f32[1,32], index: 6, kind: input, shape index: {}]   ;;  %s11668_s7 = inlined_call_operand.hbm [shape: f32[9,32,64], index: 7, kind: input, shape index: {}]   ;;  %s11669_s8 = inlined_call_operand.hbm [shape: f32[1,64], index: 8, kind: input, shape index: {}]   ;;  %s11670_s9 = inlined_call_operand.hbm [shape: f32[1,64], index: 9, kind: input, shape index: {}]   ;;  %s11671_s10 = inlined_call_operand.vmem [shape: bf16[2,16,64], index: 10, kind: output, shape index: {}]  }
   0x1   :  { %16 = vsyncpa [#allocation12], 0 }
   0x2   :  { %17 = vsyncpa [#allocation15], 0 }
   0x3   :  { %18 = vsyncpa [#allocation18], 0 }
   0x4   :  { %19 = vsyncpa [#allocation21], 0  ;;  %s9467_s13 = smov 0  }
   0x5 LB: > { %s9395_s14 = smov [#allocation11]   ;;  %s9473_s16 = sadd.s32 4294967295, %s9393_s13   ;;  %s9393_s13 = sphi %s9467_s13, %s25_s13  }
   0x6   : > { %s297_s15 = sshll.u32 %s9395_s14, 4  ;;  %p7816_p0 = scmp.ge.s32.totalorder %s9393_s13, 1  ;;  %s9478_s15 = int_to_ptr.vmem [resolvable:$true] %s297_s15 }
   0x7   : > { %p271_p1 = scmp.lt.s32.totalorder %s9393_s13, 3  ;;  %p11672_p2 = scmp.eq.s32.totalorder %s9473_s16, 0 }
   0x8   : > { %s9396_s18 = smov [#allocation14]   ;;  %s9397_s21 = smov [#allocation17]  }
   0x9   : > { %p9480_p3 = pnand %p7816_p0, %p271_p1  ;;  %s318_s19 = sshll.u32 %s9396_s18, 4  ;;  %s9486_s19 = int_to_ptr.vmem [resolvable:$true] %s318_s19 }
   0xa   : > { %s343_s22 = sshll.u32 %s9397_s21, 4  ;;  %s9398_s23 = smov [#allocation20]   ;;  %s9494_s22 = int_to_ptr.vmem [resolvable:$true] %s343_s22 }
   0xb   : > { %s11681_s17 = scalar_select %p9480_p3, 1, 0 }
   0xc   : > { %p9020_p4 = pneg %p9480_p3  ;;  %s9496_s24 = sshll.u32 %s9398_s23, 4  ;;  %s368_s24 = int_to_ptr.vmem [resolvable:$true] %s9496_s24 }
   0xd   : > { %s9115_s27 = scalar_lea.hbm %s11663_s2, 16 }
   0xe   : > { %p9490_p5 = pnand %p11672_p2, %p9020_p4  ;;  %p9116_p6 = scmp.ne.s32.totalorder %s11663_s2, %s9115_s27 }
   0xf   : > { %p9122_p10 = scmp.lt.u32.totalorder %s9115_s27, %s11663_s2 }
  0x10   : > { %p9506_p7 = pneg %p9490_p5 }
  0x12   : > { %p9118_p8 = pnand %p9506_p7, %p9116_p6 }
  0x14   : > { %p9119_p9 = pneg %p9118_p8 }
  0x16   : > { %p9124_p11 = pnand %p9122_p10, %p9119_p9 }
  0x18   : > { %9127 = shalt.err (!%p9124_p11)
}
  0x19   : > { %s9128_s14 = scalar_lea.vmem %s9478_s15, 16  ;;  %s9135_s18 = scalar_lea.vmem %s9478_s15, 32 }
  0x1a   : > { %p9129_p12 = scmp.ne.s32.totalorder %s9478_s15, %s9128_s14  ;;  %p9136_p1 = scmp.lt.s32.totalorder %s9478_s15, %s9478_s15 }
  0x1b   : > { %p9137_p4 = scmp.lt.s32.totalorder %s9135_s18, %s9128_s14 }
  0x1c   : > { %p9131_p13 = pnand %p9129_p12, %p9506_p7 }
  0x1d   : > { %p9138_p6 = por %p9137_p4, %p9136_p1 }
  0x1e   : > { %p9132_p0 = pneg %p9131_p13 }
  0x20   : > { %p9139_p8 = pnand %p9138_p6, %p9132_p0 }
  0x22   : > { %9142 = shalt.err (!%p9139_p8)
}
  0x23   : > { %9026 = dma.hbm_to_vmem [thread:$0]  (!%p9490_p5), %s11663_s2, 16, %s9478_s15, [#allocation12]  }
  0x24   : > { %s9143_s27 = scalar_lea.hbm %s11665_s4, 2304 }
  0x25   : > { %p9144_p9 = scmp.ne.s32.totalorder %s11665_s4, %s9143_s27  ;;  %p9150_p12 = scmp.lt.u32.totalorder %s9143_s27, %s11665_s4 }
  0x27   : > { %p9146_p10 = pnand %p9144_p9, %p9506_p7 }
  0x29   : > { %p9147_p11 = pneg %p9146_p10 }
  0x2b   : > { %p9152_p13 = pnand %p9150_p12, %p9147_p11 }
  0x2d   : > { %9155 = shalt.err (!%p9152_p13)
}
  0x2e   : > { %s9156_s15 = scalar_lea.vmem %s9486_s19, 2304  ;;  %p9164_p6 = scmp.lt.s32.totalorder %s9486_s19, %s9486_s19 }
  0x2f   : > { %p9157_p0 = scmp.ne.s32.totalorder %s9486_s19, %s9156_s15  ;;  %p9165_p8 = scmp.lt.s32.totalorder %s9156_s15, %s9156_s15 }
  0x31   : > { %p9159_p1 = pnand %p9157_p0, %p9506_p7  ;;  %p9166_p9 = por %p9165_p8, %p9164_p6 }
  0x33   : > { %p9160_p4 = pneg %p9159_p1 }
  0x35   : > { %p9167_p10 = pnand %p9166_p9, %p9160_p4 }
  0x37   : > { %9170 = shalt.err (!%p9167_p10)
}
  0x38   : > { %s11674_s14 = smov 128   ;;  %s9400_s18 = smov 8  }
  0x39   : > { %9032 = dma.hbm_to_vmem [thread:$0]  (!%p9490_p5), %s11665_s4, 2304, %s9486_s19, [#allocation15], %s11674_s14, %s11674_s14, %s9400_s18  }
  0x3a   : > { %s9171_s27 = scalar_lea.hbm %s11667_s6, 16 }
  0x3b   : > { %p9172_p11 = scmp.ne.s32.totalorder %s11667_s6, %s9171_s27  ;;  %p9178_p0 = scmp.lt.u32.totalorder %s9171_s27, %s11667_s6 }
  0x3d   : > { %p9174_p12 = pnand %p9172_p11, %p9506_p7 }
  0x3f   : > { %p9175_p13 = pneg %p9174_p12 }
  0x41   : > { %p9180_p1 = pnand %p9178_p0, %p9175_p13 }
  0x43   : > { %9183 = shalt.err (!%p9180_p1)
}
  0x44   : > { %s9184_s19 = scalar_lea.vmem %s9494_s22, 16  ;;  %s9191_s15 = scalar_lea.vmem %s9494_s22, 32 }
  0x45   : > { %p9185_p4 = scmp.ne.s32.totalorder %s9494_s22, %s9184_s19  ;;  %p9192_p9 = scmp.lt.s32.totalorder %s9494_s22, %s9494_s22 }
  0x46   : > { %p9193_p10 = scmp.lt.s32.totalorder %s9191_s15, %s9184_s19 }
  0x47   : > { %p9187_p6 = pnand %p9185_p4, %p9506_p7 }
  0x48   : > { %p9194_p11 = por %p9193_p10, %p9192_p9 }
  0x49   : > { %p9188_p8 = pneg %p9187_p6 }
  0x4b   : > { %p9195_p12 = pnand %p9194_p11, %p9188_p8 }
  0x4d   : > { %9198 = shalt.err (!%p9195_p12)
}
  0x4e   : > { %9038 = dma.hbm_to_vmem [thread:$0]  (!%p9490_p5), %s11667_s6, 16, %s9494_s22, [#allocation18]  }
  0x4f   : > { %s9199_s27 = scalar_lea.hbm %s11669_s8, 16 }
  0x50   : > { %p9200_p13 = scmp.ne.s32.totalorder %s11669_s8, %s9199_s27  ;;  %p9206_p4 = scmp.lt.u32.totalorder %s9199_s27, %s11669_s8 }
  0x52   : > { %p9202_p0 = pnand %p9200_p13, %p9506_p7 }
  0x54   : > { %p9203_p1 = pneg %p9202_p0 }
  0x56   : > { %p9208_p6 = pnand %p9206_p4, %p9203_p1 }
  0x58   : > { %9211 = shalt.err (!%p9208_p6)
}
  0x59   : > { %s9212_s19 = scalar_lea.vmem %s368_s24, 16  ;;  %s9219_s22 = scalar_lea.vmem %s368_s24, 32 }
  0x5a   : > { %p9213_p8 = scmp.ne.s32.totalorder %s368_s24, %s9212_s19  ;;  %p9220_p11 = scmp.lt.s32.totalorder %s368_s24, %s368_s24 }
  0x5b   : > { %p9221_p12 = scmp.lt.s32.totalorder %s9219_s22, %s9212_s19 }
  0x5c   : > { %p9215_p9 = pnand %p9213_p8, %p9506_p7 }
  0x5d   : > { %p9222_p2 = por %p9221_p12, %p9220_p11 }
  0x5e   : > { %p9216_p10 = pneg %p9215_p9 }
  0x60   : > { %p9223_p3 = pnand %p9222_p2, %p9216_p10 }
  0x62   : > { %9226 = shalt.err (!%p9223_p3)
}
  0x63   : > { %9044 = dma.hbm_to_vmem [thread:$0]  (!%p9490_p5), %s11669_s8, 16, %s368_s24, [#allocation21]  }
  0x64   : > { %s9401_s23 = smov [#allocation9]   ;;  %s9227_s28 = scalar_lea.hbm %s11662_s1, 144 }
  0x65   : > { %s283_s25 = sshll.u32 %s9401_s23, 4  ;;  %p9228_p13 = scmp.ne.s32.totalorder %s11662_s1, %s9227_s28  ;;  %s284_s25 = int_to_ptr.vmem [resolvable:$true] %s283_s25 }
  0x66   : > { %p9234_p0 = scmp.lt.u32.totalorder %s9227_s28, %s11662_s1 }
  0x67   : > { %p9230_p2 = pnand %p9228_p13, %p9506_p7 }
  0x69   : > { %p9231_p3 = pneg %p9230_p2 }
  0x6b   : > { %p9236_p1 = pnand %p9234_p0, %p9231_p3 }
  0x6d   : > { %9239 = shalt.err (!%p9236_p1)
}
  0x6e   : > { %s9240_s24 = scalar_lea.vmem %s284_s25, 144  ;;  %s9247_s22 = scalar_lea.vmem %s284_s25, 160 }
  0x6f   : > { %p9241_p4 = scmp.ne.s32.totalorder %s284_s25, %s9240_s24  ;;  %p9248_p9 = scmp.lt.s32.totalorder %s284_s25, %s284_s25 }
  0x70   : > { %p9249_p10 = scmp.lt.s32.totalorder %s9247_s22, %s9240_s24 }
  0x71   : > { %p9243_p6 = pnand %p9241_p4, %p9506_p7 }
  0x72   : > { %p9250_p11 = por %p9249_p10, %p9248_p9 }
  0x73   : > { %p9244_p8 = pneg %p9243_p6 }
  0x75   : > { %p9251_p12 = pnand %p9250_p11, %p9244_p8 }
  0x77   : > { %9254 = shalt.err (!%p9251_p12)
}
  0x78   : > { %s9402_s15 = smov 16   ;;  %s9403_s21 = smov 1  }
  0x79   : > { %9023 = dma.hbm_to_vmem [thread:$0]  (!%p9490_p5), %s11662_s1, 144, %s284_s25, [#allocation10], %s9402_s15, %s9402_s15, %s9403_s21  }
  0x7a   : > { %s9404_s27 = smov [#allocation13]   ;;  %s9405_s29 = smov [#allocation16]  }
  0x7b   : > { %s308_s28 = sshll.u32 %s9404_s27, 4  ;;  %s332_s11 = sshll.u32 %s9405_s29, 4  ;;  %s309_s28 = int_to_ptr.vmem [resolvable:$true] %s308_s28  ;;  %s9615_s11 = int_to_ptr.vmem [resolvable:$true] %s332_s11 }
  0x7c   : > { %s9255_s24 = scalar_lea.hbm %s11664_s3, 16 }
  0x7d   : > { %p9256_p13 = scmp.ne.s32.totalorder %s11664_s3, %s9255_s24  ;;  %p9262_p0 = scmp.lt.u32.totalorder %s9255_s24, %s11664_s3 }
  0x7f   : > { %p9258_p2 = pnand %p9256_p13, %p9506_p7 }
  0x81   : > { %p9259_p3 = pneg %p9258_p2 }
  0x83   : > { %p9264_p1 = pnand %p9262_p0, %p9259_p3 }
  0x85   : > { %9267 = shalt.err (!%p9264_p1)
}
  0x86   : > { %s9268_s15 = scalar_lea.vmem %s309_s28, 16  ;;  %s9275_s21 = scalar_lea.vmem %s309_s28, 32 }
  0x87   : > { %p9269_p4 = scmp.ne.s32.totalorder %s309_s28, %s9268_s15  ;;  %p9276_p9 = scmp.lt.s32.totalorder %s309_s28, %s309_s28 }
  0x88   : > { %p9277_p10 = scmp.lt.s32.totalorder %s9275_s21, %s9268_s15 }
  0x89   : > { %p9271_p6 = pnand %p9269_p4, %p9506_p7 }
  0x8a   : > { %p9278_p11 = por %p9277_p10, %p9276_p9 }
  0x8b   : > { %p9272_p8 = pneg %p9271_p6 }
  0x8d   : > { %p9279_p12 = pnand %p9278_p11, %p9272_p8 }
  0x8f   : > { %9282 = shalt.err (!%p9279_p12)
}
  0x90   : > { %9029 = dma.hbm_to_vmem [thread:$0]  (!%p9490_p5), %s11664_s3, 16, %s309_s28, [#allocation12]  }
  0x91   : > { %s9283_s12 = scalar_lea.hbm %s11666_s5, 16 }
  0x92   : > { %p9284_p13 = scmp.ne.s32.totalorder %s11666_s5, %s9283_s12  ;;  %p9290_p0 = scmp.lt.u32.totalorder %s9283_s12, %s11666_s5 }
  0x94   : > { %p9286_p2 = pnand %p9284_p13, %p9506_p7 }
  0x96   : > { %p9287_p3 = pneg %p9286_p2 }
  0x98   : > { %p9292_p1 = pnand %p9290_p0, %p9287_p3 }
  0x9a   : > { %9295 = shalt.err (!%p9292_p1)
}
  0x9b   : > { %s9296_s28 = scalar_lea.vmem %s9615_s11, 16  ;;  %s9303_s25 = scalar_lea.vmem %s9615_s11, 32 }
  0x9c   : > { %p9297_p4 = scmp.ne.s32.totalorder %s9615_s11, %s9296_s28  ;;  %p9304_p9 = scmp.lt.s32.totalorder %s9615_s11, %s9615_s11 }
  0x9d   : > { %p9305_p10 = scmp.lt.s32.totalorder %s9303_s25, %s9296_s28 }
  0x9e   : > { %p9299_p6 = pnand %p9297_p4, %p9506_p7 }
  0x9f   : > { %p9306_p11 = por %p9305_p10, %p9304_p9 }
  0xa0   : > { %p9300_p8 = pneg %p9299_p6 }
  0xa2   : > { %p9307_p12 = pnand %p9306_p11, %p9300_p8 }
  0xa4   : > { %9310 = shalt.err (!%p9307_p12)
}
  0xa5   : > { %9035 = dma.hbm_to_vmem [thread:$0]  (!%p9490_p5), %s11666_s5, 16, %s9615_s11, [#allocation15]  }
  0xa6   : > { %s9406_s14 = smov [#allocation19]   ;;  %s9407_s27 = smov [#allocation22]  }
  0xa7   : > { %s353_s26 = sshll.u32 %s9406_s14, 4  ;;  %s378_s29 = sshll.u32 %s9407_s27, 4  ;;  %s354_s26 = int_to_ptr.vmem [resolvable:$true] %s353_s26  ;;  %s9659_s29 = int_to_ptr.vmem [resolvable:$true] %s378_s29 }
  0xa8   : > { %s9311_s24 = scalar_lea.hbm %s11668_s7, 4608 }
  0xa9   : > { %p9312_p13 = scmp.ne.s32.totalorder %s11668_s7, %s9311_s24  ;;  %p9318_p0 = scmp.lt.u32.totalorder %s9311_s24, %s11668_s7 }
  0xab   : > { %p9314_p2 = pnand %p9312_p13, %p9506_p7 }
  0xad   : > { %p9315_p3 = pneg %p9314_p2 }
  0xaf   : > { %p9320_p1 = pnand %p9318_p0, %p9315_p3 }
  0xb1   : > { %9323 = shalt.err (!%p9320_p1)
}
  0xb2   : > { %s9324_s25 = scalar_lea.vmem %s354_s26, 4608  ;;  %p9332_p9 = scmp.lt.s32.totalorder %s354_s26, %s354_s26 }
  0xb3   : > { %p9325_p4 = scmp.ne.s32.totalorder %s354_s26, %s9324_s25  ;;  %p9333_p10 = scmp.lt.s32.totalorder %s9324_s25, %s9324_s25 }
  0xb5   : > { %p9327_p6 = pnand %p9325_p4, %p9506_p7  ;;  %p9334_p11 = por %p9333_p10, %p9332_p9 }
  0xb7   : > { %p9328_p8 = pneg %p9327_p6 }
  0xb9   : > { %p9335_p12 = pnand %p9334_p11, %p9328_p8 }
  0xbb   : > { %9338 = shalt.err (!%p9335_p12)
}
  0xbc   : > { %s11684_s15 = smov 128   ;;  %s9339_s19 = scalar_lea.hbm %s11670_s9, 16 }
  0xbd   : > { %9041 = dma.hbm_to_vmem [thread:$0]  (!%p9490_p5), %s11668_s7, 4608, %s354_s26, [#allocation18], %s11684_s15, %s11684_s15, %s9400_s18  }
  0xbe   : > { %p9340_p13 = scmp.ne.s32.totalorder %s11670_s9, %s9339_s19  ;;  %p9346_p0 = scmp.lt.u32.totalorder %s9339_s19, %s11670_s9 }
  0xc0   : > { %p9342_p2 = pnand %p9340_p13, %p9506_p7 }
  0xc2   : > { %p9343_p3 = pneg %p9342_p2 }
  0xc4   : > { %p9348_p1 = pnand %p9346_p0, %p9343_p3 }
  0xc6   : > { %9351 = shalt.err (!%p9348_p1)
}
  0xc7   : > { %s9352_s18 = scalar_lea.vmem %s9659_s29, 16  ;;  %s9359_s26 = scalar_lea.vmem %s9659_s29, 32 }
  0xc8   : > { %p9353_p4 = scmp.ne.s32.totalorder %s9659_s29, %s9352_s18  ;;  %p9360_p9 = scmp.lt.s32.totalorder %s9659_s29, %s9659_s29 }
  0xc9   : > { %p9361_p10 = scmp.lt.s32.totalorder %s9359_s26, %s9352_s18 }
  0xca   : > { %p9355_p6 = pnand %p9353_p4, %p9506_p7 }
  0xcb   : > { %p9362_p11 = por %p9361_p10, %p9360_p9 }
  0xcc   : > { %p9356_p8 = pneg %p9355_p6 }
  0xce   : > { %p9363_p12 = pnand %p9362_p11, %p9356_p8 }
  0xd0   : > { %9366 = shalt.err (!%p9363_p12)
}
  0xd1   : > { %9047 = dma.hbm_to_vmem [thread:$0]  (!%p9490_p5), %s11670_s9, 16, %s9659_s29, [#allocation21]  }
  0xd2   : > { %p11685_p13 = scmp.ne.s32.totalorder %s11681_s17, 0 }
  0xd4   : > { %399 = sbr.rel (%p11685_p13) target bundleno = 2195 (0x893), region = 60 }
  0xdb   : > { %p11686_p7 = scmp.eq.s32.totalorder %s9473_s16, 0 }
  0xdd   : > { %9372 = dma.done.wait (%p11686_p7), [#allocation10], 144   ;;  %p11687_p2 = pmov %p11686_p7 }
  0xdf   : > { %9374 = vsyncadd (%p11687_p2), [#allocation10], 4294967152  ;;  %p11688_p3 = pmov %p11687_p2 }
  0xe0   : > { %p11689_p0 = pmov %p11687_p2 }
  0xe1   : > { %9376 = dma.done.wait (%p11688_p3), [#allocation12], 32  }
  0xe2   : > { %9378 = vsyncadd (%p11689_p0), [#allocation12], 4294967264  ;;  %p11690_p1 = pmov %p11689_p0 }
  0xe3   : > { %p11691_p5 = pmov %p11689_p0 }
  0xe4   : > { %9380 = dma.done.wait (%p11690_p1), [#allocation15], 2320  }
  0xe5   : > { %9382 = vsyncadd (%p11691_p5), [#allocation15], 4294964976  ;;  %p11692_p4 = pmov %p11689_p0 }
  0xe6   : > { %p11693_p6 = pmov %p11689_p0 }
  0xe7   : > { %9384 = dma.done.wait (%p11692_p4), [#allocation18], 4624  }
  0xe8   : > { %9386 = vsyncadd (%p11693_p6), [#allocation18], 4294962672  ;;  %p11694_p8 = pmov %p11689_p0 }
  0xe9   : > { %p11695_p9 = pmov %p11689_p0 }
  0xea   : > { %9388 = dma.done.wait (%p11694_p8), [#allocation21], 32  }
  0xeb   : > { %9390 = vsyncadd (%p11695_p9), [#allocation21], 4294967264  ;;  %vm479_vm0 = vcmask 7168   ;;  %v11675_v0 = vmov 0.0   ;;  %p469_p10 = scmp.lt.s32.totalorder %s9473_s16, 1  ;;  %v9409_v1 = vmov 0  }
  0xec   : > { %480 = vst.msk [vmem:[#allocation2] sm:$0xff] %vm479_vm0, %v11675_v0  ;;  %481 = vst.msk [vmem:[#allocation2 + $0x8] sm:$0xff] %vm479_vm0, %v11675_v0  ;;  %9091 = vset.pattern.permute.xlu0 %v9409_v1  ;;  %9092 = vset.pattern.permute.xlu1 %v9409_v1  ;;  %vm524_vm1 = vcmask 130048   ;;  %vm9411_vm2 = vmmov 0   ;;  %vm540_vm5 = vcmask 261120   ;;  %vm6147_vm6 = vcmask 64512  }
  0xed   : > { %482 = vst.msk [vmem:[#allocation2 + $0x10] sm:$0xff] %vm479_vm0, %v11675_v0  ;;  %483 = vst.msk [vmem:[#allocation2 + $0x18] sm:$0xff] %vm479_vm0, %v11675_v0  ;;  %s11937_s16 = smov (!%p469_p10, %s9473_s16), 1  ;;  %vm6293_vm7 = vcmask 257024   ;;  %vm7646_vm8 = vcmask 523264   ;;  %vm7651_vm9 = vcmask 519168  }
  0xee   : > { %484 = vst.msk [vmem:[#allocation2 + $0x20] sm:$0xff] %vm479_vm0, %v11675_v0  ;;  %485 = vst.msk [vmem:[#allocation2 + $0x28] sm:$0xff] %vm479_vm0, %v11675_v0  ;;  %s8003_s17 = sshll.u32 %s11937_s16, 8  ;;  %s8004_s15 = sshll.u32 %s11937_s16, 3 }
  0xef   : > { %486 = vst.msk [vmem:[#allocation2 + $0x30] sm:$0xff] %vm479_vm0, %v11675_v0  ;;  %487 = vst.msk [vmem:[#allocation2 + $0x38] sm:$0xff] %vm479_vm0, %v11675_v0  ;;  %s9818_s29 = scalar_lea.vmem %s11661_s0, %s8003_s17  ;;  %s478_s27 = scalar_lea.vmem %s11671_s10, %s8004_s15 }
  0xf0   : > { %488 = vst.msk [vmem:[#allocation2 + $0x40] sm:$0xff] %vm479_vm0, %v11675_v0  ;;  %489 = vst.msk [vmem:[#allocation2 + $0x48] sm:$0xff] %vm479_vm0, %v11675_v0  ;;  %v548_v2 = vld [vmem:[%s9818_s29] sm:$0xff]  ;;  %v549_v3 = vld [vmem:[%s9818_s29 + $0x8] sm:$0xff] }
  0xf1   : > { %490 = vst.msk [vmem:[#allocation2 + $0x50] sm:$0xff] %vm479_vm0, %v11675_v0  ;;  %491 = vst.msk [vmem:[#allocation2 + $0x58] sm:$0xff] %vm479_vm0, %v11675_v0  ;;  %v552_v4 = vld [vmem:[%s9818_s29 + $0x10] sm:$0xff]  ;;  %v553_v8 = vld [vmem:[%s9818_s29 + $0x18] sm:$0xff] }
  0xf2   : > { %492 = vst.msk [vmem:[#allocation2 + $0x60] sm:$0xff] %vm479_vm0, %v11675_v0  ;;  %493 = vst.msk [vmem:[#allocation2 + $0x68] sm:$0xff] %vm479_vm0, %v11675_v0  ;;  %v556_v9 = vld [vmem:[%s9818_s29 + $0x20] sm:$0xff]  ;;  %v557_v10 = vld [vmem:[%s9818_s29 + $0x28] sm:$0xff] }
  0xf3   : > { %494 = vst.msk [vmem:[#allocation2 + $0x70] sm:$0xff] %vm479_vm0, %v11675_v0  ;;  %495 = vst.msk [vmem:[#allocation2 + $0x78] sm:$0xff] %vm479_vm0, %v11675_v0  ;;  %v612_v5 = vld [vmem:[#allocation2] sm:$0xff]  ;;  %v613_v7 = vld [vmem:[#allocation2 + $0x8] sm:$0xff] }
  0xf4   : > { %496 = vst.msk [vmem:[#allocation2 + $0x80] sm:$0xff] %vm479_vm0, %v11675_v0  ;;  %497 = vst.msk [vmem:[#allocation2 + $0x88] sm:$0xff] %vm479_vm0, %v11675_v0  ;;  %v871_v6 = vld [vmem:[#allocation2 + $0x1] sm:$0xff]  ;;  %651 = vperm.xlu0 %9091, %v612_v5   ;;  %v560_v11 = vld [vmem:[%s9818_s29 + $0x30] sm:$0xff] }
  0xf5   : > { %498 = vst.msk [vmem:[#allocation2 + $0x90] sm:$0xff] %vm479_vm0, %v11675_v0  ;;  %499 = vst.msk [vmem:[#allocation2 + $0x98] sm:$0xff] %vm479_vm0, %v11675_v0  ;;  %911 = vperm.xlu1 %9092, %v871_v6   ;;  %v561_v12 = vld [vmem:[%s9818_s29 + $0x38] sm:$0xff]  ;;  %v564_v13 = vld [vmem:[%s9818_s29 + $0x40] sm:$0xff] }
  0xf6   : > { %500 = vst.msk [vmem:[#allocation2 + $0xa0] sm:$0xff] %vm479_vm0, %v11675_v0  ;;  %501 = vst.msk [vmem:[#allocation2 + $0xa8] sm:$0xff] %vm479_vm0, %v11675_v0  ;;  %v565_v14 = vld [vmem:[%s9818_s29 + $0x48] sm:$0xff]  ;;  %v568_v15 = vld [vmem:[%s9818_s29 + $0x50] sm:$0xff] }
  0xf7   : > { %502 = vst.msk [vmem:[#allocation2 + $0xb0] sm:$0xff] %vm479_vm0, %v11675_v0  ;;  %503 = vst.msk [vmem:[#allocation2 + $0xb8] sm:$0xff] %vm479_vm0, %v11675_v0  ;;  %v569_v16 = vld [vmem:[%s9818_s29 + $0x58] sm:$0xff]  ;;  %v872_v17 = vld [vmem:[#allocation2 + $0x9] sm:$0xff] }
  0xf8   : > { %504 = vst.msk [vmem:[#allocation2 + $0xc0] sm:$0xff] %vm479_vm0, %v11675_v0  ;;  %505 = vst.msk [vmem:[#allocation2 + $0xc8] sm:$0xff] %vm479_vm0, %v11675_v0  ;;  %656 = vperm.xlu0 %9091, %v613_v7   ;;  %v1167_v24 = vld [vmem:[#allocation2 + $0x2] sm:$0xff]  ;;  %v1168_v25 = vld [vmem:[#allocation2 + $0xa] sm:$0xff] }
  0xf9   : > { %506 = vst.msk [vmem:[#allocation2 + $0xd0] sm:$0xff] %vm479_vm0, %v11675_v0  ;;  %507 = vst.msk [vmem:[#allocation2 + $0xd8] sm:$0xff] %vm479_vm0, %v11675_v0  ;;  %v572_v27 = vld [vmem:[%s9818_s29 + $0x60] sm:$0xff]  ;;  %v573_v29 = vld [vmem:[%s9818_s29 + $0x68] sm:$0xff] }
  0xfa   : > { %508 = vst.msk [vmem:[#allocation2 + $0xe0] sm:$0xff] %vm479_vm0, %v11675_v0  ;;  %509 = vst.msk [vmem:[#allocation2 + $0xe8] sm:$0xff] %vm479_vm0, %v11675_v0  ;;  %v576_v41 = vld [vmem:[%s9818_s29 + $0x70] sm:$0xff]  ;;  %v577_v57 = vld [vmem:[%s9818_s29 + $0x78] sm:$0xff] }
  0xfb   : > { %510 = vst.msk [vmem:[#allocation2 + $0xf0] sm:$0xff] %vm479_vm0, %v11675_v0  ;;  %511 = vst.msk [vmem:[#allocation2 + $0xf8] sm:$0xff] %vm479_vm0, %v11675_v0  ;;  %v580_v58 = vld [vmem:[%s9818_s29 + $0x80] sm:$0xff]  ;;  %v581_v61 = vld [vmem:[%s9818_s29 + $0x88] sm:$0xff] }
  0xfc   : > { %512 = vst.msk [vmem:[#allocation2 + $0x100] sm:$0xff] %vm479_vm0, %v11675_v0  ;;  %513 = vst.msk [vmem:[#allocation2 + $0x108] sm:$0xff] %vm479_vm0, %v11675_v0  ;;  %916 = vperm.xlu0 %9091, %v872_v17   ;;  %v584_v62 = vld [vmem:[%s9818_s29 + $0x90] sm:$0xff] }
  0xfd   : > { %514 = vst.msk [vmem:[#allocation2 + $0x110] sm:$0xff] %vm479_vm0, %v11675_v0  ;;  %515 = vst.msk [vmem:[#allocation2 + $0x118] sm:$0xff] %vm479_vm0, %v11675_v0 }
  0xfe   : > { %516 = vst.msk [vmem:[#allocation2 + $0x120] sm:$0xff] %vm479_vm0, %v11675_v0  ;;  %517 = vst.msk [vmem:[#allocation2 + $0x128] sm:$0xff] %vm479_vm0, %v11675_v0 }
  0xff   : > { %518 = vst.msk [vmem:[#allocation2 + $0x130] sm:$0xff] %vm479_vm0, %v11675_v0  ;;  %519 = vst.msk [vmem:[#allocation2 + $0x138] sm:$0xff] %vm479_vm0, %v11675_v0 }
 0x100   : > { %520 = vst.msk [vmem:[#allocation2 + $0x140] sm:$0xff] %vm479_vm0, %v11675_v0  ;;  %550 = vst.msk [vmem:[#allocation2 + $0x13] sm:$0xff] %vm479_vm0, %v548_v2 }
 0x101   : > { %551 = vst.msk [vmem:[#allocation2 + $0x1b] sm:$0xff] %vm479_vm0, %v549_v3  ;;  %554 = vst.msk [vmem:[#allocation2 + $0x25] sm:$0xff] %vm479_vm0, %v552_v4 }
 0x102   : > { %555 = vst.msk [vmem:[#allocation2 + $0x2d] sm:$0xff] %vm479_vm0, %v553_v8  ;;  %558 = vst.msk [vmem:[#allocation2 + $0x37] sm:$0xff] %vm479_vm0, %v556_v9 }
 0x103   : > { %559 = vst.msk [vmem:[#allocation2 + $0x3f] sm:$0xff] %vm479_vm0, %v557_v10  ;;  %562 = vst.msk [vmem:[#allocation2 + $0x49] sm:$0xff] %vm479_vm0, %v560_v11 }
 0x104   : > { %563 = vst.msk [vmem:[#allocation2 + $0x51] sm:$0xff] %vm479_vm0, %v561_v12  ;;  %566 = vst.msk [vmem:[#allocation2 + $0x5b] sm:$0xff] %vm479_vm0, %v564_v13 }
 0x105   : > { %567 = vst.msk [vmem:[#allocation2 + $0x63] sm:$0xff] %vm479_vm0, %v565_v14  ;;  %570 = vst.msk [vmem:[#allocation2 + $0x6d] sm:$0xff] %vm479_vm0, %v568_v15 }
 0x106   : > { %571 = vst.msk [vmem:[#allocation2 + $0x75] sm:$0xff] %vm479_vm0, %v569_v16  ;;  %574 = vst.msk [vmem:[#allocation2 + $0x7f] sm:$0xff] %vm479_vm0, %v572_v27 }
 0x107   : > { %v614_v18 = vld [vmem:[#allocation2 + $0x10] sm:$0xff]  ;;  %575 = vst.msk [vmem:[#allocation2 + $0x87] sm:$0xff] %vm479_vm0, %v573_v29  ;;  %578 = vst.msk [vmem:[#allocation2 + $0x91] sm:$0xff] %vm479_vm0, %v576_v41 }
 0x108   : > { %661 = vperm.xlu1 %9092, %v614_v18   ;;  %v615_v19 = vld [vmem:[#allocation2 + $0x18] sm:$0xff]  ;;  %v616_v20 = vld [vmem:[#allocation2 + $0x20] sm:$0xff]  ;;  %579 = vst.msk [vmem:[#allocation2 + $0x99] sm:$0xff] %vm479_vm0, %v577_v57  ;;  %582 = vst.msk [vmem:[#allocation2 + $0xa3] sm:$0xff] %vm479_vm0, %v580_v58 }
 0x109   : > { %671 = vperm.xlu0 %9091, %v616_v20   ;;  %v873_v21 = vld [vmem:[#allocation2 + $0x11] sm:$0xff]  ;;  %v874_v22 = vld [vmem:[#allocation2 + $0x19] sm:$0xff]  ;;  %v875_v23 = vld [vmem:[#allocation2 + $0x21] sm:$0xff]  ;;  %583 = vst.msk [vmem:[#allocation2 + $0xab] sm:$0xff] %vm479_vm0, %v581_v61 }
 0x10a   : > { %v1169_v26 = vld [vmem:[#allocation2 + $0x12] sm:$0xff]  ;;  %v1170_v28 = vld [vmem:[#allocation2 + $0x1a] sm:$0xff]  ;;  %v1171_v30 = vld [vmem:[#allocation2 + $0x22] sm:$0xff]  ;;  %586 = vst.msk [vmem:[#allocation2 + $0xb5] sm:$0xff] %vm479_vm0, %v584_v62 }
 0x10b   : > { %v617_v31 = vld [vmem:[#allocation2 + $0x28] sm:$0xff]  ;;  %v618_v32 = vld [vmem:[#allocation2 + $0x30] sm:$0xff]  ;;  %v619_v33 = vld [vmem:[#allocation2 + $0x38] sm:$0xff]  ;;  %525 = vst.msk [vmem:[#allocation4] sm:$0xff] %vm524_vm1, %v11675_v0 }
 0x10c   : > { %666 = vperm.xlu1 %9092, %v615_v19   ;;  %v620_v34 = vld [vmem:[#allocation2 + $0x40] sm:$0xff]  ;;  %v876_v35 = vld [vmem:[#allocation2 + $0x29] sm:$0xff]  ;;  %v877_v36 = vld [vmem:[#allocation2 + $0x31] sm:$0xff]  ;;  %526 = vst.msk [vmem:[#allocation4 + $0x8] sm:$0xff] %vm524_vm1, %v11675_v0 }
 0x10d   : > { %926 = vperm.xlu0 %9091, %v874_v22   ;;  %v878_v37 = vld [vmem:[#allocation2 + $0x39] sm:$0xff]  ;;  %v879_v38 = vld [vmem:[#allocation2 + $0x41] sm:$0xff]  ;;  %v1466_v39 = vld [vmem:[#allocation2 + $0x2a] sm:$0xff]  ;;  %527 = vst.msk [vmem:[#allocation4 + $0x10] sm:$0xff] %vm524_vm1, %v11675_v0 }
 0x10e   : > { %v1467_v40 = vld [vmem:[#allocation2 + $0x32] sm:$0xff]  ;;  %v1174_v42 = vld [vmem:[#allocation2 + $0x3a] sm:$0xff]  ;;  %v1175_v43 = vld [vmem:[#allocation2 + $0x42] sm:$0xff]  ;;  %528 = vst.msk [vmem:[#allocation4 + $0x18] sm:$0xff] %vm524_vm1, %v11675_v0 }
 0x10f   : > { %v1759_v44 = vld [vmem:[#allocation2 + $0x13] sm:$0xff]  ;;  %v1760_v45 = vld [vmem:[#allocation2 + $0x1b] sm:$0xff]  ;;  %v1761_v46 = vld [vmem:[#allocation2 + $0x23] sm:$0xff]  ;;  %529 = vst.msk [vmem:[#allocation4 + $0x20] sm:$0xff] %vm524_vm1, %v11675_v0 }
 0x110   : > { %921 = vperm.xlu1 %9092, %v873_v21   ;;  %v1762_v47 = vld [vmem:[#allocation2 + $0x2b] sm:$0xff]  ;;  %v1763_v48 = vld [vmem:[#allocation2 + $0x33] sm:$0xff]  ;;  %v624_v52 = vld [vmem:[#allocation2 + $0x60] sm:$0xff]  ;;  %530 = vst.msk [vmem:[#allocation4 + $0x28] sm:$0xff] %vm524_vm1, %v11675_v0 }
 0x111   : > { %1207 = vperm.xlu0 %9091, %v1167_v24   ;;  %v621_v49 = vld [vmem:[#allocation2 + $0x48] sm:$0xff]  ;;  %v622_v50 = vld [vmem:[#allocation2 + $0x50] sm:$0xff]  ;;  %v623_v51 = vld [vmem:[#allocation2 + $0x58] sm:$0xff]  ;;  %531 = vst.msk [vmem:[#allocation4 + $0x30] sm:$0xff] %vm524_vm1, %v11675_v0 }
 0x112   : > { %v625_v53 = vld [vmem:[#allocation2 + $0x68] sm:$0xff]  ;;  %v881_v55 = vld [vmem:[#allocation2 + $0x51] sm:$0xff]  ;;  %v882_v56 = vld [vmem:[#allocation2 + $0x59] sm:$0xff]  ;;  %532 = vst.msk [vmem:[#allocation4 + $0x38] sm:$0xff] %vm524_vm1, %v11675_v0 }
 0x113   : > { %v880_v54 = vld [vmem:[#allocation2 + $0x49] sm:$0xff]  ;;  %v883_v59 = vld [vmem:[#allocation2 + $0x61] sm:$0xff]  ;;  %v1471_v1 = vld [vmem:[#allocation2 + $0x52] sm:$0xff]  ;;  %533 = vst.msk [vmem:[#allocation4 + $0x40] sm:$0xff] %vm524_vm1, %v11675_v0 }
 0x114   : > { %931 = vperm.xlu1 %9092, %v875_v23   ;;  %v884_v60 = vld [vmem:[#allocation2 + $0x69] sm:$0xff]  ;;  %v2055_v2 = vld [vmem:[#allocation2 + $0x14] sm:$0xff]  ;;  %v2056_v3 = vld [vmem:[#allocation2 + $0x1c] sm:$0xff]  ;;  %534 = vst.msk [vmem:[#allocation4 + $0x48] sm:$0xff] %vm524_vm1, %v11675_v0 }
 0x115   : > { %1217 = vperm.xlu0 %9091, %v1169_v26   ;;  %v1470_v63 = vld [vmem:[#allocation2 + $0x4a] sm:$0xff]  ;;  %v2059_v6 = vld [vmem:[#allocation2 + $0x34] sm:$0xff]  ;;  %v1179_v8 = vld [vmem:[#allocation2 + $0x62] sm:$0xff]  ;;  %535 = vst.msk [vmem:[#allocation4 + $0x50] sm:$0xff] %vm524_vm1, %v11675_v0 }
 0x116   : > { %v2057_v4 = vld [vmem:[#allocation2 + $0x24] sm:$0xff]  ;;  %v2058_v5 = vld [vmem:[#allocation2 + $0x2c] sm:$0xff]  ;;  %v1178_v7 = vld [vmem:[#allocation2 + $0x5a] sm:$0xff]  ;;  %536 = vst.msk [vmem:[#allocation4 + $0x58] sm:$0xff] %vm524_vm1, %v11675_v0 }
 0x117   : > { %v1180_v9 = vld [vmem:[#allocation2 + $0x6a] sm:$0xff]  ;;  %v1764_v10 = vld [vmem:[#allocation2 + $0x3b] sm:$0xff]  ;;  %v1767_v13 = vld [vmem:[#allocation2 + $0x53] sm:$0xff]  ;;  %537 = vst.msk [vmem:[#allocation4 + $0x60] sm:$0xff] %vm524_vm1, %v11675_v0 }
 0x118   : > { %1212 = vperm.xlu1 %9092, %v1168_v25   ;;  %v1765_v11 = vld [vmem:[#allocation2 + $0x43] sm:$0xff]  ;;  %v1766_v12 = vld [vmem:[#allocation2 + $0x4b] sm:$0xff]  ;;  %v627_v24 = vld [vmem:[#allocation2 + $0x78] sm:$0xff] }
 0x119   : > { %1227 = vperm.xlu0 %9091, %v1171_v30   ;;  %v2354_v17 = vld [vmem:[#allocation2 + $0x3c] sm:$0xff]  ;;  %v2355_v20 = vld [vmem:[#allocation2 + $0x44] sm:$0xff]  ;;  %v626_v21 = vld [vmem:[#allocation2 + $0x70] sm:$0xff] }
 0x11a   : > { %v628_v25 = vld [vmem:[#allocation2 + $0x80] sm:$0xff]  ;;  %v885_v29 = vld [vmem:[#allocation2 + $0x71] sm:$0xff]  ;;  %v892_v0 = vld [vmem:[#allocation2 + $0xa9] sm:$0xff] }
 0x11b   : > { %v1475_v41 = vld [vmem:[#allocation2 + $0x72] sm:$0xff]  ;;  %v2651_v62 = vld [vmem:[#allocation2 + $0x45] sm:$0xff] }
 0x11c   : > { %1222 = vperm.xlu1 %9092, %v1170_v28   ;;  %v2649_v58 = vld [vmem:[#allocation2 + $0x35] sm:$0xff] }
 0x11d   : > { %681 = vperm.xlu0 %9091, %v618_v32   ;;  %v886_v32 = vld [vmem:[#allocation2 + $0x79] sm:$0xff] }
 0x120   : > { %676 = vperm.xlu1 %9092, %v617_v31  }
 0x121   : > { %691 = vperm.xlu0 %9091, %v620_v34  }
 0x124   : > { %686 = vperm.xlu1 %9092, %v619_v33   ;;  %v887_v33 = vld [vmem:[#allocation2 + $0x81] sm:$0xff] }
 0x125   : > { %941 = vperm.xlu0 %9091, %v877_v36   ;;  %v888_v36 = vld [vmem:[#allocation2 + $0x89] sm:$0xff] }
 0x128   : > { %936 = vperm.xlu1 %9092, %v876_v35  }
 0x129   : > { %951 = vperm.xlu0 %9091, %v879_v38  }
 0x12c   : > { %946 = vperm.xlu1 %9092, %v878_v37  }
 0x12d   : > { %1508 = vperm.xlu0 %9091, %v1170_v28   ;;  %v629_v28 = vld [vmem:[#allocation2 + $0x88] sm:$0xff] }
 0x130   : > { %1503 = vperm.xlu1 %9092, %v1169_v26  }
 0x131   : > { %1518 = vperm.xlu0 %9091, %v1466_v39  }
 0x134   : > { %1513 = vperm.xlu1 %9092, %v1171_v30  }
 0x135   : > { %1232 = vperm.xlu0 %9091, %v1466_v39  }
 0x138   : > { %1523 = vperm.xlu1 %9092, %v1467_v40  }
 0x139   : > { %1242 = vperm.xlu0 %9091, %v1174_v42  }
 0x13c   : > { %1237 = vperm.xlu1 %9092, %v1467_v40  }
 0x13d   : > { %1799 = vperm.xlu0 %9091, %v1759_v44  }
 0x140   : > { %1247 = vperm.xlu1 %9092, %v1175_v43  }
 0x141   : > { %1809 = vperm.xlu0 %9091, %v1761_v46   ;;  %v585_v46 = vld [vmem:[%s9818_s29 + $0x98] sm:$0xff] }
 0x142   : > { %587 = vst.msk [vmem:[#allocation2 + $0xbd] sm:$0xff] %vm479_vm0, %v585_v46 }
 0x144   : > { %1804 = vperm.xlu1 %9092, %v1760_v45  }
 0x145   : > { %1819 = vperm.xlu0 %9091, %v1763_v48   ;;  %v588_v48 = vld [vmem:[%s9818_s29 + $0xa0] sm:$0xff] }
 0x146   : > { %590 = vst.msk [vmem:[#allocation2 + $0xc7] sm:$0xff] %vm479_vm0, %v588_v48  ;;  %v2945_v48 = vld [vmem:[#allocation2 + $0x36] sm:$0xff] }
 0x148   : > { %1814 = vperm.xlu1 %9092, %v1762_v47  }
 0x149   : > { %701 = vperm.xlu0 %9091, %v622_v50   ;;  %v2063_v50 = vld [vmem:[#allocation2 + $0x54] sm:$0xff] }
 0x14c   : > { %696 = vperm.xlu1 %9092, %v621_v49   ;;  %v2062_v49 = vld [vmem:[#allocation2 + $0x4c] sm:$0xff] }
 0x14d   : > { %711 = vperm.xlu0 %9091, %v624_v52   ;;  %v589_v52 = vld [vmem:[%s9818_s29 + $0xa8] sm:$0xff] }
 0x14e   : > { %591 = vst.msk [vmem:[#allocation2 + $0xcf] sm:$0xff] %vm479_vm0, %v589_v52 }
 0x150   : > { %706 = vperm.xlu1 %9092, %v623_v51  }
 0x151   : > { %956 = vperm.xlu0 %9091, %v880_v54   ;;  %v2647_v54 = vld [vmem:[#allocation2 + $0x25] sm:$0xff] }
 0x154   : > { %716 = vperm.xlu1 %9092, %v625_v53  }
 0x155   : > { %966 = vperm.xlu0 %9091, %v882_v56  }
 0x158   : > { %961 = vperm.xlu1 %9092, %v881_v55   ;;  %v2648_v55 = vld [vmem:[#allocation2 + $0x2d] sm:$0xff] }
 0x159   : > { %976 = vperm.xlu0 %9091, %v884_v60  }
 0x15c   : > { %971 = vperm.xlu1 %9092, %v883_v59   ;;  %v2650_v59 = vld [vmem:[#allocation2 + $0x3d] sm:$0xff] }
 0x15d   : > { %1533 = vperm.xlu0 %9091, %v1175_v43  }
 0x160   : > { %1528 = vperm.xlu1 %9092, %v1174_v42   ;;  %v1476_v42 = vld [vmem:[#allocation2 + $0x7a] sm:$0xff] }
 0x161   : > { %1543 = vperm.xlu0 %9091, %v1471_v1  }
 0x164   : > { %1538 = vperm.xlu1 %9092, %v1470_v63  }
 0x165   : > { %2100 = vperm.xlu0 %9091, %v2056_v3  }
 0x168   : > { %2095 = vperm.xlu1 %9092, %v2055_v2   ;;  %v9922_v2 = vld [vmem:[#allocation2 + $0x82] sm:$0xff] }
 0x169   : > { %2110 = vperm.xlu0 %9091, %v2058_v5  }
 0x16c   : > { %2105 = vperm.xlu1 %9092, %v2057_v4  }
 0x16d   : > { %1252 = vperm.xlu0 %9091, %v1470_v63  }
 0x170   : > { %2115 = vperm.xlu1 %9092, %v2059_v6  }
 0x171   : > { %1262 = vperm.xlu0 %9091, %v1178_v7  }
 0x173   : > { %v9858_v14 = vpop.permute.xlu0 %651 }
 0x174   : > { %1257 = vperm.xlu1 %9092, %v1471_v1   ;;  %v9860_v15 = vpop.permute.xlu1 %911 }
 0x175   : > { %1272 = vperm.xlu0 %9091, %v1180_v9  }
 0x177   : > { %v9862_v16 = vpop.permute.xlu0 %656 }
 0x178   : > { %1267 = vperm.xlu1 %9092, %v1179_v8  }
 0x179   : > { %1829 = vperm.xlu0 %9091, %v1765_v11  }
 0x17b   : > { %v9866_v19 = vpop.permute.xlu0 %916 }
 0x17c   : > { %1824 = vperm.xlu1 %9092, %v1764_v10   ;;  %v1770_v10 = vld [vmem:[#allocation2 + $0x6b] sm:$0xff] }
 0x17d   : > { %1839 = vperm.xlu0 %9091, %v1767_v13   ;;  %v1771_v13 = vld [vmem:[#allocation2 + $0x73] sm:$0xff] }
 0x180   : > { %1834 = vperm.xlu1 %9092, %v1766_v12  }
 0x181   : > { %2396 = vperm.xlu0 %9091, %v2058_v5   ;;  %v9929_v5 = vld [vmem:[#allocation2 + $0x8a] sm:$0xff] }
 0x184   : > { %2391 = vperm.xlu1 %9092, %v2057_v4  }
 0x185   : > { %2406 = vperm.xlu0 %9091, %v2354_v17  }
 0x187   : > { %v9864_v18 = vpop.permute.xlu1 %661 }
 0x188   : > { %2401 = vperm.xlu1 %9092, %v2059_v6   ;;  %v9870_v23 = vpop.permute.xlu0 %671  ;;  %v1768_v6 = vld [vmem:[#allocation2 + $0x5b] sm:$0xff] }
 0x189   : > { %721 = vperm.xlu0 %9091, %v626_v21  }
 0x18b   : > { %v9868_v22 = vpop.permute.xlu1 %666 }
 0x18c   : > { %2411 = vperm.xlu1 %9092, %v2355_v20   ;;  %v9874_v27 = vpop.permute.xlu0 %926 }
 0x18d   : > { %731 = vperm.xlu0 %9091, %v628_v25  }
 0x18f   : > { %v9872_v26 = vpop.permute.xlu1 %921 }
 0x190   : > { %726 = vperm.xlu1 %9092, %v627_v24   ;;  %v9878_v31 = vpop.permute.xlu0 %1207 }
 0x191   : > { %981 = vperm.xlu0 %9091, %v885_v29   ;;  %v9950_v29 = vld [vmem:[#allocation2 + $0x64] sm:$0xff] }
 0x193   : > { %v9876_v30 = vpop.permute.xlu1 %931 }
 0x194   : > { %736 = vperm.xlu1 %9092, %v629_v28   ;;  %v9882_v35 = vpop.permute.xlu0 %1217  ;;  %v9948_v28 = vld [vmem:[#allocation2 + $0x5c] sm:$0xff] }
 0x195   : > { %991 = vperm.xlu0 %9091, %v887_v33  }
 0x197   : > { %v9880_v34 = vpop.permute.xlu1 %1212 }
 0x198   : > { %986 = vperm.xlu1 %9092, %v886_v32   ;;  %v9886_v38 = vpop.permute.xlu0 %1227 }
 0x199   : > { %1548 = vperm.xlu0 %9091, %v1178_v7  }
 0x19b   : > { %v9884_v37 = vpop.permute.xlu1 %1222 }
 0x19c   : > { %996 = vperm.xlu1 %9092, %v888_v36   ;;  %v9890_v40 = vpop.permute.xlu0 %681  ;;  %v2943_v36 = vld [vmem:[#allocation2 + $0x26] sm:$0xff] }
 0x19d   : > { %11696 = vst [vmem:[#allocation28_spill] sm:$0xff] %v9890_v40  ;;  %1558 = vperm.xlu0 %9091, %v1180_v9   ;;  %v1769_v9 = vld [vmem:[#allocation2 + $0x63] sm:$0xff]  ;;  %v10197_v40 = vld [vmem:[#allocation2 + $0x94] sm:$0xff] }
 0x19f   : > { %v9888_v39 = vpop.permute.xlu1 %676 }
 0x1a0   : > { %1553 = vperm.xlu1 %9092, %v1179_v8   ;;  %v9894_v44 = vpop.permute.xlu0 %691 }
 0x1a1   : > { %11698 = vst [vmem:[#allocation30_spill] sm:$0xff] %v9894_v44  ;;  %1568 = vperm.xlu0 %9091, %v1476_v42  }
 0x1a3   : > { %v9892_v43 = vpop.permute.xlu1 %686 }
 0x1a4   : > { %11697 = vst [vmem:[#allocation29_spill] sm:$0xff] %v9892_v43  ;;  %1563 = vperm.xlu1 %9092, %v1475_v41   ;;  %v9899_v47 = vpop.permute.xlu0 %941 }
 0x1a5   : > { %2125 = vperm.xlu0 %9091, %v2355_v20  }
 0x1a7   : > { %v9896_v45 = vpop.permute.xlu1 %936 }
 0x1a8   : > { %2120 = vperm.xlu1 %9092, %v2354_v17   ;;  %v9907_v53 = vpop.permute.xlu0 %951  ;;  %v1772_v17 = vld [vmem:[#allocation2 + $0x7b] sm:$0xff] }
 0x1a9   : > { %11700 = vst [vmem:[#allocation32_spill] sm:$0xff] %v9907_v53  ;;  %2135 = vperm.xlu0 %9091, %v2063_v50  }
 0x1ab   : > { %v9904_v51 = vpop.permute.xlu1 %946 }
 0x1ac   : > { %11699 = vst [vmem:[#allocation31_spill] sm:$0xff] %v9904_v51  ;;  %2130 = vperm.xlu1 %9092, %v2062_v49   ;;  %v9912_v57 = vpop.permute.xlu0 %1508  ;;  %v10192_v51 = vld [vmem:[#allocation9 + $0x5] ss:$0 sm:$0xff] }
 0x1ad   : > { %2692 = vperm.xlu0 %9091, %v2648_v55   ;;  %v2947_v55 = vld [vmem:[#allocation2 + $0x46] sm:$0xff] }
 0x1af   : > { %v9910_v56 = vpop.permute.xlu1 %1503 }
 0x1b0   : > { %2687 = vperm.xlu1 %9092, %v2647_v54   ;;  %v9916_v61 = vpop.permute.xlu0 %1518  ;;  %v592_v54 = vld [vmem:[%s9818_s29 + $0xb0] sm:$0xff] }
 0x1b1   : > { %2702 = vperm.xlu0 %9091, %v2650_v59   ;;  %594 = vst.msk [vmem:[#allocation2 + $0xd9] sm:$0xff] %vm479_vm0, %v592_v54  ;;  %v890_v54 = vld [vmem:[#allocation2 + $0x99] sm:$0xff] }
 0x1b3   : > { %v9914_v60 = vpop.permute.xlu1 %1513 }
 0x1b4   : > { %2697 = vperm.xlu1 %9092, %v2649_v58   ;;  %v9920_v1 = vpop.permute.xlu0 %1232  ;;  %v630_v58 = vld [vmem:[#allocation2 + $0x90] sm:$0xff] }
 0x1b5   : > { %1277 = vperm.xlu0 %9091, %v1475_v41   ;;  %v2944_v41 = vld [vmem:[#allocation2 + $0x2e] sm:$0xff] }
 0x1b7   : > { %v9918_v63 = vpop.permute.xlu1 %1523 }
 0x1b8   : > { %2707 = vperm.xlu1 %9092, %v2651_v62   ;;  %v9926_v4 = vpop.permute.xlu0 %1242 }
 0x1b9   : > { %11702 = vst [vmem:[#allocation34_spill] sm:$0xff] %v9926_v4  ;;  %1287 = vperm.xlu0 %9091, %v9922_v2   ;;  %v897_v4 = vld [vmem:[#allocation2 + $0xd1] sm:$0xff] }
 0x1bb   : > { %v9924_v3 = vpop.permute.xlu1 %1237 }
 0x1bc   : > { %11701 = vst [vmem:[#allocation33_spill] sm:$0xff] %v9924_v3  ;;  %1282 = vperm.xlu1 %9092, %v1476_v42   ;;  %v9934_v8 = vpop.permute.xlu0 %1799 }
 0x1bd   : > { %1844 = vperm.xlu0 %9091, %v1768_v6   ;;  %v631_v6 = vld [vmem:[#allocation2 + $0x98] sm:$0xff] }
 0x1bf   : > { %v9931_v7 = vpop.permute.xlu1 %1247 }
 0x1c0   : > { %11703 = vst [vmem:[#allocation35_spill] sm:$0xff] %v9931_v7  ;;  %1292 = vperm.xlu1 %9092, %v9929_v5   ;;  %v9938_v12 = vpop.permute.xlu0 %1809 }
 0x1c1   : > { %1854 = vperm.xlu0 %9091, %v1770_v10  }
 0x1c3   : > { %v9936_v11 = vpop.permute.xlu1 %1804 }
 0x1c4   : > { %1849 = vperm.xlu1 %9092, %v1769_v9   ;;  %v9942_v21 = vpop.permute.xlu0 %1819  ;;  %v632_v9 = vld [vmem:[#allocation2 + $0xa0] sm:$0xff] }
 0x1c5   : > { %1864 = vperm.xlu0 %9091, %v1772_v17   ;;  %v633_v17 = vld [vmem:[#allocation2 + $0xa8] sm:$0xff] }
 0x1c7   : > { %v9940_v20 = vpop.permute.xlu1 %1814 }
 0x1c8   : > { %1859 = vperm.xlu1 %9092, %v1771_v13   ;;  %v9946_v25 = vpop.permute.xlu0 %701 }
 0x1c9   : > { %11705 = vst [vmem:[#allocation37_spill] sm:$0xff] %v9946_v25  ;;  %2421 = vperm.xlu0 %9091, %v2063_v50  }
 0x1cb   : > { %v9944_v24 = vpop.permute.xlu1 %696 }
 0x1cc   : > { %11704 = vst [vmem:[#allocation36_spill] sm:$0xff] %v9944_v24  ;;  %2416 = vperm.xlu1 %9092, %v2062_v49   ;;  %v9955_v33 = vpop.permute.xlu0 %711  ;;  %v2946_v49 = vld [vmem:[#allocation2 + $0x3e] sm:$0xff] }
 0x1cd   : > { %11707 = vst [vmem:[#allocation39_spill] sm:$0xff] %v9955_v33  ;;  %2431 = vperm.xlu0 %9091, %v9950_v29   ;;  %v2654_v24 = vld [vmem:[#allocation2 + $0x5d] sm:$0xff] }
 0x1cf   : > { %v9952_v32 = vpop.permute.xlu1 %706 }
 0x1d0   : > { %11706 = vst [vmem:[#allocation38_spill] sm:$0xff] %v9952_v32  ;;  %2426 = vperm.xlu1 %9092, %v9948_v28   ;;  %v9960_v46 = vpop.permute.xlu0 %956  ;;  %v2067_v32 = vld [vmem:[#allocation2 + $0x74] sm:$0xff] }
 0x1d1   : > { %11709 = vst [vmem:[#allocation41_spill] sm:$0xff] %v9960_v46  ;;  %2988 = vperm.xlu0 %9091, %v2944_v41  }
 0x1d3   : > { %v9958_v42 = vpop.permute.xlu1 %716 }
 0x1d4   : > { %11708 = vst [vmem:[#allocation40_spill] sm:$0xff] %v9958_v42  ;;  %2983 = vperm.xlu1 %9092, %v2943_v36   ;;  %v9990_v52 = vpop.permute.xlu0 %966  ;;  %v634_v36 = vld [vmem:[#allocation2 + $0xb0] sm:$0xff] }
 0x1d5   : > { %11711 = vst [vmem:[#allocation43_spill] sm:$0xff] %v9990_v52  ;;  %2998 = vperm.xlu0 %9091, %v2946_v49   ;;  %v889_v49 = vld [vmem:[#allocation2 + $0x91] sm:$0xff] }
 0x1d7   : > { %v9988_v50 = vpop.permute.xlu1 %961 }
 0x1d8   : > { %11710 = vst [vmem:[#allocation42_spill] sm:$0xff] %v9988_v50  ;;  %2993 = vperm.xlu1 %9092, %v2945_v48   ;;  %v9996_v62 = vpop.permute.xlu0 %976 }
 0x1d9   : > { %11713 = vst [vmem:[#allocation45_spill] sm:$0xff] %v9996_v62  ;;  %741 = vperm.xlu0 %9091, %v630_v58  }
 0x1db   : > { %v9994_v59 = vpop.permute.xlu1 %971 }
 0x1dc   : > { %11712 = vst [vmem:[#allocation44_spill] sm:$0xff] %v9994_v59  ;;  %3003 = vperm.xlu1 %9092, %v2947_v55   ;;  %v10000_v13 = vpop.permute.xlu0 %1533  ;;  %v593_v59 = vld [vmem:[%s9818_s29 + $0xb8] sm:$0xff] }
 0x1dd   : > { %11715 = vst [vmem:[#allocation47_spill] sm:$0xff] %v10000_v13  ;;  %751 = vperm.xlu0 %9091, %v632_v9   ;;  %595 = vst.msk [vmem:[#allocation2 + $0xe1] sm:$0xff] %vm479_vm0, %v593_v59  ;;  %v10125_v13 = vld [vmem:[#allocation9 + $0x1] ss:$0 sm:$0xff] }
 0x1df   : > { %v9998_v10 = vpop.permute.xlu1 %1528 }
 0x1e0   : > { %11714 = vst [vmem:[#allocation46_spill] sm:$0xff] %v9998_v10  ;;  %746 = vperm.xlu1 %9092, %v631_v6   ;;  %v10004_v48 = vpop.permute.xlu0 %1543  ;;  %v891_v6 = vld [vmem:[#allocation2 + $0xa1] sm:$0xff] }
 0x1e1   : > { %11717 = vst [vmem:[#allocation49_spill] sm:$0xff] %v10004_v48  ;;  %761 = vperm.xlu0 %9091, %v634_v36  }
 0x1e3   : > { %v10002_v41 = vpop.permute.xlu1 %1538 }
 0x1e4   : > { %11716 = vst [vmem:[#allocation48_spill] sm:$0xff] %v10002_v41  ;;  %756 = vperm.xlu1 %9092, %v633_v17   ;;  %v10008_v58 = vpop.permute.xlu0 %2100  ;;  %v893_v17 = vld [vmem:[#allocation2 + $0xb1] sm:$0xff] }
 0x1e5   : > { %1006 = vperm.xlu0 %9091, %v890_v54   ;;  %v1479_v54 = vld [vmem:[#allocation2 + $0x92] sm:$0xff] }
 0x1e7   : > { %v10006_v55 = vpop.permute.xlu1 %2095 }
 0x1e8   : > { %1001 = vperm.xlu1 %9092, %v889_v49   ;;  %v10012_v9 = vpop.permute.xlu0 %2110  ;;  %v11677_v49 = vmov 0.0|0.0  }
 0x1e9   : > { %1016 = vperm.xlu0 %9091, %v892_v0   ;;  %8718 = vmatprep.subr.bf16.mxu0 %v11677_v49 }
 0x1ea   : > { %8721 = vmatprep.subr.bf16.mxu1 %v11677_v49  ;;  %v2066_v49 = vld [vmem:[#allocation2 + $0x6c] sm:$0xff] }
 0x1eb   : > { %v10010_v42 = vpop.permute.xlu1 %2105 }
 0x1ec   : > { %1011 = vperm.xlu1 %9092, %v891_v6   ;;  %v10016_v36 = vpop.permute.xlu0 %1252 }
 0x1ed   : > { %11718 = vst [vmem:[#allocation50_spill] sm:$0xff] %v10016_v36  ;;  %1573 = vperm.xlu0 %9091, %v9922_v2   ;;  %v2653_v36 = vld [vmem:[#allocation2 + $0x55] sm:$0xff] }
 0x1ef   : > { %v10014_v33 = vpop.permute.xlu1 %2115 }
 0x1f0   : > { %1021 = vperm.xlu1 %9092, %v893_v17   ;;  %v10024_v0 = vpop.permute.xlu0 %1262  ;;  %v1480_v17 = vld [vmem:[#allocation2 + $0x9a] sm:$0xff] }
 0x1f1   : > { %11720 = vst [vmem:[#allocation52_spill] sm:$0xff] %v10024_v0  ;;  %1583 = vperm.xlu0 %9091, %v1479_v54  }
 0x1f3   : > { %v10021_v6 = vpop.permute.xlu1 %1257 }
 0x1f4   : > { %11719 = vst [vmem:[#allocation51_spill] sm:$0xff] %v10021_v6  ;;  %1578 = vperm.xlu1 %9092, %v9929_v5   ;;  %v10028_v2 = vpop.permute.xlu0 %1272  ;;  %v596_v5 = vld [vmem:[%s9818_s29 + $0xc0] sm:$0xff] }
 0x1f5   : > { %11722 = vst [vmem:[#allocation54_spill] sm:$0xff] %v10028_v2  ;;  %2140 = vperm.xlu0 %9091, %v9948_v28   ;;  %598 = vst.msk [vmem:[#allocation2 + $0xeb] sm:$0xff] %vm479_vm0, %v596_v5  ;;  %v2068_v2 = vld [vmem:[#allocation2 + $0x7c] sm:$0xff]  ;;  %v600_v28 = vld [vmem:[%s9818_s29 + $0xd0] sm:$0xff] }
 0x1f6   : > { %602 = vst.msk [vmem:[#allocation2 + $0xfd] sm:$0xff] %vm479_vm0, %v600_v28 }
 0x1f7   : > { %v10026_v62 = vpop.permute.xlu1 %1267 }
 0x1f8   : > { %11721 = vst [vmem:[#allocation53_spill] sm:$0xff] %v10026_v62  ;;  %1588 = vperm.xlu1 %9092, %v1480_v17   ;;  %v10037_v0 = vpop.permute.xlu0 %1829  ;;  %v597_v62 = vld [vmem:[%s9818_s29 + $0xc8] sm:$0xff] }
 0x1f9   : > { %11724 = vst [vmem:[#allocation56_spill] sm:$0xff] %v10037_v0  ;;  %2150 = vperm.xlu0 %9091, %v2066_v49   ;;  %599 = vst.msk [vmem:[#allocation2 + $0xf3] sm:$0xff] %vm479_vm0, %v597_v62  ;;  %v2655_v62 = vld [vmem:[#allocation2 + $0x65] sm:$0xff] }
 0x1fb   : > { %v10033_v6 = vpop.permute.xlu1 %1824 }
 0x1fc   : > { %11723 = vst [vmem:[#allocation55_spill] sm:$0xff] %v10033_v6  ;;  %2145 = vperm.xlu1 %9092, %v9950_v29   ;;  %v10045_v59 = vpop.permute.xlu0 %1839  ;;  %v2652_v29 = vld [vmem:[#allocation2 + $0x4d] sm:$0xff] }
 0x1fd   : > { %11726 = vst [vmem:[#allocation58_spill] sm:$0xff] %v10045_v59  ;;  %2160 = vperm.xlu0 %9091, %v2068_v2  }
 0x1ff   : > { %v10042_v25 = vpop.permute.xlu1 %1834 }
 0x200   : > { %11725 = vst [vmem:[#allocation57_spill] sm:$0xff] %v10042_v25  ;;  %2155 = vperm.xlu1 %9092, %v2067_v32   ;;  %v10050_v5 = vpop.permute.xlu0 %2396  ;;  %v10060_v25 = vld [vmem:[#allocation2 + $0xa2] sm:$0xff] }
 0x201   : > { %2717 = vperm.xlu0 %9091, %v2653_v36  }
 0x203   : > { %v10048_v52 = vpop.permute.xlu1 %2391 }
 0x204   : > { %2712 = vperm.xlu1 %9092, %v2652_v29   ;;  %v10054_v46 = vpop.permute.xlu0 %2406  ;;  %v10062_v29 = vld [vmem:[#allocation2 + $0xaa] sm:$0xff] }
 0x205   : > { %2727 = vperm.xlu0 %9091, %v2655_v62   ;;  %v1773_v62 = vld [vmem:[#allocation2 + $0x83] sm:$0xff] }
 0x207   : > { %v10052_v50 = vpop.permute.xlu1 %2401 }
 0x208   : > { %2722 = vperm.xlu1 %9092, %v2654_v24   ;;  %v10058_v28 = vpop.permute.xlu0 %721  ;;  %v10070_v24 = vld [vmem:[#allocation2 + $0xb2] sm:$0xff] }
 0x209   : > { %11727 = vst [vmem:[#allocation59_spill] sm:$0xff] %v10058_v28  ;;  %1302 = vperm.xlu0 %9091, %v1480_v17   ;;  %v1774_v17 = vld [vmem:[#allocation2 + $0x8b] sm:$0xff]  ;;  %v1775_v28 = vld [vmem:[#allocation2 + $0x93] sm:$0xff] }
 0x20b   : > { %v10056_v59 = vpop.permute.xlu1 %2411 }
 0x20c   : > { %1297 = vperm.xlu1 %9092, %v1479_v54   ;;  %v10067_v36 = vpop.permute.xlu0 %731 }
 0x20d   : > { %11729 = vst [vmem:[#allocation61_spill] sm:$0xff] %v10067_v36  ;;  %1312 = vperm.xlu0 %9091, %v10062_v29   ;;  %v1776_v36 = vld [vmem:[#allocation2 + $0x9b] sm:$0xff] }
 0x20f   : > { %v10064_v48 = vpop.permute.xlu1 %726 }
 0x210   : > { %11728 = vst [vmem:[#allocation60_spill] sm:$0xff] %v10064_v48  ;;  %1307 = vperm.xlu1 %9092, %v10060_v25   ;;  %v10075_v54 = vpop.permute.xlu0 %981 }
 0x211   : > { %11731 = vst [vmem:[#allocation63_spill] sm:$0xff] %v10075_v54  ;;  %1869 = vperm.xlu0 %9091, %v1773_v62   ;;  %v10089_v62 = vld [vmem:[#allocation2 + $0x84] sm:$0xff] }
 0x213   : > { %v10072_v41 = vpop.permute.xlu1 %736 }
 0x214   : > { %11730 = vst [vmem:[#allocation62_spill] sm:$0xff] %v10072_v41  ;;  %1317 = vperm.xlu1 %9092, %v10070_v24   ;;  %v10079_v48 = vpop.permute.xlu0 %991 }
 0x215   : > { %11733 = vst [vmem:[#allocation65_spill] sm:$0xff] %v10079_v48  ;;  %1879 = vperm.xlu0 %9091, %v1775_v28   ;;  %v2951_v48 = vld [vmem:[#allocation2 + $0x66] sm:$0xff] }
 0x217   : > { %v10077_v0 = vpop.permute.xlu1 %986 }
 0x218   : > { %11732 = vst [vmem:[#allocation64_spill] sm:$0xff] %v10077_v0  ;;  %1874 = vperm.xlu1 %9092, %v1774_v17   ;;  %v10083_v44 = vpop.permute.xlu0 %1548  ;;  %v10091_v0 = vld [vmem:[#allocation2 + $0x8c] sm:$0xff] }
 0x219   : > { %11735 = vst [vmem:[#allocation67_spill] sm:$0xff] %v10083_v44  ;;  %2436 = vperm.xlu0 %9091, %v2066_v49   ;;  %v2949_v49 = vld [vmem:[#allocation2 + $0x56] sm:$0xff] }
 0x21b   : > { %v10081_v7 = vpop.permute.xlu1 %996 }
 0x21c   : > { %11734 = vst [vmem:[#allocation66_spill] sm:$0xff] %v10081_v7  ;;  %1884 = vperm.xlu1 %9092, %v1776_v36   ;;  %v10087_v54 = vpop.permute.xlu0 %1558  ;;  %v2948_v36 = vld [vmem:[#allocation2 + $0x4e] sm:$0xff] }
 0x21d   : > { %11737 = vst [vmem:[#allocation69_spill] sm:$0xff] %v10087_v54  ;;  %2446 = vperm.xlu0 %9091, %v2068_v2   ;;  %v2950_v2 = vld [vmem:[#allocation2 + $0x5e] sm:$0xff] }
 0x21f   : > { %v10085_v41 = vpop.permute.xlu1 %1553 }
 0x220   : > { %11736 = vst [vmem:[#allocation68_spill] sm:$0xff] %v10085_v41  ;;  %2441 = vperm.xlu1 %9092, %v2067_v32   ;;  %v10096_v28 = vpop.permute.xlu0 %1568  ;;  %v635_v41 = vld [vmem:[#allocation2 + $0xb8] sm:$0xff] }
 0x221   : > { %11739 = vst [vmem:[#allocation71_spill] sm:$0xff] %v10096_v28  ;;  %2456 = vperm.xlu0 %9091, %v10091_v0   ;;  %v636_v28 = vld [vmem:[#allocation2 + $0xc0] sm:$0xff] }
 0x223   : > { %v10093_v17 = vpop.permute.xlu1 %1563 }
 0x224   : > { %11738 = vst [vmem:[#allocation70_spill] sm:$0xff] %v10093_v17  ;;  %2451 = vperm.xlu1 %9092, %v10089_v62   ;;  %v10101_v32 = vpop.permute.xlu0 %2125 }
 0x225   : > { %11741 = vst [vmem:[#allocation73_spill] sm:$0xff] %v10101_v32  ;;  %3013 = vperm.xlu0 %9091, %v2949_v49  }
 0x227   : > { %v10099_v7 = vpop.permute.xlu1 %2120 }
 0x228   : > { %11740 = vst [vmem:[#allocation72_spill] sm:$0xff] %v10099_v7  ;;  %3008 = vperm.xlu1 %9092, %v2948_v36   ;;  %v10105_v17 = vpop.permute.xlu0 %2135  ;;  %v637_v36 = vld [vmem:[#allocation2 + $0xc8] sm:$0xff]  ;;  %v638_v7 = vld [vmem:[#allocation2 + $0xd0] sm:$0xff] }
 0x229   : > { %11743 = vst [vmem:[#allocation75_spill] sm:$0xff] %v10105_v17  ;;  %3023 = vperm.xlu0 %9091, %v2951_v48  }
 0x22b   : > { %v10103_v54 = vpop.permute.xlu1 %2130 }
 0x22c   : > { %11742 = vst [vmem:[#allocation74_spill] sm:$0xff] %v10103_v54  ;;  %3018 = vperm.xlu1 %9092, %v2950_v2   ;;  %v10109_v6 = vpop.permute.xlu0 %2692  ;;  %v894_v2 = vld [vmem:[#allocation2 + $0xb9] sm:$0xff]  ;;  %v895_v54 = vld [vmem:[#allocation2 + $0xc1] sm:$0xff] }
 0x22d   : > { %771 = vperm.xlu0 %9091, %v636_v28  }
 0x22f   : > { %v10107_v44 = vpop.permute.xlu1 %2687 }
 0x230   : > { %766 = vperm.xlu1 %9092, %v635_v41   ;;  %v10113_v49 = vpop.permute.xlu0 %2702  ;;  %v896_v41 = vld [vmem:[#allocation2 + $0xc9] sm:$0xff] }
 0x231   : > { %781 = vperm.xlu0 %9091, %v638_v7  }
 0x233   : > { %v10111_v32 = vpop.permute.xlu1 %2697 }
 0x234   : > { %776 = vperm.xlu1 %9092, %v637_v36   ;;  %v10117_v48 = vpop.permute.xlu0 %1277  ;;  %v10123_v36 = vld [vmem:[#allocation9] ss:$0 sm:$0xff] }
 0x235   : > { %11744 = vst [vmem:[#allocation76_spill] sm:$0xff] %v10117_v48  ;;  %1031 = vperm.xlu0 %9091, %v895_v54   ;;  %v835_v54 = vmul.f32 %v10123_v36, %v9858_v14  ;;  %v1096_v14 = vmul.f32 %v10125_v13, %v9866_v19  ;;  %v10157_v48 = vld [vmem:[#allocation2 + $0xc2] sm:$0xff]  ;;  %v836_v19 = vmul.f32 %v10123_v36, %v9862_v16 }
 0x237   : > { %v10115_v17 = vpop.permute.xlu1 %2707 }
 0x238   : > { %1026 = vperm.xlu1 %9092, %v894_v2   ;;  %v10121_v28 = vpop.permute.xlu0 %1287 }
 0x239   : > { %11746 = vst [vmem:[#allocation78_spill] sm:$0xff] %v10121_v28  ;;  %1041 = vperm.xlu0 %9091, %v897_v4   ;;  %v10137_v28 = vld [vmem:[#allocation2 + $0xba] sm:$0xff]  ;;  %v11749_v4 = vmov 0.0  }
 0x23a   : > { %8246 = vmatprep.mubr.msk.f32.mxu0 %vm9411_vm2, %v11749_v4  ;;  %8253 = vmatprep.mubr.msk.f32.mxu1 %vm9411_vm2, %v11749_v4  ;;  %541 = vst.msk [vmem:[#allocation6] sm:$0xff] %vm540_vm5, %v11749_v4  ;;  %542 = vst.msk [vmem:[#allocation6 + $0x8] sm:$0xff] %vm540_vm5, %v11749_v4 }
 0x23b   : > { %v10119_v43 = vpop.permute.xlu1 %1282  ;;  %543 = vst.msk [vmem:[#allocation6 + $0x10] sm:$0xff] %vm540_vm5, %v11749_v4  ;;  %544 = vst.msk [vmem:[#allocation6 + $0x18] sm:$0xff] %vm540_vm5, %v11749_v4 }
 0x23c   : > { %11745 = vst [vmem:[#allocation77_spill] sm:$0xff] %v10119_v43  ;;  %1036 = vperm.xlu1 %9092, %v896_v41   ;;  %v10130_v2 = vpop.permute.xlu0 %1844  ;;  %v1095_v41 = vmul.f32 %v10125_v13, %v9860_v15  ;;  %v1097_v15 = vmul.f32 %v10125_v13, %v9872_v26  ;;  %v10154_v43 = vld [vmem:[#allocation9 + $0x3] ss:$0 sm:$0xff]  ;;  %v837_v26 = vmul.f32 %v10123_v36, %v9864_v18  ;;  %545 = vst.msk [vmem:[#allocation6 + $0x20] sm:$0xff] %vm540_vm5, %v11749_v4 }
 0x23d   : > { %11748 = vst [vmem:[#allocation80_spill] sm:$0xff] %v10130_v2  ;;  %1598 = vperm.xlu0 %9091, %v10062_v29   ;;  %v1687_v18 = vmul.f32 %v10154_v43, %v9910_v56 }
 0x23e   : > { %v1131_v2 = vadd.f32 %v1095_v41, %v835_v54  ;;  %v10173_v41 = vld [vmem:[#allocation9 + $0x4] ss:$0 sm:$0xff]  ;;  %v1133_v10 = vadd.f32 %v1097_v15, %v837_v26 }
 0x23f   : > { %v10127_v7 = vpop.permute.xlu1 %1292  ;;  %v1983_v56 = vmul.f32 %v10173_v41, %v9934_v8  ;;  %v2279_v8 = vmul.f32 %v10192_v51, %v10006_v55 }
 0x240   : > { %11747 = vst [vmem:[#allocation79_spill] sm:$0xff] %v10127_v7  ;;  %1593 = vperm.xlu1 %9092, %v10060_v25   ;;  %v10143_v25 = vld [vmem:[#allocation9 + $0x2] ss:$0 sm:$0xff]  ;;  %v10148_v29 = vpop.permute.xlu0 %1854 }
 0x241   : > { %11751 = vst [vmem:[#allocation82_spill] sm:$0xff] %v10148_v29  ;;  %1608 = vperm.xlu0 %9091, %v10137_v28   ;;  %v1391_v29 = vmul.f32 %v10143_v25, %v9878_v31  ;;  %v1392_v53 = vmul.f32 %v10143_v25, %v9880_v34  ;;  %v1393_v54 = vmul.f32 %v10143_v25, %v9882_v35 }
 0x242   : > { %v839_v31 = vmul.f32 %v10123_v36, %v9870_v23  ;;  %v1394_v16 = vmul.f32 %v10143_v25, %v9884_v37  ;;  %v1132_v35 = vadd.f32 %v1096_v14, %v836_v19  ;;  %v10203_v19 = vld [vmem:[#allocation9 + $0x6] ss:$0 sm:$0xff] }
 0x243   : > { %v10145_v7 = vpop.permute.xlu1 %1849  ;;  %v1427_v3 = vadd.f32 %v1391_v29, %v1131_v2  ;;  %v1429_v15 = vadd.f32 %v1393_v54, %v1133_v10  ;;  %v1690_v2 = vmul.f32 %v10154_v43, %v9916_v61  ;;  %v2280_v29 = vmul.f32 %v10192_v51, %v10008_v58  ;;  %v10221_v61 = vld [vmem:[#allocation2 + $0x9c] sm:$0xff]  ;;  %v2656_v54 = vld [vmem:[#allocation2 + $0x6d] sm:$0xff] }
 0x244   : > { %11750 = vst [vmem:[#allocation81_spill] sm:$0xff] %v10145_v7  ;;  %1603 = vperm.xlu1 %9092, %v10070_v24   ;;  %v1098_v7 = vmul.f32 %v10125_v13, %v9874_v27  ;;  %v1099_v24 = vmul.f32 %v10125_v13, %v9876_v30  ;;  %v838_v30 = vmul.f32 %v10123_v36, %v9868_v22  ;;  %v10186_v34 = vpop.permute.xlu0 %1864 }
 0x245   : > { %v1688_v22 = vmul.f32 %v10154_v43, %v9912_v57  ;;  %2165 = vperm.xlu0 %9091, %v10089_v62   ;;  %v1428_v14 = vadd.f32 %v1392_v53, %v1132_v35  ;;  %v1984_v57 = vmul.f32 %v10173_v41, %v9936_v11  ;;  %v1691_v11 = vmul.f32 %v10154_v43, %v9918_v63 }
 0x246   : > { %v1134_v23 = vadd.f32 %v1098_v7, %v838_v30  ;;  %v1135_v37 = vadd.f32 %v1099_v24, %v839_v31  ;;  %v1723_v7 = vadd.f32 %v1687_v18, %v1427_v3  ;;  %v10218_v3 = vld [vmem:[#allocation9 + $0x7] ss:$0 sm:$0xff]  ;;  %v1986_v24 = vmul.f32 %v10173_v41, %v9940_v20  ;;  %v601_v18 = vld [vmem:[%s9818_s29 + $0xd8] sm:$0xff] }
 0x247   : > { %v10175_v27 = vpop.permute.xlu1 %1859  ;;  %v1724_v10 = vadd.f32 %v1688_v22, %v1428_v14  ;;  %v2575_v63 = vmul.f32 %v10203_v19, %v10048_v52  ;;  %v1987_v30 = vmul.f32 %v10173_v41, %v9942_v21  ;;  %v2576_v31 = vmul.f32 %v10203_v19, %v10050_v5  ;;  %603 = vst.msk [vmem:[#allocation2 + $0x105] sm:$0xff] %vm479_vm0, %v601_v18  ;;  %v604_v21 = vld [vmem:[%s9818_s29 + $0xe0] sm:$0xff]  ;;  %v2657_v14 = vld [vmem:[#allocation2 + $0x75] sm:$0xff] }
 0x248   : > { %11752 = vst [vmem:[#allocation83_spill] sm:$0xff] %v10175_v27  ;;  %1613 = vperm.xlu1 %9092, %v10157_v48   ;;  %v1395_v27 = vmul.f32 %v10143_v25, %v9886_v38  ;;  %v1689_v38 = vmul.f32 %v10154_v43, %v9914_v60  ;;  %v1430_v62 = vadd.f32 %v1394_v16, %v1134_v23  ;;  %v10212_v53 = vpop.permute.xlu0 %2421  ;;  %606 = vst.msk [vmem:[#allocation2 + $0x10f] sm:$0xff] %vm479_vm0, %v604_v21  ;;  %v10268_v18 = vld [vmem:[#allocation13] ss:$0 sm:$0xff] }
 0x249   : > { %2175 = vperm.xlu0 %9091, %v10197_v40   ;;  %v2019_v55 = vadd.f32 %v1983_v56, %v1723_v7  ;;  %v2020_v58 = vadd.f32 %v1984_v57, %v1724_v10  ;;  %v2281_v20 = vmul.f32 %v10192_v51, %v10010_v42  ;;  %v2871_v52 = vmul.f32 %v10218_v3, %v10107_v44  ;;  %v10249_v42 = vld [vmem:[#allocation9 + $0x8] ss:$0 sm:$0xff] }
 0x24a   : > { %v1431_v60 = vadd.f32 %v1395_v27, %v1135_v37  ;;  %v1725_v27 = vadd.f32 %v1689_v38, %v1429_v15  ;;  %v2282_v37 = vmul.f32 %v10192_v51, %v10012_v9  ;;  %v2872_v56 = vmul.f32 %v10218_v3, %v10109_v6 }
 0x24b   : > { %v10205_v26 = vpop.permute.xlu1 %2416  ;;  %v2315_v35 = vadd.f32 %v2279_v8, %v2019_v55  ;;  %v2316_v5 = vadd.f32 %v2280_v29, %v2020_v58  ;;  %v2577_v57 = vmul.f32 %v10203_v19, %v10052_v50  ;;  %v2283_v9 = vmul.f32 %v10192_v51, %v10014_v33  ;;  %v10263_v33 = vld [vmem:[#allocation11] ss:$0 sm:$0xff]  ;;  %v2660_v58 = vld [vmem:[#allocation2 + $0x8d] sm:$0xff] }
 0x24c   : > { %2170 = vperm.xlu1 %9092, %v10091_v0   ;;  %v1985_v0 = vmul.f32 %v10173_v41, %v9938_v12  ;;  %v1726_v12 = vadd.f32 %v1690_v2, %v1430_v62  ;;  %v10241_v22 = vpop.permute.xlu0 %2431  ;;  %v1727_v23 = vadd.f32 %v1691_v11, %v1431_v60  ;;  %v2658_v62 = vld [vmem:[#allocation2 + $0x7d] sm:$0xff]  ;;  %v2578_v6 = vmul.f32 %v10203_v19, %v10054_v46  ;;  %v2659_v46 = vld [vmem:[#allocation2 + $0x85] sm:$0xff] }
 0x24d   : > { %2732 = vperm.xlu0 %9091, %v2656_v54   ;;  %v2611_v38 = vadd.f32 %v2575_v63, %v2315_v35  ;;  %v2612_v2 = vadd.f32 %v2576_v31, %v2316_v5  ;;  %v2873_v11 = vmul.f32 %v10218_v3, %v10111_v32 }
 0x24e   : > { %v2021_v44 = vadd.f32 %v1985_v0, %v1725_v27  ;;  %v2022_v15 = vadd.f32 %v1986_v24, %v1726_v12  ;;  %v2023_v7 = vadd.f32 %v1987_v30, %v1727_v23  ;;  %v2874_v24 = vmul.f32 %v10218_v3, %v10113_v49 }
 0x24f   : > { %v10233_v16 = vpop.permute.xlu1 %2426  ;;  %v2907_v10 = vadd.f32 %v2871_v52, %v2611_v38  ;;  %v2908_v0 = vadd.f32 %v2872_v56, %v2612_v2  ;;  %v2579_v27 = vmul.f32 %v10203_v19, %v10056_v59  ;;  %v2875_v49 = vmul.f32 %v10218_v3, %v10115_v17 }
 0x250   : > { %2180 = vperm.xlu1 %9092, %v10221_v61   ;;  %v2317_v60 = vadd.f32 %v2281_v20, %v2021_v44  ;;  %v2989_v55 = vpop.permute.xlu0 %2988  ;;  %v2318_v50 = vadd.f32 %v2282_v37, %v2022_v15  ;;  %v2319_v30 = vadd.f32 %v2283_v9, %v2023_v7 }
 0x251   : > { %v3168_v63 = vmul.f32 %v10249_v42, %v2989_v55  ;;  %2742 = vperm.xlu0 %9091, %v2658_v62  }
 0x252   : > { %v2613_v54 = vadd.f32 %v2577_v57, %v2317_v60  ;;  %v2614_v31 = vadd.f32 %v2578_v6, %v2318_v50  ;;  %v2615_v56 = vadd.f32 %v2579_v27, %v2319_v30  ;;  %v10285_v60 = vld [vmem:[#allocation2 + $0xca] sm:$0xff] }
 0x253   : > { %v2984_v8 = vpop.permute.xlu1 %2983  ;;  %v3204_v12 = vadd.f32 %v3168_v63, %v2908_v0  ;;  %v1778_v27 = vld [vmem:[#allocation2 + $0xab] sm:$0xff] }
 0x254   : > { %v3167_v29 = vmul.f32 %v10249_v42, %v2984_v8  ;;  %2737 = vperm.xlu1 %9092, %v2657_v14   ;;  %v2909_v20 = vadd.f32 %v2873_v11, %v2613_v54  ;;  %v2999_v23 = vpop.permute.xlu0 %2998  ;;  %v2910_v5 = vadd.f32 %v2874_v24, %v2614_v31  ;;  %v2911_v57 = vadd.f32 %v2875_v49, %v2615_v56 }
 0x255   : > { %v3247_v59 = vmul.f32 %v10263_v33, %v3204_v12  ;;  %v3170_v37 = vmul.f32 %v10249_v42, %v2999_v23  ;;  %2752 = vperm.xlu0 %9091, %v2660_v58   ;;  %v3397_v24 = vlaneseq  ;;  %v1779_v12 = vld [vmem:[#allocation2 + $0xb3] sm:$0xff] }
 0x256   : > { %v3203_v32 = vadd.f32 %v3167_v29, %v2907_v10  ;;  %v10289_v29 = vld [vmem:[#allocation2 + $0xd2] sm:$0xff] }
 0x257   : > { %v2994_v35 = vpop.permute.xlu1 %2993  ;;  %v3290_v15 = vadd.f32 %v10268_v18, %v3247_v59  ;;  %v3206_v38 = vadd.f32 %v3170_v37, %v2910_v5  ;;  %v3398_v31 = vshrl.u32 %v3397_v24, 7  ;;  %v3400_v59 = vand.u32 127, %v3397_v24 }
 0x258   : > { %v3246_v52 = vmul.f32 %v10263_v33, %v3203_v32  ;;  %v3169_v21 = vmul.f32 %v10249_v42, %v2994_v35  ;;  %2747 = vperm.xlu1 %9092, %v2659_v46   ;;  %v10281_v2 = vpop.permute.xlu0 %741  ;;  %v1777_v46 = vld [vmem:[#allocation2 + $0xa3] sm:$0xff]  ;;  %v1780_v35 = vld [vmem:[#allocation2 + $0xbb] sm:$0xff] }
 0x259   : > { %11753 = vst [vmem:[#allocation84_spill] sm:$0xff] %v10281_v2  ;;  %v3326_v6 = vmax.f32 %v3290_v15, 0.0  ;;  %v3249_v8 = vmul.f32 %v10263_v33, %v3206_v38  ;;  %1327 = vperm.xlu0 %9091, %v10157_v48   ;;  %v10317_v38 = vld [vmem:[#allocation2 + $0xa4] sm:$0xff]  ;;  %v11786_v2 = vld [vmem:[#allocation56_spill] sm:$0xff] }
 0x25a   : > { %v3289_v14 = vadd.f32 %v10268_v18, %v3246_v52  ;;  %v3205_v44 = vadd.f32 %v3169_v21, %v2909_v20  ;;  %v3401_v52 = vmul.u32 2, %v3398_v31  ;;  %v1781_v21 = vld [vmem:[#allocation2 + $0xc3] sm:$0xff]  ;;  %v639_v31 = vld [vmem:[#allocation2 + $0xd8] sm:$0xff] }
 0x25b   : > { %v3004_v17 = vpop.permute.xlu1 %3003  ;;  %3362 = vst.msk [vmem:[#allocation3 + $0x8] sm:$0xff] %vm524_vm1, %v3326_v6  ;;  %v10325_v6 = vld [vmem:[#allocation2 + $0xac] sm:$0xff] }
 0x25c   : > { %v3325_v62 = vmax.f32 %v3289_v14, 0.0  ;;  %v3248_v7 = vmul.f32 %v10263_v33, %v3205_v44  ;;  %v3171_v9 = vmul.f32 %v10249_v42, %v3004_v17  ;;  %1322 = vperm.xlu1 %9092, %v10137_v28   ;;  %v3292_v28 = vadd.f32 %v10268_v18, %v3249_v8  ;;  %v10297_v48 = vpop.permute.xlu0 %751 }
 0x25d   : > { %11755 = vst [vmem:[#allocation86_spill] sm:$0xff] %v10297_v48  ;;  %1337 = vperm.xlu0 %9091, %v10289_v29   ;;  %v3405_v56 = vadd.s32 1, %v3401_v52  ;;  %vm3402_vm3 = vcmp.eq.s32.totalorder %v3400_v59, %v3401_v52 }
 0x25e   : > { %3361 = vst.msk [vmem:[#allocation3] sm:$0xff] %vm524_vm1, %v3325_v62  ;;  %v3291_v10 = vadd.f32 %v10268_v18, %v3248_v7  ;;  %v3207_v11 = vadd.f32 %v3171_v9, %v2911_v57  ;;  %v3328_v63 = vmax.f32 %v3292_v28, 0.0  ;;  %v10328_v8 = vsel %vm3402_vm3, 1.0, %v11749_v4 }
 0x25f   : > { %v10293_v55 = vpop.permute.xlu1 %746  ;;  %vm3406_vm4 = vcmp.eq.s32.totalorder %v3400_v59, %v3405_v56 }
 0x260   : > { %11754 = vst [vmem:[#allocation85_spill] sm:$0xff] %v10293_v55  ;;  %v3327_v50 = vmax.f32 %v3291_v10, 0.0  ;;  %v3250_v0 = vmul.f32 %v10263_v33, %v3207_v11  ;;  %1332 = vperm.xlu1 %9092, %v10285_v60   ;;  %3364 = vst.msk [vmem:[#allocation3 + $0x18] sm:$0xff] %vm524_vm1, %v3328_v63  ;;  %v10305_v30 = vpop.permute.xlu0 %761  ;;  %v11764_v11 = vmov 0.0|0.0   ;;  %v11785_v55 = vld [vmem:[#allocation35_spill] sm:$0xff] }
 0x261   : > { %11757 = vst [vmem:[#allocation88_spill] sm:$0xff] %v10305_v30  ;;  %1894 = vperm.xlu0 %9091, %v1778_v27  }
 0x262   : > { %3363 = vst.msk [vmem:[#allocation3 + $0x10] sm:$0xff] %vm524_vm1, %v3327_v50  ;;  %v3293_v54 = vadd.f32 %v10268_v18, %v3250_v0  ;;  %v3410_v44 = vld [vmem:[#allocation3 + $0x8] sm:$0xff]  ;;  %v2953_v50 = vld [vmem:[#allocation2 + $0x76] sm:$0xff] }
 0x263   : > { %v10303_v32 = vpop.permute.xlu1 %756  ;;  %v2954_v0 = vld [vmem:[#allocation2 + $0x7e] sm:$0xff] }
 0x264   : > { %11756 = vst [vmem:[#allocation87_spill] sm:$0xff] %v10303_v32  ;;  %v3329_v58 = vmax.f32 %v3293_v54, 0.0  ;;  %1889 = vperm.xlu1 %9092, %v1777_v46   ;;  %v10310_v49 = vpop.permute.xlu0 %1006  ;;  %v2955_v46 = vld [vmem:[#allocation2 + $0x86] sm:$0xff]  ;;  %v2956_v54 = vld [vmem:[#allocation2 + $0x8e] sm:$0xff] }
 0x265   : > { %11759 = vst [vmem:[#allocation90_spill] sm:$0xff] %v10310_v49  ;;  %1904 = vperm.xlu0 %9091, %v1780_v35   ;;  %v3409_v14 = vld [vmem:[#allocation3] sm:$0xff]  ;;  %v11783_v49 = vld [vmem:[#allocation55_spill] sm:$0xff] }
 0x266   : > { %3365 = vst.msk [vmem:[#allocation3 + $0x20] sm:$0xff] %vm524_vm1, %v3329_v58 }
 0x267   : > { %v10308_v20 = vpop.permute.xlu1 %1001 }
 0x268   : > { %11758 = vst [vmem:[#allocation89_spill] sm:$0xff] %v10308_v20  ;;  %1899 = vperm.xlu1 %9092, %v1779_v12   ;;  %v10314_v37 = vpop.permute.xlu0 %1016  ;;  %v640_v12 = vld [vmem:[#allocation2 + $0xe0] sm:$0xff]  ;;  %v1989_v20 = vmul.f32 %v10173_v41, %v11786_v2 }
 0x269   : > { %v3411_v5 = vld [vmem:[#allocation3 + $0x12] sm:$0xff]  ;;  %11761 = vst [vmem:[#allocation92_spill] sm:$0xff] %v10314_v37  ;;  %2461 = vperm.xlu0 %9091, %v10197_v40   ;;  %v11790_v2 = vld [vmem:[#allocation73_spill] sm:$0xff] }
 0x26a   : > { %v3413_v17 = vmax.f32 %v3409_v14, %v3411_v5  ;;  %v2952_v40 = vld [vmem:[#allocation2 + $0x6e] sm:$0xff]  ;;  %v643_v14 = vld [vmem:[#allocation2 + $0xf8] sm:$0xff] }
 0x26b   : > { %v10312_v23 = vpop.permute.xlu1 %1011  ;;  %v642_v5 = vld [vmem:[#allocation2 + $0xf0] sm:$0xff] }
 0x26c   : > { %11760 = vst [vmem:[#allocation91_spill] sm:$0xff] %v10312_v23  ;;  %1909 = vperm.xlu1 %9092, %v1781_v21   ;;  %v10322_v7 = vpop.permute.xlu0 %1573  ;;  %v641_v21 = vld [vmem:[#allocation2 + $0xe8] sm:$0xff] }
 0x26d   : > { %v3412_v15 = vld [vmem:[#allocation3 + $0x1a] sm:$0xff]  ;;  %2471 = vperm.xlu0 %9091, %v10317_v38  }
 0x26e   : > { %v3414_v57 = vmax.f32 %v3410_v44, %v3412_v15  ;;  %v898_v44 = vld [vmem:[#allocation2 + $0xd9] sm:$0xff]  ;;  %v11780_v23 = vld [vmem:[#allocation47_spill] sm:$0xff] }
 0x26f   : > { %v10319_v62 = vpop.permute.xlu1 %1021  ;;  %v1693_v32 = vmul.f32 %v10154_v43, %v11780_v23 }
 0x270   : > { %11762 = vst [vmem:[#allocation93_spill] sm:$0xff] %v10319_v62  ;;  %2466 = vperm.xlu1 %9092, %v10221_v61   ;;  %v8719_v9 = vpack.c.bf16 %v3414_v57, %v3413_v17  ;;  %v10335_v61 = vsel %vm3406_vm4, 1.0, %v11749_v4  ;;  %v10338_v28 = vpop.permute.xlu0 %1583  ;;  %v899_v57 = vld [vmem:[#allocation2 + $0xe1] sm:$0xff]  ;;  %v11777_v62 = vld [vmem:[#allocation31_spill] sm:$0xff] }
 0x271   : > { %11765 = vst [vmem:[#allocation95_spill] sm:$0xff] %v10338_v28  ;;  %3028 = vperm.xlu0 %9091, %v2952_v40   ;;  %v1102_v30 = vmul.f32 %v10125_v13, %v11777_v62  ;;  %v11781_v62 = vld [vmem:[#allocation29_spill] sm:$0xff] }
 0x272   : > { %8720 = vmatpush3.bf16.msra.mxu0 %v8719_v9  ;;  %8723 = vmatpush3.bf16.msra.mxu1 %v8719_v9  ;;  %v900_v9 = vld [vmem:[#allocation2 + $0xe9] sm:$0xff] }
 0x273   : > { %v10330_v10 = vpop.permute.xlu1 %1578  ;;  %8724 = vmatprep.subr.bf16.mxu0 %v11764_v11  ;;  %8727 = vmatprep.subr.bf16.mxu1 %v11764_v11 }
 0x274   : > { %11763 = vst [vmem:[#allocation94_spill] sm:$0xff] %v10330_v10  ;;  %2476 = vperm.xlu1 %9092, %v10325_v6   ;;  %v10350_v63 = vpop.permute.xlu0 %2140 }
 0x275   : > { %8247 = vmatmul.mubr.msk.f32.vlgmr.msra.gmra.mrb[0].mxu0 %vm524_vm1, %v10328_v8  ;;  %8254 = vmatmul.mubr.msk.f32.vlgmr.msra.gmra.mrb[0].mxu1 %vm524_vm1, %v10335_v61 }
 0x276   : > { %8260 = vmatprep.mubr.msk.f32.mxu0 %vm9411_vm2, %v11749_v4  ;;  %8267 = vmatprep.mubr.msk.f32.mxu1 %vm9411_vm2, %v11749_v4 }
 0x277   : > { %v10346_v24 = vpop.permute.xlu1 %1588  ;;  %3038 = vperm.xlu0 %9091, %v2954_v0   ;;  %v901_v0 = vld [vmem:[#allocation2 + $0xf1] sm:$0xff] }
 0x278   : > { %11766 = vst [vmem:[#allocation96_spill] sm:$0xff] %v10346_v24  ;;  %3033 = vperm.xlu1 %9092, %v2953_v50   ;;  %v10354_v58 = vpop.permute.xlu0 %2150 }
 0x27b   : > { %v10352_v27 = vpop.permute.xlu1 %2145  ;;  %3048 = vperm.xlu0 %9091, %v2956_v54  }
 0x27c   : > { %3043 = vperm.xlu1 %9092, %v2955_v46   ;;  %v10358_v52 = vpop.permute.xlu0 %2160  ;;  %v902_v46 = vld [vmem:[#allocation2 + $0xf9] sm:$0xff] }
 0x27f   : > { %v10356_v35 = vpop.permute.xlu1 %2155  ;;  %791 = vperm.xlu0 %9091, %v640_v12  }
 0x280   : > { %786 = vperm.xlu1 %9092, %v639_v31   ;;  %v10362_v56 = vpop.permute.xlu0 %2717 }
 0x283   : > { %v10360_v59 = vpop.permute.xlu1 %2712  ;;  %801 = vperm.xlu0 %9091, %v642_v5   ;;  %v10382_v5 = vld [vmem:[#allocation2 + $0xda] sm:$0xff] }
 0x284   : > { %796 = vperm.xlu1 %9092, %v641_v21   ;;  %v10366_v17 = vpop.permute.xlu0 %2727 }
 0x287   : > { %v10364_v15 = vpop.permute.xlu1 %2722  ;;  %1046 = vperm.xlu0 %9091, %v898_v44  }
 0x288   : > { %806 = vperm.xlu1 %9092, %v643_v14   ;;  %v10370_v50 = vpop.permute.xlu0 %1302  ;;  %v10384_v14 = vld [vmem:[#allocation2 + $0xe2] sm:$0xff] }
 0x289   : > { %11768 = vst [vmem:[#allocation98_spill] sm:$0xff] %v10370_v50 }
 0x28b   : > { %v10368_v40 = vpop.permute.xlu1 %1297  ;;  %1056 = vperm.xlu0 %9091, %v900_v9  }
 0x28c   : > { %11767 = vst [vmem:[#allocation97_spill] sm:$0xff] %v10368_v40  ;;  %1051 = vperm.xlu1 %9092, %v899_v57   ;;  %v10374_v31 = vpop.permute.xlu0 %1312  ;;  %v1100_v57 = vmul.f32 %v10125_v13, %v9896_v45  ;;  %v608_v40 = vld [vmem:[%s9818_s29 + $0xf0] sm:$0xff] }
 0x28d   : > { %11770 = vst [vmem:[#allocation100_spill] sm:$0xff] %v10374_v31  ;;  %v11775_v31 = vld [vmem:[#allocation33_spill] sm:$0xff]  ;;  %610 = vst.msk [vmem:[#allocation2 + $0x121] sm:$0xff] %vm479_vm0, %v608_v40  ;;  %v1988_v40 = vmul.f32 %v10173_v41, %v11783_v49  ;;  %v11788_v49 = vld [vmem:[#allocation72_spill] sm:$0xff] }
 0x28e   : > { %v2284_v24 = vmul.f32 %v10192_v51, %v11788_v49  ;;  %v2580_v49 = vmul.f32 %v10203_v19, %v10205_v26 }
 0x28f   : > { %v10372_v54 = vpop.permute.xlu1 %1307  ;;  %1066 = vperm.xlu0 %9091, %v902_v46   ;;  %v1396_v46 = vmul.f32 %v10143_v25, %v9920_v1 }
 0x290   : > { %11769 = vst [vmem:[#allocation99_spill] sm:$0xff] %v10372_v54  ;;  %1061 = vperm.xlu1 %9092, %v901_v0   ;;  %v10379_v21 = vpop.permute.xlu0 %1869  ;;  %v605_v0 = vld [vmem:[%s9818_s29 + $0xe8] sm:$0xff]  ;;  %v1397_v54 = vmul.f32 %v10143_v25, %v11775_v31 }
 0x291   : > { %607 = vst.msk [vmem:[#allocation2 + $0x117] sm:$0xff] %vm479_vm0, %v605_v0  ;;  %v11778_v0 = vld [vmem:[#allocation46_spill] sm:$0xff] }
 0x292   : > { %v1692_v37 = vmul.f32 %v10154_v43, %v11778_v0 }
 0x293   : > { %v10376_v12 = vpop.permute.xlu1 %1317  ;;  %1623 = vperm.xlu0 %9091, %v10289_v29   ;;  %v840_v29 = vmul.f32 %v10123_v36, %v9888_v39 }
 0x294   : > { %11771 = vst [vmem:[#allocation101_spill] sm:$0xff] %v10376_v12  ;;  %1618 = vperm.xlu1 %9092, %v10285_v60   ;;  %v10391_v9 = vpop.permute.xlu0 %1879  ;;  %v1101_v60 = vmul.f32 %v10125_v13, %v9899_v47  ;;  %v11774_v12 = vld [vmem:[#allocation28_spill] sm:$0xff] }
 0x295   : > { %11773 = vst [vmem:[#allocation103_spill] sm:$0xff] %v10391_v9  ;;  %v841_v45 = vmul.f32 %v10123_v36, %v11774_v12  ;;  %v1136_v47 = vadd.f32 %v1100_v57, %v840_v29  ;;  %v11779_v12 = vld [vmem:[#allocation32_spill] sm:$0xff]  ;;  %v842_v29 = vmul.f32 %v10123_v36, %v11781_v62 }
 0x296   : > { %v1103_v31 = vmul.f32 %v10125_v13, %v11779_v12  ;;  %v10422_v57 = vld [vmem:[#allocation2 + $0xb4] sm:$0xff] }
 0x297   : > { %v10386_v44 = vpop.permute.xlu1 %1874  ;;  %1633 = vperm.xlu0 %9091, %v10384_v14   ;;  %v1137_v1 = vadd.f32 %v1101_v60, %v841_v45  ;;  %v1432_v0 = vadd.f32 %v1396_v46, %v1136_v47  ;;  %v10430_v60 = vld [vmem:[#allocation2 + $0xbc] sm:$0xff]  ;;  %v11784_v45 = vld [vmem:[#allocation30_spill] sm:$0xff]  ;;  %v1138_v46 = vadd.f32 %v1102_v30, %v842_v29 }
 0x298   : > { %11772 = vst [vmem:[#allocation102_spill] sm:$0xff] %v10386_v44  ;;  %1628 = vperm.xlu1 %9092, %v10382_v5   ;;  %v10414_v39 = vpop.permute.xlu0 %2436  ;;  %v843_v12 = vmul.f32 %v10123_v36, %v11784_v45  ;;  %v2285_v44 = vmul.f32 %v10192_v51, %v11790_v2  ;;  %v10452_v30 = vld [vmem:[#allocation2 + $0xc4] sm:$0xff]  ;;  %v2581_v2 = vmul.f32 %v10203_v19, %v10212_v53 }
 0x299   : > { %v1433_v23 = vadd.f32 %v1397_v54, %v1137_v1  ;;  %v1728_v47 = vadd.f32 %v1692_v37, %v1432_v0  ;;  %v11791_v0 = vld [vmem:[#allocation57_spill] sm:$0xff]  ;;  %v2877_v53 = vmul.f32 %v10218_v3, %v10362_v56 }
 0x29a   : > { %v1139_v54 = vadd.f32 %v1103_v31, %v843_v12  ;;  %v2661_v31 = vld [vmem:[#allocation2 + $0x95] sm:$0xff] }
 0x29b   : > { %v10406_v50 = vpop.permute.xlu1 %1884  ;;  %2190 = vperm.xlu0 %9091, %v10325_v6   ;;  %v1399_v6 = vmul.f32 %v10143_v25, %v11785_v55  ;;  %v1729_v1 = vadd.f32 %v1693_v32, %v1433_v23  ;;  %v11789_v55 = vld [vmem:[#allocation49_spill] sm:$0xff]  ;;  %v2024_v29 = vadd.f32 %v1988_v40, %v1728_v47  ;;  %v11792_v23 = vld [vmem:[#allocation58_spill] sm:$0xff]  ;;  %v2876_v47 = vmul.f32 %v10218_v3, %v10360_v59 }
 0x29c   : > { %11776 = vst [vmem:[#allocation28_spill] sm:$0xff] %v10406_v50  ;;  %2185 = vperm.xlu1 %9092, %v10317_v38   ;;  %v11782_v38 = vld [vmem:[#allocation34_spill] sm:$0xff]  ;;  %v10445_v45 = vpop.permute.xlu0 %2446  ;;  %v1695_v9 = vmul.f32 %v10154_v43, %v11789_v55  ;;  %v1991_v55 = vmul.f32 %v10173_v41, %v11792_v23 }
 0x29d   : > { %v1398_v48 = vmul.f32 %v10143_v25, %v11782_v38  ;;  %v11787_v38 = vld [vmem:[#allocation48_spill] sm:$0xff]  ;;  %v1435_v32 = vadd.f32 %v1399_v6, %v1139_v54  ;;  %v2025_v12 = vadd.f32 %v1989_v20, %v1729_v1  ;;  %v11793_v40 = vld [vmem:[#allocation74_spill] sm:$0xff]  ;;  %v11794_v54 = vld [vmem:[#allocation75_spill] sm:$0xff] }
 0x29e   : > { %v1694_v50 = vmul.f32 %v10154_v43, %v11787_v38  ;;  %v1990_v38 = vmul.f32 %v10173_v41, %v11791_v0  ;;  %v2287_v1 = vmul.f32 %v10192_v51, %v11794_v54  ;;  %v2663_v59 = vld [vmem:[#allocation2 + $0xa5] sm:$0xff] }
 0x29f   : > { %v10438_v62 = vpop.permute.xlu1 %2441  ;;  %2200 = vperm.xlu0 %9091, %v10430_v60   ;;  %v1434_v37 = vadd.f32 %v1398_v48, %v1138_v46  ;;  %v2320_v48 = vadd.f32 %v2284_v24, %v2024_v29  ;;  %v2286_v46 = vmul.f32 %v10192_v51, %v11793_v40  ;;  %v1731_v20 = vadd.f32 %v1695_v9, %v1435_v32  ;;  %v2662_v24 = vld [vmem:[#allocation2 + $0x9d] sm:$0xff] }
 0x2a0   : > { %2195 = vperm.xlu1 %9092, %v10422_v57   ;;  %v10469_v26 = vpop.permute.xlu0 %2456  ;;  %v2321_v6 = vadd.f32 %v2285_v44, %v2025_v12  ;;  %v2582_v29 = vmul.f32 %v10203_v19, %v10233_v16  ;;  %v2583_v9 = vmul.f32 %v10203_v19, %v10241_v22  ;;  %v2878_v40 = vmul.f32 %v10218_v3, %v10364_v15 }
 0x2a1   : > { %v1730_v10 = vadd.f32 %v1694_v50, %v1434_v37  ;;  %v2616_v37 = vadd.f32 %v2580_v49, %v2320_v48  ;;  %v2027_v0 = vadd.f32 %v1991_v55, %v1731_v20  ;;  %v2879_v16 = vmul.f32 %v10218_v3, %v10366_v17  ;;  %v2664_v55 = vld [vmem:[#allocation2 + $0xad] sm:$0xff] }
 0x2a2   : > { %v2617_v23 = vadd.f32 %v2581_v2, %v2321_v6 }
 0x2a3   : > { %v10462_v28 = vpop.permute.xlu1 %2451  ;;  %2757 = vperm.xlu0 %9091, %v2661_v31   ;;  %v2026_v50 = vadd.f32 %v1990_v38, %v1730_v10  ;;  %v2912_v12 = vadd.f32 %v2876_v47, %v2616_v37  ;;  %v2323_v38 = vadd.f32 %v2287_v1, %v2027_v0  ;;  %v10491_v37 = vld [vmem:[#allocation2 + $0xea] sm:$0xff] }
 0x2a4   : > { %2205 = vperm.xlu1 %9092, %v10452_v30   ;;  %v3014_v10 = vpop.permute.xlu0 %3013  ;;  %v2913_v49 = vadd.f32 %v2877_v53, %v2617_v23 }
 0x2a5   : > { %v2322_v32 = vadd.f32 %v2286_v46, %v2026_v50  ;;  %v3173_v31 = vmul.f32 %v10249_v42, %v3014_v10  ;;  %v2619_v48 = vadd.f32 %v2583_v9, %v2323_v38 }
 0x2a7   : > { %v3009_v44 = vpop.permute.xlu1 %3008  ;;  %2767 = vperm.xlu0 %9091, %v2663_v59   ;;  %v2618_v22 = vadd.f32 %v2582_v29, %v2322_v32  ;;  %v3209_v46 = vadd.f32 %v3173_v31, %v2913_v49  ;;  %v2915_v1 = vadd.f32 %v2879_v16, %v2619_v48  ;;  %v1782_v31 = vld [vmem:[#allocation2 + $0xcb] sm:$0xff]  ;;  %v1784_v48 = vld [vmem:[#allocation2 + $0xdb] sm:$0xff] }
 0x2a8   : > { %v3172_v56 = vmul.f32 %v10249_v42, %v3009_v44  ;;  %2762 = vperm.xlu1 %9092, %v2662_v24   ;;  %v3024_v54 = vpop.permute.xlu0 %3023 }
 0x2a9   : > { %v2914_v20 = vadd.f32 %v2878_v40, %v2618_v22  ;;  %v3252_v53 = vmul.f32 %v10263_v33, %v3209_v46  ;;  %v3175_v17 = vmul.f32 %v10249_v42, %v3024_v54  ;;  %v1785_v46 = vld [vmem:[#allocation2 + $0xe3] sm:$0xff] }
 0x2aa   : > { %v3208_v2 = vadd.f32 %v3172_v56, %v2912_v12  ;;  %v10502_v12 = vld [vmem:[#allocation2 + $0xf2] sm:$0xff]  ;;  %v10506_v56 = vld [vmem:[#allocation2 + $0xfa] sm:$0xff] }
 0x2ab   : > { %v3019_v47 = vpop.permute.xlu1 %3018  ;;  %1342 = vperm.xlu0 %9091, %v10382_v5   ;;  %v3295_v29 = vadd.f32 %v10268_v18, %v3252_v53  ;;  %v3211_v59 = vadd.f32 %v3175_v17, %v2915_v1 }
 0x2ac   : > { %v3251_v15 = vmul.f32 %v10263_v33, %v3208_v2  ;;  %v3174_v6 = vmul.f32 %v10249_v42, %v3019_v47  ;;  %2772 = vperm.xlu1 %9092, %v2664_v55   ;;  %v10498_v44 = vpop.permute.xlu0 %771  ;;  %v1783_v55 = vld [vmem:[#allocation2 + $0xd3] sm:$0xff] }
 0x2ad   : > { %11796 = vst [vmem:[#allocation31_spill] sm:$0xff] %v10498_v44  ;;  %v3331_v32 = vmax.f32 %v3295_v29, 0.0  ;;  %v3254_v5 = vmul.f32 %v10263_v33, %v3211_v59  ;;  %v2372_v59 = vld [vmem:[#allocation2 + $0xcc] sm:$0xff] }
 0x2ae   : > { %v3294_v24 = vadd.f32 %v10268_v18, %v3251_v15  ;;  %v3210_v50 = vadd.f32 %v3174_v6, %v2914_v20  ;;  %v11822_v44 = vld [vmem:[#allocation50_spill] sm:$0xff] }
 0x2af   : > { %v10494_v0 = vpop.permute.xlu1 %766  ;;  %1352 = vperm.xlu0 %9091, %v10491_v37   ;;  %3367 = vst.msk [vmem:[#allocation3 + $0x30] sm:$0xff] %vm524_vm1, %v3331_v32  ;;  %v3297_v10 = vadd.f32 %v10268_v18, %v3254_v5  ;;  %v2373_v32 = vld [vmem:[#allocation2 + $0xd4] sm:$0xff]  ;;  %v2958_v5 = vld [vmem:[#allocation2 + $0x9e] sm:$0xff] }
 0x2b0   : > { %11795 = vst [vmem:[#allocation33_spill] sm:$0xff] %v10494_v0  ;;  %v3330_v23 = vmax.f32 %v3294_v24, 0.0  ;;  %v3253_v9 = vmul.f32 %v10263_v33, %v3210_v50  ;;  %1347 = vperm.xlu1 %9092, %v10384_v14   ;;  %v10513_v49 = vpop.permute.xlu0 %781 }
 0x2b1   : > { %11798 = vst [vmem:[#allocation32_spill] sm:$0xff] %v10513_v49  ;;  %v3333_v16 = vmax.f32 %v3297_v10, 0.0  ;;  %v11819_v49 = vld [vmem:[#allocation42_spill] sm:$0xff] }
 0x2b2   : > { %3366 = vst.msk [vmem:[#allocation3 + $0x28] sm:$0xff] %vm524_vm1, %v3330_v23  ;;  %v3296_v40 = vadd.f32 %v10268_v18, %v3253_v9 }
 0x2b3   : > { %v10510_v14 = vpop.permute.xlu1 %776  ;;  %1362 = vperm.xlu0 %9091, %v10506_v56   ;;  %3369 = vst.msk [vmem:[#allocation3 + $0x40] sm:$0xff] %vm524_vm1, %v3333_v16  ;;  %v2960_v16 = vld [vmem:[#allocation2 + $0xae] sm:$0xff] }
 0x2b4   : > { %11797 = vst [vmem:[#allocation46_spill] sm:$0xff] %v10510_v14  ;;  %v3332_v38 = vmax.f32 %v3296_v40, 0.0  ;;  %1357 = vperm.xlu1 %9092, %v10502_v12   ;;  %v10520_v2 = vpop.permute.xlu0 %1031  ;;  %v2959_v40 = vld [vmem:[#allocation2 + $0xa6] sm:$0xff] }
 0x2b5   : > { %11800 = vst [vmem:[#allocation29_spill] sm:$0xff] %v10520_v2  ;;  %v2668_v14 = vld [vmem:[#allocation2 + $0xcd] sm:$0xff]  ;;  %v11824_v2 = vld [vmem:[#allocation37_spill] sm:$0xff] }
 0x2b6   : > { %3368 = vst.msk [vmem:[#allocation3 + $0x38] sm:$0xff] %vm524_vm1, %v3332_v38 }
 0x2b7   : > { %v10518_v22 = vpop.permute.xlu1 %1026  ;;  %1919 = vperm.xlu0 %9091, %v1783_v55  }
 0x2b8   : > { %11799 = vst [vmem:[#allocation47_spill] sm:$0xff] %v10518_v22  ;;  %1914 = vperm.xlu1 %9092, %v1782_v31   ;;  %v10524_v20 = vpop.permute.xlu0 %1041 }
 0x2b9   : > { %11802 = vst [vmem:[#allocation55_spill] sm:$0xff] %v10524_v20  ;;  %v3563_v15 = vld [vmem:[#allocation3 + $0x24] sm:$0xff]  ;;  %v3564_v54 = vld [vmem:[#allocation3 + $0x2c] sm:$0xff]  ;;  %v11821_v20 = vld [vmem:[#allocation43_spill] sm:$0xff] }
 0x2bb   : > { %v10522_v47 = vpop.permute.xlu1 %1036  ;;  %1929 = vperm.xlu0 %9091, %v1785_v46  }
 0x2bc   : > { %11801 = vst [vmem:[#allocation34_spill] sm:$0xff] %v10522_v47  ;;  %1924 = vperm.xlu1 %9092, %v1784_v48   ;;  %v10529_v50 = vpop.permute.xlu0 %1598  ;;  %v1106_v47 = vmul.f32 %v10125_v13, %v11821_v20  ;;  %v11829_v20 = vld [vmem:[#allocation39_spill] sm:$0xff] }
 0x2bd   : > { %v3565_v6 = vld [vmem:[#allocation3 + $0x36] sm:$0xff]  ;;  %v3566_v1 = vld [vmem:[#allocation3 + $0x3e] sm:$0xff]  ;;  %11804 = vst [vmem:[#allocation35_spill] sm:$0xff] %v10529_v50 }
 0x2be   : > { %v3567_v53 = vmax.f32 %v3563_v15, %v3565_v6  ;;  %v3568_v24 = vmax.f32 %v3564_v54, %v3566_v1  ;;  %v609_v15 = vld [vmem:[%s9818_s29 + $0xf8] sm:$0xff]  ;;  %v10567_v6 = vld [vmem:[#allocation2 + $0x102] sm:$0xff]  ;;  %v10570_v54 = vld [vmem:[#allocation2 + $0x10a] sm:$0xff] }
 0x2bf   : > { %v10526_v17 = vpop.permute.xlu1 %1593  ;;  %2486 = vperm.xlu0 %9091, %v10430_v60   ;;  %11810 = vst [vmem:[#allocation57_spill] sm:$0xff] %v10567_v6  ;;  %611 = vst.msk [vmem:[#allocation2 + $0x129] sm:$0xff] %vm479_vm0, %v609_v15 }
 0x2c0   : > { %11803 = vst [vmem:[#allocation30_spill] sm:$0xff] %v10526_v17  ;;  %2481 = vperm.xlu1 %9092, %v10422_v57   ;;  %v8725_v29 = vpack.c.bf16 %v3568_v24, %v3567_v53  ;;  %v10535_v9 = vpop.permute.xlu0 %1608  ;;  %v2957_v57 = vld [vmem:[#allocation2 + $0x96] sm:$0xff]  ;;  %11811 = vst [vmem:[#allocation58_spill] sm:$0xff] %v10570_v54  ;;  %v10584_v24 = vld [vmem:[#allocation2 + $0xe4] sm:$0xff] }
 0x2c1   : > { %11806 = vst [vmem:[#allocation48_spill] sm:$0xff] %v10535_v9  ;;  %v11827_v9 = vld [vmem:[#allocation45_spill] sm:$0xff]  ;;  %v11832_v17 = vld [vmem:[#allocation40_spill] sm:$0xff] }
 0x2c2   : > { %8726 = vmatpush3.bf16.msra.mxu0 %v8725_v29  ;;  %8729 = vmatpush3.bf16.msra.mxu1 %v8725_v29 }
 0x2c3   : > { %v10532_v23 = vpop.permute.xlu1 %1603  ;;  %8730 = vmatprep.subr.bf16.mxu0 %v11764_v11  ;;  %2496 = vperm.xlu0 %9091, %v2372_v59  }
 0x2c4   : > { %11805 = vst [vmem:[#allocation56_spill] sm:$0xff] %v10532_v23  ;;  %2491 = vperm.xlu1 %9092, %v10452_v30   ;;  %8733 = vmatprep.subr.bf16.mxu1 %v11764_v11  ;;  %v10549_v30 = vpop.permute.xlu0 %2165 }
 0x2c5   : > { %8261 = vmatmul.mubr.msk.f32.vlgmr.msra.gmra.mrb[2].mxu0 %vm524_vm1, %v10328_v8  ;;  %8268 = vmatmul.mubr.msk.f32.vlgmr.msra.gmra.mrb[2].mxu1 %vm524_vm1, %v10335_v61 }
 0x2c6   : > { %8274 = vmatprep.mubr.msk.f32.mxu0 %vm9411_vm2, %v11749_v4  ;;  %8281 = vmatprep.mubr.msk.f32.mxu1 %vm9411_vm2, %v11749_v4 }
 0x2c7   : > { %v10543_v60 = vpop.permute.xlu1 %1613  ;;  %3053 = vperm.xlu0 %9091, %v2957_v57  }
 0x2c8   : > { %11807 = vst [vmem:[#allocation72_spill] sm:$0xff] %v10543_v60  ;;  %2501 = vperm.xlu1 %9092, %v2373_v32   ;;  %v10553_v38 = vpop.permute.xlu0 %2175  ;;  %v11826_v60 = vld [vmem:[#allocation44_spill] sm:$0xff] }
 0x2c9   : > { %11808 = vst [vmem:[#allocation49_spill] sm:$0xff] %v10553_v38 }
 0x2cb   : > { %v10551_v10 = vpop.permute.xlu1 %2170  ;;  %3063 = vperm.xlu0 %9091, %v2959_v40   ;;  %v2666_v40 = vld [vmem:[#allocation2 + $0xbd] sm:$0xff] }
 0x2cc   : > { %3058 = vperm.xlu1 %9092, %v2958_v5   ;;  %v10557_v55 = vpop.permute.xlu0 %2732  ;;  %v2665_v5 = vld [vmem:[#allocation2 + $0xb5] sm:$0xff] }
 0x2cf   : > { %v10555_v31 = vpop.permute.xlu1 %2180  ;;  %1638 = vperm.xlu0 %9091, %v10491_v37  }
 0x2d0   : > { %11809 = vst [vmem:[#allocation73_spill] sm:$0xff] %v10555_v31  ;;  %3068 = vperm.xlu1 %9092, %v2960_v16   ;;  %v10563_v46 = vpop.permute.xlu0 %2742  ;;  %v11836_v31 = vld [vmem:[#allocation80_spill] sm:$0xff] }
 0x2d3   : > { %v10560_v48 = vpop.permute.xlu1 %2737  ;;  %1648 = vperm.xlu0 %9091, %v10506_v56   ;;  %v10582_v56 = vld [vmem:[#allocation2 + $0xdc] sm:$0xff] }
 0x2d4   : > { %1643 = vperm.xlu1 %9092, %v10502_v12   ;;  %v10575_v37 = vpop.permute.xlu0 %2752 }
 0x2d7   : > { %v10572_v1 = vpop.permute.xlu1 %2747  ;;  %1658 = vperm.xlu0 %9091, %v10570_v54  }
 0x2d8   : > { %1653 = vperm.xlu1 %9092, %v10567_v6   ;;  %v10580_v53 = vpop.permute.xlu0 %1327  ;;  %v11835_v6 = vld [vmem:[#allocation54_spill] sm:$0xff] }
 0x2d9   : > { %11813 = vst [vmem:[#allocation75_spill] sm:$0xff] %v10580_v53  ;;  %v2667_v53 = vld [vmem:[#allocation2 + $0xc5] sm:$0xff] }
 0x2db   : > { %v10578_v12 = vpop.permute.xlu1 %1322  ;;  %2215 = vperm.xlu0 %9091, %v2373_v32   ;;  %v11818_v32 = vld [vmem:[#allocation41_spill] sm:$0xff] }
 0x2dc   : > { %11812 = vst [vmem:[#allocation74_spill] sm:$0xff] %v10578_v12  ;;  %2210 = vperm.xlu1 %9092, %v2372_v59   ;;  %v10589_v57 = vpop.permute.xlu0 %1337  ;;  %v1104_v15 = vmul.f32 %v10125_v13, %v11818_v32  ;;  %v11820_v12 = vld [vmem:[#allocation36_spill] sm:$0xff]  ;;  %v845_v32 = vmul.f32 %v10123_v36, %v11824_v2  ;;  %v11831_v2 = vld [vmem:[#allocation67_spill] sm:$0xff] }
 0x2dd   : > { %11815 = vst [vmem:[#allocation105_spill] sm:$0xff] %v10589_v57  ;;  %v844_v57 = vmul.f32 %v10123_v36, %v11820_v12  ;;  %v1108_v12 = vmul.f32 %v10125_v13, %v11827_v9  ;;  %v1696_v50 = vmul.f32 %v10154_v43, %v11831_v2 }
 0x2df   : > { %v10586_v29 = vpop.permute.xlu1 %1332  ;;  %2225 = vperm.xlu0 %9091, %v10584_v24   ;;  %v1140_v23 = vadd.f32 %v1104_v15, %v844_v57 }
 0x2e0   : > { %11814 = vst [vmem:[#allocation104_spill] sm:$0xff] %v10586_v29  ;;  %2220 = vperm.xlu1 %9092, %v10582_v56   ;;  %v10594_v59 = vpop.permute.xlu0 %1894  ;;  %v1105_v29 = vmul.f32 %v10125_v13, %v11819_v49  ;;  %v1107_v49 = vmul.f32 %v10125_v13, %v11826_v60  ;;  %v848_v60 = vmul.f32 %v10123_v36, %v11832_v17  ;;  %v11833_v13 = vld [vmem:[#allocation52_spill] sm:$0xff] }
 0x2e1   : > { %11817 = vst [vmem:[#allocation107_spill] sm:$0xff] %v10594_v59  ;;  %v1402_v9 = vmul.f32 %v10143_v25, %v11833_v13  ;;  %v11838_v17 = vld [vmem:[#allocation68_spill] sm:$0xff] }
 0x2e2   : > { %v1141_v54 = vadd.f32 %v1105_v29, %v845_v32  ;;  %v1697_v29 = vmul.f32 %v10154_v43, %v11838_v17  ;;  %v11839_v32 = vld [vmem:[#allocation69_spill] sm:$0xff] }
 0x2e3   : > { %v10592_v16 = vpop.permute.xlu1 %1889  ;;  %2782 = vperm.xlu0 %9091, %v2666_v40   ;;  %v11825_v40 = vld [vmem:[#allocation38_spill] sm:$0xff]  ;;  %v1698_v13 = vmul.f32 %v10154_v43, %v11839_v32  ;;  %v1788_v17 = vld [vmem:[#allocation2 + $0xfb] sm:$0xff] }
 0x2e4   : > { %11816 = vst [vmem:[#allocation106_spill] sm:$0xff] %v10592_v16  ;;  %2777 = vperm.xlu1 %9092, %v2665_v5   ;;  %v1400_v5 = vmul.f32 %v10143_v25, %v11822_v44  ;;  %v846_v22 = vmul.f32 %v10123_v36, %v11825_v40  ;;  %v10616_v59 = vpop.permute.xlu0 %1904  ;;  %v847_v44 = vmul.f32 %v10123_v36, %v11829_v20  ;;  %v2669_v40 = vld [vmem:[#allocation2 + $0xd5] sm:$0xff]  ;;  %v1786_v20 = vld [vmem:[#allocation2 + $0xeb] sm:$0xff] }
 0x2e5   : > { %11828 = vst [vmem:[#allocation42_spill] sm:$0xff] %v10616_v59  ;;  %v1144_v36 = vadd.f32 %v1108_v12, %v848_v60  ;;  %v11841_v12 = vld [vmem:[#allocation71_spill] sm:$0xff]  ;;  %v11842_v60 = vld [vmem:[#allocation81_spill] sm:$0xff] }
 0x2e6   : > { %v1142_v57 = vadd.f32 %v1106_v47, %v846_v22  ;;  %v1436_v15 = vadd.f32 %v1400_v5, %v1140_v23  ;;  %v1143_v38 = vadd.f32 %v1107_v49, %v847_v44  ;;  %v11840_v23 = vld [vmem:[#allocation70_spill] sm:$0xff]  ;;  %v1700_v44 = vmul.f32 %v10154_v43, %v11841_v12  ;;  %v10678_v12 = vld [vmem:[#allocation9 + $0x5] ss:$0 sm:$0xff] }
 0x2e7   : > { %v10606_v0 = vpop.permute.xlu1 %1899  ;;  %2792 = vperm.xlu0 %9091, %v2668_v14   ;;  %v1992_v14 = vmul.f32 %v10173_v41, %v11836_v31  ;;  %v2288_v31 = vmul.f32 %v10192_v51, %v10350_v63 }
 0x2e8   : > { %11823 = vst [vmem:[#allocation41_spill] sm:$0xff] %v10606_v0  ;;  %2787 = vperm.xlu1 %9092, %v2667_v53   ;;  %v11830_v0 = vld [vmem:[#allocation51_spill] sm:$0xff]  ;;  %v11834_v53 = vld [vmem:[#allocation53_spill] sm:$0xff]  ;;  %v1732_v47 = vadd.f32 %v1696_v50, %v1436_v15  ;;  %v1438_v5 = vadd.f32 %v1402_v9, %v1142_v57  ;;  %v11843_v50 = vld [vmem:[#allocation82_spill] sm:$0xff]  ;;  %v2584_v15 = vmul.f32 %v10203_v19, %v10414_v39 }
 0x2e9   : > { %v1401_v16 = vmul.f32 %v10143_v25, %v11830_v0  ;;  %v1403_v59 = vmul.f32 %v10143_v25, %v11834_v53  ;;  %v1404_v0 = vmul.f32 %v10143_v25, %v11835_v6  ;;  %v10640_v53 = vpop.permute.xlu0 %2461  ;;  %v1699_v25 = vmul.f32 %v10154_v43, %v11840_v23  ;;  %v1787_v6 = vld [vmem:[#allocation2 + $0xf3] sm:$0xff]  ;;  %v1790_v23 = vld [vmem:[#allocation2 + $0x10b] sm:$0xff] }
 0x2ea   : > { %v1734_v9 = vadd.f32 %v1698_v13, %v1438_v5  ;;  %v2289_v43 = vmul.f32 %v10192_v51, %v10352_v27  ;;  %v2880_v39 = vmul.f32 %v10218_v3, %v10557_v55  ;;  %v2585_v27 = vmul.f32 %v10203_v19, %v10438_v62 }
 0x2eb   : > { %v10634_v2 = vpop.permute.xlu1 %1909  ;;  %v1437_v22 = vadd.f32 %v1401_v16, %v1141_v54  ;;  %1934 = vperm.xlu0 %9091, %v1786_v20   ;;  %v1439_v49 = vadd.f32 %v1403_v59, %v1143_v38  ;;  %v1440_v32 = vadd.f32 %v1404_v0, %v1144_v36  ;;  %v2028_v54 = vadd.f32 %v1992_v14, %v1732_v47  ;;  %v11844_v38 = vld [vmem:[#allocation83_spill] sm:$0xff] }
 0x2ec   : > { %11837 = vst [vmem:[#allocation36_spill] sm:$0xff] %v10634_v2  ;;  %2797 = vperm.xlu1 %9092, %v2669_v40   ;;  %v1993_v40 = vmul.f32 %v10173_v41, %v11842_v60  ;;  %v1994_v16 = vmul.f32 %v10173_v41, %v11843_v50  ;;  %v1995_v59 = vmul.f32 %v10173_v41, %v11844_v38  ;;  %v10666_v47 = vld [vmem:[#allocation9 + $0x4] ss:$0 sm:$0xff] }
 0x2ed   : > { %v1733_v20 = vadd.f32 %v1697_v29, %v1437_v22  ;;  %v10660_v57 = vpop.permute.xlu0 %2471  ;;  %v1735_v0 = vadd.f32 %v1699_v25, %v1439_v49  ;;  %v2324_v14 = vadd.f32 %v2288_v31, %v2028_v54  ;;  %v2290_v36 = vmul.f32 %v10192_v51, %v10354_v58  ;;  %v1789_v29 = vld [vmem:[#allocation2 + $0x103] sm:$0xff] }
 0x2ee   : > { %v1736_v13 = vadd.f32 %v1700_v44, %v1440_v32  ;;  %v1996_v41 = vmul.f32 %v10666_v47, %v10186_v34  ;;  %v2030_v25 = vadd.f32 %v1994_v16, %v1734_v9  ;;  %v2291_v58 = vmul.f32 %v10192_v51, %v10356_v35 }
 0x2ef   : > { %v10654_v63 = vpop.permute.xlu1 %2466  ;;  %1944 = vperm.xlu0 %9091, %v1788_v17   ;;  %v2029_v22 = vadd.f32 %v1993_v40, %v1733_v20  ;;  %v2620_v31 = vadd.f32 %v2584_v15, %v2324_v14  ;;  %v2586_v55 = vmul.f32 %v10203_v19, %v10445_v45  ;;  %v2031_v5 = vadd.f32 %v1995_v59, %v1735_v0  ;;  %v10687_v17 = vld [vmem:[#allocation9 + $0x6] ss:$0 sm:$0xff]  ;;  %v2376_v0 = vld [vmem:[#allocation2 + $0xec] sm:$0xff] }
 0x2f0   : > { %1939 = vperm.xlu1 %9092, %v1787_v6   ;;  %v2292_v34 = vmul.f32 %v10678_v12, %v10358_v52  ;;  %v2881_v62 = vmul.f32 %v10218_v3, %v10560_v48  ;;  %v2326_v60 = vadd.f32 %v2290_v36, %v2030_v25  ;;  %v2882_v35 = vmul.f32 %v10218_v3, %v10563_v46  ;;  %v10693_v3 = vld [vmem:[#allocation9 + $0x7] ss:$0 sm:$0xff] }
 0x2f1   : > { %v2325_v49 = vadd.f32 %v2289_v43, %v2029_v22  ;;  %v3029_v44 = vpop.permute.xlu0 %3028  ;;  %v2916_v51 = vadd.f32 %v2880_v39, %v2620_v31  ;;  %v2032_v45 = vadd.f32 %v1996_v41, %v1736_v13  ;;  %v2587_v52 = vmul.f32 %v10687_v17, %v10462_v28  ;;  %v2377_v39 = vld [vmem:[#allocation2 + $0xf4] sm:$0xff] }
 0x2f2   : > { %v3176_v19 = vmul.f32 %v10249_v42, %v3029_v44  ;;  %v2327_v32 = vadd.f32 %v2291_v58, %v2031_v5  ;;  %v2622_v54 = vadd.f32 %v2586_v55, %v2326_v60  ;;  %v2588_v48 = vmul.f32 %v10687_v17, %v10469_v26  ;;  %v2961_v31 = vld [vmem:[#allocation2 + $0xb6] sm:$0xff] }
 0x2f3   : > { %v10676_v6 = vpop.permute.xlu1 %2476  ;;  %1954 = vperm.xlu0 %9091, %v1790_v23   ;;  %v2621_v40 = vadd.f32 %v2585_v27, %v2325_v49  ;;  %v2328_v15 = vadd.f32 %v2292_v34, %v2032_v45  ;;  %v2883_v46 = vmul.f32 %v10693_v3, %v10572_v1  ;;  %v2884_v59 = vmul.f32 %v10693_v3, %v10575_v37  ;;  %v2962_v49 = vld [vmem:[#allocation2 + $0xbe] sm:$0xff]  ;;  %v2963_v45 = vld [vmem:[#allocation2 + $0xc6] sm:$0xff] }
 0x2f4   : > { %1949 = vperm.xlu1 %9092, %v1789_v29   ;;  %v3212_v50 = vadd.f32 %v3176_v19, %v2916_v51  ;;  %v2918_v28 = vadd.f32 %v2882_v35, %v2622_v54  ;;  %v2623_v14 = vadd.f32 %v2587_v52, %v2327_v32  ;;  %v2964_v52 = vld [vmem:[#allocation2 + $0xce] sm:$0xff] }
 0x2f5   : > { %v2917_v20 = vadd.f32 %v2881_v62, %v2621_v40  ;;  %v2624_v1 = vadd.f32 %v2588_v48, %v2328_v15 }
 0x2f6   : > { %v3039_v38 = vpop.permute.xlu0 %3038  ;;  %v3255_v26 = vmul.f32 %v10263_v33, %v3212_v50  ;;  %v2919_v22 = vadd.f32 %v2883_v46, %v2623_v14 }
 0x2f7   : > { %v3034_v16 = vpop.permute.xlu1 %3033  ;;  %v3178_v43 = vmul.f32 %v10249_v42, %v3039_v38  ;;  %2511 = vperm.xlu0 %9091, %v10584_v24   ;;  %v2920_v23 = vadd.f32 %v2884_v59, %v2624_v1  ;;  %v2085_v38 = vld [vmem:[#allocation2 + $0x104] sm:$0xff] }
 0x2f8   : > { %v3177_v9 = vmul.f32 %v10249_v42, %v3034_v16  ;;  %2506 = vperm.xlu1 %9092, %v10582_v56   ;;  %v3298_v29 = vadd.f32 %v10268_v18, %v3255_v26  ;;  %v2086_v26 = vld [vmem:[#allocation2 + $0x10c] sm:$0xff] }
 0x2f9   : > { %v3214_v13 = vadd.f32 %v3178_v43, %v2918_v28 }
 0x2fa   : > { %v3213_v36 = vadd.f32 %v3177_v9, %v2917_v20  ;;  %v3049_v27 = vpop.permute.xlu0 %3048  ;;  %v3334_v25 = vmax.f32 %v3298_v29, 0.0 }
 0x2fb   : > { %v3044_v56 = vpop.permute.xlu1 %3043  ;;  %v3257_v24 = vmul.f32 %v10263_v33, %v3214_v13  ;;  %v3180_v58 = vmul.f32 %v10249_v42, %v3049_v27  ;;  %2521 = vperm.xlu0 %9091, %v2377_v39   ;;  %v2673_v27 = vld [vmem:[#allocation2 + $0xf5] sm:$0xff] }
 0x2fc   : > { %v3256_v41 = vmul.f32 %v10263_v33, %v3213_v36  ;;  %v3179_v37 = vmul.f32 %v10249_v42, %v3044_v56  ;;  %2516 = vperm.xlu1 %9092, %v2376_v0   ;;  %3370 = vst.msk [vmem:[#allocation3 + $0x48] sm:$0xff] %vm524_vm1, %v3334_v25  ;;  %v2670_v56 = vld [vmem:[#allocation2 + $0xdd] sm:$0xff] }
 0x2fd   : > { %v3300_v34 = vadd.f32 %v10268_v18, %v3257_v24  ;;  %v3216_v62 = vadd.f32 %v3180_v58, %v2920_v23 }
 0x2fe   : > { %v3299_v55 = vadd.f32 %v10268_v18, %v3256_v41  ;;  %v3215_v5 = vadd.f32 %v3179_v37, %v2919_v22  ;;  %v10715_v35 = vpop.permute.xlu0 %791  ;;  %v2672_v37 = vld [vmem:[#allocation2 + $0xed] sm:$0xff] }
 0x2ff   : > { %v10712_v44 = vpop.permute.xlu1 %786  ;;  %v3336_v42 = vmax.f32 %v3300_v34, 0.0  ;;  %v3259_v19 = vmul.f32 %v10263_v33, %v3216_v62  ;;  %3078 = vperm.xlu0 %9091, %v2962_v49   ;;  %v10769_v49 = vld [vmem:[#allocation2 + $0x11c] sm:$0xff] }
 0x300   : > { %v3335_v60 = vmax.f32 %v3299_v55, 0.0  ;;  %v3258_v51 = vmul.f32 %v10263_v33, %v3215_v5  ;;  %3073 = vperm.xlu1 %9092, %v2961_v31   ;;  %v2965_v33 = vld [vmem:[#allocation2 + $0xd6] sm:$0xff]  ;;  %v2966_v34 = vld [vmem:[#allocation2 + $0xde] sm:$0xff] }
 0x301   : > { %3372 = vst.msk [vmem:[#allocation3 + $0x58] sm:$0xff] %vm524_vm1, %v3336_v42  ;;  %v3302_v32 = vadd.f32 %v10268_v18, %v3259_v19  ;;  %v10762_v31 = vld [vmem:[#allocation2 + $0x114] sm:$0xff] }
 0x302   : > { %3371 = vst.msk [vmem:[#allocation3 + $0x50] sm:$0xff] %vm524_vm1, %v3335_v60  ;;  %v3301_v40 = vadd.f32 %v10268_v18, %v3258_v51  ;;  %v10724_v50 = vpop.permute.xlu0 %801  ;;  %v2084_v18 = vld [vmem:[#allocation2 + $0xfc] sm:$0xff]  ;;  %v2967_v51 = vld [vmem:[#allocation2 + $0xe6] sm:$0xff]  ;;  %v2968_v42 = vld [vmem:[#allocation2 + $0xee] sm:$0xff] }
 0x303   : > { %v10722_v54 = vpop.permute.xlu1 %796  ;;  %v3338_v16 = vmax.f32 %v3302_v32, 0.0  ;;  %3088 = vperm.xlu0 %9091, %v2964_v52   ;;  %v3711_v28 = vld [vmem:[#allocation3 + $0x48] sm:$0xff] }
 0x304   : > { %v3337_v48 = vmax.f32 %v3301_v40, 0.0  ;;  %3083 = vperm.xlu1 %9092, %v2963_v45   ;;  %v2969_v40 = vld [vmem:[#allocation2 + $0xf6] sm:$0xff] }
 0x305   : > { %3374 = vst.msk [vmem:[#allocation3 + $0x68] sm:$0xff] %vm524_vm1, %v3338_v16  ;;  %v2674_v52 = vld [vmem:[#allocation2 + $0xfd] sm:$0xff]  ;;  %v2675_v16 = vld [vmem:[#allocation2 + $0x105] sm:$0xff] }
 0x306   : > { %3373 = vst.msk [vmem:[#allocation3 + $0x60] sm:$0xff] %vm524_vm1, %v3337_v48  ;;  %v10730_v20 = vpop.permute.xlu0 %1046 }
 0x307   : > { %v10728_v15 = vpop.permute.xlu1 %806  ;;  %2230 = vperm.xlu0 %9091, %v2376_v0  }
 0x308   : > { %3093 = vperm.xlu1 %9092, %v2965_v33   ;;  %v2676_v33 = vld [vmem:[#allocation2 + $0x10d] sm:$0xff] }
 0x309   : > { %v3712_v43 = vld [vmem:[#allocation3 + $0x50] sm:$0xff] }
 0x30a   : > { %v10734_v9 = vpop.permute.xlu0 %1056 }
 0x30b   : > { %v10732_v46 = vpop.permute.xlu1 %1051  ;;  %2240 = vperm.xlu0 %9091, %v2084_v18  }
 0x30c   : > { %2235 = vperm.xlu1 %9092, %v2377_v39   ;;  %v2671_v39 = vld [vmem:[#allocation2 + $0xe5] sm:$0xff] }
 0x30d   : > { %v3713_v59 = vld [vmem:[#allocation3 + $0x5a] sm:$0xff]  ;;  %v3714_v14 = vld [vmem:[#allocation3 + $0x62] sm:$0xff] }
 0x30e   : > { %v3715_v36 = vmax.f32 %v3711_v28, %v3713_v59  ;;  %v3716_v29 = vmax.f32 %v3712_v43, %v3714_v14  ;;  %v10738_v13 = vpop.permute.xlu0 %1066  ;;  %v2677_v28 = vld [vmem:[#allocation2 + $0x115] sm:$0xff]  ;;  %v2678_v59 = vld [vmem:[#allocation2 + $0x11d] sm:$0xff] }
 0x30f   : > { %v10736_v1 = vpop.permute.xlu1 %1061  ;;  %2250 = vperm.xlu0 %9091, %v2086_v26   ;;  %v2970_v14 = vld [vmem:[#allocation2 + $0xfe] sm:$0xff] }
 0x310   : > { %2245 = vperm.xlu1 %9092, %v2085_v38   ;;  %v8731_v0 = vpack.c.bf16 %v3716_v29, %v3715_v36  ;;  %v2971_v36 = vld [vmem:[#allocation2 + $0x106] sm:$0xff] }
 0x312   : > { %8732 = vmatpush3.bf16.msra.mxu0 %v8731_v0  ;;  %8735 = vmatpush3.bf16.msra.mxu1 %v8731_v0  ;;  %v10742_v41 = vpop.permute.xlu0 %1623 }
 0x313   : > { %v10740_v22 = vpop.permute.xlu1 %1618  ;;  %11846 = vst [vmem:[#allocation50_spill] sm:$0xff] %v10742_v41  ;;  %8736 = vmatprep.subr.bf16.mxu0 %v11764_v11  ;;  %2807 = vperm.xlu0 %9091, %v2671_v39   ;;  %v11856_v39 = vld [vmem:[#allocation63_spill] sm:$0xff]  ;;  %v11864_v41 = vld [vmem:[#allocation77_spill] sm:$0xff] }
 0x314   : > { %11845 = vst [vmem:[#allocation43_spill] sm:$0xff] %v10740_v22  ;;  %2802 = vperm.xlu1 %9092, %v2670_v56   ;;  %8739 = vmatprep.subr.bf16.mxu1 %v11764_v11  ;;  %v10796_v56 = vld [vmem:[#allocation9 + $0x1] ss:$0 sm:$0xff]  ;;  %v11865_v22 = vld [vmem:[#allocation61_spill] sm:$0xff] }
 0x315   : > { %8275 = vmatmul.mubr.msk.f32.vlgmr.msra.gmra.mrb[4].mxu0 %vm524_vm1, %v10328_v8  ;;  %8282 = vmatmul.mubr.msk.f32.vlgmr.msra.gmra.mrb[4].mxu1 %vm524_vm1, %v10335_v61 }
 0x316   : > { %8288 = vmatprep.mubr.msk.f32.mxu0 %vm9411_vm2, %v11749_v4  ;;  %8295 = vmatprep.mubr.msk.f32.mxu1 %vm9411_vm2, %v11749_v4  ;;  %v10756_v25 = vpop.permute.xlu0 %1633 }
 0x317   : > { %v10750_v23 = vpop.permute.xlu1 %1628  ;;  %11848 = vst [vmem:[#allocation38_spill] sm:$0xff] %v10756_v25  ;;  %2817 = vperm.xlu0 %9091, %v2673_v27   ;;  %v2972_v27 = vld [vmem:[#allocation2 + $0x10e] sm:$0xff]  ;;  %v11862_v25 = vld [vmem:[#allocation65_spill] sm:$0xff] }
 0x318   : > { %11847 = vst [vmem:[#allocation37_spill] sm:$0xff] %v10750_v23  ;;  %2812 = vperm.xlu1 %9092, %v2672_v37   ;;  %v1109_v37 = vmul.f32 %v10796_v56, %v11856_v39  ;;  %v10816_v23 = vld [vmem:[#allocation9 + $0x3] ss:$0 sm:$0xff] }
 0x31a   : > { %v10760_v58 = vpop.permute.xlu0 %2190 }
 0x31b   : > { %v10758_v24 = vpop.permute.xlu1 %2185  ;;  %11850 = vst [vmem:[#allocation45_spill] sm:$0xff] %v10760_v58  ;;  %2531 = vperm.xlu0 %9091, %v2085_v38   ;;  %v11873_v58 = vld [vmem:[#allocation79_spill] sm:$0xff] }
 0x31c   : > { %11849 = vst [vmem:[#allocation44_spill] sm:$0xff] %v10758_v24  ;;  %2526 = vperm.xlu1 %9092, %v2084_v18  }
 0x31e   : > { %v10766_v5 = vpop.permute.xlu0 %2200 }
 0x31f   : > { %v10764_v55 = vpop.permute.xlu1 %2195  ;;  %11852 = vst [vmem:[#allocation51_spill] sm:$0xff] %v10766_v5  ;;  %2541 = vperm.xlu0 %9091, %v10762_v31   ;;  %v11868_v5 = vld [vmem:[#allocation66_spill] sm:$0xff] }
 0x320   : > { %11851 = vst [vmem:[#allocation39_spill] sm:$0xff] %v10764_v55  ;;  %2536 = vperm.xlu1 %9092, %v2086_v26   ;;  %v11869_v55 = vld [vmem:[#allocation94_spill] sm:$0xff] }
 0x322   : > { %v10774_v60 = vpop.permute.xlu0 %2757 }
 0x323   : > { %v10771_v62 = vpop.permute.xlu1 %2205  ;;  %3098 = vperm.xlu0 %9091, %v2966_v34   ;;  %v2973_v34 = vld [vmem:[#allocation2 + $0x116] sm:$0xff] }
 0x324   : > { %11853 = vst [vmem:[#allocation67_spill] sm:$0xff] %v10771_v62  ;;  %2546 = vperm.xlu1 %9092, %v10769_v49   ;;  %v1997_v62 = vmul.f32 %v10666_v47, %v10379_v21  ;;  %v2293_v21 = vmul.f32 %v10678_v12, %v10549_v30  ;;  %v2589_v30 = vmul.f32 %v10687_v17, %v10640_v53 }
 0x325   : > { %v2885_v53 = vmul.f32 %v10693_v3, %v10774_v60 }
 0x326   : > { %v10778_v45 = vpop.permute.xlu0 %2767 }
 0x327   : > { %v10776_v19 = vpop.permute.xlu1 %2762  ;;  %3108 = vperm.xlu0 %9091, %v2968_v42   ;;  %v11857_v42 = vld [vmem:[#allocation59_spill] sm:$0xff] }
 0x328   : > { %3103 = vperm.xlu1 %9092, %v2967_v51   ;;  %v10800_v51 = vld [vmem:[#allocation9] ss:$0 sm:$0xff] }
 0x32a   : > { %v10782_v48 = vpop.permute.xlu0 %1342 }
 0x32b   : > { %v10780_v32 = vpop.permute.xlu1 %2772  ;;  %2822 = vperm.xlu0 %9091, %v2674_v52   ;;  %v10804_v52 = vld [vmem:[#allocation9 + $0x2] ss:$0 sm:$0xff] }
 0x32c   : > { %3113 = vperm.xlu1 %9092, %v2969_v40   ;;  %v849_v40 = vmul.f32 %v10800_v51, %v11857_v42  ;;  %v1701_v42 = vmul.f32 %v10816_v23, %v10322_v7 }
 0x32e   : > { %v10786_v38 = vpop.permute.xlu0 %1352 }
 0x32f   : > { %v10784_v18 = vpop.permute.xlu1 %1347  ;;  %2832 = vperm.xlu0 %9091, %v2676_v33  }
 0x330   : > { %2827 = vperm.xlu1 %9092, %v2675_v16   ;;  %v11858_v16 = vld [vmem:[#allocation76_spill] sm:$0xff] }
 0x331   : > { %v1405_v33 = vmul.f32 %v10804_v52, %v11858_v16  ;;  %v11863_v16 = vld [vmem:[#allocation60_spill] sm:$0xff] }
 0x332   : > { %v10790_v43 = vpop.permute.xlu0 %1362 }
 0x333   : > { %v10788_v26 = vpop.permute.xlu1 %1357  ;;  %2842 = vperm.xlu0 %9091, %v2678_v59   ;;  %v11860_v59 = vld [vmem:[#allocation64_spill] sm:$0xff] }
 0x334   : > { %2837 = vperm.xlu1 %9092, %v2677_v28  }
 0x336   : > { %v10794_v0 = vpop.permute.xlu0 %1919 }
 0x337   : > { %v10792_v29 = vpop.permute.xlu1 %1914  ;;  %11855 = vst [vmem:[#allocation52_spill] sm:$0xff] %v10794_v0  ;;  %3123 = vperm.xlu0 %9091, %v2971_v36   ;;  %v1145_v36 = vadd.f32 %v1109_v37, %v849_v40  ;;  %v1111_v0 = vmul.f32 %v10796_v56, %v11862_v25  ;;  %v851_v37 = vmul.f32 %v10800_v51, %v11865_v22 }
 0x338   : > { %11854 = vst [vmem:[#allocation40_spill] sm:$0xff] %v10792_v29  ;;  %3118 = vperm.xlu1 %9092, %v2970_v14   ;;  %v1110_v14 = vmul.f32 %v10796_v56, %v11860_v59  ;;  %v2974_v29 = vld [vmem:[#allocation2 + $0x11e] sm:$0xff]  ;;  %v1406_v59 = vmul.f32 %v10804_v52, %v11864_v41  ;;  %v1702_v41 = vmul.f32 %v10816_v23, %v11869_v55 }
 0x339   : > { %v1441_v40 = vadd.f32 %v1405_v33, %v1145_v36  ;;  %v1147_v22 = vadd.f32 %v1111_v0, %v851_v37  ;;  %v11871_v36 = vld [vmem:[#allocation95_spill] sm:$0xff]  ;;  %v1408_v55 = vmul.f32 %v10804_v52, %v11873_v58  ;;  %v2294_v58 = vmul.f32 %v10678_v12, %v10551_v10 }
 0x33a   : > { %v10812_v39 = vpop.permute.xlu0 %1929  ;;  %v646_v0 = vld [vmem:[#allocation2 + $0x110] sm:$0xff]  ;;  %v2590_v10 = vmul.f32 %v10687_v17, %v10654_v63 }
 0x33b   : > { %v10808_v28 = vpop.permute.xlu1 %1924  ;;  %11861 = vst [vmem:[#allocation54_spill] sm:$0xff] %v10812_v39  ;;  %3133 = vperm.xlu0 %9091, %v2973_v34   ;;  %v11866_v39 = vld [vmem:[#allocation78_spill] sm:$0xff]  ;;  %v1737_v33 = vadd.f32 %v1701_v42, %v1441_v40  ;;  %v11875_v40 = vld [vmem:[#allocation103_spill] sm:$0xff] }
 0x33c   : > { %11859 = vst [vmem:[#allocation53_spill] sm:$0xff] %v10808_v28  ;;  %3128 = vperm.xlu1 %9092, %v2972_v27   ;;  %v850_v28 = vmul.f32 %v10800_v51, %v11863_v16  ;;  %v644_v27 = vld [vmem:[#allocation2 + $0x100] sm:$0xff]  ;;  %v1407_v25 = vmul.f32 %v10804_v52, %v11866_v39  ;;  %v1112_v16 = vmul.f32 %v10796_v56, %v11868_v5 }
 0x33d   : > { %v1703_v39 = vmul.f32 %v10816_v23, %v11871_v36  ;;  %v2033_v37 = vadd.f32 %v1997_v62, %v1737_v33  ;;  %v1999_v36 = vmul.f32 %v10666_v47, %v11875_v40 }
 0x33e   : > { %v1146_v34 = vadd.f32 %v1110_v14, %v850_v28  ;;  %v10836_v2 = vpop.permute.xlu0 %2486  ;;  %v11872_v28 = vld [vmem:[#allocation62_spill] sm:$0xff]  ;;  %v1443_v42 = vadd.f32 %v1407_v25, %v1147_v22  ;;  %v11877_v22 = vld [vmem:[#allocation49_spill] sm:$0xff] }
 0x33f   : > { %v10830_v7 = vpop.permute.xlu1 %2481  ;;  %11870 = vst [vmem:[#allocation68_spill] sm:$0xff] %v10836_v2  ;;  %811 = vperm.xlu0 %9091, %v644_v27   ;;  %v852_v14 = vmul.f32 %v10800_v51, %v11872_v28  ;;  %v2329_v25 = vadd.f32 %v2293_v21, %v2033_v37  ;;  %v2295_v33 = vmul.f32 %v10678_v12, %v11877_v22  ;;  %v905_v22 = vld [vmem:[#allocation2 + $0x111] sm:$0xff] }
 0x340   : > { %11867 = vst [vmem:[#allocation80_spill] sm:$0xff] %v10830_v7  ;;  %3138 = vperm.xlu1 %9092, %v2974_v29   ;;  %v645_v7 = vld [vmem:[#allocation2 + $0x108] sm:$0xff]  ;;  %v1442_v5 = vadd.f32 %v1406_v59, %v1146_v34  ;;  %v11876_v59 = vld [vmem:[#allocation96_spill] sm:$0xff]  ;;  %v1739_v62 = vadd.f32 %v1703_v39, %v1443_v42  ;;  %v2591_v21 = vmul.f32 %v10687_v17, %v10660_v57 }
 0x341   : > { %v11874_v29 = vld [vmem:[#allocation102_spill] sm:$0xff]  ;;  %v1148_v24 = vadd.f32 %v1112_v16, %v852_v14  ;;  %v1704_v34 = vmul.f32 %v10816_v23, %v11876_v59  ;;  %v647_v16 = vld [vmem:[#allocation2 + $0x118] sm:$0xff]  ;;  %v2625_v39 = vadd.f32 %v2589_v30, %v2329_v25  ;;  %v2592_v25 = vmul.f32 %v10687_v17, %v10676_v6 }
 0x342   : > { %v1998_v2 = vmul.f32 %v10666_v47, %v11874_v29  ;;  %v1738_v28 = vadd.f32 %v1702_v41, %v1442_v5  ;;  %v10858_v29 = vpop.permute.xlu0 %2496  ;;  %v11878_v5 = vld [vmem:[#allocation28_spill] sm:$0xff]  ;;  %v2035_v59 = vadd.f32 %v1999_v36, %v1739_v62  ;;  %v2887_v36 = vmul.f32 %v10693_v3, %v10778_v45 }
 0x343   : > { %v10852_v27 = vpop.permute.xlu1 %2491  ;;  %821 = vperm.xlu0 %9091, %v646_v0   ;;  %v1444_v41 = vadd.f32 %v1408_v55, %v1148_v24  ;;  %v2000_v40 = vmul.f32 %v10666_v47, %v11878_v5  ;;  %v11879_v0 = vld [vmem:[#allocation73_spill] sm:$0xff]  ;;  %v2921_v63 = vadd.f32 %v2885_v53, %v2625_v39  ;;  %v10878_v30 = vld [vmem:[#allocation9 + $0x8] ss:$0 sm:$0xff]  ;;  %v2888_v45 = vmul.f32 %v10693_v3, %v10780_v32 }
 0x344   : > { %816 = vperm.xlu1 %9092, %v645_v7   ;;  %v2034_v14 = vadd.f32 %v1998_v2, %v1738_v28  ;;  %v903_v7 = vld [vmem:[#allocation2 + $0x101] sm:$0xff]  ;;  %v2296_v24 = vmul.f32 %v10678_v12, %v11879_v0  ;;  %v2886_v2 = vmul.f32 %v10693_v3, %v10776_v19  ;;  %v2331_v28 = vadd.f32 %v2295_v33, %v2035_v59  ;;  %v10886_v59 = vld [vmem:[#allocation11] ss:$0 sm:$0xff] }
 0x345   : > { %v1740_v37 = vadd.f32 %v1704_v34, %v1444_v41  ;;  %v904_v34 = vld [vmem:[#allocation2 + $0x109] sm:$0xff] }
 0x346   : > { %v2330_v60 = vadd.f32 %v2294_v58, %v2034_v14  ;;  %v3054_v55 = vpop.permute.xlu0 %3053  ;;  %v2627_v19 = vadd.f32 %v2591_v21, %v2331_v28 }
 0x347   : > { %v10870_v42 = vpop.permute.xlu1 %2501  ;;  %v3181_v57 = vmul.f32 %v10878_v30, %v3054_v55  ;;  %1071 = vperm.xlu0 %9091, %v903_v7   ;;  %v2036_v58 = vadd.f32 %v2000_v40, %v1740_v37  ;;  %v10890_v37 = vld [vmem:[#allocation13] ss:$0 sm:$0xff] }
 0x348   : > { %826 = vperm.xlu1 %9092, %v647_v16   ;;  %v2626_v62 = vadd.f32 %v2590_v10, %v2330_v60  ;;  %v2923_v7 = vadd.f32 %v2887_v36, %v2627_v19  ;;  %v906_v10 = vld [vmem:[#allocation2 + $0x119] sm:$0xff] }
 0x349   : > { %v3217_v16 = vadd.f32 %v3181_v57, %v2921_v63  ;;  %v2332_v33 = vadd.f32 %v2296_v24, %v2036_v58  ;;  %v11880_v57 = vld [vmem:[#allocation57_spill] sm:$0xff] }
 0x34a   : > { %v2922_v53 = vadd.f32 %v2886_v2, %v2626_v62  ;;  %v3064_v5 = vpop.permute.xlu0 %3063  ;;  %v1201_v62 = vld [vmem:[#allocation2 + $0x112] sm:$0xff] }
 0x34b   : > { %v3059_v41 = vpop.permute.xlu1 %3058  ;;  %v3260_v40 = vmul.f32 %v10886_v59, %v3217_v16  ;;  %v3183_v6 = vmul.f32 %v10878_v30, %v3064_v5  ;;  %1081 = vperm.xlu0 %9091, %v905_v22   ;;  %v2628_v39 = vadd.f32 %v2592_v25, %v2332_v33 }
 0x34c   : > { %v3182_v14 = vmul.f32 %v10878_v30, %v3059_v41  ;;  %1076 = vperm.xlu1 %9092, %v904_v34   ;;  %v11881_v41 = vld [vmem:[#allocation58_spill] sm:$0xff] }
 0x34d   : > { %v3303_v60 = vadd.f32 %v10890_v37, %v3260_v40  ;;  %v3219_v32 = vadd.f32 %v3183_v6, %v2923_v7  ;;  %v2924_v24 = vadd.f32 %v2888_v45, %v2628_v39  ;;  %v1202_v45 = vld [vmem:[#allocation2 + $0x11a] sm:$0xff]  ;;  %v1497_v6 = vld [vmem:[#allocation2 + $0x122] sm:$0xff] }
 0x34e   : > { %v3218_v21 = vadd.f32 %v3182_v14, %v2922_v53  ;;  %v10895_v28 = vpop.permute.xlu0 %1638 }
 0x34f   : > { %v3069_v0 = vpop.permute.xlu1 %3068  ;;  %v3339_v63 = vmax.f32 %v3303_v60, 0.0  ;;  %v3262_v36 = vmul.f32 %v10886_v59, %v3219_v32  ;;  %1367 = vperm.xlu0 %9091, %v11880_v57   ;;  %v1791_v60 = vld [vmem:[#allocation2 + $0x113] sm:$0xff]  ;;  %v1793_v57 = vld [vmem:[#allocation2 + $0x123] sm:$0xff] }
 0x350   : > { %v3261_v2 = vmul.f32 %v10886_v59, %v3218_v21  ;;  %v3184_v55 = vmul.f32 %v10878_v30, %v3069_v0  ;;  %1086 = vperm.xlu1 %9092, %v906_v10   ;;  %v1498_v21 = vld [vmem:[#allocation2 + $0x12a] sm:$0xff] }
 0x351   : > { %3375 = vst.msk [vmem:[#allocation3 + $0x70] sm:$0xff] %vm524_vm1, %v3339_v63  ;;  %v3305_v25 = vadd.f32 %v10890_v37, %v3262_v36 }
 0x352   : > { %v3304_v34 = vadd.f32 %v10890_v37, %v3261_v2  ;;  %v3220_v58 = vadd.f32 %v3184_v55, %v2924_v24  ;;  %v10906_v33 = vpop.permute.xlu0 %1648  ;;  %v1792_v2 = vld [vmem:[#allocation2 + $0x11b] sm:$0xff] }
 0x353   : > { %v10902_v22 = vpop.permute.xlu1 %1643  ;;  %v3341_v53 = vmax.f32 %v3305_v25, 0.0  ;;  %1377 = vperm.xlu0 %9091, %v1201_v62   ;;  %v11883_v25 = vld [vmem:[#allocation89_spill] sm:$0xff] }
 0x354   : > { %v3340_v19 = vmax.f32 %v3304_v34, 0.0  ;;  %v3263_v16 = vmul.f32 %v10886_v59, %v3220_v58  ;;  %1372 = vperm.xlu1 %9092, %v11881_v41  }
 0x355   : > { %3377 = vst.msk [vmem:[#allocation3 + $0x80] sm:$0xff] %vm524_vm1, %v3341_v53  ;;  %v11884_v53 = vld [vmem:[#allocation84_spill] sm:$0xff] }
 0x356   : > { %3376 = vst.msk [vmem:[#allocation3 + $0x78] sm:$0xff] %vm524_vm1, %v3340_v19  ;;  %v3306_v14 = vadd.f32 %v10890_v37, %v3263_v16  ;;  %v10913_v40 = vpop.permute.xlu0 %1658  ;;  %v1113_v19 = vmul.f32 %v10796_v56, %v11883_v25  ;;  %v11890_v25 = vld [vmem:[#allocation92_spill] sm:$0xff] }
 0x357   : > { %v10911_v5 = vpop.permute.xlu1 %1653  ;;  %1663 = vperm.xlu0 %9091, %v1201_v62  }
 0x358   : > { %v3342_v7 = vmax.f32 %v3306_v14, 0.0  ;;  %1382 = vperm.xlu1 %9092, %v1202_v45   ;;  %v3859_v55 = vld [vmem:[#allocation3 + $0x6c] sm:$0xff] }
 0x359   : > { %v11885_v14 = vld [vmem:[#allocation85_spill] sm:$0xff] }
 0x35a   : > { %3378 = vst.msk [vmem:[#allocation3 + $0x88] sm:$0xff] %vm524_vm1, %v3342_v7  ;;  %v10918_v39 = vpop.permute.xlu0 %2215  ;;  %v854_v7 = vmul.f32 %v10800_v51, %v11885_v14  ;;  %v862_v14 = vmul.f32 %v10800_v51, %v10712_v44  ;;  %v1124_v44 = vmul.f32 %v10796_v56, %v10734_v9  ;;  %v864_v9 = vmul.f32 %v10800_v51, %v10722_v54 }
 0x35b   : > { %v10916_v10 = vpop.permute.xlu1 %2210  ;;  %1673 = vperm.xlu0 %9091, %v1497_v6   ;;  %v11886_v6 = vld [vmem:[#allocation90_spill] sm:$0xff] }
 0x35c   : > { %1668 = vperm.xlu1 %9092, %v1202_v45   ;;  %v853_v45 = vmul.f32 %v10800_v51, %v11884_v53  ;;  %v1116_v53 = vmul.f32 %v10796_v56, %v11890_v25 }
 0x35d   : > { %v3861_v0 = vld [vmem:[#allocation3 + $0x7e] sm:$0xff]  ;;  %v3860_v63 = vld [vmem:[#allocation3 + $0x74] sm:$0xff] }
 0x35e   : > { %v10922_v24 = vpop.permute.xlu0 %2225  ;;  %v3863_v34 = vmax.f32 %v3859_v55, %v3861_v0  ;;  %v1794_v0 = vld [vmem:[#allocation2 + $0x12b] sm:$0xff] }
 0x35f   : > { %v10920_v32 = vpop.permute.xlu1 %2220  ;;  %11882 = vst [vmem:[#allocation69_spill] sm:$0xff] %v10922_v24  ;;  %1959 = vperm.xlu0 %9091, %v1791_v60   ;;  %v1122_v60 = vmul.f32 %v10796_v56, %v10730_v20  ;;  %v11887_v55 = vld [vmem:[#allocation86_spill] sm:$0xff]  ;;  %v1418_v20 = vmul.f32 %v10804_v52, %v10782_v48  ;;  %v1714_v24 = vmul.f32 %v10816_v23, %v10895_v28 }
 0x360   : > { %1678 = vperm.xlu1 %9092, %v1498_v21   ;;  %v1114_v21 = vmul.f32 %v10796_v56, %v11886_v6  ;;  %v11891_v6 = vld [vmem:[#allocation88_spill] sm:$0xff] }
 0x361   : > { %v3862_v36 = vld [vmem:[#allocation3 + $0x86] sm:$0xff]  ;;  %v1158_v25 = vadd.f32 %v1122_v60, %v862_v14  ;;  %v1125_v60 = vmul.f32 %v10796_v56, %v10736_v1  ;;  %v2090_v14 = vld [vmem:[#allocation2 + $0x12c] sm:$0xff] }
 0x362   : > { %v3864_v58 = vmax.f32 %v3860_v63, %v3862_v36  ;;  %v10928_v16 = vpop.permute.xlu0 %2782  ;;  %v11888_v63 = vld [vmem:[#allocation87_spill] sm:$0xff]  ;;  %v10964_v48 = vadd.f32 %v1114_v21, %v854_v7 }
 0x363   : > { %v10924_v62 = vpop.permute.xlu1 %2777  ;;  %1969 = vperm.xlu0 %9091, %v1793_v57   ;;  %v856_v36 = vmul.f32 %v10800_v51, %v11888_v63  ;;  %v10956_v63 = vadd.f32 %v1113_v19, %v853_v45  ;;  %v1419_v19 = vmul.f32 %v10804_v52, %v10784_v18  ;;  %v2089_v45 = vld [vmem:[#allocation2 + $0x124] sm:$0xff]  ;;  %v1454_v7 = vadd.f32 %v1418_v20, %v1158_v25 }
 0x364   : > { %1964 = vperm.xlu1 %9092, %v1792_v2   ;;  %v8737_v41 = vpack.c.bf16 %v3864_v58, %v3863_v34  ;;  %v855_v2 = vmul.f32 %v10800_v51, %v11887_v55  ;;  %v11889_v34 = vld [vmem:[#allocation91_spill] sm:$0xff]  ;;  %v857_v55 = vmul.f32 %v10800_v51, %v11891_v6  ;;  %v1160_v18 = vadd.f32 %v1124_v44, %v864_v9  ;;  %v11892_v20 = vld [vmem:[#allocation93_spill] sm:$0xff] }
 0x365   : > { %v1115_v58 = vmul.f32 %v10796_v56, %v11889_v34  ;;  %v10983_v28 = vadd.f32 %v1116_v53, %v856_v36  ;;  %v1126_v36 = vmul.f32 %v10796_v56, %v10738_v13  ;;  %v1117_v1 = vmul.f32 %v10796_v56, %v11892_v20 }
 0x366   : > { %8738 = vmatpush3.bf16.msra.mxu0 %v8737_v41  ;;  %8741 = vmatpush3.bf16.msra.mxu1 %v8737_v41  ;;  %v1123_v41 = vmul.f32 %v10796_v56, %v10732_v46  ;;  %v10962_v34 = vpop.permute.xlu0 %2792  ;;  %v863_v46 = vmul.f32 %v10800_v51, %v10715_v35  ;;  %v1420_v35 = vmul.f32 %v10804_v52, %v10786_v38 }
 0x367   : > { %v10950_v57 = vpop.permute.xlu1 %2787  ;;  %8742 = vmatprep.subr.bf16.mxu0 %v11764_v11  ;;  %8745 = vmatprep.subr.bf16.mxu1 %v11764_v11  ;;  %v1750_v38 = vadd.f32 %v1714_v24, %v1454_v7  ;;  %v866_v13 = vmul.f32 %v10800_v51, %v10728_v15  ;;  %v1717_v9 = vmul.f32 %v10816_v23, %v10911_v5 }
 0x368   : > { %1974 = vperm.xlu1 %9092, %v1794_v0   ;;  %2255 = vperm.xlu0 %9091, %v10762_v31   ;;  %v10981_v31 = vadd.f32 %v1115_v58, %v855_v2  ;;  %v1159_v54 = vadd.f32 %v1123_v41, %v863_v46  ;;  %v1715_v0 = vmul.f32 %v10816_v23, %v10902_v22 }
 0x369   : > { %8289 = vmatmul.mubr.msk.f32.vlgmr.msra.gmra.mrb[6].mxu0 %vm524_vm1, %v10328_v8  ;;  %8296 = vmatmul.mubr.msk.f32.vlgmr.msra.gmra.mrb[6].mxu1 %vm524_vm1, %v10335_v61  ;;  %v1716_v58 = vmul.f32 %v10816_v23, %v10906_v33  ;;  %v865_v22 = vmul.f32 %v10800_v51, %v10724_v50  ;;  %v1456_v24 = vadd.f32 %v1420_v35, %v1160_v18  ;;  %v11894_v18 = vld [vmem:[#allocation98_spill] sm:$0xff] }
 0x36a   : > { %8302 = vmatprep.mubr.msk.f32.mxu0 %vm9411_vm2, %v11749_v4  ;;  %8309 = vmatprep.mubr.msk.f32.mxu1 %vm9411_vm2, %v11749_v4  ;;  %v1935_v2 = vpop.permute.xlu0 %1934  ;;  %v1455_v6 = vadd.f32 %v1419_v19, %v1159_v54  ;;  %v1422_v33 = vmul.f32 %v10804_v52, %v10790_v43  ;;  %v1718_v15 = vmul.f32 %v10816_v23, %v10913_v40  ;;  %v11893_v43 = vld [vmem:[#allocation97_spill] sm:$0xff] }
 0x36b   : > { %v10987_v21 = vpop.permute.xlu1 %2797  ;;  %v2010_v53 = vmul.f32 %v10666_v47, %v1935_v2  ;;  %v1161_v25 = vadd.f32 %v1125_v60, %v865_v22  ;;  %v1752_v7 = vadd.f32 %v1716_v58, %v1456_v24  ;;  %v1409_v54 = vmul.f32 %v10804_v52, %v11893_v43  ;;  %v2385_v2 = vld [vmem:[#allocation2 + $0x134] sm:$0xff]  ;;  %v2679_v43 = vld [vmem:[#allocation2 + $0x125] sm:$0xff] }
 0x36c   : > { %2260 = vperm.xlu1 %9092, %v10769_v49   ;;  %2265 = vperm.xlu0 %9091, %v2089_v45   ;;  %v1421_v49 = vmul.f32 %v10804_v52, %v10788_v26  ;;  %v1751_v46 = vadd.f32 %v1715_v0, %v1455_v6  ;;  %v1162_v26 = vadd.f32 %v1126_v36, %v866_v13  ;;  %v11896_v22 = vld [vmem:[#allocation100_spill] sm:$0xff]  ;;  %v11897_v6 = vld [vmem:[#allocation30_spill] sm:$0xff] }
 0x36d   : > { %v11011_v41 = vadd.f32 %v2010_v53, %v1750_v38  ;;  %v1410_v60 = vmul.f32 %v10804_v52, %v11894_v18  ;;  %v1153_v38 = vadd.f32 %v1117_v1, %v857_v55  ;;  %v11895_v53 = vld [vmem:[#allocation99_spill] sm:$0xff]  ;;  %v1705_v13 = vmul.f32 %v10816_v23, %v11897_v6 }
 0x36e   : > { %v1945_v19 = vpop.permute.xlu0 %1944  ;;  %v1457_v0 = vadd.f32 %v1421_v49, %v1161_v25  ;;  %v1411_v36 = vmul.f32 %v10804_v52, %v11895_v53  ;;  %v1458_v58 = vadd.f32 %v1422_v33, %v1162_v26  ;;  %v11898_v25 = vld [vmem:[#allocation101_spill] sm:$0xff]  ;;  %v11899_v1 = vld [vmem:[#allocation35_spill] sm:$0xff]  ;;  %v1445_v26 = vadd.f32 %v1409_v54, %v10956_v63  ;;  %v11903_v54 = vld [vmem:[#allocation48_spill] sm:$0xff] }
 0x36f   : > { %v1940_v44 = vpop.permute.xlu1 %1939  ;;  %v2012_v35 = vmul.f32 %v10666_v47, %v1945_v19  ;;  %v1413_v55 = vmul.f32 %v10804_v52, %v11898_v25  ;;  %v1706_v33 = vmul.f32 %v10816_v23, %v11899_v1  ;;  %v2386_v19 = vld [vmem:[#allocation2 + $0x13c] sm:$0xff] }
 0x370   : > { %v2011_v50 = vmul.f32 %v10666_v47, %v1940_v44  ;;  %2270 = vperm.xlu1 %9092, %v2090_v14   ;;  %2551 = vperm.xlu0 %9091, %v2089_v45   ;;  %v1412_v45 = vmul.f32 %v10804_v52, %v11896_v22  ;;  %v1753_v24 = vadd.f32 %v1717_v9, %v1457_v0  ;;  %v11900_v9 = vld [vmem:[#allocation106_spill] sm:$0xff]  ;;  %v11901_v0 = vld [vmem:[#allocation56_spill] sm:$0xff]  ;;  %v11906_v25 = vld [vmem:[#allocation45_spill] sm:$0xff] }
 0x371   : > { %v11027_v20 = vadd.f32 %v2012_v35, %v1752_v7  ;;  %v1446_v7 = vadd.f32 %v1410_v60, %v10964_v48  ;;  %v2001_v35 = vmul.f32 %v10666_v47, %v11900_v9  ;;  %v1447_v18 = vadd.f32 %v1411_v36, %v10981_v31  ;;  %v11904_v22 = vld [vmem:[#allocation44_spill] sm:$0xff] }
 0x372   : > { %v11023_v5 = vadd.f32 %v2011_v50, %v1751_v46  ;;  %v1955_v44 = vpop.permute.xlu0 %1954  ;;  %v1754_v46 = vadd.f32 %v1718_v15, %v1458_v58  ;;  %v1707_v53 = vmul.f32 %v10816_v23, %v11901_v0  ;;  %v11902_v15 = vld [vmem:[#allocation107_spill] sm:$0xff]  ;;  %v1448_v63 = vadd.f32 %v1412_v45, %v10983_v28 }
 0x373   : > { %v1950_v40 = vpop.permute.xlu1 %1949  ;;  %v2014_v50 = vmul.f32 %v10666_v47, %v1955_v44  ;;  %v2002_v58 = vmul.f32 %v10666_v47, %v11902_v15  ;;  %v1741_v48 = vadd.f32 %v1705_v13, %v1445_v26  ;;  %v1708_v60 = vmul.f32 %v10816_v23, %v11903_v54  ;;  %v2680_v28 = vld [vmem:[#allocation2 + $0x12d] sm:$0xff]  ;;  %v11907_v13 = vld [vmem:[#allocation41_spill] sm:$0xff]  ;;  %v11911_v15 = vld [vmem:[#allocation68_spill] sm:$0xff] }
 0x374   : > { %v2013_v49 = vmul.f32 %v10666_v47, %v1950_v40  ;;  %2556 = vperm.xlu1 %9092, %v2090_v14   ;;  %2561 = vperm.xlu0 %9091, %v2385_v2   ;;  %v2297_v6 = vmul.f32 %v10678_v12, %v11904_v22  ;;  %v1449_v36 = vadd.f32 %v1413_v55, %v1153_v38  ;;  %v2681_v38 = vld [vmem:[#allocation2 + $0x135] sm:$0xff] }
 0x375   : > { %v11050_v2 = vadd.f32 %v2014_v50, %v1754_v46  ;;  %v2298_v1 = vmul.f32 %v10678_v12, %v11906_v25  ;;  %v2037_v45 = vadd.f32 %v2001_v35, %v1741_v48  ;;  %v2003_v46 = vmul.f32 %v10666_v47, %v11907_v13  ;;  %v11908_v50 = vld [vmem:[#allocation42_spill] sm:$0xff]  ;;  %v11912_v22 = vld [vmem:[#allocation39_spill] sm:$0xff] }
 0x376   : > { %v11043_v14 = vadd.f32 %v2013_v49, %v1753_v24  ;;  %v11059_v31 = vpop.permute.xlu0 %2511  ;;  %v1742_v24 = vadd.f32 %v1706_v33, %v1446_v7  ;;  %v11905_v49 = vld [vmem:[#allocation72_spill] sm:$0xff]  ;;  %v2004_v26 = vmul.f32 %v10666_v47, %v11908_v50  ;;  %v1743_v55 = vadd.f32 %v1707_v53, %v1447_v18 }
 0x377   : > { %v11052_v40 = vpop.permute.xlu1 %2506  ;;  %v1709_v44 = vmul.f32 %v10816_v23, %v11905_v49  ;;  %v11910_v7 = vld [vmem:[#allocation36_spill] sm:$0xff]  ;;  %v1744_v35 = vadd.f32 %v1708_v60, %v1448_v63  ;;  %v2333_v48 = vadd.f32 %v2297_v6, %v2037_v45  ;;  %v2299_v49 = vmul.f32 %v10678_v12, %v11912_v22 }
 0x378   : > { %2566 = vperm.xlu1 %9092, %v2386_v19   ;;  %2847 = vperm.xlu0 %9091, %v2679_v43   ;;  %v11909_v19 = vld [vmem:[#allocation80_spill] sm:$0xff]  ;;  %v2038_v33 = vadd.f32 %v2002_v58, %v1742_v24  ;;  %v2005_v0 = vmul.f32 %v10666_v47, %v11910_v7  ;;  %v2594_v43 = vmul.f32 %v10687_v17, %v11911_v15  ;;  %v11913_v58 = vld [vmem:[#allocation51_spill] sm:$0xff] }
 0x379   : > { %v2593_v9 = vmul.f32 %v10687_v17, %v11909_v19  ;;  %v2889_v25 = vmul.f32 %v10693_v3, %v10924_v62  ;;  %v1745_v18 = vadd.f32 %v1709_v44, %v1449_v36  ;;  %v2300_v47 = vmul.f32 %v10678_v12, %v11913_v58  ;;  %v2682_v63 = vld [vmem:[#allocation2 + $0x13d] sm:$0xff]  ;;  %v2975_v62 = vld [vmem:[#allocation2 + $0x126] sm:$0xff]  ;;  %v11914_v19 = vld [vmem:[#allocation67_spill] sm:$0xff] }
 0x37a   : > { %v11081_v13 = vpop.permute.xlu0 %2521  ;;  %v2334_v53 = vadd.f32 %v2298_v1, %v2038_v33  ;;  %v2890_v24 = vmul.f32 %v10693_v3, %v10928_v16  ;;  %v2039_v60 = vadd.f32 %v2003_v46, %v1743_v55  ;;  %v2040_v6 = vadd.f32 %v2004_v26, %v1744_v35  ;;  %v2977_v35 = vld [vmem:[#allocation2 + $0x136] sm:$0xff] }
 0x37b   : > { %v11075_v54 = vpop.permute.xlu1 %2516  ;;  %v2629_v45 = vadd.f32 %v2593_v9, %v2333_v48  ;;  %v2595_v50 = vmul.f32 %v10687_v17, %v10852_v27  ;;  %v2301_v36 = vmul.f32 %v10678_v12, %v11914_v19  ;;  %v2596_v1 = vmul.f32 %v10687_v17, %v10858_v29 }
 0x37c   : > { %2852 = vperm.xlu1 %9092, %v2680_v28   ;;  %2857 = vperm.xlu0 %9091, %v2681_v38   ;;  %v2041_v28 = vadd.f32 %v2005_v0, %v1745_v18  ;;  %v2630_v44 = vadd.f32 %v2594_v43, %v2334_v53  ;;  %v2335_v7 = vadd.f32 %v2299_v49, %v2039_v60  ;;  %v2976_v0 = vld [vmem:[#allocation2 + $0x12e] sm:$0xff] }
 0x37d   : > { %v2925_v16 = vadd.f32 %v2889_v25, %v2629_v45  ;;  %v2891_v46 = vmul.f32 %v10693_v3, %v10950_v57  ;;  %v2336_v27 = vadd.f32 %v2300_v47, %v2040_v6  ;;  %v2892_v55 = vmul.f32 %v10693_v3, %v10962_v34 }
 0x37e   : > { %v3079_v9 = vpop.permute.xlu0 %3078  ;;  %v2926_v38 = vadd.f32 %v2890_v24, %v2630_v44  ;;  %v2631_v29 = vadd.f32 %v2595_v50, %v2335_v7  ;;  %v2597_v15 = vmul.f32 %v10687_v17, %v10870_v42  ;;  %v2337_v57 = vadd.f32 %v2301_v36, %v2041_v28  ;;  %v2978_v42 = vld [vmem:[#allocation2 + $0x13e] sm:$0xff] }
 0x37f   : > { %v3074_v33 = vpop.permute.xlu1 %3073  ;;  %v3186_v12 = vmul.f32 %v10878_v30, %v3079_v9  ;;  %v2632_v48 = vadd.f32 %v2596_v1, %v2336_v27  ;;  %v2893_v18 = vmul.f32 %v10693_v3, %v10987_v21 }
 0x380   : > { %v3185_v26 = vmul.f32 %v10878_v30, %v3074_v33  ;;  %2862 = vperm.xlu1 %9092, %v2682_v63   ;;  %3143 = vperm.xlu0 %9091, %v2975_v62   ;;  %v2927_v25 = vadd.f32 %v2891_v46, %v2631_v29  ;;  %v2633_v63 = vadd.f32 %v2597_v15, %v2337_v57 }
 0x381   : > { %v3222_v22 = vadd.f32 %v3186_v12, %v2926_v38  ;;  %v2928_v47 = vadd.f32 %v2892_v55, %v2632_v48  ;;  %v11916_v48 = vld [vmem:[#allocation29_spill] sm:$0xff] }
 0x382   : > { %v3221_v43 = vadd.f32 %v3185_v26, %v2925_v16  ;;  %v3089_v58 = vpop.permute.xlu0 %3088  ;;  %v2929_v50 = vadd.f32 %v2893_v18, %v2633_v63  ;;  %v11918_v18 = vld [vmem:[#allocation31_spill] sm:$0xff] }
 0x383   : > { %v3084_v49 = vpop.permute.xlu1 %3083  ;;  %v3265_v24 = vmul.f32 %v10886_v59, %v3222_v22  ;;  %v3188_v17 = vmul.f32 %v10878_v30, %v3089_v58  ;;  %v1119_v22 = vmul.f32 %v10796_v56, %v11916_v48 }
 0x384   : > { %v3264_v34 = vmul.f32 %v10886_v59, %v3221_v43  ;;  %v3187_v53 = vmul.f32 %v10878_v30, %v3084_v49  ;;  %3148 = vperm.xlu1 %9092, %v2976_v0   ;;  %3153 = vperm.xlu0 %9091, %v2977_v35   ;;  %v11915_v35 = vld [vmem:[#allocation47_spill] sm:$0xff]  ;;  %v11917_v49 = vld [vmem:[#allocation33_spill] sm:$0xff] }
 0x385   : > { %v3308_v45 = vadd.f32 %v10890_v37, %v3265_v24  ;;  %v3224_v3 = vadd.f32 %v3188_v17, %v2928_v47  ;;  %v1118_v57 = vmul.f32 %v10796_v56, %v11915_v35  ;;  %v11920_v47 = vld [vmem:[#allocation55_spill] sm:$0xff]  ;;  %v11921_v17 = vld [vmem:[#allocation74_spill] sm:$0xff] }
 0x386   : > { %v3307_v60 = vadd.f32 %v10890_v37, %v3264_v34  ;;  %v3223_v6 = vadd.f32 %v3187_v53, %v2927_v25  ;;  %v11111_v36 = vpop.permute.xlu0 %2230  ;;  %v858_v25 = vmul.f32 %v10800_v51, %v11917_v49  ;;  %v859_v34 = vmul.f32 %v10800_v51, %v11918_v18  ;;  %v11919_v53 = vld [vmem:[#allocation34_spill] sm:$0xff]  ;;  %v11929_v18 = vld [vmem:[#allocation40_spill] sm:$0xff] }
 0x387   : > { %v3094_v21 = vpop.permute.xlu1 %3093  ;;  %v3344_v44 = vmax.f32 %v3308_v45, 0.0  ;;  %v3267_v1 = vmul.f32 %v10886_v59, %v3224_v3  ;;  %v1120_v58 = vmul.f32 %v10796_v56, %v11919_v53  ;;  %v1121_v24 = vmul.f32 %v10796_v56, %v11920_v47  ;;  %v11923_v3 = vld [vmem:[#allocation32_spill] sm:$0xff] }
 0x388   : > { %v3343_v62 = vmax.f32 %v3307_v60, 0.0  ;;  %v3266_v28 = vmul.f32 %v10886_v59, %v3223_v6  ;;  %v3189_v19 = vmul.f32 %v10878_v30, %v3094_v21  ;;  %3158 = vperm.xlu1 %9092, %v2978_v42   ;;  %v1414_v42 = vmul.f32 %v10804_v52, %v11921_v17  ;;  %v11922_v6 = vld [vmem:[#allocation46_spill] sm:$0xff]  ;;  %v11925_v56 = vld [vmem:[#allocation104_spill] sm:$0xff]  ;;  %v11930_v17 = vld [vmem:[#allocation37_spill] sm:$0xff] }
 0x389   : > { %3380 = vst.msk [vmem:[#allocation3 + $0x98] sm:$0xff] %vm524_vm1, %v3344_v44  ;;  %v3310_v16 = vadd.f32 %v10890_v37, %v3267_v1  ;;  %v860_v45 = vmul.f32 %v10800_v51, %v11922_v6  ;;  %v861_v21 = vmul.f32 %v10800_v51, %v11923_v3  ;;  %v1155_v44 = vadd.f32 %v1119_v22, %v859_v34  ;;  %v11928_v51 = vld [vmem:[#allocation50_spill] sm:$0xff] }
 0x38a   : > { %3379 = vst.msk [vmem:[#allocation3 + $0x90] sm:$0xff] %vm524_vm1, %v3343_v62  ;;  %v3309_v33 = vadd.f32 %v10890_v37, %v3266_v28  ;;  %v3225_v7 = vadd.f32 %v3189_v19, %v2929_v50  ;;  %v11121_v27 = vpop.permute.xlu0 %2240  ;;  %v11924_v50 = vld [vmem:[#allocation75_spill] sm:$0xff]  ;;  %v1154_v19 = vadd.f32 %v1118_v57, %v858_v25  ;;  %v1416_v1 = vmul.f32 %v10804_v52, %v11925_v56  ;;  %v11932_v56 = vld [vmem:[#allocation53_spill] sm:$0xff] }
 0x38b   : > { %v11118_v46 = vpop.permute.xlu1 %2235  ;;  %v3346_v38 = vmax.f32 %v3310_v16, 0.0  ;;  %v1415_v62 = vmul.f32 %v10804_v52, %v11924_v50  ;;  %v1156_v49 = vadd.f32 %v1120_v58, %v860_v45  ;;  %v1157_v57 = vadd.f32 %v1121_v24, %v861_v21  ;;  %v11165_v25 = vld [vmem:[#allocation9 + $0x4] ss:$0 sm:$0xff] }
 0x38c   : > { %v3345_v26 = vmax.f32 %v3309_v33, 0.0  ;;  %v3268_v9 = vmul.f32 %v10886_v59, %v3225_v7  ;;  %v11926_v33 = vld [vmem:[#allocation43_spill] sm:$0xff]  ;;  %v1450_v22 = vadd.f32 %v1414_v42, %v1154_v19  ;;  %v2006_v34 = vmul.f32 %v11165_v25, %v11929_v18 }
 0x38d   : > { %3382 = vst.msk [vmem:[#allocation3 + $0xa8] sm:$0xff] %vm524_vm1, %v3346_v38  ;;  %v1710_v7 = vmul.f32 %v10816_v23, %v11926_v33  ;;  %v11927_v38 = vld [vmem:[#allocation105_spill] sm:$0xff]  ;;  %v1451_v47 = vadd.f32 %v1415_v62, %v1155_v44  ;;  %v1712_v6 = vmul.f32 %v10816_v23, %v11930_v17  ;;  %v1452_v58 = vadd.f32 %v1416_v1, %v1156_v49  ;;  %v11177_v42 = vld [vmem:[#allocation9 + $0x5] ss:$0 sm:$0xff]  ;;  %v11933_v44 = vld [vmem:[#allocation38_spill] sm:$0xff]  ;;  %v3557_v49 = vpop.f32.mrb[0].mxu1 }
 0x38e   : > { %3381 = vst.msk [vmem:[#allocation3 + $0xa0] sm:$0xff] %vm524_vm1, %v3345_v26  ;;  %v3311_v55 = vadd.f32 %v10890_v37, %v3268_v9  ;;  %v11128_v29 = vpop.permute.xlu0 %2250  ;;  %v2302_v45 = vmul.f32 %v11177_v42, %v10916_v10  ;;  %v2008_v62 = vmul.f32 %v11165_v25, %v11932_v56  ;;  %v1713_v33 = vmul.f32 %v10816_v23, %v11933_v44  ;;  %v8255_v18 = vpop.f32.mrb[1].mxu1 }
 0x38f   : > { %v11126_v12 = vpop.permute.xlu1 %2245  ;;  %v1746_v24 = vadd.f32 %v1710_v7, %v1450_v22  ;;  %v1748_v10 = vadd.f32 %v1712_v6, %v1452_v58 }
 0x390   : > { %v3347_v0 = vmax.f32 %v3311_v55, 0.0  ;;  %v4008_v26 = vld [vmem:[#allocation3 + $0x98] sm:$0xff]  ;;  %v1417_v55 = vmul.f32 %v10804_v52, %v11927_v38  ;;  %v2303_v38 = vmul.f32 %v11177_v42, %v10918_v39  ;;  %v3484_v39 = vpop.f32.mrb[0].mxu0 }
 0x391   : > { %v4007_v16 = vld [vmem:[#allocation3 + $0x90] sm:$0xff]  ;;  %v11931_v52 = vld [vmem:[#allocation52_spill] sm:$0xff]  ;;  %v3561_v22 = vmax.f32 %v3484_v39, %v3557_v49 }
 0x392   : > { %3383 = vst.msk [vmem:[#allocation3 + $0xb0] sm:$0xff] %vm524_vm1, %v3347_v0  ;;  %v11131_v43 = vpop.permute.xlu0 %2807  ;;  %v1711_v0 = vmul.f32 %v10816_v23, %v11928_v51  ;;  %v2007_v3 = vmul.f32 %v11165_v25, %v11931_v52  ;;  %v1453_v21 = vadd.f32 %v1417_v55, %v1157_v57  ;;  %v2304_v23 = vmul.f32 %v11177_v42, %v10920_v32  ;;  %v11934_v51 = vld [vmem:[#allocation54_spill] sm:$0xff] }
 0x393   : > { %v2803_v15 = vpop.permute.xlu1 %2802  ;;  %v2044_v57 = vadd.f32 %v2008_v62, %v1748_v10  ;;  %3562 = vst.msk [vmem:[#allocation4 + $0xb] sm:$0xff] %vm524_vm1, %v3561_v22 }
 0x394   : > { %v1747_v19 = vadd.f32 %v1711_v0, %v1451_v47  ;;  %v2009_v0 = vmul.f32 %v11165_v25, %v11934_v51 }
 0x395   : > { %v4009_v60 = vld [vmem:[#allocation3 + $0xa2] sm:$0xff] }
 0x396   : > { %v11155_v28 = vpop.permute.xlu0 %2817  ;;  %v4011_v35 = vmax.f32 %v4007_v16, %v4009_v60  ;;  %v2042_v16 = vadd.f32 %v2006_v34, %v1746_v24  ;;  %v1749_v34 = vadd.f32 %v1713_v33, %v1453_v21 }
 0x397   : > { %v11147_v63 = vpop.permute.xlu1 %2812 }
 0x399   : > { %v4010_v9 = vld [vmem:[#allocation3 + $0xaa] sm:$0xff] }
 0x39a   : > { %v4012_v48 = vmax.f32 %v4008_v26, %v4010_v9  ;;  %v11175_v50 = vpop.permute.xlu0 %2531  ;;  %v11185_v26 = vld [vmem:[#allocation9 + $0x6] ss:$0 sm:$0xff]  ;;  %v2043_v9 = vadd.f32 %v2007_v3, %v1747_v19  ;;  %v3705_v19 = vpop.f32.mrb[2].mxu1 }
 0x39b   : > { %v11169_v53 = vpop.permute.xlu1 %2526  ;;  %v2598_v1 = vmul.f32 %v11185_v26, %v11052_v40  ;;  %v2338_v40 = vadd.f32 %v2302_v45, %v2042_v16  ;;  %v2599_v32 = vmul.f32 %v11185_v26, %v11059_v31  ;;  %v2600_v17 = vmul.f32 %v11185_v26, %v11075_v54  ;;  %v11935_v31 = vld [vmem:[#allocation69_spill] sm:$0xff]  ;;  %v8269_v33 = vpop.f32.mrb[3].mxu1 }
 0x39c   : > { %v8743_v60 = vpack.c.bf16 %v4012_v48, %v4011_v35  ;;  %v11201_v35 = vld [vmem:[#allocation9 + $0x7] ss:$0 sm:$0xff]  ;;  %v2339_v3 = vadd.f32 %v2303_v38, %v2043_v9  ;;  %v2305_v58 = vmul.f32 %v11177_v42, %v11935_v31  ;;  %v2045_v16 = vadd.f32 %v2009_v0, %v1749_v34 }
 0x39d   : > { %v2894_v48 = vmul.f32 %v11201_v35, %v2803_v15  ;;  %v8248_v15 = vpop.f32.mrb[1].mxu0  ;;  %v2634_v47 = vadd.f32 %v2598_v1, %v2338_v40  ;;  %v2895_v24 = vmul.f32 %v11201_v35, %v11131_v43  ;;  %v2896_v56 = vmul.f32 %v11201_v35, %v11147_v63 }
 0x39e   : > { %8744 = vmatpush3.bf16.msra.mxu0 %v8743_v60  ;;  %8747 = vmatpush3.bf16.msra.mxu1 %v8743_v60  ;;  %v11197_v55 = vpop.permute.xlu0 %2541  ;;  %v3635_v52 = vpop.f32.mrb[2].mxu0  ;;  %v2340_v60 = vadd.f32 %v2304_v23, %v2044_v57  ;;  %v2635_v1 = vadd.f32 %v2599_v32, %v2339_v3  ;;  %v2601_v10 = vmul.f32 %v11185_v26, %v11081_v13 }
 0x39f   : > { %v11189_v7 = vpop.permute.xlu1 %2536  ;;  %8748 = vmatprep.subr.bf16.mxu0 %v11764_v11  ;;  %8751 = vmatprep.subr.bf16.mxu1 %v11764_v11  ;;  %v2930_v21 = vadd.f32 %v2894_v48, %v2634_v47  ;;  %v3709_v62 = vmax.f32 %v3635_v52, %v3705_v19  ;;  %v8262_v44 = vpop.f32.mrb[3].mxu0  ;;  %v2341_v23 = vadd.f32 %v2305_v58, %v2045_v16 }
 0x3a0   : > { %v2636_v9 = vadd.f32 %v2600_v17, %v2340_v60  ;;  %v2931_v51 = vadd.f32 %v2895_v24, %v2635_v1  ;;  %v2897_v63 = vmul.f32 %v11201_v35, %v11155_v28  ;;  %v2306_v24 = vmul.f32 %v11177_v42, %v11111_v36 }
 0x3a1   : > { %8303 = vmatmul.mubr.msk.f32.vlgmr.msra.gmra.mrb[8].mxu0 %vm524_vm1, %v10328_v8  ;;  %8310 = vmatmul.mubr.msk.f32.vlgmr.msra.gmra.mrb[8].mxu1 %vm524_vm1, %v10335_v61  ;;  %3710 = vst.msk [vmem:[#allocation4 + $0x15] sm:$0xff] %vm524_vm1, %v3709_v62  ;;  %v2637_v57 = vadd.f32 %v2601_v10, %v2341_v23  ;;  %v2602_v62 = vmul.f32 %v11185_v26, %v11169_v53 }
 0x3a2   : > { %8316 = vmatprep.mubr.msk.f32.mxu0 %vm9411_vm2, %v11749_v4  ;;  %8323 = vmatprep.mubr.msk.f32.mxu1 %vm9411_vm2, %v11749_v4  ;;  %v3099_v45 = vpop.permute.xlu0 %3098  ;;  %v2932_v39 = vadd.f32 %v2896_v56, %v2636_v9  ;;  %v2307_v56 = vmul.f32 %v11177_v42, %v11118_v46  ;;  %v2308_v33 = vmul.f32 %v11177_v42, %v11121_v27 }
 0x3a3   : > { %v11216_v6 = vpop.permute.xlu1 %2546  ;;  %v3190_v54 = vmul.f32 %v10878_v30, %v3099_v45  ;;  %v2933_v18 = vadd.f32 %v2897_v63, %v2637_v57  ;;  %v2603_v36 = vmul.f32 %v11185_v26, %v11175_v50  ;;  %v2342_v1 = vadd.f32 %v2306_v24, %v11011_v41 }
 0x3a4   : > { %v2309_v46 = vmul.f32 %v11177_v42, %v11126_v12  ;;  %v2604_v50 = vmul.f32 %v11185_v26, %v11189_v7  ;;  %v2344_v23 = vadd.f32 %v2308_v33, %v11027_v20  ;;  %v2310_v41 = vmul.f32 %v11177_v42, %v11128_v29 }
 0x3a5   : > { %v3226_v43 = vadd.f32 %v3190_v54, %v2930_v21  ;;  %v2638_v27 = vadd.f32 %v2602_v62, %v2342_v1 }
 0x3a6   : > { %v3109_v48 = vpop.permute.xlu0 %3108  ;;  %v2640_v57 = vadd.f32 %v2604_v50, %v2344_v23 }
 0x3a7   : > { %v3104_v38 = vpop.permute.xlu1 %3103  ;;  %v3269_v0 = vmul.f32 %v10886_v59, %v3226_v43  ;;  %v3192_v49 = vmul.f32 %v10878_v30, %v3109_v48  ;;  %v2343_v43 = vadd.f32 %v2307_v56, %v11023_v5  ;;  %v2345_v5 = vadd.f32 %v2309_v46, %v11043_v14 }
 0x3a8   : > { %v3191_v40 = vmul.f32 %v10878_v30, %v3104_v38 }
 0x3a9   : > { %v3312_v32 = vadd.f32 %v10890_v37, %v3269_v0  ;;  %v3228_v22 = vadd.f32 %v3192_v49, %v2932_v39  ;;  %v2639_v12 = vadd.f32 %v2603_v36, %v2343_v43  ;;  %v2606_v0 = vmul.f32 %v11185_v26, %v11216_v6 }
 0x3aa   : > { %v3227_v13 = vadd.f32 %v3191_v40, %v2931_v51  ;;  %v2823_v28 = vpop.permute.xlu0 %2822  ;;  %v2605_v51 = vmul.f32 %v11185_v26, %v11197_v55  ;;  %v2346_v55 = vadd.f32 %v2310_v41, %v11050_v2 }
 0x3ab   : > { %v3114_v15 = vpop.permute.xlu1 %3113  ;;  %v3348_v17 = vmax.f32 %v3312_v32, 0.0  ;;  %v3271_v52 = vmul.f32 %v10886_v59, %v3228_v22  ;;  %v2898_v53 = vmul.f32 %v11201_v35, %v2823_v28 }
 0x3ac   : > { %v3270_v34 = vmul.f32 %v10886_v59, %v3227_v13  ;;  %v3193_v47 = vmul.f32 %v10878_v30, %v3114_v15  ;;  %v2641_v32 = vadd.f32 %v2605_v51, %v2345_v5 }
 0x3ad   : > { %3384 = vst.msk [vmem:[#allocation3 + $0xb8] sm:$0xff] %vm524_vm1, %v3348_v17  ;;  %v3314_v31 = vadd.f32 %v10890_v37, %v3271_v52  ;;  %v2934_v40 = vadd.f32 %v2898_v53, %v2638_v27  ;;  %v2642_v17 = vadd.f32 %v2606_v0, %v2346_v55 }
 0x3ae   : > { %v3313_v3 = vadd.f32 %v10890_v37, %v3270_v34  ;;  %v3229_v60 = vadd.f32 %v3193_v47, %v2933_v18  ;;  %v2833_v21 = vpop.permute.xlu0 %2832 }
 0x3af   : > { %v2828_v58 = vpop.permute.xlu1 %2827  ;;  %v3350_v54 = vmax.f32 %v3314_v31, 0.0  ;;  %v2900_v48 = vmul.f32 %v11201_v35, %v2833_v21 }
 0x3b0   : > { %v3349_v45 = vmax.f32 %v3313_v3, 0.0  ;;  %v3272_v19 = vmul.f32 %v10886_v59, %v3229_v60  ;;  %v2899_v38 = vmul.f32 %v11201_v35, %v2828_v58 }
 0x3b1   : > { %3386 = vst.msk [vmem:[#allocation3 + $0xc8] sm:$0xff] %vm524_vm1, %v3350_v54  ;;  %v2936_v34 = vadd.f32 %v2900_v48, %v2640_v57 }
 0x3b2   : > { %3385 = vst.msk [vmem:[#allocation3 + $0xc0] sm:$0xff] %vm524_vm1, %v3349_v45  ;;  %v3315_v44 = vadd.f32 %v10890_v37, %v3272_v19  ;;  %v2843_v9 = vpop.permute.xlu0 %2842  ;;  %v2935_v20 = vadd.f32 %v2899_v38, %v2639_v12 }
 0x3b3   : > { %v2838_v16 = vpop.permute.xlu1 %2837  ;;  %v2902_v14 = vmul.f32 %v11201_v35, %v2843_v9 }
 0x3b4   : > { %v3351_v10 = vmax.f32 %v3315_v44, 0.0  ;;  %v2901_v49 = vmul.f32 %v11201_v35, %v2838_v16  ;;  %v4155_v31 = vld [vmem:[#allocation3 + $0xb4] sm:$0xff] }
 0x3b5   : > { %v2938_v56 = vadd.f32 %v2902_v14, %v2642_v17 }
 0x3b6   : > { %3387 = vst.msk [vmem:[#allocation3 + $0xd0] sm:$0xff] %vm524_vm1, %v3351_v10  ;;  %v3124_v7 = vpop.permute.xlu0 %3123  ;;  %v2937_v52 = vadd.f32 %v2901_v49, %v2641_v32 }
 0x3b7   : > { %v3119_v63 = vpop.permute.xlu1 %3118  ;;  %v3195_v29 = vmul.f32 %v10878_v30, %v3124_v7 }
 0x3b8   : > { %v3194_v39 = vmul.f32 %v10878_v30, %v3119_v63 }
 0x3b9   : > { %v3231_v22 = vadd.f32 %v3195_v29, %v2935_v20  ;;  %v4157_v18 = vld [vmem:[#allocation3 + $0xc6] sm:$0xff]  ;;  %v4156_v2 = vld [vmem:[#allocation3 + $0xbc] sm:$0xff] }
 0x3ba   : > { %v3230_v13 = vadd.f32 %v3194_v39, %v2934_v40  ;;  %v3134_v28 = vpop.permute.xlu0 %3133  ;;  %v4159_v19 = vmax.f32 %v4155_v31, %v4157_v18 }
 0x3bb   : > { %v3129_v15 = vpop.permute.xlu1 %3128  ;;  %v3274_v3 = vmul.f32 %v10886_v59, %v3231_v22  ;;  %v3197_v60 = vmul.f32 %v10878_v30, %v3134_v28 }
 0x3bc   : > { %v3273_v47 = vmul.f32 %v10886_v59, %v3230_v13  ;;  %v3196_v6 = vmul.f32 %v10878_v30, %v3129_v15 }
 0x3bd   : > { %v4158_v58 = vld [vmem:[#allocation3 + $0xce] sm:$0xff]  ;;  %v3317_v54 = vadd.f32 %v10890_v37, %v3274_v3  ;;  %v3233_v62 = vadd.f32 %v3197_v60, %v2937_v52 }
 0x3be   : > { %v3316_v24 = vadd.f32 %v10890_v37, %v3273_v47  ;;  %v3232_v45 = vadd.f32 %v3196_v6, %v2936_v34  ;;  %v4160_v21 = vmax.f32 %v4156_v2, %v4158_v58  ;;  %v11286_v1 = vpop.permute.xlu0 %811 }
 0x3bf   : > { %v3139_v44 = vpop.permute.xlu1 %3138  ;;  %v3353_v10 = vmax.f32 %v3317_v54, 0.0  ;;  %v3276_v53 = vmul.f32 %v10886_v59, %v3233_v62  ;;  %v9109_v54 = vld [vmem:[#allocation9] ss:$0 sm:$0xff] }
 0x3c0   : > { %v3352_v33 = vmax.f32 %v3316_v24, 0.0  ;;  %v3275_v36 = vmul.f32 %v10886_v59, %v3232_v45  ;;  %v3198_v16 = vmul.f32 %v10878_v30, %v3139_v44  ;;  %v8749_v46 = vpack.c.bf16 %v4160_v21, %v4159_v19  ;;  %v9108_v21 = vld [vmem:[#allocation9 + $0x1] ss:$0 sm:$0xff]  ;;  %v9110_v44 = vld [vmem:[#allocation9 + $0x2] ss:$0 sm:$0xff] }
 0x3c1   : > { %3389 = vst.msk [vmem:[#allocation3 + $0xe0] sm:$0xff] %vm524_vm1, %v3353_v10  ;;  %v3319_v38 = vadd.f32 %v10890_v37, %v3276_v53  ;;  %v867_v62 = vmul.f32 %v9109_v54, %v11286_v1 }
 0x3c2   : > { %3388 = vst.msk [vmem:[#allocation3 + $0xd8] sm:$0xff] %vm524_vm1, %v3352_v33  ;;  %v3318_v9 = vadd.f32 %v10890_v37, %v3275_v36  ;;  %v3234_v43 = vadd.f32 %v3198_v16, %v2938_v56  ;;  %8750 = vmatpush3.bf16.msra.mxu0 %v8749_v46  ;;  %8753 = vmatpush3.bf16.msra.mxu1 %v8749_v46  ;;  %v11298_v23 = vpop.permute.xlu0 %821 }
 0x3c3   : > { %v11293_v27 = vpop.permute.xlu1 %816  ;;  %8754 = vmatprep.subr.bf16.mxu0 %v11764_v11  ;;  %8757 = vmatprep.subr.bf16.mxu1 %v11764_v11  ;;  %v3355_v41 = vmax.f32 %v3319_v38, 0.0 }
 0x3c4   : > { %v3354_v30 = vmax.f32 %v3318_v9, 0.0  ;;  %v3277_v50 = vmul.f32 %v10886_v59, %v3234_v43  ;;  %v9111_v9 = vld [vmem:[#allocation9 + $0x3] ss:$0 sm:$0xff]  ;;  %v868_v38 = vmul.f32 %v9109_v54, %v11293_v27 }
 0x3c5   : > { %8317 = vmatmul.mubr.msk.f32.vlgmr.msra.gmra.mrb[10].mxu0 %vm524_vm1, %v10328_v8  ;;  %8324 = vmatmul.mubr.msk.f32.vlgmr.msra.gmra.mrb[10].mxu1 %vm524_vm1, %v10335_v61  ;;  %3391 = vst.msk [vmem:[#allocation3 + $0xf0] sm:$0xff] %vm524_vm1, %v3355_v41 }
 0x3c6   : > { %3390 = vst.msk [vmem:[#allocation3 + $0xe8] sm:$0xff] %vm524_vm1, %v3354_v30  ;;  %v3320_v12 = vadd.f32 %v10890_v37, %v3277_v50  ;;  %8330 = vmatprep.mubr.msk.f32.mxu0 %vm9411_vm2, %v11749_v4  ;;  %8337 = vmatprep.mubr.msk.f32.mxu1 %vm9411_vm2, %v11749_v4  ;;  %v1072_v63 = vpop.permute.xlu0 %1071  ;;  %v869_v50 = vmul.f32 %v9109_v54, %v11298_v23 }
 0x3c7   : > { %v11311_v59 = vpop.permute.xlu1 %826  ;;  %v1127_v56 = vmul.f32 %v9108_v21, %v1072_v63 }
 0x3c8   : > { %v3356_v51 = vmax.f32 %v3320_v12, 0.0  ;;  %v4304_v0 = vld [vmem:[#allocation3 + $0xe0] sm:$0xff] }
 0x3c9   : > { %v4303_v37 = vld [vmem:[#allocation3 + $0xd8] sm:$0xff]  ;;  %v1163_v10 = vadd.f32 %v1127_v56, %v867_v62 }
 0x3ca   : > { %3392 = vst.msk [vmem:[#allocation3 + $0xf8] sm:$0xff] %vm524_vm1, %v3356_v51  ;;  %v1082_v40 = vpop.permute.xlu0 %1081 }
 0x3cb   : > { %v1077_v5 = vpop.permute.xlu1 %1076  ;;  %v1129_v53 = vmul.f32 %v9108_v21, %v1082_v40 }
 0x3cc   : > { %v1128_v16 = vmul.f32 %v9108_v21, %v1077_v5 }
 0x3cd   : > { %v4305_v39 = vld [vmem:[#allocation3 + $0xea] sm:$0xff]  ;;  %v1165_v5 = vadd.f32 %v1129_v53, %v869_v50  ;;  %v9112_v53 = vld [vmem:[#allocation9 + $0x8] ss:$0 sm:$0xff] }
 0x3ce   : > { %v1368_v7 = vpop.permute.xlu0 %1367  ;;  %v4307_v49 = vmax.f32 %v4303_v37, %v4305_v39  ;;  %v1164_v1 = vadd.f32 %v1128_v16, %v868_v38 }
 0x3cf   : > { %v1087_v48 = vpop.permute.xlu1 %1086  ;;  %v1423_v33 = vmul.f32 %v9110_v44, %v1368_v7 }
 0x3d0   : > { %v1130_v39 = vmul.f32 %v9108_v21, %v1087_v48 }
 0x3d1   : > { %v4306_v20 = vld [vmem:[#allocation3 + $0xf2] sm:$0xff]  ;;  %v1459_v41 = vadd.f32 %v1423_v33, %v1163_v10 }
 0x3d2   : > { %v4308_v29 = vmax.f32 %v4304_v0, %v4306_v20  ;;  %v1378_v13 = vpop.permute.xlu0 %1377 }
 0x3d3   : > { %v1373_v57 = vpop.permute.xlu1 %1372  ;;  %v1425_v12 = vmul.f32 %v9110_v44, %v1378_v13 }
 0x3d4   : > { %v8755_v55 = vpack.c.bf16 %v4308_v29, %v4307_v49  ;;  %v1424_v30 = vmul.f32 %v9110_v44, %v1373_v57  ;;  %v870_v49 = vmul.f32 %v9109_v54, %v11311_v59 }
 0x3d5   : > { %v1461_v57 = vadd.f32 %v1425_v12, %v1165_v5  ;;  %v9114_v5 = vld [vmem:[#allocation13] ss:$0 sm:$0xff] }
 0x3d6   : > { %8756 = vmatpush3.bf16.msra.mxu0 %v8755_v55  ;;  %8759 = vmatpush3.bf16.msra.mxu1 %v8755_v55  ;;  %v1664_v14 = vpop.permute.xlu0 %1663  ;;  %v1460_v27 = vadd.f32 %v1424_v30, %v1164_v1 }
 0x3d7   : > { %v1383_v32 = vpop.permute.xlu1 %1382  ;;  %8760 = vmatprep.subr.bf16.mxu0 %v11764_v11  ;;  %8763 = vmatprep.subr.bf16.mxu1 %v11764_v11  ;;  %v1719_v43 = vmul.f32 %v9111_v9, %v1664_v14 }
 0x3d8   : > { %v1426_v29 = vmul.f32 %v9110_v44, %v1383_v32 }
 0x3d9   : > { %8331 = vmatmul.mubr.msk.f32.vlgmr.msra.gmra.mrb[12].mxu0 %vm524_vm1, %v10328_v8  ;;  %8338 = vmatmul.mubr.msk.f32.vlgmr.msra.gmra.mrb[12].mxu1 %vm524_vm1, %v10335_v61  ;;  %v1755_v0 = vadd.f32 %v1719_v43, %v1459_v41 }
 0x3da   : > { %8344 = vmatprep.mubr.msk.f32.mxu0 %vm9411_vm2, %v11749_v4  ;;  %8351 = vmatprep.mubr.msk.f32.mxu1 %vm9411_vm2, %v11749_v4  ;;  %v1674_v15 = vpop.permute.xlu0 %1673 }
 0x3db   : > { %v1669_v22 = vpop.permute.xlu1 %1668  ;;  %v1721_v20 = vmul.f32 %v9111_v9, %v1674_v15 }
 0x3dc   : > { %v1720_v7 = vmul.f32 %v9111_v9, %v1669_v22  ;;  %v1166_v22 = vadd.f32 %v1130_v39, %v870_v49 }
 0x3de   : > { %v1960_v34 = vpop.permute.xlu0 %1959 }
 0x3df   : > { %v1679_v18 = vpop.permute.xlu1 %1678  ;;  %v2015_v51 = vmul.f32 %v11165_v25, %v1960_v34  ;;  %v1756_v34 = vadd.f32 %v1720_v7, %v1460_v27 }
 0x3e1   : > { %v2051_v13 = vadd.f32 %v2015_v51, %v1755_v0  ;;  %v9113_v51 = vld [vmem:[#allocation11] ss:$0 sm:$0xff] }
 0x3e2   : > { %v1970_v6 = vpop.permute.xlu0 %1969 }
 0x3e3   : > { %v1965_v47 = vpop.permute.xlu1 %1964  ;;  %v2017_v55 = vmul.f32 %v11165_v25, %v1970_v6 }
 0x3e4   : > { %v2016_v23 = vmul.f32 %v11165_v25, %v1965_v47  ;;  %v1462_v47 = vadd.f32 %v1426_v29, %v1166_v22 }
 0x3e7   : > { %v1975_v28 = vpop.permute.xlu1 %1974  ;;  %v2256_v17 = vpop.permute.xlu0 %2255 }
 0x3e8   : > { %v3783_v52 = vpop.f32.mrb[4].mxu0  ;;  %v3853_v3 = vpop.f32.mrb[4].mxu1  ;;  %v2311_v40 = vmul.f32 %v11177_v42, %v2256_v17  ;;  %v1757_v17 = vadd.f32 %v1721_v20, %v1461_v57 }
 0x3e9   : > { %v3857_v60 = vmax.f32 %v3783_v52, %v3853_v3  ;;  %v8276_v31 = vpop.f32.mrb[5].mxu0  ;;  %v8283_v2 = vpop.f32.mrb[5].mxu1  ;;  %v1722_v52 = vmul.f32 %v9111_v9, %v1679_v18 }
 0x3ea   : > { %v2052_v31 = vadd.f32 %v2016_v23, %v1756_v34  ;;  %v2018_v2 = vmul.f32 %v11165_v25, %v1975_v28 }
 0x3eb   : > { %v2261_v58 = vpop.permute.xlu1 %2260  ;;  %v2266_v24 = vpop.permute.xlu0 %2265  ;;  %3858 = vst.msk [vmem:[#allocation4 + $0x1f] sm:$0xff] %vm524_vm1, %v3857_v60  ;;  %v2347_v60 = vadd.f32 %v2311_v40, %v2051_v13  ;;  %v1758_v54 = vadd.f32 %v1722_v52, %v1462_v47  ;;  %v4609_v52 = vld [vmem:[#allocation14] sm:$0xff] }
 0x3ec   : > { %v2312_v15 = vmul.f32 %v11177_v42, %v2261_v58  ;;  %v2313_v59 = vmul.f32 %v11177_v42, %v2266_v24 }
 0x3ed   : > { %v2054_v28 = vadd.f32 %v2018_v2, %v1758_v54  ;;  %v4599_v2 = vld [vmem:[#allocation4] sm:$0xff] }
 0x3ee   : > { %v2348_v58 = vadd.f32 %v2312_v15, %v2052_v31  ;;  %v4610_v15 = vld [vmem:[#allocation14 + $0x8] sm:$0xff]  ;;  %v4623_v54 = vld [vmem:[#allocation14 + $0x18] sm:$0xff] }
 0x3ef   : > { %v2271_v45 = vpop.permute.xlu1 %2270  ;;  %v2552_v19 = vpop.permute.xlu0 %2551  ;;  %v8770_v47 = vpack.c.bf16 %v4610_v15, %v4609_v52  ;;  %v5262_v52 = vld [vmem:[#allocation14 + $0x48] sm:$0xff] }
 0x3f0   : > { %v2607_v14 = vmul.f32 %v11185_v26, %v2552_v19  ;;  %v2053_v19 = vadd.f32 %v2017_v55, %v1757_v17  ;;  %v2314_v62 = vmul.f32 %v11177_v42, %v2271_v45  ;;  %v4915_v15 = vld [vmem:[#allocation4 + $0xa] sm:$0xff] }
 0x3f2   : > { %v2643_v21 = vadd.f32 %v2607_v14, %v2347_v60  ;;  %v2349_v33 = vadd.f32 %v2313_v59, %v2053_v19  ;;  %v2350_v30 = vadd.f32 %v2314_v62, %v2054_v28  ;;  %v4601_v19 = vld [vmem:[#allocation4 + $0x10] sm:$0xff]  ;;  %v4925_v62 = vld [vmem:[#allocation14 + $0x20] sm:$0xff] }
 0x3f3   : > { %v2557_v36 = vpop.permute.xlu1 %2556  ;;  %v2562_v46 = vpop.permute.xlu0 %2561 }
 0x3f4   : > { %v2608_v6 = vmul.f32 %v11185_v26, %v2557_v36  ;;  %v2609_v56 = vmul.f32 %v11185_v26, %v2562_v46 }
 0x3f6   : > { %v2644_v36 = vadd.f32 %v2608_v6, %v2348_v58  ;;  %v2645_v43 = vadd.f32 %v2609_v56, %v2349_v33  ;;  %v4600_v6 = vld [vmem:[#allocation4 + $0x8] sm:$0xff]  ;;  %v4603_v56 = vld [vmem:[#allocation4 + $0x20] sm:$0xff] }
 0x3f7   : > { %v2567_v63 = vpop.permute.xlu1 %2566  ;;  %v2848_v37 = vpop.permute.xlu0 %2847 }
 0x3f8   : > { %v2903_v32 = vmul.f32 %v11201_v35, %v2848_v37  ;;  %v2610_v9 = vmul.f32 %v11185_v26, %v2567_v63 }
 0x3fa   : > { %v2939_v16 = vadd.f32 %v2903_v32, %v2643_v21  ;;  %v2646_v7 = vadd.f32 %v2610_v9, %v2350_v30  ;;  %v4602_v21 = vld [vmem:[#allocation4 + $0x18] sm:$0xff] }
 0x3fb   : > { %v2853_v48 = vpop.permute.xlu1 %2852  ;;  %v2858_v3 = vpop.permute.xlu0 %2857 }
 0x3fc   : > { %v2904_v44 = vmul.f32 %v11201_v35, %v2853_v48  ;;  %v2905_v10 = vmul.f32 %v11201_v35, %v2858_v3 }
 0x3fe   : > { %v2940_v50 = vadd.f32 %v2904_v44, %v2644_v36  ;;  %v2941_v12 = vadd.f32 %v2905_v10, %v2645_v43  ;;  %v4926_v44 = vld [vmem:[#allocation14 + $0x28] sm:$0xff]  ;;  %v4614_v43 = vld [vmem:[#allocation4 + $0x19] sm:$0xff] }
 0x3ff   : > { %v2863_v18 = vpop.permute.xlu1 %2862  ;;  %v3144_v24 = vpop.permute.xlu0 %3143  ;;  %v8774_v33 = vpack.c.bf16 %v4926_v44, %v4925_v62  ;;  %v5430_v62 = vld [vmem:[#allocation14 + $0x58] sm:$0xff] }
 0x400   : > { %v3199_v25 = vmul.f32 %v9112_v53, %v3144_v24  ;;  %v2906_v42 = vmul.f32 %v11201_v35, %v2863_v18  ;;  %v4622_v18 = vld [vmem:[#allocation14 + $0x10] sm:$0xff]  ;;  %v4611_v24 = vld [vmem:[#allocation4 + $0x1] sm:$0xff] }
 0x401   : > { %v8766_v58 = vpack.c.bf16 %v4623_v54, %v4622_v18 }
 0x402   : > { %v3235_v46 = vadd.f32 %v3199_v25, %v2939_v16  ;;  %v2942_v26 = vadd.f32 %v2906_v42, %v2646_v7  ;;  %v4612_v16 = vld [vmem:[#allocation4 + $0x9] sm:$0xff] }
 0x403   : > { %v3149_v38 = vpop.permute.xlu1 %3148  ;;  %v3154_v41 = vpop.permute.xlu0 %3153 }
 0x404   : > { %v3200_v45 = vmul.f32 %v9112_v53, %v3149_v38  ;;  %v3278_v1 = vmul.f32 %v9113_v51, %v3235_v46  ;;  %v3201_v39 = vmul.f32 %v9112_v53, %v3154_v41  ;;  %v4615_v46 = vld [vmem:[#allocation4 + $0x21] sm:$0xff] }
 0x406   : > { %v3236_v37 = vadd.f32 %v3200_v45, %v2940_v50  ;;  %v3321_v0 = vadd.f32 %v9114_v5, %v3278_v1  ;;  %v3237_v20 = vadd.f32 %v3201_v39, %v2941_v12  ;;  %v5094_v1 = vld [vmem:[#allocation14 + $0x38] sm:$0xff] }
 0x407   : > { %v3159_v40 = vpop.permute.xlu1 %3158 }
 0x408   : > { %v3279_v63 = vmul.f32 %v9113_v51, %v3236_v37  ;;  %v3202_v49 = vmul.f32 %v9112_v53, %v3159_v40  ;;  %v3357_v27 = vmax.f32 %v3321_v0, 0.0  ;;  %v3280_v29 = vmul.f32 %v9113_v51, %v3237_v20  ;;  %v4613_v53 = vld [vmem:[#allocation4 + $0x11] sm:$0xff] }
 0x40a   : > { %v3322_v23 = vadd.f32 %v9114_v5, %v3279_v63  ;;  %v3238_v57 = vadd.f32 %v3202_v49, %v2942_v26  ;;  %3393 = vst.msk [vmem:[#allocation3 + $0x100] sm:$0xff] %vm524_vm1, %v3357_v27  ;;  %v3323_v35 = vadd.f32 %v9114_v5, %v3280_v29 }
 0x40c   : > { %v3358_v13 = vmax.f32 %v3322_v23, 0.0  ;;  %v3281_v55 = vmul.f32 %v9113_v51, %v3238_v57  ;;  %v3359_v14 = vmax.f32 %v3323_v35, 0.0  ;;  %v5093_v51 = vld [vmem:[#allocation14 + $0x30] sm:$0xff] }
 0x40d   : > { %v8778_v39 = vpack.c.bf16 %v5094_v1, %v5093_v51 }
 0x40e   : > { %3394 = vst.msk [vmem:[#allocation3 + $0x108] sm:$0xff] %vm524_vm1, %v3358_v13  ;;  %v3324_v48 = vadd.f32 %v9114_v5, %v3281_v55  ;;  %3395 = vst.msk [vmem:[#allocation3 + $0x110] sm:$0xff] %vm524_vm1, %v3359_v14  ;;  %v4914_v13 = vld [vmem:[#allocation4 + $0x2] sm:$0xff] }
 0x410   : > { %v3360_v22 = vmax.f32 %v3324_v48, 0.0 }
 0x411   : > { %v4451_v3 = vld [vmem:[#allocation3 + $0xfc] sm:$0xff] }
 0x412   : > { %3396 = vst.msk [vmem:[#allocation3 + $0x118] sm:$0xff] %vm524_vm1, %v3360_v22 }
 0x415   : > { %v4453_v34 = vld [vmem:[#allocation3 + $0x10e] sm:$0xff]  ;;  %v4452_v17 = vld [vmem:[#allocation3 + $0x104] sm:$0xff] }
 0x416   : > { %v4455_v59 = vmax.f32 %v4451_v3, %v4453_v34  ;;  %v5261_v34 = vld [vmem:[#allocation14 + $0x40] sm:$0xff]  ;;  %v4916_v3 = vld [vmem:[#allocation4 + $0x12] sm:$0xff] }
 0x419   : > { %v4454_v60 = vld [vmem:[#allocation3 + $0x116] sm:$0xff] }
 0x41a   : > { %v4456_v32 = vmax.f32 %v4452_v17, %v4454_v60  ;;  %v8782_v17 = vpack.c.bf16 %v5262_v52, %v5261_v34  ;;  %v4917_v60 = vld [vmem:[#allocation4 + $0x1a] sm:$0xff] }
 0x41c   : > { %v8761_v31 = vpack.c.bf16 %v4456_v32, %v4455_v59 }
 0x41e   : > { %8762 = vmatpush3.bf16.msra.mxu0 %v8761_v31  ;;  %8765 = vmatpush3.bf16.msra.mxu1 %v8761_v31 }
 0x41f   : > { %8771 = vmatprep.subr.bf16.mxu0 %v8770_v47  ;;  %8767 = vmatprep.subr.bf16.mxu1 %v8766_v58 }
 0x421   : > { %8345 = vmatmul.mubr.msk.f32.vlgmr.msra.gmra.mrb[14].mxu0 %vm524_vm1, %v10328_v8  ;;  %8352 = vmatmul.mubr.msk.f32.vlgmr.msra.gmra.mrb[14].mxu1 %vm524_vm1, %v10335_v61 }
 0x422   : > { %8773 = vmatpush3.bf16.msra.mxu0 %v8770_v47  ;;  %8377 = vmatprep.mubr.msk.f32.mxu0 %vm524_vm1, %v4599_v2 }
 0x423   : > { %8358 = vmatprep.mubr.msk.f32.mxu1 %vm524_vm1, %v4611_v24  ;;  %8775 = vmatprep.subr.bf16.mxu0 %v8774_v33 }
 0x424   : > { %8769 = vmatpush3.bf16.msra.mxu1 %v8766_v58  ;;  %v5429_v58 = vld [vmem:[#allocation14 + $0x50] sm:$0xff] }
 0x425   : > { %8378 = vmatmul.mubr.msk.f32.vlgmr.msra.gmra.mrb[16].mxu0 %vm524_vm1, %v4600_v6  ;;  %8525 = vmatprep.subr.mxu1 %v11749_v4  ;;  %v8786_v44 = vpack.c.bf16 %v5430_v62, %v5429_v58 }
 0x426   : > { %8380 = vmatprep.mubr.msk.f32.mxu0 %vm524_vm1, %v4601_v19  ;;  %8777 = vmatpush3.bf16.msra.mxu0 %v8774_v33 }
 0x427   : > { %8359 = vmatmul.mubr.msk.f32.vlgmr.msra.gmra.mrb[16].mxu1 %vm524_vm1, %v4612_v16  ;;  %8779 = vmatprep.subr.bf16.mxu0 %v8778_v39  ;;  %v5597_v16 = vld [vmem:[#allocation14 + $0x60] sm:$0xff] }
 0x428   : > { %8361 = vmatprep.mubr.msk.f32.mxu1 %vm524_vm1, %v4613_v53 }
 0x429   : > { %8381 = vmatmul.mubr.msk.f32.gmra.mrb[18].mxu0 %vm524_vm1, %v4602_v21 }
 0x42a   : > { %8383 = vmatprep.mubr.msk.f32.mxu0 %vm524_vm1, %v4603_v56 }
 0x42b   : > { %8362 = vmatmul.mubr.msk.f32.gmra.mrb[18].mxu1 %vm524_vm1, %v4614_v43 }
 0x42c   : > { %8364 = vmatprep.mubr.msk.f32.mxu1 %vm524_vm1, %v4615_v46  ;;  %v5252_v46 = vld [vmem:[#allocation4 + $0x1b] sm:$0xff] }
 0x43c   : > { %v3931_v10 = vpop.f32.mrb[6].mxu0  ;;  %v4001_v25 = vpop.f32.mrb[6].mxu1 }
 0x43d   : > { %v8290_v28 = vpop.f32.mrb[7].mxu0  ;;  %v4005_v36 = vmax.f32 %v3931_v10, %v4001_v25  ;;  %v8297_v9 = vpop.f32.mrb[7].mxu1  ;;  %v5598_v10 = vld [vmem:[#allocation14 + $0x68] sm:$0xff] }
 0x43e   : > { %v5250_v25 = vld [vmem:[#allocation4 + $0xb] sm:$0xff]  ;;  %v8790_v28 = vpack.c.bf16 %v5598_v10, %v5597_v16  ;;  %v5251_v9 = vld [vmem:[#allocation4 + $0x13] sm:$0xff] }
 0x43f   : > { %4006 = vst.msk [vmem:[#allocation4 + $0x29] sm:$0xff] %vm524_vm1, %v4005_v36  ;;  %v7960_v10 = vld [vmem:[#allocation16] ss:$0 sm:$0xff] }
 0x446   : > { %v4604_v38 = vld [vmem:[#allocation4 + $0x28] sm:$0xff] }
 0x447   : > { %v4616_v30 = vld [vmem:[#allocation4 + $0x29] sm:$0xff]  ;;  %8384 = vmatmul.mubr.msk.f32.gmra.mrb[20].mxu0 %vm524_vm1, %v4604_v38 }
 0x448   : > { %8365 = vmatmul.mubr.msk.f32.gmra.mrb[20].mxu1 %vm524_vm1, %v4616_v30  ;;  %v4918_v59 = vld [vmem:[#allocation4 + $0x22] sm:$0xff]  ;;  %v4919_v32 = vld [vmem:[#allocation4 + $0x2a] sm:$0xff] }
 0x449   : > { %v5253_v38 = vld [vmem:[#allocation4 + $0x23] sm:$0xff]  ;;  %v5254_v30 = vld [vmem:[#allocation4 + $0x2b] sm:$0xff] }
 0x474   : > { %v4079_v50 = vpop.f32.mrb[8].mxu0  ;;  %v4149_v42 = vpop.f32.mrb[8].mxu1 }
 0x475   : > { %v4153_v45 = vmax.f32 %v4079_v50, %v4149_v42  ;;  %v8304_v41 = vpop.f32.mrb[9].mxu0  ;;  %v8311_v12 = vpop.f32.mrb[9].mxu1 }
 0x477   : > { %4154 = vst.msk [vmem:[#allocation4 + $0x33] sm:$0xff] %vm524_vm1, %v4153_v45 }
 0x47e   : > { %v4605_v7 = vld [vmem:[#allocation4 + $0x30] sm:$0xff] }
 0x47f   : > { %v4617_v37 = vld [vmem:[#allocation4 + $0x31] sm:$0xff]  ;;  %8386 = vmatprep.mubr.msk.f32.mxu0 %vm524_vm1, %v4605_v7  ;;  %v5766_v7 = vld [vmem:[#allocation14 + $0x78] sm:$0xff] }
 0x480   : > { %8367 = vmatprep.mubr.msk.f32.mxu1 %vm524_vm1, %v4617_v37  ;;  %v4920_v47 = vld [vmem:[#allocation4 + $0x32] sm:$0xff] }
 0x481   : > { %v5255_v45 = vld [vmem:[#allocation4 + $0x33] sm:$0xff] }
 0x482   : > { %v5418_v37 = vld [vmem:[#allocation4 + $0xc] sm:$0xff]  ;;  %v5758_v52 = vld [vmem:[#allocation4 + $0x35] sm:$0xff] }
 0x483   : > { %v5757_v34 = vld [vmem:[#allocation4 + $0x2d] sm:$0xff] }
 0x498   : > { %v4227_v5 = vpop.f32.mrb[10].mxu0  ;;  %v4297_v0 = vpop.f32.mrb[10].mxu1 }
 0x499   : > { %v4301_v20 = vmax.f32 %v4227_v5, %v4297_v0  ;;  %v8318_v40 = vpop.f32.mrb[11].mxu0  ;;  %v8325_v26 = vpop.f32.mrb[11].mxu1  ;;  %v5419_v0 = vld [vmem:[#allocation4 + $0x14] sm:$0xff] }
 0x49a   : > { %v5421_v40 = vld [vmem:[#allocation4 + $0x24] sm:$0xff]  ;;  %v5422_v26 = vld [vmem:[#allocation4 + $0x2c] sm:$0xff] }
 0x49b   : > { %4302 = vst.msk [vmem:[#allocation4 + $0x3d] sm:$0xff] %vm524_vm1, %v4301_v20  ;;  %v5420_v20 = vld [vmem:[#allocation4 + $0x1c] sm:$0xff] }
 0x4a2   : > { %v4606_v63 = vld [vmem:[#allocation4 + $0x38] sm:$0xff] }
 0x4a3   : > { %v4618_v49 = vld [vmem:[#allocation4 + $0x39] sm:$0xff]  ;;  %8387 = vmatmul.mubr.msk.f32.gmra.mrb[22].mxu0 %vm524_vm1, %v4606_v63 }
 0x4a4   : > { %8368 = vmatmul.mubr.msk.f32.gmra.mrb[22].mxu1 %vm524_vm1, %v4618_v49  ;;  %v4921_v31 = vld [vmem:[#allocation4 + $0x3a] sm:$0xff] }
 0x4a5   : > { %v5256_v41 = vld [vmem:[#allocation4 + $0x3b] sm:$0xff] }
 0x4a6   : > { %v5423_v63 = vld [vmem:[#allocation4 + $0x34] sm:$0xff]  ;;  %v5424_v49 = vld [vmem:[#allocation4 + $0x3c] sm:$0xff] }
 0x4ac   : > { %v4375_v27 = vpop.f32.mrb[12].mxu0  ;;  %v4445_v29 = vpop.f32.mrb[12].mxu1 }
 0x4ad   : > { %v4449_v23 = vmax.f32 %v4375_v27, %v4445_v29  ;;  %v8332_v57 = vpop.f32.mrb[13].mxu0  ;;  %v8339_v35 = vpop.f32.mrb[13].mxu1 }
 0x4ae   : > { %v5933_v57 = vld [vmem:[#allocation14 + $0x80] sm:$0xff]  ;;  %v5934_v35 = vld [vmem:[#allocation14 + $0x88] sm:$0xff] }
 0x4af   : > { %4450 = vst.msk [vmem:[#allocation4 + $0x47] sm:$0xff] %vm524_vm1, %v4449_v23 }
 0x4b6   : > { %v4607_v55 = vld [vmem:[#allocation4 + $0x40] sm:$0xff]  ;;  %v4608_v14 = vld [vmem:[#allocation4 + $0x48] sm:$0xff] }
 0x4b7   : > { %v4619_v48 = vld [vmem:[#allocation4 + $0x41] sm:$0xff]  ;;  %8389 = vmatprep.mubr.msk.f32.mxu0 %vm524_vm1, %v4607_v55  ;;  %v4620_v22 = vld [vmem:[#allocation4 + $0x49] sm:$0xff] }
 0x4b8   : > { %8370 = vmatprep.mubr.msk.f32.mxu1 %vm524_vm1, %v4619_v48  ;;  %8390 = vmatmul.mubr.msk.f32.gmra.mrb[24].mxu0 %vm524_vm1, %v4608_v14  ;;  %v4922_v2 = vld [vmem:[#allocation4 + $0x42] sm:$0xff]  ;;  %v5754_v14 = vld [vmem:[#allocation4 + $0x15] sm:$0xff] }
 0x4b9   : > { %8371 = vmatmul.mubr.msk.f32.gmra.mrb[24].mxu1 %vm524_vm1, %v4620_v22  ;;  %8396 = vmatprep.mubr.msk.f32.mxu0 %vm524_vm1, %v4914_v13  ;;  %v5257_v12 = vld [vmem:[#allocation4 + $0x43] sm:$0xff]  ;;  %v8798_v13 = vpack.c.bf16 %v5934_v35, %v5933_v57 }
 0x4ba   : > { %8527 = vmatprep.mubr.msk.f32.mxu1 %vm9411_vm2, %v11749_v4  ;;  %v5425_v27 = vld [vmem:[#allocation4 + $0x44] sm:$0xff]  ;;  %v5595_v55 = vld [vmem:[#allocation4 + $0x5c] sm:$0xff] }
 0x4bb   : > { %v5755_v48 = vld [vmem:[#allocation4 + $0x1d] sm:$0xff]  ;;  %v5756_v22 = vld [vmem:[#allocation4 + $0x25] sm:$0xff] }
 0x4bc   : > { %8397 = vmatmul.mubr.msk.f32.vlgmr.msra.gmra.mrb[16].mxu0 %vm524_vm1, %v4915_v15 }
 0x4bd   : > { %8399 = vmatprep.mubr.msk.f32.mxu0 %vm524_vm1, %v4916_v3  ;;  %8781 = vmatpush3.bf16.msra.mxu0 %v8778_v39  ;;  %v5765_v39 = vld [vmem:[#allocation14 + $0x70] sm:$0xff] }
 0x4be   : > { %8783 = vmatprep.subr.bf16.mxu0 %v8782_v17  ;;  %v8794_v5 = vpack.c.bf16 %v5766_v7, %v5765_v39 }
 0x4c0   : > { %8400 = vmatmul.mubr.msk.f32.gmra.mrb[18].mxu0 %vm524_vm1, %v4917_v60 }
 0x4c1   : > { %8402 = vmatprep.mubr.msk.f32.mxu0 %vm524_vm1, %v4918_v59 }
 0x4c4   : > { %8403 = vmatmul.mubr.msk.f32.gmra.mrb[20].mxu0 %vm524_vm1, %v4919_v32 }
 0x4c5   : > { %8405 = vmatprep.mubr.msk.f32.mxu0 %vm524_vm1, %v4920_v47 }
 0x4c8   : > { %8406 = vmatmul.mubr.msk.f32.gmra.mrb[22].mxu0 %vm524_vm1, %v4921_v31 }
 0x4c9   : > { %8408 = vmatprep.mubr.msk.f32.mxu0 %vm524_vm1, %v4922_v2 }
 0x4f4   : > { %v4523_v6 = vpop.f32.mrb[14].mxu0  ;;  %v4593_v19 = vpop.f32.mrb[14].mxu1 }
 0x4f5   : > { %v4597_v21 = vmax.f32 %v4523_v6, %v4593_v19  ;;  %v8346_v56 = vpop.f32.mrb[15].mxu0  ;;  %v8353_v18 = vpop.f32.mrb[15].mxu1  ;;  %v5926_v6 = vld [vmem:[#allocation4 + $0x36] sm:$0xff]  ;;  %v5927_v19 = vld [vmem:[#allocation4 + $0x3e] sm:$0xff] }
 0x4f7   : > { %4598 = vst.msk [vmem:[#allocation4 + $0x51] sm:$0xff] %vm524_vm1, %v4597_v21  ;;  %v5928_v21 = vld [vmem:[#allocation4 + $0x46] sm:$0xff] }
 0x4fa   : > { %v11410_v24 = vpop.f32.mrb[16].mxu1 }
 0x4fb   : > { %v11412_v53 = vpop.f32.mrb[17].mxu1 }
 0x4fe   : > { %v4923_v54 = vld [vmem:[#allocation4 + $0x4a] sm:$0xff]  ;;  %v5091_v33 = vld [vmem:[#allocation4 + $0x52] sm:$0xff]  ;;  %v11416_v36 = vpop.f32.mrb[18].mxu1 }
 0x4ff   : > { %8409 = vmatmul.mubr.msk.f32.gmra.mrb[24].mxu0 %vm524_vm1, %v4923_v54  ;;  %v11418_v43 = vpop.f32.mrb[19].mxu1  ;;  %v5258_v51 = vld [vmem:[#allocation4 + $0x4b] sm:$0xff]  ;;  %v5259_v1 = vld [vmem:[#allocation4 + $0x53] sm:$0xff] }
 0x500   : > { %8415 = vmatprep.mubr.msk.f32.mxu0 %vm524_vm1, %v4915_v15  ;;  %v5426_v29 = vld [vmem:[#allocation4 + $0x4c] sm:$0xff]  ;;  %v5427_v23 = vld [vmem:[#allocation4 + $0x54] sm:$0xff]  ;;  %v5759_v15 = vld [vmem:[#allocation4 + $0x3d] sm:$0xff] }
 0x501   : > { %v5929_v56 = vld [vmem:[#allocation4 + $0x4e] sm:$0xff]  ;;  %v5930_v18 = vld [vmem:[#allocation4 + $0x56] sm:$0xff] }
 0x503   : > { %8416 = vmatmul.mubr.msk.f32.vlgmr.msra.gmra.mrb[16].mxu0 %vm524_vm1, %v4916_v3  ;;  %v5760_v3 = vld [vmem:[#allocation4 + $0x45] sm:$0xff] }
 0x504   : > { %8418 = vmatprep.mubr.msk.f32.mxu0 %vm524_vm1, %v4917_v60  ;;  %8785 = vmatpush3.bf16.msra.mxu0 %v8782_v17  ;;  %v5761_v17 = vld [vmem:[#allocation4 + $0x4d] sm:$0xff]  ;;  %v5762_v60 = vld [vmem:[#allocation4 + $0x55] sm:$0xff] }
 0x505   : > { %8787 = vmatprep.subr.bf16.mxu0 %v8786_v44 }
 0x507   : > { %8419 = vmatmul.mubr.msk.f32.gmra.mrb[18].mxu0 %vm524_vm1, %v4918_v59  ;;  %v5763_v59 = vld [vmem:[#allocation4 + $0x5d] sm:$0xff] }
 0x508   : > { %8421 = vmatprep.mubr.msk.f32.mxu0 %vm524_vm1, %v4919_v32  ;;  %v5922_v32 = vld [vmem:[#allocation4 + $0x16] sm:$0xff] }
 0x50b   : > { %8422 = vmatmul.mubr.msk.f32.gmra.mrb[20].mxu0 %vm524_vm1, %v4920_v47  ;;  %v5923_v47 = vld [vmem:[#allocation4 + $0x1e] sm:$0xff] }
 0x50c   : > { %8424 = vmatprep.mubr.msk.f32.mxu0 %vm524_vm1, %v4921_v31  ;;  %v5924_v31 = vld [vmem:[#allocation4 + $0x26] sm:$0xff] }
 0x50f   : > { %8425 = vmatmul.mubr.msk.f32.gmra.mrb[22].mxu0 %vm524_vm1, %v4922_v2  ;;  %v5925_v2 = vld [vmem:[#allocation4 + $0x2e] sm:$0xff] }
 0x510   : > { %8427 = vmatprep.mubr.msk.f32.mxu0 %vm524_vm1, %v4923_v54  ;;  %v5931_v54 = vld [vmem:[#allocation4 + $0x5e] sm:$0xff] }
 0x513   : > { %8428 = vmatmul.mubr.msk.f32.gmra.mrb[24].mxu0 %vm524_vm1, %v5091_v33 }
 0x514   : > { %8434 = vmatprep.mubr.msk.f32.mxu0 %vm524_vm1, %v5250_v25 }
 0x517   : > { %8435 = vmatmul.mubr.msk.f32.vlgmr.msra.gmra.mrb[16].mxu0 %vm524_vm1, %v5251_v9  ;;  %v7961_v9 = vld [vmem:[#allocation17] ss:$0 sm:$0xff] }
 0x518   : > { %8437 = vmatprep.mubr.msk.f32.mxu0 %vm524_vm1, %v5252_v46  ;;  %8789 = vmatpush3.bf16.msra.mxu0 %v8786_v44 }
 0x519   : > { %8791 = vmatprep.subr.bf16.mxu0 %v8790_v28 }
 0x51b   : > { %8438 = vmatmul.mubr.msk.f32.gmra.mrb[18].mxu0 %vm524_vm1, %v5253_v38  ;;  %v11423_v50 = vpop.f32.mrb[20].mxu1 }
 0x51c   : > { %8440 = vmatprep.mubr.msk.f32.mxu0 %vm524_vm1, %v5254_v30  ;;  %v11426_v42 = vpop.f32.mrb[21].mxu1 }
 0x51f   : > { %8441 = vmatmul.mubr.msk.f32.gmra.mrb[20].mxu0 %vm524_vm1, %v5255_v45 }
 0x520   : > { %8443 = vmatprep.mubr.msk.f32.mxu0 %vm524_vm1, %v5256_v41 }
 0x523   : > { %8444 = vmatmul.mubr.msk.f32.gmra.mrb[22].mxu0 %vm524_vm1, %v5257_v12 }
 0x524   : > { %8446 = vmatprep.mubr.msk.f32.mxu0 %vm524_vm1, %v5258_v51 }
 0x527   : > { %8447 = vmatmul.mubr.msk.f32.gmra.mrb[24].mxu0 %vm524_vm1, %v5259_v1 }
 0x528   : > { %8453 = vmatprep.mubr.msk.f32.mxu0 %vm524_vm1, %v5418_v37 }
 0x52b   : > { %8454 = vmatmul.mubr.msk.f32.vlgmr.msra.gmra.mrb[16].mxu0 %vm524_vm1, %v5419_v0 }
 0x52c   : > { %8456 = vmatprep.mubr.msk.f32.mxu0 %vm524_vm1, %v5420_v20  ;;  %8793 = vmatpush3.bf16.msra.mxu0 %v8790_v28 }
 0x52d   : > { %8795 = vmatprep.subr.bf16.mxu0 %v8794_v5 }
 0x52f   : > { %8457 = vmatmul.mubr.msk.f32.gmra.mrb[18].mxu0 %vm524_vm1, %v5421_v40 }
 0x530   : > { %8459 = vmatprep.mubr.msk.f32.mxu0 %vm524_vm1, %v5422_v26 }
 0x533   : > { %8460 = vmatmul.mubr.msk.f32.gmra.mrb[20].mxu0 %vm524_vm1, %v5423_v63 }
 0x534   : > { %8462 = vmatprep.mubr.msk.f32.mxu0 %vm524_vm1, %v5424_v49 }
 0x537   : > { %8463 = vmatmul.mubr.msk.f32.gmra.mrb[22].mxu0 %vm524_vm1, %v5425_v27 }
 0x538   : > { %8465 = vmatprep.mubr.msk.f32.mxu0 %vm524_vm1, %v5426_v29 }
 0x53b   : > { %8466 = vmatmul.mubr.msk.f32.gmra.mrb[24].mxu0 %vm524_vm1, %v5427_v23 }
 0x53c   : > { %8472 = vmatprep.mubr.msk.f32.mxu0 %vm524_vm1, %v5419_v0 }
 0x53f   : > { %8473 = vmatmul.mubr.msk.f32.vlgmr.msra.gmra.mrb[16].mxu0 %vm524_vm1, %v5420_v20 }
 0x540   : > { %8475 = vmatprep.mubr.msk.f32.mxu0 %vm524_vm1, %v5421_v40  ;;  %8797 = vmatpush3.bf16.msra.mxu0 %v8794_v5 }
 0x541   : > { %8799 = vmatprep.subr.bf16.mxu0 %v8798_v13 }
 0x543   : > { %8476 = vmatmul.mubr.msk.f32.gmra.mrb[18].mxu0 %vm524_vm1, %v5422_v26 }
 0x544   : > { %8478 = vmatprep.mubr.msk.f32.mxu0 %vm524_vm1, %v5423_v63 }
 0x547   : > { %8479 = vmatmul.mubr.msk.f32.gmra.mrb[20].mxu0 %vm524_vm1, %v5424_v49 }
 0x548   : > { %8481 = vmatprep.mubr.msk.f32.mxu0 %vm524_vm1, %v5425_v27 }
 0x54b   : > { %8482 = vmatmul.mubr.msk.f32.gmra.mrb[22].mxu0 %vm524_vm1, %v5426_v29 }
 0x54c   : > { %8484 = vmatprep.mubr.msk.f32.mxu0 %vm524_vm1, %v5427_v23 }
 0x54f   : > { %8485 = vmatmul.mubr.msk.f32.gmra.mrb[24].mxu0 %vm524_vm1, %v5595_v55 }
 0x550   : > { %8491 = vmatprep.mubr.msk.f32.mxu0 %vm524_vm1, %v5754_v14 }
 0x553   : > { %8492 = vmatmul.mubr.msk.f32.vlgmr.msra.gmra.mrb[16].mxu0 %vm524_vm1, %v5755_v48 }
 0x554   : > { %8494 = vmatprep.mubr.msk.f32.mxu0 %vm524_vm1, %v5756_v22  ;;  %8801 = vmatpush3.bf16.msra.mxu0 %v8798_v13 }
 0x557   : > { %8495 = vmatmul.mubr.msk.f32.gmra.mrb[18].mxu0 %vm524_vm1, %v5757_v34 }
 0x558   : > { %8497 = vmatprep.mubr.msk.f32.mxu0 %vm524_vm1, %v5758_v52 }
 0x55b   : > { %8498 = vmatmul.mubr.msk.f32.gmra.mrb[20].mxu0 %vm524_vm1, %v5759_v15 }
 0x55c   : > { %8500 = vmatprep.mubr.msk.f32.mxu0 %vm524_vm1, %v5760_v3 }
 0x55f   : > { %8501 = vmatmul.mubr.msk.f32.gmra.mrb[22].mxu0 %vm524_vm1, %v5761_v17 }
 0x560   : > { %8503 = vmatprep.mubr.msk.f32.mxu0 %vm524_vm1, %v5762_v60 }
 0x563   : > { %8504 = vmatmul.mubr.msk.f32.gmra.mrb[24].mxu0 %vm524_vm1, %v5763_v59 }
 0x564   : > { %8510 = vmatprep.mubr.msk.f32.mxu0 %vm524_vm1, %v5922_v32 }
 0x567   : > { %8511 = vmatmul.mubr.msk.f32.vlgmr.msra.gmra.mrb[16].mxu0 %vm524_vm1, %v5923_v47 }
 0x568   : > { %8513 = vmatprep.mubr.msk.f32.mxu0 %vm524_vm1, %v5924_v31 }
 0x56b   : > { %8514 = vmatmul.mubr.msk.f32.gmra.mrb[18].mxu0 %vm524_vm1, %v5925_v2 }
 0x56c   : > { %8516 = vmatprep.mubr.msk.f32.mxu0 %vm524_vm1, %v5926_v6 }
 0x56f   : > { %8517 = vmatmul.mubr.msk.f32.gmra.mrb[20].mxu0 %vm524_vm1, %v5927_v19 }
 0x570   : > { %8519 = vmatprep.mubr.msk.f32.mxu0 %vm524_vm1, %v5928_v21 }
 0x573   : > { %8520 = vmatmul.mubr.msk.f32.gmra.mrb[22].mxu0 %vm524_vm1, %v5929_v56 }
 0x574   : > { %8522 = vmatprep.mubr.msk.f32.mxu0 %vm524_vm1, %v5930_v18 }
 0x577   : > { %v8369_v58 = vpop.f32.mrb[22].mxu1  ;;  %8523 = vmatmul.mubr.msk.f32.gmra.mrb[24].mxu0 %vm524_vm1, %v5931_v54 }
 0x578   : > { %v4750_v62 = vpop.f32.mrb[23].mxu1 }
 0x58c   : > { %v8372_v44 = vpop.f32.mrb[24].mxu1 }
 0x58d   : > { %v4760_v33 = vpop.f32.mrb[25].mxu1 }
 0x63a   : > { %v8512_v16 = vpop.f32.mrb[16].mxu0 }
 0x63b   : > { %v8856_v25 = vadd.f32 %v8512_v16, %v11410_v24  ;;  %v6031_v28 = vpop.f32.mrb[17].mxu0 }
 0x63c   : > { %v8857_v46 = vadd.f32 %v6031_v28, %v11412_v53 }
 0x63d   : > { %v6098_v38 = vmul.f32 %v8856_v25, %v7960_v10 }
 0x63e   : > { %v6097_v30 = vmul.f32 %v8857_v46, %v7960_v10  ;;  %v8515_v45 = vpop.f32.mrb[18].mxu0  ;;  %v6742_v46 = vld [vmem:[#allocation19 + $0x28] sm:$0xff] }
 0x63f   : > { %v6115_v41 = vadd.f32 %v7961_v9, %v6098_v38  ;;  %v8858_v12 = vadd.f32 %v8515_v45, %v11416_v36  ;;  %v6041_v51 = vpop.f32.mrb[19].mxu0 }
 0x640   : > { %v6114_v1 = vadd.f32 %v7961_v9, %v6097_v30  ;;  %v8859_v39 = vadd.f32 %v6041_v51, %v11418_v43  ;;  %v6743_v30 = vld [vmem:[#allocation19 + $0x30] sm:$0xff] }
 0x641   : > { %v6125_v7 = vmax.f32 %v6115_v41, 0.0  ;;  %v6100_v37 = vmul.f32 %v8858_v12, %v7960_v10 }
 0x642   : > { %v6124_v5 = vmax.f32 %v6114_v1, 0.0  ;;  %v6099_v0 = vmul.f32 %v8859_v39, %v7960_v10  ;;  %v8518_v20 = vpop.f32.mrb[20].mxu0 }
 0x643   : > { %6135 = vst.msk [vmem:[#allocation5 + $0x8] sm:$0xff] %vm540_vm5, %v6125_v7  ;;  %v6117_v24 = vadd.f32 %v7961_v9, %v6100_v37  ;;  %v8860_v53 = vadd.f32 %v8518_v20, %v11423_v50  ;;  %v6051_v40 = vpop.f32.mrb[21].mxu0  ;;  %v6733_v37 = vld [vmem:[#allocation19] sm:$0xff] }
 0x644   : > { %6134 = vst.msk [vmem:[#allocation5] sm:$0xff] %vm540_vm5, %v6124_v5  ;;  %v6116_v26 = vadd.f32 %v7961_v9, %v6099_v0  ;;  %v8861_v36 = vadd.f32 %v6051_v40, %v11426_v42  ;;  %v6734_v5 = vld [vmem:[#allocation19 + $0x8] sm:$0xff]  ;;  %v6735_v40 = vld [vmem:[#allocation19 + $0x10] sm:$0xff] }
 0x645   : > { %v6127_v63 = vmax.f32 %v6117_v24, 0.0  ;;  %v6102_v49 = vmul.f32 %v8860_v53, %v7960_v10  ;;  %v8809_v20 = vpack.c.bf16 %v6734_v5, %v6733_v37  ;;  %v7330_v37 = vld [vmem:[#allocation19 + $0xd8] sm:$0xff] }
 0x646   : > { %v6126_v27 = vmax.f32 %v6116_v26, 0.0  ;;  %v6101_v43 = vmul.f32 %v8861_v36, %v7960_v10  ;;  %v8521_v29 = vpop.f32.mrb[22].mxu0  ;;  %v6736_v26 = vld [vmem:[#allocation19 + $0x18] sm:$0xff] }
 0x647   : > { %6137 = vst.msk [vmem:[#allocation5 + $0x18] sm:$0xff] %vm540_vm5, %v6127_v63  ;;  %v6119_v23 = vadd.f32 %v7961_v9, %v6102_v49  ;;  %v8862_v57 = vadd.f32 %v8521_v29, %v8369_v58  ;;  %v6061_v35 = vpop.f32.mrb[23].mxu0  ;;  %v8812_v49 = vpack.c.bf16 %v6736_v26, %v6735_v40  ;;  %v7429_v40 = vld [vmem:[#allocation19 + $0xf0] sm:$0xff]  ;;  %v7430_v26 = vld [vmem:[#allocation19 + $0xf8] sm:$0xff] }
 0x648   : > { %6136 = vst.msk [vmem:[#allocation5 + $0x10] sm:$0xff] %vm540_vm5, %v6126_v27  ;;  %v6118_v13 = vadd.f32 %v7961_v9, %v6101_v43  ;;  %v8863_v50 = vadd.f32 %v6061_v35, %v4750_v62 }
 0x649   : > { %v6129_v55 = vmax.f32 %v6119_v23, 0.0  ;;  %v6104_v14 = vmul.f32 %v8862_v57, %v7960_v10 }
 0x64a   : > { %v6128_v48 = vmax.f32 %v6118_v13, 0.0  ;;  %v6103_v22 = vmul.f32 %v8863_v50, %v7960_v10  ;;  %v8524_v34 = vpop.f32.mrb[24].mxu0 }
 0x64b   : > { %6139 = vst.msk [vmem:[#allocation5 + $0x28] sm:$0xff] %vm540_vm5, %v6129_v55  ;;  %v6121_v42 = vadd.f32 %v7961_v9, %v6104_v14  ;;  %v8864_v52 = vadd.f32 %v8524_v34, %v8372_v44  ;;  %v6071_v15 = vpop.f32.mrb[25].mxu0  ;;  %v6144_v2 = vld [vmem:[#allocation5] sm:$0xff]  ;;  %v6927_v14 = vld [vmem:[#allocation19 + $0x40] sm:$0xff] }
 0x64c   : > { %6138 = vst.msk [vmem:[#allocation5 + $0x20] sm:$0xff] %vm540_vm5, %v6128_v48  ;;  %v6120_v3 = vadd.f32 %v7961_v9, %v6103_v22  ;;  %v8865_v17 = vadd.f32 %v6071_v15, %v4760_v33  ;;  %v6928_v48 = vld [vmem:[#allocation19 + $0x48] sm:$0xff]  ;;  %v6930_v15 = vld [vmem:[#allocation19 + $0x58] sm:$0xff] }
 0x64d   : > { %v6131_v60 = vmax.f32 %v6121_v42, 0.0  ;;  %v6106_v59 = vmul.f32 %v8864_v52, %v7960_v10  ;;  %v8815_v42 = vpack.c.bf16 %v6928_v48, %v6927_v14  ;;  %v6929_v52 = vld [vmem:[#allocation19 + $0x50] sm:$0xff]  ;;  %v7425_v14 = vld [vmem:[#allocation6 + $0x1d] sm:$0xff]  ;;  %v7997_v48 = vld [vmem:[#allocation20] ss:$0 sm:$0xff] }
 0x64e   : > { %v6130_v32 = vmax.f32 %v6120_v3, 0.0  ;;  %v6105_v47 = vmul.f32 %v8865_v17, %v7960_v10  ;;  %v8818_v17 = vpack.c.bf16 %v6930_v15, %v6929_v52 }
 0x64f   : > { %6141 = vst.msk [vmem:[#allocation5 + $0x38] sm:$0xff] %vm540_vm5, %v6131_v60  ;;  %v6123_v31 = vadd.f32 %v7961_v9, %v6106_v59  ;;  %v6145_v6 = vld [vmem:[#allocation5 + $0xa] sm:$0xff]  ;;  %v6295_v54 = vld [vmem:[#allocation5 + $0x14] sm:$0xff] }
 0x650   : > { %6140 = vst.msk [vmem:[#allocation5 + $0x30] sm:$0xff] %vm540_vm5, %v6130_v32  ;;  %v6122_v19 = vadd.f32 %v7961_v9, %v6105_v47  ;;  %v6146_v21 = vmax.f32 %v6144_v2, %v6145_v6  ;;  %v6741_v9 = vld [vmem:[#allocation19 + $0x20] sm:$0xff]  ;;  %v7028_v32 = vld [vmem:[#allocation19 + $0x68] sm:$0xff]  ;;  %v7029_v2 = vld [vmem:[#allocation19 + $0x70] sm:$0xff] }
 0x651   : > { %v6133_v56 = vmax.f32 %v6123_v31, 0.0  ;;  %v8803_v38 = vpack.c.bf16 %v6742_v46, %v6741_v9  ;;  %v7027_v59 = vld [vmem:[#allocation19 + $0x60] sm:$0xff]  ;;  %v7030_v6 = vld [vmem:[#allocation19 + $0x78] sm:$0xff]  ;;  %v7228_v9 = vld [vmem:[#allocation19 + $0xa8] sm:$0xff] }
 0x652   : > { %v6132_v18 = vmax.f32 %v6122_v19, 0.0  ;;  %8526 = vmatpush3.msra.mxu1 %v6146_v21  ;;  %v6440_v33 = vld [vmem:[#allocation5 + $0x28] sm:$0xff]  ;;  %v8821_v31 = vpack.c.bf16 %v7028_v32, %v7027_v59 }
 0x653   : > { %6143 = vst.msk [vmem:[#allocation5 + $0x48] sm:$0xff] %vm540_vm5, %v6133_v56  ;;  %8528 = vmatmul.mubr.msk.f32.vlgmr.msra.gmra.mrb[26].mxu1 %vm6147_vm6, %v10328_v8  ;;  %8530 = vmatprep.subr.mxu1 %v11749_v4  ;;  %v6296_v58 = vld [vmem:[#allocation5 + $0x1e] sm:$0xff] }
 0x654   : > { %6142 = vst.msk [vmem:[#allocation5 + $0x40] sm:$0xff] %vm540_vm5, %v6132_v18  ;;  %8531 = vmatpush3.msra.mxu1 %v6146_v21  ;;  %8532 = vmatprep.mubr.msk.f32.mxu1 %vm9411_vm2, %v11749_v4  ;;  %v6297_v62 = vmax.f32 %v6295_v54, %v6296_v58  ;;  %v8824_v21 = vpack.c.bf16 %v7030_v6, %v7029_v2  ;;  %v7127_v18 = vld [vmem:[#allocation19 + $0x80] sm:$0xff]  ;;  %v7128_v54 = vld [vmem:[#allocation19 + $0x88] sm:$0xff] }
 0x655   : > { %8535 = vmatprep.subr.mxu1 %v11749_v4 }
 0x657   : > { %8533 = vmatmul.mubr.msk.f32.vlgmr.msra.gmra.mrb[28].mxu1 %vm6147_vm6, %v10335_v61  ;;  %v6441_v44 = vld [vmem:[#allocation5 + $0x32] sm:$0xff] }
 0x658   : > { %8536 = vmatpush3.msra.mxu1 %v6297_v62  ;;  %8537 = vmatprep.mubr.msk.f32.mxu1 %vm9411_vm2, %v11749_v4  ;;  %v6442_v16 = vmax.f32 %v6440_v33, %v6441_v44  ;;  %v7129_v44 = vld [vmem:[#allocation19 + $0x90] sm:$0xff]  ;;  %v7130_v33 = vld [vmem:[#allocation19 + $0x98] sm:$0xff] }
 0x659   : > { %8540 = vmatprep.subr.mxu1 %v11749_v4 }
 0x65b   : > { %8538 = vmatmul.mubr.msk.f32.vlgmr.msra.gmra.mrb[30].mxu1 %vm6147_vm6, %v10328_v8  ;;  %v6585_v10 = vld [vmem:[#allocation5 + $0x3c] sm:$0xff]  ;;  %v6586_v25 = vld [vmem:[#allocation5 + $0x46] sm:$0xff] }
 0x65c   : > { %8541 = vmatpush3.msra.mxu1 %v6297_v62  ;;  %8542 = vmatprep.mubr.msk.f32.mxu1 %vm9411_vm2, %v11749_v4  ;;  %v6587_v28 = vmax.f32 %v6585_v10, %v6586_v25  ;;  %v8827_v62 = vpack.c.bf16 %v7128_v54, %v7127_v18  ;;  %v8830_v10 = vpack.c.bf16 %v7130_v33, %v7129_v44 }
 0x65d   : > { %8545 = vmatprep.subr.mxu1 %v11749_v4 }
 0x65f   : > { %8543 = vmatmul.mubr.msk.f32.vlgmr.msra.gmra.mrb[32].mxu1 %vm6147_vm6, %v10335_v61 }
 0x660   : > { %8546 = vmatpush3.msra.mxu1 %v6442_v16  ;;  %8547 = vmatprep.mubr.msk.f32.mxu1 %vm9411_vm2, %v11749_v4 }
 0x661   : > { %8550 = vmatprep.subr.mxu1 %v11749_v4 }
 0x663   : > { %8548 = vmatmul.mubr.msk.f32.vlgmr.msra.gmra.mrb[34].mxu1 %vm6147_vm6, %v10328_v8 }
 0x664   : > { %8551 = vmatpush3.msra.mxu1 %v6442_v16  ;;  %8552 = vmatprep.mubr.msk.f32.mxu1 %vm9411_vm2, %v11749_v4 }
 0x665   : > { %8555 = vmatprep.subr.mxu1 %v11749_v4 }
 0x667   : > { %8553 = vmatmul.mubr.msk.f32.vlgmr.msra.gmra.mrb[36].mxu1 %vm6147_vm6, %v10335_v61 }
 0x668   : > { %8556 = vmatpush3.msra.mxu1 %v6587_v28  ;;  %8557 = vmatprep.mubr.msk.f32.mxu1 %vm9411_vm2, %v11749_v4 }
 0x669   : > { %8560 = vmatprep.subr.mxu1 %v11749_v4 }
 0x66b   : > { %8558 = vmatmul.mubr.msk.f32.vlgmr.msra.gmra.mrb[38].mxu1 %vm6147_vm6, %v10328_v8  ;;  %v6744_v8 = vld [vmem:[#allocation19 + $0x38] sm:$0xff] }
 0x66c   : > { %8561 = vmatpush3.msra.mxu1 %v6587_v28  ;;  %8562 = vmatprep.mubr.msk.f32.mxu1 %vm9411_vm2, %v11749_v4  ;;  %v8806_v45 = vpack.c.bf16 %v6744_v8, %v6743_v30  ;;  %v7227_v28 = vld [vmem:[#allocation19 + $0xa0] sm:$0xff]  ;;  %v7229_v30 = vld [vmem:[#allocation19 + $0xb0] sm:$0xff]  ;;  %v7230_v8 = vld [vmem:[#allocation19 + $0xb8] sm:$0xff] }
 0x66d   : > { %8802 = vmatprep.subr.bf16.mxu1 %v11764_v11 }
 0x66f   : > { %8563 = vmatmul.mubr.msk.f32.vlgmr.msra.gmra.mrb[40].mxu1 %vm6147_vm6, %v10335_v61 }
 0x670   : > { %8573 = vmatprep.mubr.msk.f32.mxu1 %vm9411_vm2, %v11749_v4  ;;  %8804 = vmatpush3.bf16.msra.mxu1 %v8803_v38  ;;  %v8833_v38 = vpack.c.bf16 %v7228_v9, %v7227_v28 }
 0x671   : > { %8805 = vmatprep.subr.bf16.mxu1 %v11764_v11 }
 0x674   : > { %8807 = vmatpush3.bf16.msra.mxu1 %v8806_v45 }
 0x675   : > { %8808 = vmatprep.subr.bf16.mxu1 %v11764_v11 }
 0x726   : > { %v6216_v41 = vpop.f32.mrb[26].mxu1 }
 0x727   : > { %v8529_v12 = vpop.f32.mrb[27].mxu1 }
 0x72a   : > { %v6288_v51 = vpop.f32.mrb[28].mxu1 }
 0x72b   : > { %v6292_v61 = vmax.f32 %v6216_v41, %v6288_v51  ;;  %v8534_v1 = vpop.f32.mrb[29].mxu1  ;;  %v8836_v41 = vpack.c.bf16 %v7230_v8, %v7229_v30  ;;  %v7327_v51 = vld [vmem:[#allocation19 + $0xc0] sm:$0xff] }
 0x72d   : > { %6294 = vst.msk [vmem:[#allocation6 + $0x7] sm:$0xf] %vm6293_vm7, %v6292_v61  ;;  %v7328_v61 = vld [vmem:[#allocation19 + $0xc8] sm:$0xff] }
 0x72e   : > { %v6364_v39 = vpop.f32.mrb[30].mxu1 }
 0x72f   : > { %v8539_v7 = vpop.f32.mrb[31].mxu1 }
 0x730   : > { %v7329_v7 = vld [vmem:[#allocation19 + $0xd0] sm:$0xff] }
 0x731   : > { %v8842_v5 = vpack.c.bf16 %v7330_v37, %v7329_v7 }
 0x732   : > { %v6434_v0 = vpop.f32.mrb[32].mxu1 }
 0x733   : > { %v6438_v24 = vmax.f32 %v6364_v39, %v6434_v0  ;;  %v8544_v53 = vpop.f32.mrb[33].mxu1  ;;  %v8839_v39 = vpack.c.bf16 %v7328_v61, %v7327_v51  ;;  %v7427_v0 = vld [vmem:[#allocation19 + $0xe0] sm:$0xff] }
 0x734   : > { %v6737_v36 = vld [vmem:[#allocation6 + $0x1] sm:$0xff] }
 0x735   : > { %6439 = vst.msk [vmem:[#allocation6 + $0xd] sm:$0xf] %vm6293_vm7, %v6438_v24  ;;  %8574 = vmatmul.mubr.msk.f32.vlgmr.msra.gmra.mrb[42].mxu1 %vm540_vm5, %v6737_v36  ;;  %v6730_v3 = vld [vmem:[#allocation6] sm:$0xff] }
 0x736   : > { %v6509_v63 = vpop.f32.mrb[34].mxu1  ;;  %8576 = vmatprep.mubr.msk.f32.mxu1 %vm9411_vm2, %v11749_v4  ;;  %8810 = vmatpush3.bf16.msra.mxu1 %v8809_v20  ;;  %v6923_v19 = vld [vmem:[#allocation6 + $0x2] sm:$0xff] }
 0x737   : > { %v8549_v27 = vpop.f32.mrb[35].mxu1  ;;  %8811 = vmatprep.subr.bf16.mxu1 %v11764_v11  ;;  %v7428_v20 = vld [vmem:[#allocation19 + $0xe8] sm:$0xff] }
 0x738   : > { %v8845_v53 = vpack.c.bf16 %v7428_v20, %v7427_v0  ;;  %v7527_v27 = vld [vmem:[#allocation19 + $0x100] sm:$0xff] }
 0x73a   : > { %v6579_v43 = vpop.f32.mrb[36].mxu1  ;;  %8813 = vmatpush3.bf16.msra.mxu1 %v8812_v49 }
 0x73b   : > { %v6583_v29 = vmax.f32 %v6509_v63, %v6579_v43  ;;  %v8554_v23 = vpop.f32.mrb[37].mxu1  ;;  %8814 = vmatprep.subr.bf16.mxu1 %v11764_v11  ;;  %v8848_v63 = vpack.c.bf16 %v7430_v26, %v7429_v40  ;;  %v7528_v43 = vld [vmem:[#allocation19 + $0x108] sm:$0xff] }
 0x73c   : > { %v6738_v57 = vld [vmem:[#allocation6 + $0x9] sm:$0xff]  ;;  %v8851_v23 = vpack.c.bf16 %v7528_v43, %v7527_v27 }
 0x73d   : > { %6584 = vst.msk [vmem:[#allocation6 + $0x13] sm:$0xf] %vm6293_vm7, %v6583_v29  ;;  %8577 = vmatmul.mubr.msk.f32.gmra.mrb[44].mxu1 %vm540_vm5, %v6738_v57  ;;  %v11550_v60 = vld [vmem:[#allocation6 + $0x8] sm:$0xff] }
 0x73e   : > { %8579 = vmatprep.mubr.msk.f32.mxu1 %vm9411_vm2, %v11749_v4  ;;  %v6654_v35 = vpop.f32.mrb[38].mxu1  ;;  %v6924_v56 = vld [vmem:[#allocation6 + $0xa] sm:$0xff] }
 0x73f   : > { %v8559_v13 = vpop.f32.mrb[39].mxu1  ;;  %v7023_v16 = vld [vmem:[#allocation6 + $0x6] sm:$0xff] }
 0x740   : > { %v7123_v45 = vld [vmem:[#allocation6 + $0x7] sm:$0xff] }
 0x741   : > { %v7529_v57 = vld [vmem:[#allocation19 + $0x110] sm:$0xff] }
 0x742   : > { %v6724_v50 = vpop.f32.mrb[40].mxu1 }
 0x743   : > { %v6728_v55 = vmax.f32 %v6654_v35, %v6724_v50  ;;  %v8564_v22 = vpop.f32.mrb[41].mxu1  ;;  %v7530_v35 = vld [vmem:[#allocation19 + $0x118] sm:$0xff] }
 0x744   : > { %v6739_v34 = vld [vmem:[#allocation6 + $0x11] sm:$0xff]  ;;  %v8854_v50 = vpack.c.bf16 %v7530_v35, %v7529_v57 }
 0x745   : > { %8580 = vmatmul.mubr.msk.f32.gmra.mrb[46].mxu1 %vm540_vm5, %v6739_v34  ;;  %6729 = vst.msk [vmem:[#allocation6 + $0x19] sm:$0xf] %vm6293_vm7, %v6728_v55  ;;  %v11557_v47 = vld [vmem:[#allocation6 + $0x10] sm:$0xff]  ;;  %v7998_v34 = vld [vmem:[#allocation22] ss:$0 sm:$0xff] }
 0x746   : > { %8590 = vmatprep.mubr.msk.f32.mxu1 %vm9411_vm2, %v11749_v4  ;;  %v11578_v25 = vld [vmem:[#allocation6 + $0xe] sm:$0xff] }
 0x747   : > { %v7124_v12 = vld [vmem:[#allocation6 + $0xf] sm:$0xff] }
 0x748   : > { %v7323_v36 = vld [vmem:[#allocation6 + $0xc] sm:$0xff] }
 0x749   : > { %8591 = vmatmul.mubr.msk.f32.vlgmr.msra.gmra.mrb[42].mxu1 %vm540_vm5, %v6730_v3  ;;  %v7423_v13 = vld [vmem:[#allocation6 + $0xd] sm:$0xff] }
 0x74a   : > { %8593 = vmatprep.mubr.msk.f32.mxu1 %vm9411_vm2, %v11749_v4  ;;  %8816 = vmatpush3.bf16.msra.mxu1 %v8815_v42 }
 0x74b   : > { %8817 = vmatprep.subr.bf16.mxu1 %v11764_v11 }
 0x74c   : > { %v6925_v58 = vld [vmem:[#allocation6 + $0x12] sm:$0xff]  ;;  %v7325_v29 = vld [vmem:[#allocation6 + $0x1c] sm:$0xff] }
 0x74d   : > { %8594 = vmatmul.mubr.msk.f32.gmra.mrb[44].mxu1 %vm540_vm5, %v11550_v60  ;;  %v11585_v46 = vld [vmem:[#allocation6 + $0x16] sm:$0xff] }
 0x74e   : > { %8596 = vmatprep.mubr.msk.f32.mxu1 %vm9411_vm2, %v11749_v4  ;;  %8819 = vmatpush3.bf16.msra.mxu1 %v8818_v17  ;;  %v7125_v1 = vld [vmem:[#allocation6 + $0x17] sm:$0xff] }
 0x74f   : > { %8820 = vmatprep.subr.bf16.mxu1 %v11764_v11  ;;  %v7225_v24 = vld [vmem:[#allocation6 + $0x18] sm:$0xff] }
 0x750   : > { %v7324_v49 = vld [vmem:[#allocation6 + $0x14] sm:$0xff] }
 0x751   : > { %8597 = vmatmul.mubr.msk.f32.gmra.mrb[46].mxu1 %vm540_vm5, %v11557_v47  ;;  %v7424_v55 = vld [vmem:[#allocation6 + $0x15] sm:$0xff] }
 0x752   : > { %8607 = vmatprep.mubr.msk.f32.mxu1 %vm9411_vm2, %v11749_v4 }
 0x755   : > { %8608 = vmatmul.mubr.msk.f32.vlgmr.msra.gmra.mrb[42].mxu1 %vm540_vm5, %v6923_v19 }
 0x756   : > { %8610 = vmatprep.mubr.msk.f32.mxu1 %vm9411_vm2, %v11749_v4  ;;  %8822 = vmatpush3.bf16.msra.mxu1 %v8821_v31 }
 0x757   : > { %8823 = vmatprep.subr.bf16.mxu1 %v11764_v11 }
 0x759   : > { %8611 = vmatmul.mubr.msk.f32.gmra.mrb[44].mxu1 %vm540_vm5, %v6924_v56 }
 0x75a   : > { %8613 = vmatprep.mubr.msk.f32.mxu1 %vm9411_vm2, %v11749_v4  ;;  %8825 = vmatpush3.bf16.msra.mxu1 %v8824_v21 }
 0x75b   : > { %8826 = vmatprep.subr.bf16.mxu1 %v11764_v11 }
 0x75d   : > { %8614 = vmatmul.mubr.msk.f32.gmra.mrb[46].mxu1 %vm540_vm5, %v6925_v58 }
 0x75e   : > { %8624 = vmatprep.mubr.msk.f32.mxu1 %vm9411_vm2, %v11749_v4 }
 0x761   : > { %8625 = vmatmul.mubr.msk.f32.vlgmr.msra.gmra.mrb[42].mxu1 %vm540_vm5, %v7023_v16 }
 0x762   : > { %8627 = vmatprep.mubr.msk.f32.mxu1 %vm9411_vm2, %v11749_v4  ;;  %8828 = vmatpush3.bf16.msra.mxu1 %v8827_v62 }
 0x763   : > { %8829 = vmatprep.subr.bf16.mxu1 %v11764_v11 }
 0x765   : > { %8628 = vmatmul.mubr.msk.f32.gmra.mrb[44].mxu1 %vm540_vm5, %v11578_v25 }
 0x766   : > { %8630 = vmatprep.mubr.msk.f32.mxu1 %vm9411_vm2, %v11749_v4  ;;  %8831 = vmatpush3.bf16.msra.mxu1 %v8830_v10 }
 0x767   : > { %8832 = vmatprep.subr.bf16.mxu1 %v11764_v11 }
 0x769   : > { %8631 = vmatmul.mubr.msk.f32.gmra.mrb[46].mxu1 %vm540_vm5, %v11585_v46 }
 0x76a   : > { %8641 = vmatprep.mubr.msk.f32.mxu1 %vm9411_vm2, %v11749_v4 }
 0x76d   : > { %8642 = vmatmul.mubr.msk.f32.vlgmr.msra.gmra.mrb[42].mxu1 %vm540_vm5, %v7123_v45 }
 0x76e   : > { %8644 = vmatprep.mubr.msk.f32.mxu1 %vm9411_vm2, %v11749_v4  ;;  %8834 = vmatpush3.bf16.msra.mxu1 %v8833_v38 }
 0x76f   : > { %8835 = vmatprep.subr.bf16.mxu1 %v11764_v11 }
 0x771   : > { %8645 = vmatmul.mubr.msk.f32.gmra.mrb[44].mxu1 %vm540_vm5, %v7124_v12 }
 0x772   : > { %8647 = vmatprep.mubr.msk.f32.mxu1 %vm9411_vm2, %v11749_v4  ;;  %8837 = vmatpush3.bf16.msra.mxu1 %v8836_v41 }
 0x773   : > { %8838 = vmatprep.subr.bf16.mxu1 %v11764_v11 }
 0x775   : > { %8648 = vmatmul.mubr.msk.f32.gmra.mrb[46].mxu1 %vm540_vm5, %v7125_v1 }
 0x776   : > { %8658 = vmatprep.mubr.msk.f32.mxu1 %vm9411_vm2, %v11749_v4 }
 0x779   : > { %8659 = vmatmul.mubr.msk.f32.vlgmr.msra.gmra.mrb[42].mxu1 %vm540_vm5, %v11550_v60 }
 0x77a   : > { %8661 = vmatprep.mubr.msk.f32.mxu1 %vm9411_vm2, %v11749_v4  ;;  %8840 = vmatpush3.bf16.msra.mxu1 %v8839_v39 }
 0x77b   : > { %8841 = vmatprep.subr.bf16.mxu1 %v11764_v11 }
 0x77d   : > { %8662 = vmatmul.mubr.msk.f32.gmra.mrb[44].mxu1 %vm540_vm5, %v11557_v47 }
 0x77e   : > { %8664 = vmatprep.mubr.msk.f32.mxu1 %vm9411_vm2, %v11749_v4  ;;  %8843 = vmatpush3.bf16.msra.mxu1 %v8842_v5 }
 0x77f   : > { %8844 = vmatprep.subr.bf16.mxu1 %v11764_v11 }
 0x781   : > { %8665 = vmatmul.mubr.msk.f32.gmra.mrb[46].mxu1 %vm540_vm5, %v7225_v24 }
 0x782   : > { %8675 = vmatprep.mubr.msk.f32.mxu1 %vm9411_vm2, %v11749_v4 }
 0x785   : > { %8676 = vmatmul.mubr.msk.f32.vlgmr.msra.gmra.mrb[42].mxu1 %vm540_vm5, %v7323_v36 }
 0x786   : > { %8678 = vmatprep.mubr.msk.f32.mxu1 %vm9411_vm2, %v11749_v4  ;;  %8846 = vmatpush3.bf16.msra.mxu1 %v8845_v53 }
 0x787   : > { %8847 = vmatprep.subr.bf16.mxu1 %v11764_v11 }
 0x789   : > { %8679 = vmatmul.mubr.msk.f32.gmra.mrb[44].mxu1 %vm540_vm5, %v7324_v49 }
 0x78a   : > { %8681 = vmatprep.mubr.msk.f32.mxu1 %vm9411_vm2, %v11749_v4  ;;  %8849 = vmatpush3.bf16.msra.mxu1 %v8848_v63 }
 0x78b   : > { %8850 = vmatprep.subr.bf16.mxu1 %v11764_v11 }
 0x78d   : > { %8682 = vmatmul.mubr.msk.f32.gmra.mrb[46].mxu1 %vm540_vm5, %v7325_v29 }
 0x78e   : > { %8692 = vmatprep.mubr.msk.f32.mxu1 %vm9411_vm2, %v11749_v4 }
 0x791   : > { %8693 = vmatmul.mubr.msk.f32.vlgmr.msra.gmra.mrb[42].mxu1 %vm540_vm5, %v7423_v13 }
 0x792   : > { %8695 = vmatprep.mubr.msk.f32.mxu1 %vm9411_vm2, %v11749_v4  ;;  %8852 = vmatpush3.bf16.msra.mxu1 %v8851_v23 }
 0x793   : > { %8853 = vmatprep.subr.bf16.mxu1 %v11764_v11  ;;  %v7525_v11 = vld [vmem:[#allocation6 + $0x1e] sm:$0xff] }
 0x795   : > { %8696 = vmatmul.mubr.msk.f32.gmra.mrb[44].mxu1 %vm540_vm5, %v7424_v55 }
 0x796   : > { %8698 = vmatprep.mubr.msk.f32.mxu1 %vm9411_vm2, %v11749_v4  ;;  %8855 = vmatpush3.bf16.msra.mxu1 %v8854_v50 }
 0x799   : > { %8699 = vmatmul.mubr.msk.f32.gmra.mrb[46].mxu1 %vm540_vm5, %v7425_v14 }
 0x79a   : > { %8709 = vmatprep.mubr.msk.f32.mxu1 %vm9411_vm2, %v11749_v4 }
 0x79d   : > { %8710 = vmatmul.mubr.msk.f32.vlgmr.msra.gmra.mrb[42].mxu1 %vm540_vm5, %v11578_v25 }
 0x79e   : > { %8712 = vmatprep.mubr.msk.f32.mxu1 %vm9411_vm2, %v11749_v4 }
 0x7a1   : > { %8713 = vmatmul.mubr.msk.f32.gmra.mrb[44].mxu1 %vm540_vm5, %v11585_v46 }
 0x7a2   : > { %8715 = vmatprep.mubr.msk.f32.mxu1 %vm9411_vm2, %v11749_v4 }
 0x7a5   : > { %8716 = vmatmul.mubr.msk.f32.gmra.mrb[46].mxu1 %vm540_vm5, %v7525_v11 }
 0x870   : > { %v7606_v22 = vpop.f32.mrb[42].mxu1 }
 0x871   : > { %v7630_v42 = vmul.f32 %v7997_v48, %v7606_v22  ;;  %v8711_v52 = vpop.f32.mrb[43].mxu1 }
 0x873   : > { %v7640_v15 = vadd.f32 %v7998_v34, %v7630_v42 }
 0x874   : > { %v7611_v3 = vpop.f32.mrb[44].mxu1 }
 0x875   : > { %v7643_v17 = vmax.f32 %v7640_v15, 0.0  ;;  %v7631_v60 = vmul.f32 %v7997_v48, %v7611_v3  ;;  %v8714_v59 = vpop.f32.mrb[45].mxu1 }
 0x877   : > { %7647 = vst.msk [vmem:[#allocation7] sm:$0xff] %vm7646_vm8, %v7643_v17  ;;  %v7641_v32 = vadd.f32 %v7998_v34, %v7631_v60 }
 0x878   : > { %v7616_v47 = vpop.f32.mrb[46].mxu1 }
 0x879   : > { %v7644_v4 = vmax.f32 %v7641_v32, 0.0  ;;  %v7632_v31 = vmul.f32 %v7997_v48, %v7616_v47  ;;  %v8717_v2 = vpop.f32.mrb[47].mxu1 }
 0x87b   : > { %7648 = vst.msk [vmem:[#allocation7 + $0x8] sm:$0xff] %vm7646_vm8, %v7644_v4  ;;  %v7642_v6 = vadd.f32 %v7998_v34, %v7632_v31 }
 0x87d   : > { %v7645_v19 = vmax.f32 %v7642_v6, 0.0 }
 0x87e   : > { %v7650_v21 = vld [vmem:[#allocation7] sm:$0xf] }
 0x87f   : > { %7652 = vst.msk [vmem:[#allocation8] sm:$0xf] %vm7651_vm9, %v7650_v21 }
 0x880   : > { %7649 = vst.msk [vmem:[#allocation7 + $0x10] sm:$0xff] %vm7646_vm8, %v7645_v19 }
 0x882   : > { %v7653_v56 = vld [vmem:[#allocation7 + $0x6] sm:$0xf]  ;;  %v7655_v18 = vld [vmem:[#allocation7 + $0xc] sm:$0xf] }
 0x883   : > { %7654 = vst.msk [vmem:[#allocation8 + $0x4] sm:$0xf] %vm7651_vm9, %v7653_v56  ;;  %7656 = vst.msk [vmem:[#allocation8 + $0x8] sm:$0xf] %vm7651_vm9, %v7655_v18 }
 0x887   : > { %v7657_v54 = vld [vmem:[#allocation7 + $0x12] sm:$0xf] }
 0x888   : > { %7658 = vst.msk [vmem:[#allocation8 + $0xc] sm:$0xf] %vm7651_vm9, %v7657_v54 }
 0x88a   : > { %v7659_v58 = vld [vmem:[#allocation8] sm:$0xff] }
 0x88b   : > { %v8005_v62 = vpack.c.bf16 %v7659_v58, %v7659_v58 }
 0x88d   : > { %7669 = vst.msk [vmem:[%s478_s27] sm:$0xf] %vm7651_vm9, %v8005_v62 }
 0x88f   : > { %v7660_v44 = vld [vmem:[#allocation8 + $0x8] sm:$0xff] }
 0x890   : > { %v8006_v33 = vpack.c.bf16 %v7660_v44, %v7660_v44 }
 0x892   : > { %7670 = vst.msk [vmem:[%s478_s27 + $0x4] sm:$0xf] %vm7651_vm9, %v8006_v33 }
 0x893 PF: > { %s25_s13 = sadd.s32 1, %s9393_s13  }
 0x894   : > { %p22_p11 = scmp.ge.s32.totalorder %s25_s13, 4  }
 0x896   :  { %24 = sbr.rel (!%p22_p11) target bundleno = 5 (0x5), region = 151 }
 0x89d   :  { %7692 = vsyncpa [#allocation10], 1 }
 0x89e   :  { %7694 = vsyncpa [#allocation10 + $0x1], 1 }
 0x89f   :  { %7695 = vsyncpa [#allocation12], 1 }
 0x8a0   :  { %7696 = vsyncpa [#allocation15], 1 }
 0x8a1   :  { %7697 = vsyncpa [#allocation18], 1 }
 0x8a2   :  { %7698 = vsyncpa [#allocation21], 1 }

</bundles_post_ra>
